<compile_context>
chip_gen: v6e
topology: v6e:2x2x1
jax: 0.10.0
libtpu: 0.0.40
codegen_flags: <defaults>
</compile_context>

<pallas_src>
import functools
import jax
import jax.numpy as jnp
from jax.experimental import pallas as pl
from jax.experimental.pallas import tpu as pltpu

# ---------------- configuration consistent with the module -------------------
IMG = 16          # img_size
PATCH = 2         # patch_size
IN_CH = 3         # in_chans
EMBED = 64        # embed_dim
DEPTH = 2         # depth
HEADS = 4         # num_heads
MLP_RATIO = 4.0
NUM_CLASSES = 10
BATCH = 2

GRID_SZ = IMG // PATCH
NUM_PATCHES = GRID_SZ * GRID_SZ          # 64
SEQ = NUM_PATCHES + 1                    # 65 (cls token + patches)
HEAD_DIM = EMBED // HEADS                # 16
HIDDEN = int(EMBED * MLP_RATIO)          # 256
PATCH_DIM = IN_CH * PATCH * PATCH        # 12
LN_EPS = 1e-5
SCALE = HEAD_DIM ** (-0.5)
LOGIT_PAD = 128                          # lane-dense logits block width


# ------------------------------ kernel helpers --------------------------------
def _ln(x, g, b):
    # x: [N, D] f32; g, b: [1, D] f32
    mu = jnp.mean(x, axis=-1, keepdims=True)
    var = jnp.mean((x - mu) ** 2, axis=-1, keepdims=True)
    return (x - mu) * jax.lax.rsqrt(var + LN_EPS) * g + b


def _gelu(x):
    # TODO(synk): PyTorch nn.GELU() defaults to the exact erf form; tanh
    # approximation kept for guaranteed Mosaic lowering (diff ~1e-3).
    return 0.5 * x * (1.0 + jnp.tanh(0.7978845608028654
                                     * (x + 0.044715 * x * x * x)))


def _mm(a, b):
    # bf16 x bf16 matmul on the MXU, f32 accumulation.
    return jnp.dot(a.astype(jnp.bfloat16), b.astype(jnp.bfloat16),
                   preferred_element_type=jnp.float32)


# ------------------------------ fused kernel ----------------------------------
def vit_kernel(p_ref, pw_ref, pb_ref, cls_ref, pos_ref,
               ln1g_ref, ln1b_ref,
               wq_ref, bq_ref, wk_ref, bk_ref, wv_ref, bv_ref,
               wp_ref, bp_ref,
               ln2g_ref, ln2b_ref,
               w1_ref, b1_ref, w2_ref, b2_ref,
               ng_ref, nb_ref, hw_ref, hb_ref,
               o_ref):
    # ---- patch embedding + cls token + positional embedding -----------------
    patches = p_ref[0]                                     # [NUM_PATCHES, PATCH_DIM] f32
    emb = _mm(patches, pw_ref[...]) + pb_ref[...]          # [NUM_PATCHES, EMBED] f32
    x = jnp.concatenate([cls_ref[...], emb], axis=0) + pos_ref[...]   # [SEQ, EMBED]

    # ---- transformer blocks (statically unrolled) ----------------------------
    for d in range(DEPTH):
        # ---------------- attention branch ------------------------------------
        xn = _ln(x, ln1g_ref[d], ln1b_ref[d])
        xn_bf = xn.astype(jnp.bfloat16)

        wq, wk, wv = wq_ref[d], wk_ref[d], wv_ref[d]       # [HEADS, EMBED, HEAD_DIM] bf16
        bq, bk, bv = bq_ref[d], bk_ref[d], bv_ref[d]       # [HEADS, 1, HEAD_DIM] f32
        wp = wp_ref[d]                                     # [HEADS, HEAD_DIM, EMBED] bf16

        scores = []
        vs = []
        for h in range(HEADS):                             # head split on leading axis
            # scale is pre-folded into wq/bq host-side
            qh = _mm(xn_bf, wq[h]) + bq[h]                 # [SEQ, HEAD_DIM] f32
            kh = _mm(xn_bf, wk[h]) + bk[h]
            vh = _mm(xn_bf, wv[h]) + bv[h]
            vs.append(vh)
            scores.append(jax.lax.dot_general(             # qh @ kh^T -> [SEQ, SEQ]
                qh.astype(jnp.bfloat16), kh.astype(jnp.bfloat16),
                (((1,), (1,)), ((), ())),
                preferred_element_type=jnp.float32))

        # one softmax over all heads at once
        s = jnp.stack(scores, axis=0)                      # [HEADS, SEQ, SEQ]
        s = s - jnp.max(s, axis=-1, keepdims=True)
        p = jnp.exp(s)
        p = p * pl.reciprocal(jnp.sum(p, axis=-1, keepdims=True), approx=True)

        # head-concat folded into the output projection (accumulate per head)
        acc = jnp.zeros((SEQ, EMBED), jnp.float32)
        for h in range(HEADS):
            ctx = _mm(p[h], vs[h])                         # [SEQ, HEAD_DIM]
            acc = acc + _mm(ctx, wp[h])                    # [SEQ, EMBED]
        x = x + acc + bp_ref[d]                            # residual 1

        # ---------------- MLP branch ------------------------------------------
        xn2 = _ln(x, ln2g_ref[d], ln2b_ref[d])
        h1 = _mm(xn2, w1_ref[d]) + b1_ref[d]               # [SEQ, HIDDEN]
        h1 = _gelu(h1)
        x = x + _mm(h1, w2_ref[d]) + b2_ref[d]             # residual 2

    # ---- final LN (cls token only: LayerNorm is per-token) + classifier ------
    cls_tok = x[0:1, :]                                    # [1, EMBED]
    cls_n = _ln(cls_tok, ng_ref[...], nb_ref[...])
    o_ref[0] = _mm(cls_n, hw_ref[...]) + hb_ref[...]       # [1, LOGIT_PAD]


# ------------------------------- wrapper ---------------------------------------
def _const_spec(shape):
    n = len(shape)
    return pl.BlockSpec(shape, lambda i: (0,) * n)


def vit_forward(x_nchw, kp):
    B = x_nchw.shape[0]
    # Patch extraction (glue): NCHW -> [B, num_patches, C*p*p], features in
    # (c, dh, dw) order, patch-grid row-major order — matches Conv2d(stride=p)
    # + flatten(2).transpose(1, 2) in PyTorch.
    x = x_nchw.reshape(B, IN_CH, GRID_SZ, PATCH, GRID_SZ, PATCH)
    x = x.transpose(0, 2, 4, 1, 3, 5).reshape(B, NUM_PATCHES, PATCH_DIM)

    logits_pad = pl.pallas_call(
        vit_kernel,
        out_shape=jax.ShapeDtypeStruct((B, 1, LOGIT_PAD), jnp.float32),
        grid=(B,),
        in_specs=[
            pl.BlockSpec((1, NUM_PATCHES, PATCH_DIM), lambda i: (i, 0, 0)),
            _const_spec((PATCH_DIM, EMBED)), _const_spec((1, EMBED)),        # patch proj
            _const_spec((1, EMBED)), _const_spec((SEQ, EMBED)),              # cls, pos
            _const_spec((DEPTH, 1, EMBED)), _const_spec((DEPTH, 1, EMBED)),  # ln1
            _const_spec((DEPTH, HEADS, EMBED, HEAD_DIM)),                    # wq (scaled)
            _const_spec((DEPTH, HEADS, 1, HEAD_DIM)),                        # bq (scaled)
            _const_spec((DEPTH, HEADS, EMBED, HEAD_DIM)),                    # wk
            _const_spec((DEPTH, HEADS, 1, HEAD_DIM)),                        # bk
            _const_spec((DEPTH, HEADS, EMBED, HEAD_DIM)),                    # wv
            _const_spec((DEPTH, HEADS, 1, HEAD_DIM)),                        # bv
            _const_spec((DEPTH, HEADS, HEAD_DIM, EMBED)),                    # proj w
            _const_spec((DEPTH, 1, EMBED)),                                  # proj b
            _const_spec((DEPTH, 1, EMBED)), _const_spec((DEPTH, 1, EMBED)),  # ln2
            _const_spec((DEPTH, EMBED, HIDDEN)), _const_spec((DEPTH, 1, HIDDEN)),   # fc1
            _const_spec((DEPTH, HIDDEN, EMBED)), _const_spec((DEPTH, 1, EMBED)),    # fc2
            _const_spec((1, EMBED)), _const_spec((1, EMBED)),                # final norm
            _const_spec((EMBED, LOGIT_PAD)), _const_spec((1, LOGIT_PAD)),    # head (padded)
        ],
        out_specs=pl.BlockSpec((1, 1, LOGIT_PAD), lambda i: (i, 0, 0)),
        compiler_params=pltpu.CompilerParams(
            dimension_semantics=("parallel",)),
    )(x, kp["patch_w"], kp["patch_b"], kp["cls"], kp["pos"],
      kp["ln1_g"], kp["ln1_b"],
      kp["wq"], kp["bq"], kp["wk"], kp["bk"], kp["wv"], kp["bv"],
      kp["wp"], kp["bp"],
      kp["ln2_g"], kp["ln2_b"],
      kp["w1"], kp["b1"], kp["w2"], kp["b2"],
      kp["norm_g"], kp["norm_b"], kp["head_w"], kp["head_b"])

    return logits_pad[:, 0, :NUM_CLASSES]


# --------------------------- parameter init (synthetic) ------------------------
def init_params(key):
    keys = jax.random.split(key, 4 + DEPTH)

    def nrm(k, shape, std=0.02):
        return (std * jax.random.normal(k, shape)).astype(jnp.float32)

    params = {
        # Conv2d(kernel=stride=PATCH) weight [D, C, p, p] expressed as a
        # [C*p*p, D] projection over flattened patch vectors.
        "patch_w": nrm(keys[0], (PATCH_DIM, EMBED)),
        "patch_b": jnp.zeros((1, EMBED), jnp.float32),
        "cls_token": nrm(keys[1], (1, 1, EMBED)),
        "pos_embed": nrm(keys[2], (1, SEQ, EMBED)),
        "norm_g": jnp.ones((1, EMBED), jnp.float32),
        "norm_b": jnp.zeros((1, EMBED), jnp.float32),
        "head_w": nrm(keys[3], (EMBED, NUM_CLASSES)),
        "head_b": jnp.zeros((1, NUM_CLASSES), jnp.float32),
        "blocks": [],
    }
    for d in range(DEPTH):
        bk = jax.random.split(keys[4 + d], 4)
        params["blocks"].append(dict(
            ln1_g=jnp.ones((1, EMBED), jnp.float32),
            ln1_b=jnp.zeros((1, EMBED), jnp.float32),
            qkv_w=nrm(bk[0], (EMBED, 3 * EMBED)),
            qkv_b=jnp.zeros((1, 3 * EMBED), jnp.float32),   # qkv_bias=True
            proj_w=nrm(bk[1], (EMBED, EMBED)),
            proj_b=jnp.zeros((1, EMBED), jnp.float32),
            ln2_g=jnp.ones((1, EMBED), jnp.float32),
            ln2_b=jnp.zeros((1, EMBED), jnp.float32),
            fc1_w=nrm(bk[2], (EMBED, HIDDEN)),
            fc1_b=jnp.zeros((1, HIDDEN), jnp.float32),
            fc2_w=nrm(bk[3], (HIDDEN, EMBED)),
            fc2_b=jnp.zeros((1, EMBED), jnp.float32),
        ))
    return params


def prepare_kernel_params(params):
    """Host-side (free) reshapes/casts into the kernel weight layout:
    per-head q/k/v/proj weights on a leading axis, bf16 matmul weights,
    f32 biases/LN params, attention scale folded into wq/bq,
    128-lane-padded classifier."""
    bf = jnp.bfloat16

    def split_w(w):    # [EMBED, EMBED] (in, out) -> [HEADS, EMBED, HEAD_DIM]
        return jnp.transpose(w.reshape(EMBED, HEADS, HEAD_DIM), (1, 0, 2))

    def split_b(b):    # [1, EMBED] -> [HEADS, 1, HEAD_DIM]
        return jnp.transpose(b.reshape(1, HEADS, HEAD_DIM), (1, 0, 2))

    kp = {
        "patch_w": params["patch_w"].astype(bf),
        "patch_b": params["patch_b"],
        "cls": params["cls_token"].reshape(1, EMBED),
        "pos": params["pos_embed"].reshape(SEQ, EMBED),
        "norm_g": params["norm_g"],
        "norm_b": params["norm_b"],
        "head_w": jnp.zeros((EMBED, LOGIT_PAD), jnp.float32)
                     .at[:, :NUM_CLASSES].set(params["head_w"]).astype(bf),
        "head_b": jnp.zeros((1, LOGIT_PAD), jnp.float32)
                     .at[:, :NUM_CLASSES].set(params["head_b"]),
    }

    stacks = {k: [] for k in ("ln1_g", "ln1_b", "wq", "bq", "wk", "bk", "wv",
                              "bv", "wp", "bp", "ln2_g", "ln2_b",
                              "w1", "b1", "w2", "b2")}
    for blk in params["blocks"]:
        qkv_w, qkv_b = blk["qkv_w"], blk["qkv_b"]
        stacks["ln1_g"].append(blk["ln1_g"])
        stacks["ln1_b"].append(blk["ln1_b"])
        # fold the attention scale (head_dim ** -0.5) into query weight/bias
        stacks["wq"].append((SCALE * split_w(qkv_w[:, 0 * EMBED:1 * EMBED])).astype(bf))
        stacks["wk"].append(split_w(qkv_w[:, 1 * EMBED:2 * EMBED]).astype(bf))
        stacks["wv"].append(split_w(qkv_w[:, 2 * EMBED:3 * EMBED]).astype(bf))
        stacks["bq"].append(SCALE * split_b(qkv_b[:, 0 * EMBED:1 * EMBED]))
        stacks["bk"].append(split_b(qkv_b[:, 1 * EMBED:2 * EMBED]))
        stacks["bv"].append(split_b(qkv_b[:, 2 * EMBED:3 * EMBED]))
        stacks["wp"].append(blk["proj_w"].reshape(HEADS, HEAD_DIM, EMBED).astype(bf))
        stacks["bp"].append(blk["proj_b"])
        stacks["ln2_g"].append(blk["ln2_g"])
        stacks["ln2_b"].append(blk["ln2_b"])
        stacks["w1"].append(blk["fc1_w"].astype(bf))
        stacks["b1"].append(blk["fc1_b"])
        stacks["w2"].append(blk["fc2_w"].astype(bf))
        stacks["b2"].append(blk["fc2_b"])
    for k, v in stacks.items():
        kp[k] = jnp.stack(v, axis=0)
    return kp


# --------------------------------- main ----------------------------------------
if __name__ == "__main__":
    key = jax.random.PRNGKey(0)
    pkey, xkey = jax.random.split(key)
    params = init_params(pkey)
    kparams = prepare_kernel_params(params)
    x = jax.random.normal(xkey, (BATCH, IN_CH, IMG, IMG), dtype=jnp.float32)

    fwd = jax.jit(functools.partial(vit_forward, kp=kparams))
    logits = jax.block_until_ready(fwd(x))

    assert logits.shape == (BATCH, NUM_CLASSES)
    assert bool(jnp.all(jnp.isfinite(logits)))
    print("KERNEL_OK")
</pallas_src>

<mosaic_0001>
module attributes {stable_mosaic.version = 11 : i64} {
  func.func @vit_kernel(%arg0: i32, %arg1: memref<1x64x12xf32, #tpu.memory_space<vmem>>, %arg2: memref<12x64xbf16, #tpu.memory_space<vmem>>, %arg3: memref<1x64xf32, #tpu.memory_space<vmem>>, %arg4: memref<1x64xf32, #tpu.memory_space<vmem>>, %arg5: memref<65x64xf32, #tpu.memory_space<vmem>>, %arg6: memref<2x1x64xf32, #tpu.memory_space<vmem>>, %arg7: memref<2x1x64xf32, #tpu.memory_space<vmem>>, %arg8: memref<2x4x64x16xbf16, #tpu.memory_space<vmem>>, %arg9: memref<2x4x1x16xf32, #tpu.memory_space<vmem>>, %arg10: memref<2x4x64x16xbf16, #tpu.memory_space<vmem>>, %arg11: memref<2x4x1x16xf32, #tpu.memory_space<vmem>>, %arg12: memref<2x4x64x16xbf16, #tpu.memory_space<vmem>>, %arg13: memref<2x4x1x16xf32, #tpu.memory_space<vmem>>, %arg14: memref<2x4x16x64xbf16, #tpu.memory_space<vmem>>, %arg15: memref<2x1x64xf32, #tpu.memory_space<vmem>>, %arg16: memref<2x1x64xf32, #tpu.memory_space<vmem>>, %arg17: memref<2x1x64xf32, #tpu.memory_space<vmem>>, %arg18: memref<2x64x256xbf16, #tpu.memory_space<vmem>>, %arg19: memref<2x1x256xf32, #tpu.memory_space<vmem>>, %arg20: memref<2x256x64xbf16, #tpu.memory_space<vmem>>, %arg21: memref<2x1x64xf32, #tpu.memory_space<vmem>>, %arg22: memref<1x64xf32, #tpu.memory_space<vmem>>, %arg23: memref<1x64xf32, #tpu.memory_space<vmem>>, %arg24: memref<64x128xbf16, #tpu.memory_space<vmem>>, %arg25: memref<1x128xf32, #tpu.memory_space<vmem>>, %arg26: memref<1x1x128xf32, #tpu.memory_space<vmem>>) attributes {dimension_semantics = [#tpu.dimension_semantics<parallel>], iteration_bounds = array<i64: 2>, scalar_prefetch = 0 : i64, scratch_operands = 0 : i64, tpu.core_type = #tpu.core_type<tc>, window_params = [{transform_indices = @transform_0, window_bounds = array<i64: 1, 64, 12>}, {pipeline_mode = #tpu.pipeline_mode<synchronous>, transform_indices = @transform_1, window_bounds = array<i64: 12, 64>}, {pipeline_mode = #tpu.pipeline_mode<synchronous>, transform_indices = @transform_2, window_bounds = array<i64: 1, 64>}, {pipeline_mode = #tpu.pipeline_mode<synchronous>, transform_indices = @transform_3, window_bounds = array<i64: 1, 64>}, {pipeline_mode = #tpu.pipeline_mode<synchronous>, transform_indices = @transform_4, window_bounds = array<i64: 65, 64>}, {pipeline_mode = #tpu.pipeline_mode<synchronous>, transform_indices = @transform_5, window_bounds = array<i64: 2, 1, 64>}, {pipeline_mode = #tpu.pipeline_mode<synchronous>, transform_indices = @transform_6, window_bounds = array<i64: 2, 1, 64>}, {pipeline_mode = #tpu.pipeline_mode<synchronous>, transform_indices = @transform_7, window_bounds = array<i64: 2, 4, 64, 16>}, {pipeline_mode = #tpu.pipeline_mode<synchronous>, transform_indices = @transform_8, window_bounds = array<i64: 2, 4, 1, 16>}, {pipeline_mode = #tpu.pipeline_mode<synchronous>, transform_indices = @transform_9, window_bounds = array<i64: 2, 4, 64, 16>}, {pipeline_mode = #tpu.pipeline_mode<synchronous>, transform_indices = @transform_10, window_bounds = array<i64: 2, 4, 1, 16>}, {pipeline_mode = #tpu.pipeline_mode<synchronous>, transform_indices = @transform_11, window_bounds = array<i64: 2, 4, 64, 16>}, {pipeline_mode = #tpu.pipeline_mode<synchronous>, transform_indices = @transform_12, window_bounds = array<i64: 2, 4, 1, 16>}, {pipeline_mode = #tpu.pipeline_mode<synchronous>, transform_indices = @transform_13, window_bounds = array<i64: 2, 4, 16, 64>}, {pipeline_mode = #tpu.pipeline_mode<synchronous>, transform_indices = @transform_14, window_bounds = array<i64: 2, 1, 64>}, {pipeline_mode = #tpu.pipeline_mode<synchronous>, transform_indices = @transform_15, window_bounds = array<i64: 2, 1, 64>}, {pipeline_mode = #tpu.pipeline_mode<synchronous>, transform_indices = @transform_16, window_bounds = array<i64: 2, 1, 64>}, {pipeline_mode = #tpu.pipeline_mode<synchronous>, transform_indices = @transform_17, window_bounds = array<i64: 2, 64, 256>}, {pipeline_mode = #tpu.pipeline_mode<synchronous>, transform_indices = @transform_18, window_bounds = array<i64: 2, 1, 256>}, {pipeline_mode = #tpu.pipeline_mode<synchronous>, transform_indices = @transform_19, window_bounds = array<i64: 2, 256, 64>}, {pipeline_mode = #tpu.pipeline_mode<synchronous>, transform_indices = @transform_20, window_bounds = array<i64: 2, 1, 64>}, {pipeline_mode = #tpu.pipeline_mode<synchronous>, transform_indices = @transform_21, window_bounds = array<i64: 1, 64>}, {pipeline_mode = #tpu.pipeline_mode<synchronous>, transform_indices = @transform_22, window_bounds = array<i64: 1, 64>}, {pipeline_mode = #tpu.pipeline_mode<synchronous>, transform_indices = @transform_23, window_bounds = array<i64: 64, 128>}, {pipeline_mode = #tpu.pipeline_mode<synchronous>, transform_indices = @transform_24, window_bounds = array<i64: 1, 128>}, {transform_indices = @transform_25, window_bounds = array<i64: 1, 1, 128>}]} {
    %c0 = arith.constant 0 : index
    %c0_0 = arith.constant 0 : index
    %c0_1 = arith.constant 0 : index
    %0 = vector.load %arg1[%c0, %c0_0, %c0_1] : memref<1x64x12xf32, #tpu.memory_space<vmem>>, vector<1x64x12xf32>
    %1 = vector.shape_cast %0 : vector<1x64x12xf32> to vector<64x12xf32>
    %c0_2 = arith.constant 0 : index
    %c0_3 = arith.constant 0 : index
    %2 = vector.load %arg2[%c0_2, %c0_3] : memref<12x64xbf16, #tpu.memory_space<vmem>>, vector<12x64xbf16>
    %3 = arith.truncf %1 : vector<64x12xf32> to vector<64x12xbf16>
    %cst = arith.constant dense<0.000000e+00> : vector<64x64xf32>
    %4 = tpu.matmul %3, %2, %cst {dimension_numbers = #tpu.dot_dimension_numbers<[1], [0], [0], [1], [0, 0, 1, 1], [], []>} : vector<64x12xbf16>, vector<12x64xbf16>, vector<64x64xf32> -> vector<64x64xf32>
    %c0_4 = arith.constant 0 : index
    %c0_5 = arith.constant 0 : index
    %5 = vector.load %arg3[%c0_4, %c0_5] : memref<1x64xf32, #tpu.memory_space<vmem>>, vector<1x64xf32>
    %6 = vector.broadcast %5 : vector<1x64xf32> to vector<64x64xf32>
    %7 = arith.addf %4, %6 : vector<64x64xf32>
    %c0_6 = arith.constant 0 : index
    %c0_7 = arith.constant 0 : index
    %8 = vector.load %arg4[%c0_6, %c0_7] : memref<1x64xf32, #tpu.memory_space<vmem>>, vector<1x64xf32>
    %9 = tpu.concatenate %8, %7 in 0 : vector<1x64xf32>, vector<64x64xf32> -> vector<65x64xf32>
    %c0_8 = arith.constant 0 : index
    %c0_9 = arith.constant 0 : index
    %10 = vector.load %arg5[%c0_8, %c0_9] : memref<65x64xf32, #tpu.memory_space<vmem>>, vector<65x64xf32>
    %11 = arith.addf %9, %10 : vector<65x64xf32>
    %c0_10 = arith.constant 0 : index
    %c0_11 = arith.constant 0 : index
    %c0_12 = arith.constant 0 : index
    %12 = vector.load %arg6[%c0_10, %c0_11, %c0_12] : memref<2x1x64xf32, #tpu.memory_space<vmem>>, vector<1x1x64xf32>
    %13 = vector.shape_cast %12 : vector<1x1x64xf32> to vector<1x64xf32>
    %c0_13 = arith.constant 0 : index
    %c0_14 = arith.constant 0 : index
    %c0_15 = arith.constant 0 : index
    %14 = vector.load %arg7[%c0_13, %c0_14, %c0_15] : memref<2x1x64xf32, #tpu.memory_space<vmem>>, vector<1x1x64xf32>
    %15 = vector.shape_cast %14 : vector<1x1x64xf32> to vector<1x64xf32>
    %cst_16 = arith.constant dense<0.000000e+00> : vector<65xf32>
    %16 = vector.multi_reduction <add>, %11, %cst_16 [1] : vector<65x64xf32> to vector<65xf32>
    %17 = vector.shape_cast %16 : vector<65xf32> to vector<65x1xf32>
    %cst_17 = arith.constant 6.400000e+01 : f32
    %18 = vector.broadcast %cst_17 : f32 to vector<65x1xf32>
    %19 = arith.divf %17, %18 : vector<65x1xf32>
    %20 = vector.broadcast %19 : vector<65x1xf32> to vector<65x64xf32>
    %21 = arith.subf %11, %20 : vector<65x64xf32>
    %22 = arith.mulf %21, %21 : vector<65x64xf32>
    %cst_18 = arith.constant dense<0.000000e+00> : vector<65xf32>
    %23 = vector.multi_reduction <add>, %22, %cst_18 [1] : vector<65x64xf32> to vector<65xf32>
    %24 = vector.shape_cast %23 : vector<65xf32> to vector<65x1xf32>
    %cst_19 = arith.constant 6.400000e+01 : f32
    %25 = vector.broadcast %cst_19 : f32 to vector<65x1xf32>
    %26 = arith.divf %24, %25 : vector<65x1xf32>
    %27 = vector.broadcast %19 : vector<65x1xf32> to vector<65x64xf32>
    %28 = arith.subf %11, %27 : vector<65x64xf32>
    %cst_20 = arith.constant 9.99999974E-6 : f32
    %29 = vector.broadcast %cst_20 : f32 to vector<65x1xf32>
    %30 = arith.addf %26, %29 : vector<65x1xf32>
    %31 = math.rsqrt %30 : vector<65x1xf32>
    %32 = vector.broadcast %31 : vector<65x1xf32> to vector<65x64xf32>
    %33 = arith.mulf %28, %32 : vector<65x64xf32>
    %34 = vector.broadcast %13 : vector<1x64xf32> to vector<65x64xf32>
    %35 = arith.mulf %33, %34 : vector<65x64xf32>
    %36 = vector.broadcast %15 : vector<1x64xf32> to vector<65x64xf32>
    %37 = arith.addf %35, %36 : vector<65x64xf32>
    %38 = arith.truncf %37 : vector<65x64xf32> to vector<65x64xbf16>
    %c0_21 = arith.constant 0 : index
    %c0_22 = arith.constant 0 : index
    %c0_23 = arith.constant 0 : index
    %c0_24 = arith.constant 0 : index
    %39 = vector.load %arg8[%c0_21, %c0_22, %c0_23, %c0_24] : memref<2x4x64x16xbf16, #tpu.memory_space<vmem>>, vector<1x4x64x16xbf16>
    %40 = vector.shape_cast %39 : vector<1x4x64x16xbf16> to vector<4x64x16xbf16>
    %c0_25 = arith.constant 0 : index
    %c0_26 = arith.constant 0 : index
    %c0_27 = arith.constant 0 : index
    %c0_28 = arith.constant 0 : index
    %41 = vector.load %arg10[%c0_25, %c0_26, %c0_27, %c0_28] : memref<2x4x64x16xbf16, #tpu.memory_space<vmem>>, vector<1x4x64x16xbf16>
    %42 = vector.shape_cast %41 : vector<1x4x64x16xbf16> to vector<4x64x16xbf16>
    %c0_29 = arith.constant 0 : index
    %c0_30 = arith.constant 0 : index
    %c0_31 = arith.constant 0 : index
    %c0_32 = arith.constant 0 : index
    %43 = vector.load %arg12[%c0_29, %c0_30, %c0_31, %c0_32] : memref<2x4x64x16xbf16, #tpu.memory_space<vmem>>, vector<1x4x64x16xbf16>
    %44 = vector.shape_cast %43 : vector<1x4x64x16xbf16> to vector<4x64x16xbf16>
    %c0_33 = arith.constant 0 : index
    %c0_34 = arith.constant 0 : index
    %c0_35 = arith.constant 0 : index
    %c0_36 = arith.constant 0 : index
    %45 = vector.load %arg9[%c0_33, %c0_34, %c0_35, %c0_36] : memref<2x4x1x16xf32, #tpu.memory_space<vmem>>, vector<1x4x1x16xf32>
    %46 = vector.shape_cast %45 : vector<1x4x1x16xf32> to vector<4x1x16xf32>
    %c0_37 = arith.constant 0 : index
    %c0_38 = arith.constant 0 : index
    %c0_39 = arith.constant 0 : index
    %c0_40 = arith.constant 0 : index
    %47 = vector.load %arg11[%c0_37, %c0_38, %c0_39, %c0_40] : memref<2x4x1x16xf32, #tpu.memory_space<vmem>>, vector<1x4x1x16xf32>
    %48 = vector.shape_cast %47 : vector<1x4x1x16xf32> to vector<4x1x16xf32>
    %c0_41 = arith.constant 0 : index
    %c0_42 = arith.constant 0 : index
    %c0_43 = arith.constant 0 : index
    %c0_44 = arith.constant 0 : index
    %49 = vector.load %arg13[%c0_41, %c0_42, %c0_43, %c0_44] : memref<2x4x1x16xf32, #tpu.memory_space<vmem>>, vector<1x4x1x16xf32>
    %50 = vector.shape_cast %49 : vector<1x4x1x16xf32> to vector<4x1x16xf32>
    %c0_45 = arith.constant 0 : index
    %c0_46 = arith.constant 0 : index
    %c0_47 = arith.constant 0 : index
    %c0_48 = arith.constant 0 : index
    %51 = vector.load %arg14[%c0_45, %c0_46, %c0_47, %c0_48] : memref<2x4x16x64xbf16, #tpu.memory_space<vmem>>, vector<1x4x16x64xbf16>
    %52 = vector.shape_cast %51 : vector<1x4x16x64xbf16> to vector<4x16x64xbf16>
    %53 = vector.extract_strided_slice %40 {offsets = [0, 0, 0], sizes = [1, 64, 16], strides = [1, 1, 1]} : vector<4x64x16xbf16> to vector<1x64x16xbf16>
    %54 = vector.shape_cast %53 : vector<1x64x16xbf16> to vector<64x16xbf16>
    %cst_49 = arith.constant dense<0.000000e+00> : vector<65x16xf32>
    %55 = tpu.matmul %38, %54, %cst_49 {dimension_numbers = #tpu.dot_dimension_numbers<[1], [0], [0], [1], [0, 0, 1, 1], [], []>} : vector<65x64xbf16>, vector<64x16xbf16>, vector<65x16xf32> -> vector<65x16xf32>
    %56 = vector.extract_strided_slice %46 {offsets = [0, 0, 0], sizes = [1, 1, 16], strides = [1, 1, 1]} : vector<4x1x16xf32> to vector<1x1x16xf32>
    %57 = vector.shape_cast %56 : vector<1x1x16xf32> to vector<1x16xf32>
    %58 = vector.broadcast %57 : vector<1x16xf32> to vector<65x16xf32>
    %59 = arith.addf %55, %58 : vector<65x16xf32>
    %60 = vector.extract_strided_slice %42 {offsets = [0, 0, 0], sizes = [1, 64, 16], strides = [1, 1, 1]} : vector<4x64x16xbf16> to vector<1x64x16xbf16>
    %61 = vector.shape_cast %60 : vector<1x64x16xbf16> to vector<64x16xbf16>
    %cst_50 = arith.constant dense<0.000000e+00> : vector<65x16xf32>
    %62 = tpu.matmul %38, %61, %cst_50 {dimension_numbers = #tpu.dot_dimension_numbers<[1], [0], [0], [1], [0, 0, 1, 1], [], []>} : vector<65x64xbf16>, vector<64x16xbf16>, vector<65x16xf32> -> vector<65x16xf32>
    %63 = vector.extract_strided_slice %48 {offsets = [0, 0, 0], sizes = [1, 1, 16], strides = [1, 1, 1]} : vector<4x1x16xf32> to vector<1x1x16xf32>
    %64 = vector.shape_cast %63 : vector<1x1x16xf32> to vector<1x16xf32>
    %65 = vector.broadcast %64 : vector<1x16xf32> to vector<65x16xf32>
    %66 = arith.addf %62, %65 : vector<65x16xf32>
    %67 = vector.extract_strided_slice %44 {offsets = [0, 0, 0], sizes = [1, 64, 16], strides = [1, 1, 1]} : vector<4x64x16xbf16> to vector<1x64x16xbf16>
    %68 = vector.shape_cast %67 : vector<1x64x16xbf16> to vector<64x16xbf16>
    %cst_51 = arith.constant dense<0.000000e+00> : vector<65x16xf32>
    %69 = tpu.matmul %38, %68, %cst_51 {dimension_numbers = #tpu.dot_dimension_numbers<[1], [0], [0], [1], [0, 0, 1, 1], [], []>} : vector<65x64xbf16>, vector<64x16xbf16>, vector<65x16xf32> -> vector<65x16xf32>
    %70 = vector.extract_strided_slice %50 {offsets = [0, 0, 0], sizes = [1, 1, 16], strides = [1, 1, 1]} : vector<4x1x16xf32> to vector<1x1x16xf32>
    %71 = vector.shape_cast %70 : vector<1x1x16xf32> to vector<1x16xf32>
    %72 = vector.broadcast %71 : vector<1x16xf32> to vector<65x16xf32>
    %73 = arith.addf %69, %72 : vector<65x16xf32>
    %74 = arith.truncf %59 : vector<65x16xf32> to vector<65x16xbf16>
    %75 = arith.truncf %66 : vector<65x16xf32> to vector<65x16xbf16>
    %cst_52 = arith.constant dense<0.000000e+00> : vector<65x65xf32>
    %76 = tpu.matmul %74, %75, %cst_52 {dimension_numbers = #tpu.dot_dimension_numbers<[1], [1], [0], [0], [0, 0, 1, 0], [], []>} : vector<65x16xbf16>, vector<65x16xbf16>, vector<65x65xf32> -> vector<65x65xf32>
    %77 = vector.extract_strided_slice %40 {offsets = [1, 0, 0], sizes = [1, 64, 16], strides = [1, 1, 1]} : vector<4x64x16xbf16> to vector<1x64x16xbf16>
    %78 = vector.shape_cast %77 : vector<1x64x16xbf16> to vector<64x16xbf16>
    %cst_53 = arith.constant dense<0.000000e+00> : vector<65x16xf32>
    %79 = tpu.matmul %38, %78, %cst_53 {dimension_numbers = #tpu.dot_dimension_numbers<[1], [0], [0], [1], [0, 0, 1, 1], [], []>} : vector<65x64xbf16>, vector<64x16xbf16>, vector<65x16xf32> -> vector<65x16xf32>
    %80 = vector.extract_strided_slice %46 {offsets = [1, 0, 0], sizes = [1, 1, 16], strides = [1, 1, 1]} : vector<4x1x16xf32> to vector<1x1x16xf32>
    %81 = vector.shape_cast %80 : vector<1x1x16xf32> to vector<1x16xf32>
    %82 = vector.broadcast %81 : vector<1x16xf32> to vector<65x16xf32>
    %83 = arith.addf %79, %82 : vector<65x16xf32>
    %84 = vector.extract_strided_slice %42 {offsets = [1, 0, 0], sizes = [1, 64, 16], strides = [1, 1, 1]} : vector<4x64x16xbf16> to vector<1x64x16xbf16>
    %85 = vector.shape_cast %84 : vector<1x64x16xbf16> to vector<64x16xbf16>
    %cst_54 = arith.constant dense<0.000000e+00> : vector<65x16xf32>
    %86 = tpu.matmul %38, %85, %cst_54 {dimension_numbers = #tpu.dot_dimension_numbers<[1], [0], [0], [1], [0, 0, 1, 1], [], []>} : vector<65x64xbf16>, vector<64x16xbf16>, vector<65x16xf32> -> vector<65x16xf32>
    %87 = vector.extract_strided_slice %48 {offsets = [1, 0, 0], sizes = [1, 1, 16], strides = [1, 1, 1]} : vector<4x1x16xf32> to vector<1x1x16xf32>
    %88 = vector.shape_cast %87 : vector<1x1x16xf32> to vector<1x16xf32>
    %89 = vector.broadcast %88 : vector<1x16xf32> to vector<65x16xf32>
    %90 = arith.addf %86, %89 : vector<65x16xf32>
    %91 = vector.extract_strided_slice %44 {offsets = [1, 0, 0], sizes = [1, 64, 16], strides = [1, 1, 1]} : vector<4x64x16xbf16> to vector<1x64x16xbf16>
    %92 = vector.shape_cast %91 : vector<1x64x16xbf16> to vector<64x16xbf16>
    %cst_55 = arith.constant dense<0.000000e+00> : vector<65x16xf32>
    %93 = tpu.matmul %38, %92, %cst_55 {dimension_numbers = #tpu.dot_dimension_numbers<[1], [0], [0], [1], [0, 0, 1, 1], [], []>} : vector<65x64xbf16>, vector<64x16xbf16>, vector<65x16xf32> -> vector<65x16xf32>
    %94 = vector.extract_strided_slice %50 {offsets = [1, 0, 0], sizes = [1, 1, 16], strides = [1, 1, 1]} : vector<4x1x16xf32> to vector<1x1x16xf32>
    %95 = vector.shape_cast %94 : vector<1x1x16xf32> to vector<1x16xf32>
    %96 = vector.broadcast %95 : vector<1x16xf32> to vector<65x16xf32>
    %97 = arith.addf %93, %96 : vector<65x16xf32>
    %98 = arith.truncf %83 : vector<65x16xf32> to vector<65x16xbf16>
    %99 = arith.truncf %90 : vector<65x16xf32> to vector<65x16xbf16>
    %cst_56 = arith.constant dense<0.000000e+00> : vector<65x65xf32>
    %100 = tpu.matmul %98, %99, %cst_56 {dimension_numbers = #tpu.dot_dimension_numbers<[1], [1], [0], [0], [0, 0, 1, 0], [], []>} : vector<65x16xbf16>, vector<65x16xbf16>, vector<65x65xf32> -> vector<65x65xf32>
    %101 = vector.extract_strided_slice %40 {offsets = [2, 0, 0], sizes = [1, 64, 16], strides = [1, 1, 1]} : vector<4x64x16xbf16> to vector<1x64x16xbf16>
    %102 = vector.shape_cast %101 : vector<1x64x16xbf16> to vector<64x16xbf16>
    %cst_57 = arith.constant dense<0.000000e+00> : vector<65x16xf32>
    %103 = tpu.matmul %38, %102, %cst_57 {dimension_numbers = #tpu.dot_dimension_numbers<[1], [0], [0], [1], [0, 0, 1, 1], [], []>} : vector<65x64xbf16>, vector<64x16xbf16>, vector<65x16xf32> -> vector<65x16xf32>
    %104 = vector.extract_strided_slice %46 {offsets = [2, 0, 0], sizes = [1, 1, 16], strides = [1, 1, 1]} : vector<4x1x16xf32> to vector<1x1x16xf32>
    %105 = vector.shape_cast %104 : vector<1x1x16xf32> to vector<1x16xf32>
    %106 = vector.broadcast %105 : vector<1x16xf32> to vector<65x16xf32>
    %107 = arith.addf %103, %106 : vector<65x16xf32>
    %108 = vector.extract_strided_slice %42 {offsets = [2, 0, 0], sizes = [1, 64, 16], strides = [1, 1, 1]} : vector<4x64x16xbf16> to vector<1x64x16xbf16>
    %109 = vector.shape_cast %108 : vector<1x64x16xbf16> to vector<64x16xbf16>
    %cst_58 = arith.constant dense<0.000000e+00> : vector<65x16xf32>
    %110 = tpu.matmul %38, %109, %cst_58 {dimension_numbers = #tpu.dot_dimension_numbers<[1], [0], [0], [1], [0, 0, 1, 1], [], []>} : vector<65x64xbf16>, vector<64x16xbf16>, vector<65x16xf32> -> vector<65x16xf32>
    %111 = vector.extract_strided_slice %48 {offsets = [2, 0, 0], sizes = [1, 1, 16], strides = [1, 1, 1]} : vector<4x1x16xf32> to vector<1x1x16xf32>
    %112 = vector.shape_cast %111 : vector<1x1x16xf32> to vector<1x16xf32>
    %113 = vector.broadcast %112 : vector<1x16xf32> to vector<65x16xf32>
    %114 = arith.addf %110, %113 : vector<65x16xf32>
    %115 = vector.extract_strided_slice %44 {offsets = [2, 0, 0], sizes = [1, 64, 16], strides = [1, 1, 1]} : vector<4x64x16xbf16> to vector<1x64x16xbf16>
    %116 = vector.shape_cast %115 : vector<1x64x16xbf16> to vector<64x16xbf16>
    %cst_59 = arith.constant dense<0.000000e+00> : vector<65x16xf32>
    %117 = tpu.matmul %38, %116, %cst_59 {dimension_numbers = #tpu.dot_dimension_numbers<[1], [0], [0], [1], [0, 0, 1, 1], [], []>} : vector<65x64xbf16>, vector<64x16xbf16>, vector<65x16xf32> -> vector<65x16xf32>
    %118 = vector.extract_strided_slice %50 {offsets = [2, 0, 0], sizes = [1, 1, 16], strides = [1, 1, 1]} : vector<4x1x16xf32> to vector<1x1x16xf32>
    %119 = vector.shape_cast %118 : vector<1x1x16xf32> to vector<1x16xf32>
    %120 = vector.broadcast %119 : vector<1x16xf32> to vector<65x16xf32>
    %121 = arith.addf %117, %120 : vector<65x16xf32>
    %122 = arith.truncf %107 : vector<65x16xf32> to vector<65x16xbf16>
    %123 = arith.truncf %114 : vector<65x16xf32> to vector<65x16xbf16>
    %cst_60 = arith.constant dense<0.000000e+00> : vector<65x65xf32>
    %124 = tpu.matmul %122, %123, %cst_60 {dimension_numbers = #tpu.dot_dimension_numbers<[1], [1], [0], [0], [0, 0, 1, 0], [], []>} : vector<65x16xbf16>, vector<65x16xbf16>, vector<65x65xf32> -> vector<65x65xf32>
    %125 = vector.extract_strided_slice %40 {offsets = [3, 0, 0], sizes = [1, 64, 16], strides = [1, 1, 1]} : vector<4x64x16xbf16> to vector<1x64x16xbf16>
    %126 = vector.shape_cast %125 : vector<1x64x16xbf16> to vector<64x16xbf16>
    %cst_61 = arith.constant dense<0.000000e+00> : vector<65x16xf32>
    %127 = tpu.matmul %38, %126, %cst_61 {dimension_numbers = #tpu.dot_dimension_numbers<[1], [0], [0], [1], [0, 0, 1, 1], [], []>} : vector<65x64xbf16>, vector<64x16xbf16>, vector<65x16xf32> -> vector<65x16xf32>
    %128 = vector.extract_strided_slice %46 {offsets = [3, 0, 0], sizes = [1, 1, 16], strides = [1, 1, 1]} : vector<4x1x16xf32> to vector<1x1x16xf32>
    %129 = vector.shape_cast %128 : vector<1x1x16xf32> to vector<1x16xf32>
    %130 = vector.broadcast %129 : vector<1x16xf32> to vector<65x16xf32>
    %131 = arith.addf %127, %130 : vector<65x16xf32>
    %132 = vector.extract_strided_slice %42 {offsets = [3, 0, 0], sizes = [1, 64, 16], strides = [1, 1, 1]} : vector<4x64x16xbf16> to vector<1x64x16xbf16>
    %133 = vector.shape_cast %132 : vector<1x64x16xbf16> to vector<64x16xbf16>
    %cst_62 = arith.constant dense<0.000000e+00> : vector<65x16xf32>
    %134 = tpu.matmul %38, %133, %cst_62 {dimension_numbers = #tpu.dot_dimension_numbers<[1], [0], [0], [1], [0, 0, 1, 1], [], []>} : vector<65x64xbf16>, vector<64x16xbf16>, vector<65x16xf32> -> vector<65x16xf32>
    %135 = vector.extract_strided_slice %48 {offsets = [3, 0, 0], sizes = [1, 1, 16], strides = [1, 1, 1]} : vector<4x1x16xf32> to vector<1x1x16xf32>
    %136 = vector.shape_cast %135 : vector<1x1x16xf32> to vector<1x16xf32>
    %137 = vector.broadcast %136 : vector<1x16xf32> to vector<65x16xf32>
    %138 = arith.addf %134, %137 : vector<65x16xf32>
    %139 = vector.extract_strided_slice %44 {offsets = [3, 0, 0], sizes = [1, 64, 16], strides = [1, 1, 1]} : vector<4x64x16xbf16> to vector<1x64x16xbf16>
    %140 = vector.shape_cast %139 : vector<1x64x16xbf16> to vector<64x16xbf16>
    %cst_63 = arith.constant dense<0.000000e+00> : vector<65x16xf32>
    %141 = tpu.matmul %38, %140, %cst_63 {dimension_numbers = #tpu.dot_dimension_numbers<[1], [0], [0], [1], [0, 0, 1, 1], [], []>} : vector<65x64xbf16>, vector<64x16xbf16>, vector<65x16xf32> -> vector<65x16xf32>
    %142 = vector.extract_strided_slice %50 {offsets = [3, 0, 0], sizes = [1, 1, 16], strides = [1, 1, 1]} : vector<4x1x16xf32> to vector<1x1x16xf32>
    %143 = vector.shape_cast %142 : vector<1x1x16xf32> to vector<1x16xf32>
    %144 = vector.broadcast %143 : vector<1x16xf32> to vector<65x16xf32>
    %145 = arith.addf %141, %144 : vector<65x16xf32>
    %146 = arith.truncf %131 : vector<65x16xf32> to vector<65x16xbf16>
    %147 = arith.truncf %138 : vector<65x16xf32> to vector<65x16xbf16>
    %cst_64 = arith.constant dense<0.000000e+00> : vector<65x65xf32>
    %148 = tpu.matmul %146, %147, %cst_64 {dimension_numbers = #tpu.dot_dimension_numbers<[1], [1], [0], [0], [0, 0, 1, 0], [], []>} : vector<65x16xbf16>, vector<65x16xbf16>, vector<65x65xf32> -> vector<65x65xf32>
    %149 = vector.shape_cast %76 : vector<65x65xf32> to vector<1x65x65xf32>
    %150 = vector.shape_cast %100 : vector<65x65xf32> to vector<1x65x65xf32>
    %151 = vector.shape_cast %124 : vector<65x65xf32> to vector<1x65x65xf32>
    %152 = vector.shape_cast %148 : vector<65x65xf32> to vector<1x65x65xf32>
    %153 = tpu.concatenate %149, %150, %151, %152 in 0 : vector<1x65x65xf32>, vector<1x65x65xf32>, vector<1x65x65xf32>, vector<1x65x65xf32> -> vector<4x65x65xf32>
    %cst_65 = arith.constant dense<0xFF800000> : vector<4x65xf32>
    %154 = vector.multi_reduction <maximumf>, %153, %cst_65 [2] : vector<4x65x65xf32> to vector<4x65xf32>
    %155 = vector.shape_cast %154 : vector<4x65xf32> to vector<4x65x1xf32>
    %156 = vector.broadcast %155 : vector<4x65x1xf32> to vector<4x65x65xf32>
    %157 = arith.subf %153, %156 : vector<4x65x65xf32>
    %158 = math.exp %157 : vector<4x65x65xf32>
    %cst_66 = arith.constant dense<0.000000e+00> : vector<4x65xf32>
    %159 = vector.multi_reduction <add>, %158, %cst_66 [2] : vector<4x65x65xf32> to vector<4x65xf32>
    %160 = vector.shape_cast %159 : vector<4x65xf32> to vector<4x65x1xf32>
    %161 = tpu.reciprocal %160 {approx = true} : vector<4x65x1xf32> -> vector<4x65x1xf32>
    %162 = vector.broadcast %161 : vector<4x65x1xf32> to vector<4x65x65xf32>
    %163 = arith.mulf %158, %162 : vector<4x65x65xf32>
    %cst_67 = arith.constant 0.000000e+00 : f32
    %164 = vector.broadcast %cst_67 : f32 to vector<65x64xf32>
    %165 = vector.extract_strided_slice %163 {offsets = [0, 0, 0], sizes = [1, 65, 65], strides = [1, 1, 1]} : vector<4x65x65xf32> to vector<1x65x65xf32>
    %166 = vector.shape_cast %165 : vector<1x65x65xf32> to vector<65x65xf32>
    %167 = arith.truncf %166 : vector<65x65xf32> to vector<65x65xbf16>
    %168 = arith.truncf %73 : vector<65x16xf32> to vector<65x16xbf16>
    %cst_68 = arith.constant dense<0.000000e+00> : vector<65x16xf32>
    %169 = tpu.matmul %167, %168, %cst_68 {dimension_numbers = #tpu.dot_dimension_numbers<[1], [0], [0], [1], [0, 0, 1, 1], [], []>} : vector<65x65xbf16>, vector<65x16xbf16>, vector<65x16xf32> -> vector<65x16xf32>
    %170 = vector.extract_strided_slice %52 {offsets = [0, 0, 0], sizes = [1, 16, 64], strides = [1, 1, 1]} : vector<4x16x64xbf16> to vector<1x16x64xbf16>
    %171 = vector.shape_cast %170 : vector<1x16x64xbf16> to vector<16x64xbf16>
    %172 = arith.truncf %169 : vector<65x16xf32> to vector<65x16xbf16>
    %cst_69 = arith.constant dense<0.000000e+00> : vector<65x64xf32>
    %173 = tpu.matmul %172, %171, %cst_69 {dimension_numbers = #tpu.dot_dimension_numbers<[1], [0], [0], [1], [0, 0, 1, 1], [], []>} : vector<65x16xbf16>, vector<16x64xbf16>, vector<65x64xf32> -> vector<65x64xf32>
    %174 = arith.addf %164, %173 : vector<65x64xf32>
    %175 = vector.extract_strided_slice %163 {offsets = [1, 0, 0], sizes = [1, 65, 65], strides = [1, 1, 1]} : vector<4x65x65xf32> to vector<1x65x65xf32>
    %176 = vector.shape_cast %175 : vector<1x65x65xf32> to vector<65x65xf32>
    %177 = arith.truncf %176 : vector<65x65xf32> to vector<65x65xbf16>
    %178 = arith.truncf %97 : vector<65x16xf32> to vector<65x16xbf16>
    %cst_70 = arith.constant dense<0.000000e+00> : vector<65x16xf32>
    %179 = tpu.matmul %177, %178, %cst_70 {dimension_numbers = #tpu.dot_dimension_numbers<[1], [0], [0], [1], [0, 0, 1, 1], [], []>} : vector<65x65xbf16>, vector<65x16xbf16>, vector<65x16xf32> -> vector<65x16xf32>
    %180 = vector.extract_strided_slice %52 {offsets = [1, 0, 0], sizes = [1, 16, 64], strides = [1, 1, 1]} : vector<4x16x64xbf16> to vector<1x16x64xbf16>
    %181 = vector.shape_cast %180 : vector<1x16x64xbf16> to vector<16x64xbf16>
    %182 = arith.truncf %179 : vector<65x16xf32> to vector<65x16xbf16>
    %cst_71 = arith.constant dense<0.000000e+00> : vector<65x64xf32>
    %183 = tpu.matmul %182, %181, %cst_71 {dimension_numbers = #tpu.dot_dimension_numbers<[1], [0], [0], [1], [0, 0, 1, 1], [], []>} : vector<65x16xbf16>, vector<16x64xbf16>, vector<65x64xf32> -> vector<65x64xf32>
    %184 = arith.addf %174, %183 : vector<65x64xf32>
    %185 = vector.extract_strided_slice %163 {offsets = [2, 0, 0], sizes = [1, 65, 65], strides = [1, 1, 1]} : vector<4x65x65xf32> to vector<1x65x65xf32>
    %186 = vector.shape_cast %185 : vector<1x65x65xf32> to vector<65x65xf32>
    %187 = arith.truncf %186 : vector<65x65xf32> to vector<65x65xbf16>
    %188 = arith.truncf %121 : vector<65x16xf32> to vector<65x16xbf16>
    %cst_72 = arith.constant dense<0.000000e+00> : vector<65x16xf32>
    %189 = tpu.matmul %187, %188, %cst_72 {dimension_numbers = #tpu.dot_dimension_numbers<[1], [0], [0], [1], [0, 0, 1, 1], [], []>} : vector<65x65xbf16>, vector<65x16xbf16>, vector<65x16xf32> -> vector<65x16xf32>
    %190 = vector.extract_strided_slice %52 {offsets = [2, 0, 0], sizes = [1, 16, 64], strides = [1, 1, 1]} : vector<4x16x64xbf16> to vector<1x16x64xbf16>
    %191 = vector.shape_cast %190 : vector<1x16x64xbf16> to vector<16x64xbf16>
    %192 = arith.truncf %189 : vector<65x16xf32> to vector<65x16xbf16>
    %cst_73 = arith.constant dense<0.000000e+00> : vector<65x64xf32>
    %193 = tpu.matmul %192, %191, %cst_73 {dimension_numbers = #tpu.dot_dimension_numbers<[1], [0], [0], [1], [0, 0, 1, 1], [], []>} : vector<65x16xbf16>, vector<16x64xbf16>, vector<65x64xf32> -> vector<65x64xf32>
    %194 = arith.addf %184, %193 : vector<65x64xf32>
    %195 = vector.extract_strided_slice %163 {offsets = [3, 0, 0], sizes = [1, 65, 65], strides = [1, 1, 1]} : vector<4x65x65xf32> to vector<1x65x65xf32>
    %196 = vector.shape_cast %195 : vector<1x65x65xf32> to vector<65x65xf32>
    %197 = arith.truncf %196 : vector<65x65xf32> to vector<65x65xbf16>
    %198 = arith.truncf %145 : vector<65x16xf32> to vector<65x16xbf16>
    %cst_74 = arith.constant dense<0.000000e+00> : vector<65x16xf32>
    %199 = tpu.matmul %197, %198, %cst_74 {dimension_numbers = #tpu.dot_dimension_numbers<[1], [0], [0], [1], [0, 0, 1, 1], [], []>} : vector<65x65xbf16>, vector<65x16xbf16>, vector<65x16xf32> -> vector<65x16xf32>
    %200 = vector.extract_strided_slice %52 {offsets = [3, 0, 0], sizes = [1, 16, 64], strides = [1, 1, 1]} : vector<4x16x64xbf16> to vector<1x16x64xbf16>
    %201 = vector.shape_cast %200 : vector<1x16x64xbf16> to vector<16x64xbf16>
    %202 = arith.truncf %199 : vector<65x16xf32> to vector<65x16xbf16>
    %cst_75 = arith.constant dense<0.000000e+00> : vector<65x64xf32>
    %203 = tpu.matmul %202, %201, %cst_75 {dimension_numbers = #tpu.dot_dimension_numbers<[1], [0], [0], [1], [0, 0, 1, 1], [], []>} : vector<65x16xbf16>, vector<16x64xbf16>, vector<65x64xf32> -> vector<65x64xf32>
    %204 = arith.addf %194, %203 : vector<65x64xf32>
    %205 = arith.addf %11, %204 : vector<65x64xf32>
    %c0_76 = arith.constant 0 : index
    %c0_77 = arith.constant 0 : index
    %c0_78 = arith.constant 0 : index
    %206 = vector.load %arg15[%c0_76, %c0_77, %c0_78] : memref<2x1x64xf32, #tpu.memory_space<vmem>>, vector<1x1x64xf32>
    %207 = vector.shape_cast %206 : vector<1x1x64xf32> to vector<1x64xf32>
    %208 = vector.broadcast %207 : vector<1x64xf32> to vector<65x64xf32>
    %209 = arith.addf %205, %208 : vector<65x64xf32>
    %c0_79 = arith.constant 0 : index
    %c0_80 = arith.constant 0 : index
    %c0_81 = arith.constant 0 : index
    %210 = vector.load %arg16[%c0_79, %c0_80, %c0_81] : memref<2x1x64xf32, #tpu.memory_space<vmem>>, vector<1x1x64xf32>
    %211 = vector.shape_cast %210 : vector<1x1x64xf32> to vector<1x64xf32>
    %c0_82 = arith.constant 0 : index
    %c0_83 = arith.constant 0 : index
    %c0_84 = arith.constant 0 : index
    %212 = vector.load %arg17[%c0_82, %c0_83, %c0_84] : memref<2x1x64xf32, #tpu.memory_space<vmem>>, vector<1x1x64xf32>
    %213 = vector.shape_cast %212 : vector<1x1x64xf32> to vector<1x64xf32>
    %cst_85 = arith.constant dense<0.000000e+00> : vector<65xf32>
    %214 = vector.multi_reduction <add>, %209, %cst_85 [1] : vector<65x64xf32> to vector<65xf32>
    %215 = vector.shape_cast %214 : vector<65xf32> to vector<65x1xf32>
    %cst_86 = arith.constant 6.400000e+01 : f32
    %216 = vector.broadcast %cst_86 : f32 to vector<65x1xf32>
    %217 = arith.divf %215, %216 : vector<65x1xf32>
    %218 = vector.broadcast %217 : vector<65x1xf32> to vector<65x64xf32>
    %219 = arith.subf %209, %218 : vector<65x64xf32>
    %220 = arith.mulf %219, %219 : vector<65x64xf32>
    %cst_87 = arith.constant dense<0.000000e+00> : vector<65xf32>
    %221 = vector.multi_reduction <add>, %220, %cst_87 [1] : vector<65x64xf32> to vector<65xf32>
    %222 = vector.shape_cast %221 : vector<65xf32> to vector<65x1xf32>
    %cst_88 = arith.constant 6.400000e+01 : f32
    %223 = vector.broadcast %cst_88 : f32 to vector<65x1xf32>
    %224 = arith.divf %222, %223 : vector<65x1xf32>
    %225 = vector.broadcast %217 : vector<65x1xf32> to vector<65x64xf32>
    %226 = arith.subf %209, %225 : vector<65x64xf32>
    %cst_89 = arith.constant 9.99999974E-6 : f32
    %227 = vector.broadcast %cst_89 : f32 to vector<65x1xf32>
    %228 = arith.addf %224, %227 : vector<65x1xf32>
    %229 = math.rsqrt %228 : vector<65x1xf32>
    %230 = vector.broadcast %229 : vector<65x1xf32> to vector<65x64xf32>
    %231 = arith.mulf %226, %230 : vector<65x64xf32>
    %232 = vector.broadcast %211 : vector<1x64xf32> to vector<65x64xf32>
    %233 = arith.mulf %231, %232 : vector<65x64xf32>
    %234 = vector.broadcast %213 : vector<1x64xf32> to vector<65x64xf32>
    %235 = arith.addf %233, %234 : vector<65x64xf32>
    %c0_90 = arith.constant 0 : index
    %c0_91 = arith.constant 0 : index
    %c0_92 = arith.constant 0 : index
    %236 = vector.load %arg18[%c0_90, %c0_91, %c0_92] : memref<2x64x256xbf16, #tpu.memory_space<vmem>>, vector<1x64x256xbf16>
    %237 = vector.shape_cast %236 : vector<1x64x256xbf16> to vector<64x256xbf16>
    %238 = arith.truncf %235 : vector<65x64xf32> to vector<65x64xbf16>
    %cst_93 = arith.constant dense<0.000000e+00> : vector<65x256xf32>
    %239 = tpu.matmul %238, %237, %cst_93 {dimension_numbers = #tpu.dot_dimension_numbers<[1], [0], [0], [1], [0, 0, 1, 1], [], []>} : vector<65x64xbf16>, vector<64x256xbf16>, vector<65x256xf32> -> vector<65x256xf32>
    %c0_94 = arith.constant 0 : index
    %c0_95 = arith.constant 0 : index
    %c0_96 = arith.constant 0 : index
    %240 = vector.load %arg19[%c0_94, %c0_95, %c0_96] : memref<2x1x256xf32, #tpu.memory_space<vmem>>, vector<1x1x256xf32>
    %241 = vector.shape_cast %240 : vector<1x1x256xf32> to vector<1x256xf32>
    %242 = vector.broadcast %241 : vector<1x256xf32> to vector<65x256xf32>
    %243 = arith.addf %239, %242 : vector<65x256xf32>
    %cst_97 = arith.constant 5.000000e-01 : f32
    %244 = vector.broadcast %cst_97 : f32 to vector<65x256xf32>
    %245 = arith.mulf %244, %243 : vector<65x256xf32>
    %cst_98 = arith.constant 4.471500e-02 : f32
    %246 = vector.broadcast %cst_98 : f32 to vector<65x256xf32>
    %247 = arith.mulf %246, %243 : vector<65x256xf32>
    %248 = arith.mulf %247, %243 : vector<65x256xf32>
    %249 = arith.mulf %248, %243 : vector<65x256xf32>
    %250 = arith.addf %243, %249 : vector<65x256xf32>
    %cst_99 = arith.constant 0.797884583 : f32
    %251 = vector.broadcast %cst_99 : f32 to vector<65x256xf32>
    %252 = arith.mulf %251, %250 : vector<65x256xf32>
    %253 = math.tanh %252 : vector<65x256xf32>
    %cst_100 = arith.constant 1.000000e+00 : f32
    %254 = vector.broadcast %cst_100 : f32 to vector<65x256xf32>
    %255 = arith.addf %254, %253 : vector<65x256xf32>
    %256 = arith.mulf %245, %255 : vector<65x256xf32>
    %c0_101 = arith.constant 0 : index
    %c0_102 = arith.constant 0 : index
    %c0_103 = arith.constant 0 : index
    %257 = vector.load %arg20[%c0_101, %c0_102, %c0_103] : memref<2x256x64xbf16, #tpu.memory_space<vmem>>, vector<1x256x64xbf16>
    %258 = vector.shape_cast %257 : vector<1x256x64xbf16> to vector<256x64xbf16>
    %259 = arith.truncf %256 : vector<65x256xf32> to vector<65x256xbf16>
    %cst_104 = arith.constant dense<0.000000e+00> : vector<65x64xf32>
    %260 = tpu.matmul %259, %258, %cst_104 {dimension_numbers = #tpu.dot_dimension_numbers<[1], [0], [0], [1], [0, 0, 1, 1], [], []>} : vector<65x256xbf16>, vector<256x64xbf16>, vector<65x64xf32> -> vector<65x64xf32>
    %261 = arith.addf %209, %260 : vector<65x64xf32>
    %c0_105 = arith.constant 0 : index
    %c0_106 = arith.constant 0 : index
    %c0_107 = arith.constant 0 : index
    %262 = vector.load %arg21[%c0_105, %c0_106, %c0_107] : memref<2x1x64xf32, #tpu.memory_space<vmem>>, vector<1x1x64xf32>
    %263 = vector.shape_cast %262 : vector<1x1x64xf32> to vector<1x64xf32>
    %264 = vector.broadcast %263 : vector<1x64xf32> to vector<65x64xf32>
    %265 = arith.addf %261, %264 : vector<65x64xf32>
    %c1 = arith.constant 1 : index
    %c0_108 = arith.constant 0 : index
    %c0_109 = arith.constant 0 : index
    %266 = vector.load %arg6[%c1, %c0_108, %c0_109] : memref<2x1x64xf32, #tpu.memory_space<vmem>>, vector<1x1x64xf32>
    %267 = vector.shape_cast %266 : vector<1x1x64xf32> to vector<1x64xf32>
    %c1_110 = arith.constant 1 : index
    %c0_111 = arith.constant 0 : index
    %c0_112 = arith.constant 0 : index
    %268 = vector.load %arg7[%c1_110, %c0_111, %c0_112] : memref<2x1x64xf32, #tpu.memory_space<vmem>>, vector<1x1x64xf32>
    %269 = vector.shape_cast %268 : vector<1x1x64xf32> to vector<1x64xf32>
    %cst_113 = arith.constant dense<0.000000e+00> : vector<65xf32>
    %270 = vector.multi_reduction <add>, %265, %cst_113 [1] : vector<65x64xf32> to vector<65xf32>
    %271 = vector.shape_cast %270 : vector<65xf32> to vector<65x1xf32>
    %cst_114 = arith.constant 6.400000e+01 : f32
    %272 = vector.broadcast %cst_114 : f32 to vector<65x1xf32>
    %273 = arith.divf %271, %272 : vector<65x1xf32>
    %274 = vector.broadcast %273 : vector<65x1xf32> to vector<65x64xf32>
    %275 = arith.subf %265, %274 : vector<65x64xf32>
    %276 = arith.mulf %275, %275 : vector<65x64xf32>
    %cst_115 = arith.constant dense<0.000000e+00> : vector<65xf32>
    %277 = vector.multi_reduction <add>, %276, %cst_115 [1] : vector<65x64xf32> to vector<65xf32>
    %278 = vector.shape_cast %277 : vector<65xf32> to vector<65x1xf32>
    %cst_116 = arith.constant 6.400000e+01 : f32
    %279 = vector.broadcast %cst_116 : f32 to vector<65x1xf32>
    %280 = arith.divf %278, %279 : vector<65x1xf32>
    %281 = vector.broadcast %273 : vector<65x1xf32> to vector<65x64xf32>
    %282 = arith.subf %265, %281 : vector<65x64xf32>
    %cst_117 = arith.constant 9.99999974E-6 : f32
    %283 = vector.broadcast %cst_117 : f32 to vector<65x1xf32>
    %284 = arith.addf %280, %283 : vector<65x1xf32>
    %285 = math.rsqrt %284 : vector<65x1xf32>
    %286 = vector.broadcast %285 : vector<65x1xf32> to vector<65x64xf32>
    %287 = arith.mulf %282, %286 : vector<65x64xf32>
    %288 = vector.broadcast %267 : vector<1x64xf32> to vector<65x64xf32>
    %289 = arith.mulf %287, %288 : vector<65x64xf32>
    %290 = vector.broadcast %269 : vector<1x64xf32> to vector<65x64xf32>
    %291 = arith.addf %289, %290 : vector<65x64xf32>
    %292 = arith.truncf %291 : vector<65x64xf32> to vector<65x64xbf16>
    %c1_118 = arith.constant 1 : index
    %c0_119 = arith.constant 0 : index
    %c0_120 = arith.constant 0 : index
    %c0_121 = arith.constant 0 : index
    %293 = vector.load %arg8[%c1_118, %c0_119, %c0_120, %c0_121] : memref<2x4x64x16xbf16, #tpu.memory_space<vmem>>, vector<1x4x64x16xbf16>
    %294 = vector.shape_cast %293 : vector<1x4x64x16xbf16> to vector<4x64x16xbf16>
    %c1_122 = arith.constant 1 : index
    %c0_123 = arith.constant 0 : index
    %c0_124 = arith.constant 0 : index
    %c0_125 = arith.constant 0 : index
    %295 = vector.load %arg10[%c1_122, %c0_123, %c0_124, %c0_125] : memref<2x4x64x16xbf16, #tpu.memory_space<vmem>>, vector<1x4x64x16xbf16>
    %296 = vector.shape_cast %295 : vector<1x4x64x16xbf16> to vector<4x64x16xbf16>
    %c1_126 = arith.constant 1 : index
    %c0_127 = arith.constant 0 : index
    %c0_128 = arith.constant 0 : index
    %c0_129 = arith.constant 0 : index
    %297 = vector.load %arg12[%c1_126, %c0_127, %c0_128, %c0_129] : memref<2x4x64x16xbf16, #tpu.memory_space<vmem>>, vector<1x4x64x16xbf16>
    %298 = vector.shape_cast %297 : vector<1x4x64x16xbf16> to vector<4x64x16xbf16>
    %c1_130 = arith.constant 1 : index
    %c0_131 = arith.constant 0 : index
    %c0_132 = arith.constant 0 : index
    %c0_133 = arith.constant 0 : index
    %299 = vector.load %arg9[%c1_130, %c0_131, %c0_132, %c0_133] : memref<2x4x1x16xf32, #tpu.memory_space<vmem>>, vector<1x4x1x16xf32>
    %300 = vector.shape_cast %299 : vector<1x4x1x16xf32> to vector<4x1x16xf32>
    %c1_134 = arith.constant 1 : index
    %c0_135 = arith.constant 0 : index
    %c0_136 = arith.constant 0 : index
    %c0_137 = arith.constant 0 : index
    %301 = vector.load %arg11[%c1_134, %c0_135, %c0_136, %c0_137] : memref<2x4x1x16xf32, #tpu.memory_space<vmem>>, vector<1x4x1x16xf32>
    %302 = vector.shape_cast %301 : vector<1x4x1x16xf32> to vector<4x1x16xf32>
    %c1_138 = arith.constant 1 : index
    %c0_139 = arith.constant 0 : index
    %c0_140 = arith.constant 0 : index
    %c0_141 = arith.constant 0 : index
    %303 = vector.load %arg13[%c1_138, %c0_139, %c0_140, %c0_141] : memref<2x4x1x16xf32, #tpu.memory_space<vmem>>, vector<1x4x1x16xf32>
    %304 = vector.shape_cast %303 : vector<1x4x1x16xf32> to vector<4x1x16xf32>
    %c1_142 = arith.constant 1 : index
    %c0_143 = arith.constant 0 : index
    %c0_144 = arith.constant 0 : index
    %c0_145 = arith.constant 0 : index
    %305 = vector.load %arg14[%c1_142, %c0_143, %c0_144, %c0_145] : memref<2x4x16x64xbf16, #tpu.memory_space<vmem>>, vector<1x4x16x64xbf16>
    %306 = vector.shape_cast %305 : vector<1x4x16x64xbf16> to vector<4x16x64xbf16>
    %307 = vector.extract_strided_slice %294 {offsets = [0, 0, 0], sizes = [1, 64, 16], strides = [1, 1, 1]} : vector<4x64x16xbf16> to vector<1x64x16xbf16>
    %308 = vector.shape_cast %307 : vector<1x64x16xbf16> to vector<64x16xbf16>
    %cst_146 = arith.constant dense<0.000000e+00> : vector<65x16xf32>
    %309 = tpu.matmul %292, %308, %cst_146 {dimension_numbers = #tpu.dot_dimension_numbers<[1], [0], [0], [1], [0, 0, 1, 1], [], []>} : vector<65x64xbf16>, vector<64x16xbf16>, vector<65x16xf32> -> vector<65x16xf32>
    %310 = vector.extract_strided_slice %300 {offsets = [0, 0, 0], sizes = [1, 1, 16], strides = [1, 1, 1]} : vector<4x1x16xf32> to vector<1x1x16xf32>
    %311 = vector.shape_cast %310 : vector<1x1x16xf32> to vector<1x16xf32>
    %312 = vector.broadcast %311 : vector<1x16xf32> to vector<65x16xf32>
    %313 = arith.addf %309, %312 : vector<65x16xf32>
    %314 = vector.extract_strided_slice %296 {offsets = [0, 0, 0], sizes = [1, 64, 16], strides = [1, 1, 1]} : vector<4x64x16xbf16> to vector<1x64x16xbf16>
    %315 = vector.shape_cast %314 : vector<1x64x16xbf16> to vector<64x16xbf16>
    %cst_147 = arith.constant dense<0.000000e+00> : vector<65x16xf32>
    %316 = tpu.matmul %292, %315, %cst_147 {dimension_numbers = #tpu.dot_dimension_numbers<[1], [0], [0], [1], [0, 0, 1, 1], [], []>} : vector<65x64xbf16>, vector<64x16xbf16>, vector<65x16xf32> -> vector<65x16xf32>
    %317 = vector.extract_strided_slice %302 {offsets = [0, 0, 0], sizes = [1, 1, 16], strides = [1, 1, 1]} : vector<4x1x16xf32> to vector<1x1x16xf32>
    %318 = vector.shape_cast %317 : vector<1x1x16xf32> to vector<1x16xf32>
    %319 = vector.broadcast %318 : vector<1x16xf32> to vector<65x16xf32>
    %320 = arith.addf %316, %319 : vector<65x16xf32>
    %321 = vector.extract_strided_slice %298 {offsets = [0, 0, 0], sizes = [1, 64, 16], strides = [1, 1, 1]} : vector<4x64x16xbf16> to vector<1x64x16xbf16>
    %322 = vector.shape_cast %321 : vector<1x64x16xbf16> to vector<64x16xbf16>
    %cst_148 = arith.constant dense<0.000000e+00> : vector<65x16xf32>
    %323 = tpu.matmul %292, %322, %cst_148 {dimension_numbers = #tpu.dot_dimension_numbers<[1], [0], [0], [1], [0, 0, 1, 1], [], []>} : vector<65x64xbf16>, vector<64x16xbf16>, vector<65x16xf32> -> vector<65x16xf32>
    %324 = vector.extract_strided_slice %304 {offsets = [0, 0, 0], sizes = [1, 1, 16], strides = [1, 1, 1]} : vector<4x1x16xf32> to vector<1x1x16xf32>
    %325 = vector.shape_cast %324 : vector<1x1x16xf32> to vector<1x16xf32>
    %326 = vector.broadcast %325 : vector<1x16xf32> to vector<65x16xf32>
    %327 = arith.addf %323, %326 : vector<65x16xf32>
    %328 = arith.truncf %313 : vector<65x16xf32> to vector<65x16xbf16>
    %329 = arith.truncf %320 : vector<65x16xf32> to vector<65x16xbf16>
    %cst_149 = arith.constant dense<0.000000e+00> : vector<65x65xf32>
    %330 = tpu.matmul %328, %329, %cst_149 {dimension_numbers = #tpu.dot_dimension_numbers<[1], [1], [0], [0], [0, 0, 1, 0], [], []>} : vector<65x16xbf16>, vector<65x16xbf16>, vector<65x65xf32> -> vector<65x65xf32>
    %331 = vector.extract_strided_slice %294 {offsets = [1, 0, 0], sizes = [1, 64, 16], strides = [1, 1, 1]} : vector<4x64x16xbf16> to vector<1x64x16xbf16>
    %332 = vector.shape_cast %331 : vector<1x64x16xbf16> to vector<64x16xbf16>
    %cst_150 = arith.constant dense<0.000000e+00> : vector<65x16xf32>
    %333 = tpu.matmul %292, %332, %cst_150 {dimension_numbers = #tpu.dot_dimension_numbers<[1], [0], [0], [1], [0, 0, 1, 1], [], []>} : vector<65x64xbf16>, vector<64x16xbf16>, vector<65x16xf32> -> vector<65x16xf32>
    %334 = vector.extract_strided_slice %300 {offsets = [1, 0, 0], sizes = [1, 1, 16], strides = [1, 1, 1]} : vector<4x1x16xf32> to vector<1x1x16xf32>
    %335 = vector.shape_cast %334 : vector<1x1x16xf32> to vector<1x16xf32>
    %336 = vector.broadcast %335 : vector<1x16xf32> to vector<65x16xf32>
    %337 = arith.addf %333, %336 : vector<65x16xf32>
    %338 = vector.extract_strided_slice %296 {offsets = [1, 0, 0], sizes = [1, 64, 16], strides = [1, 1, 1]} : vector<4x64x16xbf16> to vector<1x64x16xbf16>
    %339 = vector.shape_cast %338 : vector<1x64x16xbf16> to vector<64x16xbf16>
    %cst_151 = arith.constant dense<0.000000e+00> : vector<65x16xf32>
    %340 = tpu.matmul %292, %339, %cst_151 {dimension_numbers = #tpu.dot_dimension_numbers<[1], [0], [0], [1], [0, 0, 1, 1], [], []>} : vector<65x64xbf16>, vector<64x16xbf16>, vector<65x16xf32> -> vector<65x16xf32>
    %341 = vector.extract_strided_slice %302 {offsets = [1, 0, 0], sizes = [1, 1, 16], strides = [1, 1, 1]} : vector<4x1x16xf32> to vector<1x1x16xf32>
    %342 = vector.shape_cast %341 : vector<1x1x16xf32> to vector<1x16xf32>
    %343 = vector.broadcast %342 : vector<1x16xf32> to vector<65x16xf32>
    %344 = arith.addf %340, %343 : vector<65x16xf32>
    %345 = vector.extract_strided_slice %298 {offsets = [1, 0, 0], sizes = [1, 64, 16], strides = [1, 1, 1]} : vector<4x64x16xbf16> to vector<1x64x16xbf16>
    %346 = vector.shape_cast %345 : vector<1x64x16xbf16> to vector<64x16xbf16>
    %cst_152 = arith.constant dense<0.000000e+00> : vector<65x16xf32>
    %347 = tpu.matmul %292, %346, %cst_152 {dimension_numbers = #tpu.dot_dimension_numbers<[1], [0], [0], [1], [0, 0, 1, 1], [], []>} : vector<65x64xbf16>, vector<64x16xbf16>, vector<65x16xf32> -> vector<65x16xf32>
    %348 = vector.extract_strided_slice %304 {offsets = [1, 0, 0], sizes = [1, 1, 16], strides = [1, 1, 1]} : vector<4x1x16xf32> to vector<1x1x16xf32>
    %349 = vector.shape_cast %348 : vector<1x1x16xf32> to vector<1x16xf32>
    %350 = vector.broadcast %349 : vector<1x16xf32> to vector<65x16xf32>
    %351 = arith.addf %347, %350 : vector<65x16xf32>
    %352 = arith.truncf %337 : vector<65x16xf32> to vector<65x16xbf16>
    %353 = arith.truncf %344 : vector<65x16xf32> to vector<65x16xbf16>
    %cst_153 = arith.constant dense<0.000000e+00> : vector<65x65xf32>
    %354 = tpu.matmul %352, %353, %cst_153 {dimension_numbers = #tpu.dot_dimension_numbers<[1], [1], [0], [0], [0, 0, 1, 0], [], []>} : vector<65x16xbf16>, vector<65x16xbf16>, vector<65x65xf32> -> vector<65x65xf32>
    %355 = vector.extract_strided_slice %294 {offsets = [2, 0, 0], sizes = [1, 64, 16], strides = [1, 1, 1]} : vector<4x64x16xbf16> to vector<1x64x16xbf16>
    %356 = vector.shape_cast %355 : vector<1x64x16xbf16> to vector<64x16xbf16>
    %cst_154 = arith.constant dense<0.000000e+00> : vector<65x16xf32>
    %357 = tpu.matmul %292, %356, %cst_154 {dimension_numbers = #tpu.dot_dimension_numbers<[1], [0], [0], [1], [0, 0, 1, 1], [], []>} : vector<65x64xbf16>, vector<64x16xbf16>, vector<65x16xf32> -> vector<65x16xf32>
    %358 = vector.extract_strided_slice %300 {offsets = [2, 0, 0], sizes = [1, 1, 16], strides = [1, 1, 1]} : vector<4x1x16xf32> to vector<1x1x16xf32>
    %359 = vector.shape_cast %358 : vector<1x1x16xf32> to vector<1x16xf32>
    %360 = vector.broadcast %359 : vector<1x16xf32> to vector<65x16xf32>
    %361 = arith.addf %357, %360 : vector<65x16xf32>
    %362 = vector.extract_strided_slice %296 {offsets = [2, 0, 0], sizes = [1, 64, 16], strides = [1, 1, 1]} : vector<4x64x16xbf16> to vector<1x64x16xbf16>
    %363 = vector.shape_cast %362 : vector<1x64x16xbf16> to vector<64x16xbf16>
    %cst_155 = arith.constant dense<0.000000e+00> : vector<65x16xf32>
    %364 = tpu.matmul %292, %363, %cst_155 {dimension_numbers = #tpu.dot_dimension_numbers<[1], [0], [0], [1], [0, 0, 1, 1], [], []>} : vector<65x64xbf16>, vector<64x16xbf16>, vector<65x16xf32> -> vector<65x16xf32>
    %365 = vector.extract_strided_slice %302 {offsets = [2, 0, 0], sizes = [1, 1, 16], strides = [1, 1, 1]} : vector<4x1x16xf32> to vector<1x1x16xf32>
    %366 = vector.shape_cast %365 : vector<1x1x16xf32> to vector<1x16xf32>
    %367 = vector.broadcast %366 : vector<1x16xf32> to vector<65x16xf32>
    %368 = arith.addf %364, %367 : vector<65x16xf32>
    %369 = vector.extract_strided_slice %298 {offsets = [2, 0, 0], sizes = [1, 64, 16], strides = [1, 1, 1]} : vector<4x64x16xbf16> to vector<1x64x16xbf16>
    %370 = vector.shape_cast %369 : vector<1x64x16xbf16> to vector<64x16xbf16>
    %cst_156 = arith.constant dense<0.000000e+00> : vector<65x16xf32>
    %371 = tpu.matmul %292, %370, %cst_156 {dimension_numbers = #tpu.dot_dimension_numbers<[1], [0], [0], [1], [0, 0, 1, 1], [], []>} : vector<65x64xbf16>, vector<64x16xbf16>, vector<65x16xf32> -> vector<65x16xf32>
    %372 = vector.extract_strided_slice %304 {offsets = [2, 0, 0], sizes = [1, 1, 16], strides = [1, 1, 1]} : vector<4x1x16xf32> to vector<1x1x16xf32>
    %373 = vector.shape_cast %372 : vector<1x1x16xf32> to vector<1x16xf32>
    %374 = vector.broadcast %373 : vector<1x16xf32> to vector<65x16xf32>
    %375 = arith.addf %371, %374 : vector<65x16xf32>
    %376 = arith.truncf %361 : vector<65x16xf32> to vector<65x16xbf16>
    %377 = arith.truncf %368 : vector<65x16xf32> to vector<65x16xbf16>
    %cst_157 = arith.constant dense<0.000000e+00> : vector<65x65xf32>
    %378 = tpu.matmul %376, %377, %cst_157 {dimension_numbers = #tpu.dot_dimension_numbers<[1], [1], [0], [0], [0, 0, 1, 0], [], []>} : vector<65x16xbf16>, vector<65x16xbf16>, vector<65x65xf32> -> vector<65x65xf32>
    %379 = vector.extract_strided_slice %294 {offsets = [3, 0, 0], sizes = [1, 64, 16], strides = [1, 1, 1]} : vector<4x64x16xbf16> to vector<1x64x16xbf16>
    %380 = vector.shape_cast %379 : vector<1x64x16xbf16> to vector<64x16xbf16>
    %cst_158 = arith.constant dense<0.000000e+00> : vector<65x16xf32>
    %381 = tpu.matmul %292, %380, %cst_158 {dimension_numbers = #tpu.dot_dimension_numbers<[1], [0], [0], [1], [0, 0, 1, 1], [], []>} : vector<65x64xbf16>, vector<64x16xbf16>, vector<65x16xf32> -> vector<65x16xf32>
    %382 = vector.extract_strided_slice %300 {offsets = [3, 0, 0], sizes = [1, 1, 16], strides = [1, 1, 1]} : vector<4x1x16xf32> to vector<1x1x16xf32>
    %383 = vector.shape_cast %382 : vector<1x1x16xf32> to vector<1x16xf32>
    %384 = vector.broadcast %383 : vector<1x16xf32> to vector<65x16xf32>
    %385 = arith.addf %381, %384 : vector<65x16xf32>
    %386 = vector.extract_strided_slice %296 {offsets = [3, 0, 0], sizes = [1, 64, 16], strides = [1, 1, 1]} : vector<4x64x16xbf16> to vector<1x64x16xbf16>
    %387 = vector.shape_cast %386 : vector<1x64x16xbf16> to vector<64x16xbf16>
    %cst_159 = arith.constant dense<0.000000e+00> : vector<65x16xf32>
    %388 = tpu.matmul %292, %387, %cst_159 {dimension_numbers = #tpu.dot_dimension_numbers<[1], [0], [0], [1], [0, 0, 1, 1], [], []>} : vector<65x64xbf16>, vector<64x16xbf16>, vector<65x16xf32> -> vector<65x16xf32>
    %389 = vector.extract_strided_slice %302 {offsets = [3, 0, 0], sizes = [1, 1, 16], strides = [1, 1, 1]} : vector<4x1x16xf32> to vector<1x1x16xf32>
    %390 = vector.shape_cast %389 : vector<1x1x16xf32> to vector<1x16xf32>
    %391 = vector.broadcast %390 : vector<1x16xf32> to vector<65x16xf32>
    %392 = arith.addf %388, %391 : vector<65x16xf32>
    %393 = vector.extract_strided_slice %298 {offsets = [3, 0, 0], sizes = [1, 64, 16], strides = [1, 1, 1]} : vector<4x64x16xbf16> to vector<1x64x16xbf16>
    %394 = vector.shape_cast %393 : vector<1x64x16xbf16> to vector<64x16xbf16>
    %cst_160 = arith.constant dense<0.000000e+00> : vector<65x16xf32>
    %395 = tpu.matmul %292, %394, %cst_160 {dimension_numbers = #tpu.dot_dimension_numbers<[1], [0], [0], [1], [0, 0, 1, 1], [], []>} : vector<65x64xbf16>, vector<64x16xbf16>, vector<65x16xf32> -> vector<65x16xf32>
    %396 = vector.extract_strided_slice %304 {offsets = [3, 0, 0], sizes = [1, 1, 16], strides = [1, 1, 1]} : vector<4x1x16xf32> to vector<1x1x16xf32>
    %397 = vector.shape_cast %396 : vector<1x1x16xf32> to vector<1x16xf32>
    %398 = vector.broadcast %397 : vector<1x16xf32> to vector<65x16xf32>
    %399 = arith.addf %395, %398 : vector<65x16xf32>
    %400 = arith.truncf %385 : vector<65x16xf32> to vector<65x16xbf16>
    %401 = arith.truncf %392 : vector<65x16xf32> to vector<65x16xbf16>
    %cst_161 = arith.constant dense<0.000000e+00> : vector<65x65xf32>
    %402 = tpu.matmul %400, %401, %cst_161 {dimension_numbers = #tpu.dot_dimension_numbers<[1], [1], [0], [0], [0, 0, 1, 0], [], []>} : vector<65x16xbf16>, vector<65x16xbf16>, vector<65x65xf32> -> vector<65x65xf32>
    %403 = vector.shape_cast %330 : vector<65x65xf32> to vector<1x65x65xf32>
    %404 = vector.shape_cast %354 : vector<65x65xf32> to vector<1x65x65xf32>
    %405 = vector.shape_cast %378 : vector<65x65xf32> to vector<1x65x65xf32>
    %406 = vector.shape_cast %402 : vector<65x65xf32> to vector<1x65x65xf32>
    %407 = tpu.concatenate %403, %404, %405, %406 in 0 : vector<1x65x65xf32>, vector<1x65x65xf32>, vector<1x65x65xf32>, vector<1x65x65xf32> -> vector<4x65x65xf32>
    %cst_162 = arith.constant dense<0xFF800000> : vector<4x65xf32>
    %408 = vector.multi_reduction <maximumf>, %407, %cst_162 [2] : vector<4x65x65xf32> to vector<4x65xf32>
    %409 = vector.shape_cast %408 : vector<4x65xf32> to vector<4x65x1xf32>
    %410 = vector.broadcast %409 : vector<4x65x1xf32> to vector<4x65x65xf32>
    %411 = arith.subf %407, %410 : vector<4x65x65xf32>
    %412 = math.exp %411 : vector<4x65x65xf32>
    %cst_163 = arith.constant dense<0.000000e+00> : vector<4x65xf32>
    %413 = vector.multi_reduction <add>, %412, %cst_163 [2] : vector<4x65x65xf32> to vector<4x65xf32>
    %414 = vector.shape_cast %413 : vector<4x65xf32> to vector<4x65x1xf32>
    %415 = tpu.reciprocal %414 {approx = true} : vector<4x65x1xf32> -> vector<4x65x1xf32>
    %416 = vector.broadcast %415 : vector<4x65x1xf32> to vector<4x65x65xf32>
    %417 = arith.mulf %412, %416 : vector<4x65x65xf32>
    %cst_164 = arith.constant 0.000000e+00 : f32
    %418 = vector.broadcast %cst_164 : f32 to vector<65x64xf32>
    %419 = vector.extract_strided_slice %417 {offsets = [0, 0, 0], sizes = [1, 65, 65], strides = [1, 1, 1]} : vector<4x65x65xf32> to vector<1x65x65xf32>
    %420 = vector.shape_cast %419 : vector<1x65x65xf32> to vector<65x65xf32>
    %421 = arith.truncf %420 : vector<65x65xf32> to vector<65x65xbf16>
    %422 = arith.truncf %327 : vector<65x16xf32> to vector<65x16xbf16>
    %cst_165 = arith.constant dense<0.000000e+00> : vector<65x16xf32>
    %423 = tpu.matmul %421, %422, %cst_165 {dimension_numbers = #tpu.dot_dimension_numbers<[1], [0], [0], [1], [0, 0, 1, 1], [], []>} : vector<65x65xbf16>, vector<65x16xbf16>, vector<65x16xf32> -> vector<65x16xf32>
    %424 = vector.extract_strided_slice %306 {offsets = [0, 0, 0], sizes = [1, 16, 64], strides = [1, 1, 1]} : vector<4x16x64xbf16> to vector<1x16x64xbf16>
    %425 = vector.shape_cast %424 : vector<1x16x64xbf16> to vector<16x64xbf16>
    %426 = arith.truncf %423 : vector<65x16xf32> to vector<65x16xbf16>
    %cst_166 = arith.constant dense<0.000000e+00> : vector<65x64xf32>
    %427 = tpu.matmul %426, %425, %cst_166 {dimension_numbers = #tpu.dot_dimension_numbers<[1], [0], [0], [1], [0, 0, 1, 1], [], []>} : vector<65x16xbf16>, vector<16x64xbf16>, vector<65x64xf32> -> vector<65x64xf32>
    %428 = arith.addf %418, %427 : vector<65x64xf32>
    %429 = vector.extract_strided_slice %417 {offsets = [1, 0, 0], sizes = [1, 65, 65], strides = [1, 1, 1]} : vector<4x65x65xf32> to vector<1x65x65xf32>
    %430 = vector.shape_cast %429 : vector<1x65x65xf32> to vector<65x65xf32>
    %431 = arith.truncf %430 : vector<65x65xf32> to vector<65x65xbf16>
    %432 = arith.truncf %351 : vector<65x16xf32> to vector<65x16xbf16>
    %cst_167 = arith.constant dense<0.000000e+00> : vector<65x16xf32>
    %433 = tpu.matmul %431, %432, %cst_167 {dimension_numbers = #tpu.dot_dimension_numbers<[1], [0], [0], [1], [0, 0, 1, 1], [], []>} : vector<65x65xbf16>, vector<65x16xbf16>, vector<65x16xf32> -> vector<65x16xf32>
    %434 = vector.extract_strided_slice %306 {offsets = [1, 0, 0], sizes = [1, 16, 64], strides = [1, 1, 1]} : vector<4x16x64xbf16> to vector<1x16x64xbf16>
    %435 = vector.shape_cast %434 : vector<1x16x64xbf16> to vector<16x64xbf16>
    %436 = arith.truncf %433 : vector<65x16xf32> to vector<65x16xbf16>
    %cst_168 = arith.constant dense<0.000000e+00> : vector<65x64xf32>
    %437 = tpu.matmul %436, %435, %cst_168 {dimension_numbers = #tpu.dot_dimension_numbers<[1], [0], [0], [1], [0, 0, 1, 1], [], []>} : vector<65x16xbf16>, vector<16x64xbf16>, vector<65x64xf32> -> vector<65x64xf32>
    %438 = arith.addf %428, %437 : vector<65x64xf32>
    %439 = vector.extract_strided_slice %417 {offsets = [2, 0, 0], sizes = [1, 65, 65], strides = [1, 1, 1]} : vector<4x65x65xf32> to vector<1x65x65xf32>
    %440 = vector.shape_cast %439 : vector<1x65x65xf32> to vector<65x65xf32>
    %441 = arith.truncf %440 : vector<65x65xf32> to vector<65x65xbf16>
    %442 = arith.truncf %375 : vector<65x16xf32> to vector<65x16xbf16>
    %cst_169 = arith.constant dense<0.000000e+00> : vector<65x16xf32>
    %443 = tpu.matmul %441, %442, %cst_169 {dimension_numbers = #tpu.dot_dimension_numbers<[1], [0], [0], [1], [0, 0, 1, 1], [], []>} : vector<65x65xbf16>, vector<65x16xbf16>, vector<65x16xf32> -> vector<65x16xf32>
    %444 = vector.extract_strided_slice %306 {offsets = [2, 0, 0], sizes = [1, 16, 64], strides = [1, 1, 1]} : vector<4x16x64xbf16> to vector<1x16x64xbf16>
    %445 = vector.shape_cast %444 : vector<1x16x64xbf16> to vector<16x64xbf16>
    %446 = arith.truncf %443 : vector<65x16xf32> to vector<65x16xbf16>
    %cst_170 = arith.constant dense<0.000000e+00> : vector<65x64xf32>
    %447 = tpu.matmul %446, %445, %cst_170 {dimension_numbers = #tpu.dot_dimension_numbers<[1], [0], [0], [1], [0, 0, 1, 1], [], []>} : vector<65x16xbf16>, vector<16x64xbf16>, vector<65x64xf32> -> vector<65x64xf32>
    %448 = arith.addf %438, %447 : vector<65x64xf32>
    %449 = vector.extract_strided_slice %417 {offsets = [3, 0, 0], sizes = [1, 65, 65], strides = [1, 1, 1]} : vector<4x65x65xf32> to vector<1x65x65xf32>
    %450 = vector.shape_cast %449 : vector<1x65x65xf32> to vector<65x65xf32>
    %451 = arith.truncf %450 : vector<65x65xf32> to vector<65x65xbf16>
    %452 = arith.truncf %399 : vector<65x16xf32> to vector<65x16xbf16>
    %cst_171 = arith.constant dense<0.000000e+00> : vector<65x16xf32>
    %453 = tpu.matmul %451, %452, %cst_171 {dimension_numbers = #tpu.dot_dimension_numbers<[1], [0], [0], [1], [0, 0, 1, 1], [], []>} : vector<65x65xbf16>, vector<65x16xbf16>, vector<65x16xf32> -> vector<65x16xf32>
    %454 = vector.extract_strided_slice %306 {offsets = [3, 0, 0], sizes = [1, 16, 64], strides = [1, 1, 1]} : vector<4x16x64xbf16> to vector<1x16x64xbf16>
    %455 = vector.shape_cast %454 : vector<1x16x64xbf16> to vector<16x64xbf16>
    %456 = arith.truncf %453 : vector<65x16xf32> to vector<65x16xbf16>
    %cst_172 = arith.constant dense<0.000000e+00> : vector<65x64xf32>
    %457 = tpu.matmul %456, %455, %cst_172 {dimension_numbers = #tpu.dot_dimension_numbers<[1], [0], [0], [1], [0, 0, 1, 1], [], []>} : vector<65x16xbf16>, vector<16x64xbf16>, vector<65x64xf32> -> vector<65x64xf32>
    %458 = arith.addf %448, %457 : vector<65x64xf32>
    %459 = arith.addf %265, %458 : vector<65x64xf32>
    %c1_173 = arith.constant 1 : index
    %c0_174 = arith.constant 0 : index
    %c0_175 = arith.constant 0 : index
    %460 = vector.load %arg15[%c1_173, %c0_174, %c0_175] : memref<2x1x64xf32, #tpu.memory_space<vmem>>, vector<1x1x64xf32>
    %461 = vector.shape_cast %460 : vector<1x1x64xf32> to vector<1x64xf32>
    %462 = vector.broadcast %461 : vector<1x64xf32> to vector<65x64xf32>
    %463 = arith.addf %459, %462 : vector<65x64xf32>
    %c1_176 = arith.constant 1 : index
    %c0_177 = arith.constant 0 : index
    %c0_178 = arith.constant 0 : index
    %464 = vector.load %arg16[%c1_176, %c0_177, %c0_178] : memref<2x1x64xf32, #tpu.memory_space<vmem>>, vector<1x1x64xf32>
    %465 = vector.shape_cast %464 : vector<1x1x64xf32> to vector<1x64xf32>
    %c1_179 = arith.constant 1 : index
    %c0_180 = arith.constant 0 : index
    %c0_181 = arith.constant 0 : index
    %466 = vector.load %arg17[%c1_179, %c0_180, %c0_181] : memref<2x1x64xf32, #tpu.memory_space<vmem>>, vector<1x1x64xf32>
    %467 = vector.shape_cast %466 : vector<1x1x64xf32> to vector<1x64xf32>
    %cst_182 = arith.constant dense<0.000000e+00> : vector<65xf32>
    %468 = vector.multi_reduction <add>, %463, %cst_182 [1] : vector<65x64xf32> to vector<65xf32>
    %469 = vector.shape_cast %468 : vector<65xf32> to vector<65x1xf32>
    %cst_183 = arith.constant 6.400000e+01 : f32
    %470 = vector.broadcast %cst_183 : f32 to vector<65x1xf32>
    %471 = arith.divf %469, %470 : vector<65x1xf32>
    %472 = vector.broadcast %471 : vector<65x1xf32> to vector<65x64xf32>
    %473 = arith.subf %463, %472 : vector<65x64xf32>
    %474 = arith.mulf %473, %473 : vector<65x64xf32>
    %cst_184 = arith.constant dense<0.000000e+00> : vector<65xf32>
    %475 = vector.multi_reduction <add>, %474, %cst_184 [1] : vector<65x64xf32> to vector<65xf32>
    %476 = vector.shape_cast %475 : vector<65xf32> to vector<65x1xf32>
    %cst_185 = arith.constant 6.400000e+01 : f32
    %477 = vector.broadcast %cst_185 : f32 to vector<65x1xf32>
    %478 = arith.divf %476, %477 : vector<65x1xf32>
    %479 = vector.broadcast %471 : vector<65x1xf32> to vector<65x64xf32>
    %480 = arith.subf %463, %479 : vector<65x64xf32>
    %cst_186 = arith.constant 9.99999974E-6 : f32
    %481 = vector.broadcast %cst_186 : f32 to vector<65x1xf32>
    %482 = arith.addf %478, %481 : vector<65x1xf32>
    %483 = math.rsqrt %482 : vector<65x1xf32>
    %484 = vector.broadcast %483 : vector<65x1xf32> to vector<65x64xf32>
    %485 = arith.mulf %480, %484 : vector<65x64xf32>
    %486 = vector.broadcast %465 : vector<1x64xf32> to vector<65x64xf32>
    %487 = arith.mulf %485, %486 : vector<65x64xf32>
    %488 = vector.broadcast %467 : vector<1x64xf32> to vector<65x64xf32>
    %489 = arith.addf %487, %488 : vector<65x64xf32>
    %c1_187 = arith.constant 1 : index
    %c0_188 = arith.constant 0 : index
    %c0_189 = arith.constant 0 : index
    %490 = vector.load %arg18[%c1_187, %c0_188, %c0_189] : memref<2x64x256xbf16, #tpu.memory_space<vmem>>, vector<1x64x256xbf16>
    %491 = vector.shape_cast %490 : vector<1x64x256xbf16> to vector<64x256xbf16>
    %492 = arith.truncf %489 : vector<65x64xf32> to vector<65x64xbf16>
    %cst_190 = arith.constant dense<0.000000e+00> : vector<65x256xf32>
    %493 = tpu.matmul %492, %491, %cst_190 {dimension_numbers = #tpu.dot_dimension_numbers<[1], [0], [0], [1], [0, 0, 1, 1], [], []>} : vector<65x64xbf16>, vector<64x256xbf16>, vector<65x256xf32> -> vector<65x256xf32>
    %c1_191 = arith.constant 1 : index
    %c0_192 = arith.constant 0 : index
    %c0_193 = arith.constant 0 : index
    %494 = vector.load %arg19[%c1_191, %c0_192, %c0_193] : memref<2x1x256xf32, #tpu.memory_space<vmem>>, vector<1x1x256xf32>
    %495 = vector.shape_cast %494 : vector<1x1x256xf32> to vector<1x256xf32>
    %496 = vector.broadcast %495 : vector<1x256xf32> to vector<65x256xf32>
    %497 = arith.addf %493, %496 : vector<65x256xf32>
    %cst_194 = arith.constant 5.000000e-01 : f32
    %498 = vector.broadcast %cst_194 : f32 to vector<65x256xf32>
    %499 = arith.mulf %498, %497 : vector<65x256xf32>
    %cst_195 = arith.constant 4.471500e-02 : f32
    %500 = vector.broadcast %cst_195 : f32 to vector<65x256xf32>
    %501 = arith.mulf %500, %497 : vector<65x256xf32>
    %502 = arith.mulf %501, %497 : vector<65x256xf32>
    %503 = arith.mulf %502, %497 : vector<65x256xf32>
    %504 = arith.addf %497, %503 : vector<65x256xf32>
    %cst_196 = arith.constant 0.797884583 : f32
    %505 = vector.broadcast %cst_196 : f32 to vector<65x256xf32>
    %506 = arith.mulf %505, %504 : vector<65x256xf32>
    %507 = math.tanh %506 : vector<65x256xf32>
    %cst_197 = arith.constant 1.000000e+00 : f32
    %508 = vector.broadcast %cst_197 : f32 to vector<65x256xf32>
    %509 = arith.addf %508, %507 : vector<65x256xf32>
    %510 = arith.mulf %499, %509 : vector<65x256xf32>
    %c1_198 = arith.constant 1 : index
    %c0_199 = arith.constant 0 : index
    %c0_200 = arith.constant 0 : index
    %511 = vector.load %arg20[%c1_198, %c0_199, %c0_200] : memref<2x256x64xbf16, #tpu.memory_space<vmem>>, vector<1x256x64xbf16>
    %512 = vector.shape_cast %511 : vector<1x256x64xbf16> to vector<256x64xbf16>
    %513 = arith.truncf %510 : vector<65x256xf32> to vector<65x256xbf16>
    %cst_201 = arith.constant dense<0.000000e+00> : vector<65x64xf32>
    %514 = tpu.matmul %513, %512, %cst_201 {dimension_numbers = #tpu.dot_dimension_numbers<[1], [0], [0], [1], [0, 0, 1, 1], [], []>} : vector<65x256xbf16>, vector<256x64xbf16>, vector<65x64xf32> -> vector<65x64xf32>
    %515 = arith.addf %463, %514 : vector<65x64xf32>
    %c1_202 = arith.constant 1 : index
    %c0_203 = arith.constant 0 : index
    %c0_204 = arith.constant 0 : index
    %516 = vector.load %arg21[%c1_202, %c0_203, %c0_204] : memref<2x1x64xf32, #tpu.memory_space<vmem>>, vector<1x1x64xf32>
    %517 = vector.shape_cast %516 : vector<1x1x64xf32> to vector<1x64xf32>
    %518 = vector.broadcast %517 : vector<1x64xf32> to vector<65x64xf32>
    %519 = arith.addf %515, %518 : vector<65x64xf32>
    %520 = vector.extract_strided_slice %519 {offsets = [0, 0], sizes = [1, 64], strides = [1, 1]} : vector<65x64xf32> to vector<1x64xf32>
    %c0_205 = arith.constant 0 : index
    %c0_206 = arith.constant 0 : index
    %521 = vector.load %arg22[%c0_205, %c0_206] : memref<1x64xf32, #tpu.memory_space<vmem>>, vector<1x64xf32>
    %c0_207 = arith.constant 0 : index
    %c0_208 = arith.constant 0 : index
    %522 = vector.load %arg23[%c0_207, %c0_208] : memref<1x64xf32, #tpu.memory_space<vmem>>, vector<1x64xf32>
    %cst_209 = arith.constant dense<0.000000e+00> : vector<1xf32>
    %523 = vector.multi_reduction <add>, %520, %cst_209 [1] : vector<1x64xf32> to vector<1xf32>
    %524 = vector.shape_cast %523 : vector<1xf32> to vector<1x1xf32>
    %cst_210 = arith.constant 6.400000e+01 : f32
    %525 = vector.broadcast %cst_210 : f32 to vector<1x1xf32>
    %526 = arith.divf %524, %525 : vector<1x1xf32>
    %527 = vector.broadcast %526 : vector<1x1xf32> to vector<1x64xf32>
    %528 = arith.subf %520, %527 : vector<1x64xf32>
    %529 = arith.mulf %528, %528 : vector<1x64xf32>
    %cst_211 = arith.constant dense<0.000000e+00> : vector<1xf32>
    %530 = vector.multi_reduction <add>, %529, %cst_211 [1] : vector<1x64xf32> to vector<1xf32>
    %531 = vector.shape_cast %530 : vector<1xf32> to vector<1x1xf32>
    %cst_212 = arith.constant 6.400000e+01 : f32
    %532 = vector.broadcast %cst_212 : f32 to vector<1x1xf32>
    %533 = arith.divf %531, %532 : vector<1x1xf32>
    %534 = vector.broadcast %526 : vector<1x1xf32> to vector<1x64xf32>
    %535 = arith.subf %520, %534 : vector<1x64xf32>
    %cst_213 = arith.constant 9.99999974E-6 : f32
    %536 = vector.broadcast %cst_213 : f32 to vector<1x1xf32>
    %537 = arith.addf %533, %536 : vector<1x1xf32>
    %538 = math.rsqrt %537 : vector<1x1xf32>
    %539 = vector.broadcast %538 : vector<1x1xf32> to vector<1x64xf32>
    %540 = arith.mulf %535, %539 : vector<1x64xf32>
    %541 = arith.mulf %540, %521 : vector<1x64xf32>
    %542 = arith.addf %541, %522 : vector<1x64xf32>
    %c0_214 = arith.constant 0 : index
    %c0_215 = arith.constant 0 : index
    %543 = vector.load %arg24[%c0_214, %c0_215] : memref<64x128xbf16, #tpu.memory_space<vmem>>, vector<64x128xbf16>
    %544 = arith.truncf %542 : vector<1x64xf32> to vector<1x64xbf16>
    %cst_216 = arith.constant dense<0.000000e+00> : vector<1x128xf32>
    %545 = tpu.matmul %544, %543, %cst_216 {dimension_numbers = #tpu.dot_dimension_numbers<[1], [0], [0], [1], [0, 0, 1, 1], [], []>} : vector<1x64xbf16>, vector<64x128xbf16>, vector<1x128xf32> -> vector<1x128xf32>
    %c0_217 = arith.constant 0 : index
    %c0_218 = arith.constant 0 : index
    %546 = vector.load %arg25[%c0_217, %c0_218] : memref<1x128xf32, #tpu.memory_space<vmem>>, vector<1x128xf32>
    %547 = arith.addf %545, %546 : vector<1x128xf32>
    %c0_219 = arith.constant 0 : index
    %c0_220 = arith.constant 0 : index
    %c0_221 = arith.constant 0 : index
    %548 = vector.load %arg26[%c0_219, %c0_220, %c0_221] : memref<1x1x128xf32, #tpu.memory_space<vmem>>, vector<1x1x128xf32>
    %549 = vector.shape_cast %548 : vector<1x1x128xf32> to vector<1x128xf32>
    %550 = vector.shape_cast %547 : vector<1x128xf32> to vector<1x1x128xf32>
    tpu.vector_store %arg26[%c0_219, %c0_220, %c0_221], %550 {strides = array<i32>} : memref<1x1x128xf32, #tpu.memory_space<vmem>>, vector<1x1x128xf32>,
    return
  }
  func.func @transform_0(%arg0: i32) -> (i32, i32, i32) {
    %c0_i32 = arith.constant 0 : i32
    %c0_i32_0 = arith.constant 0 : i32
    %c0_i32_1 = arith.constant 0 : i32
    return %arg0, %c0_i32, %c0_i32_0 : i32, i32, i32
  }
  func.func @transform_1(%arg0: i32) -> (i32, i32) {
    %c0_i32 = arith.constant 0 : i32
    %c0_i32_0 = arith.constant 0 : i32
    %c0_i32_1 = arith.constant 0 : i32
    return %c0_i32, %c0_i32_0 : i32, i32
  }
  func.func @transform_2(%arg0: i32) -> (i32, i32) {
    %c0_i32 = arith.constant 0 : i32
    %c0_i32_0 = arith.constant 0 : i32
    %c0_i32_1 = arith.constant 0 : i32
    return %c0_i32, %c0_i32_0 : i32, i32
  }
  func.func @transform_3(%arg0: i32) -> (i32, i32) {
    %c0_i32 = arith.constant 0 : i32
    %c0_i32_0 = arith.constant 0 : i32
    %c0_i32_1 = arith.constant 0 : i32
    return %c0_i32, %c0_i32_0 : i32, i32
  }
  func.func @transform_4(%arg0: i32) -> (i32, i32) {
    %c0_i32 = arith.constant 0 : i32
    %c0_i32_0 = arith.constant 0 : i32
    %c0_i32_1 = arith.constant 0 : i32
    return %c0_i32, %c0_i32_0 : i32, i32
  }
  func.func @transform_5(%arg0: i32) -> (i32, i32, i32) {
    %c0_i32 = arith.constant 0 : i32
    %c0_i32_0 = arith.constant 0 : i32
    %c0_i32_1 = arith.constant 0 : i32
    %c0_i32_2 = arith.constant 0 : i32
    return %c0_i32, %c0_i32_0, %c0_i32_1 : i32, i32, i32
  }
  func.func @transform_6(%arg0: i32) -> (i32, i32, i32) {
    %c0_i32 = arith.constant 0 : i32
    %c0_i32_0 = arith.constant 0 : i32
    %c0_i32_1 = arith.constant 0 : i32
    %c0_i32_2 = arith.constant 0 : i32
    return %c0_i32, %c0_i32_0, %c0_i32_1 : i32, i32, i32
  }
  func.func @transform_7(%arg0: i32) -> (i32, i32, i32, i32) {
    %c0_i32 = arith.constant 0 : i32
    %c0_i32_0 = arith.constant 0 : i32
    %c0_i32_1 = arith.constant 0 : i32
    %c0_i32_2 = arith.constant 0 : i32
    %c0_i32_3 = arith.constant 0 : i32
    return %c0_i32, %c0_i32_0, %c0_i32_1, %c0_i32_2 : i32, i32, i32, i32
  }
  func.func @transform_8(%arg0: i32) -> (i32, i32, i32, i32) {
    %c0_i32 = arith.constant 0 : i32
    %c0_i32_0 = arith.constant 0 : i32
    %c0_i32_1 = arith.constant 0 : i32
    %c0_i32_2 = arith.constant 0 : i32
    %c0_i32_3 = arith.constant 0 : i32
    return %c0_i32, %c0_i32_0, %c0_i32_1, %c0_i32_2 : i32, i32, i32, i32
  }
  func.func @transform_9(%arg0: i32) -> (i32, i32, i32, i32) {
    %c0_i32 = arith.constant 0 : i32
    %c0_i32_0 = arith.constant 0 : i32
    %c0_i32_1 = arith.constant 0 : i32
    %c0_i32_2 = arith.constant 0 : i32
    %c0_i32_3 = arith.constant 0 : i32
    return %c0_i32, %c0_i32_0, %c0_i32_1, %c0_i32_2 : i32, i32, i32, i32
  }
  func.func @transform_10(%arg0: i32) -> (i32, i32, i32, i32) {
    %c0_i32 = arith.constant 0 : i32
    %c0_i32_0 = arith.constant 0 : i32
    %c0_i32_1 = arith.constant 0 : i32
    %c0_i32_2 = arith.constant 0 : i32
    %c0_i32_3 = arith.constant 0 : i32
    return %c0_i32, %c0_i32_0, %c0_i32_1, %c0_i32_2 : i32, i32, i32, i32
  }
  func.func @transform_11(%arg0: i32) -> (i32, i32, i32, i32) {
    %c0_i32 = arith.constant 0 : i32
    %c0_i32_0 = arith.constant 0 : i32
    %c0_i32_1 = arith.constant 0 : i32
    %c0_i32_2 = arith.constant 0 : i32
    %c0_i32_3 = arith.constant 0 : i32
    return %c0_i32, %c0_i32_0, %c0_i32_1, %c0_i32_2 : i32, i32, i32, i32
  }
  func.func @transform_12(%arg0: i32) -> (i32, i32, i32, i32) {
    %c0_i32 = arith.constant 0 : i32
    %c0_i32_0 = arith.constant 0 : i32
    %c0_i32_1 = arith.constant 0 : i32
    %c0_i32_2 = arith.constant 0 : i32
    %c0_i32_3 = arith.constant 0 : i32
    return %c0_i32, %c0_i32_0, %c0_i32_1, %c0_i32_2 : i32, i32, i32, i32
  }
  func.func @transform_13(%arg0: i32) -> (i32, i32, i32, i32) {
    %c0_i32 = arith.constant 0 : i32
    %c0_i32_0 = arith.constant 0 : i32
    %c0_i32_1 = arith.constant 0 : i32
    %c0_i32_2 = arith.constant 0 : i32
    %c0_i32_3 = arith.constant 0 : i32
    return %c0_i32, %c0_i32_0, %c0_i32_1, %c0_i32_2 : i32, i32, i32, i32
  }
  func.func @transform_14(%arg0: i32) -> (i32, i32, i32) {
    %c0_i32 = arith.constant 0 : i32
    %c0_i32_0 = arith.constant 0 : i32
    %c0_i32_1 = arith.constant 0 : i32
    %c0_i32_2 = arith.constant 0 : i32
    return %c0_i32, %c0_i32_0, %c0_i32_1 : i32, i32, i32
  }
  func.func @transform_15(%arg0: i32) -> (i32, i32, i32) {
    %c0_i32 = arith.constant 0 : i32
    %c0_i32_0 = arith.constant 0 : i32
    %c0_i32_1 = arith.constant 0 : i32
    %c0_i32_2 = arith.constant 0 : i32
    return %c0_i32, %c0_i32_0, %c0_i32_1 : i32, i32, i32
  }
  func.func @transform_16(%arg0: i32) -> (i32, i32, i32) {
    %c0_i32 = arith.constant 0 : i32
    %c0_i32_0 = arith.constant 0 : i32
    %c0_i32_1 = arith.constant 0 : i32
    %c0_i32_2 = arith.constant 0 : i32
    return %c0_i32, %c0_i32_0, %c0_i32_1 : i32, i32, i32
  }
  func.func @transform_17(%arg0: i32) -> (i32, i32, i32) {
    %c0_i32 = arith.constant 0 : i32
    %c0_i32_0 = arith.constant 0 : i32
    %c0_i32_1 = arith.constant 0 : i32
    %c0_i32_2 = arith.constant 0 : i32
    return %c0_i32, %c0_i32_0, %c0_i32_1 : i32, i32, i32
  }
  func.func @transform_18(%arg0: i32) -> (i32, i32, i32) {
    %c0_i32 = arith.constant 0 : i32
    %c0_i32_0 = arith.constant 0 : i32
    %c0_i32_1 = arith.constant 0 : i32
    %c0_i32_2 = arith.constant 0 : i32
    return %c0_i32, %c0_i32_0, %c0_i32_1 : i32, i32, i32
  }
  func.func @transform_19(%arg0: i32) -> (i32, i32, i32) {
    %c0_i32 = arith.constant 0 : i32
    %c0_i32_0 = arith.constant 0 : i32
    %c0_i32_1 = arith.constant 0 : i32
    %c0_i32_2 = arith.constant 0 : i32
    return %c0_i32, %c0_i32_0, %c0_i32_1 : i32, i32, i32
  }
  func.func @transform_20(%arg0: i32) -> (i32, i32, i32) {
    %c0_i32 = arith.constant 0 : i32
    %c0_i32_0 = arith.constant 0 : i32
    %c0_i32_1 = arith.constant 0 : i32
    %c0_i32_2 = arith.constant 0 : i32
    return %c0_i32, %c0_i32_0, %c0_i32_1 : i32, i32, i32
  }
  func.func @transform_21(%arg0: i32) -> (i32, i32) {
    %c0_i32 = arith.constant 0 : i32
    %c0_i32_0 = arith.constant 0 : i32
    %c0_i32_1 = arith.constant 0 : i32
    return %c0_i32, %c0_i32_0 : i32, i32
  }
  func.func @transform_22(%arg0: i32) -> (i32, i32) {
    %c0_i32 = arith.constant 0 : i32
    %c0_i32_0 = arith.constant 0 : i32
    %c0_i32_1 = arith.constant 0 : i32
    return %c0_i32, %c0_i32_0 : i32, i32
  }
  func.func @transform_23(%arg0: i32) -> (i32, i32) {
    %c0_i32 = arith.constant 0 : i32
    %c0_i32_0 = arith.constant 0 : i32
    %c0_i32_1 = arith.constant 0 : i32
    return %c0_i32, %c0_i32_0 : i32, i32
  }
  func.func @transform_24(%arg0: i32) -> (i32, i32) {
    %c0_i32 = arith.constant 0 : i32
    %c0_i32_0 = arith.constant 0 : i32
    %c0_i32_1 = arith.constant 0 : i32
    return %c0_i32, %c0_i32_0 : i32, i32
  }
  func.func @transform_25(%arg0: i32) -> (i32, i32, i32) {
    %c0_i32 = arith.constant 0 : i32
    %c0_i32_0 = arith.constant 0 : i32
    %c0_i32_1 = arith.constant 0 : i32
    return %arg0, %c0_i32, %c0_i32_0 : i32, i32, i32
  }
}

</mosaic_0001>

<bundles_post_ra>
// kernel: vit_forward.1
= control target key start
LH: loop header
LB: loop body
LE: loop exit
PB: predicated region body
PF: predicated region fallthrough
CT: control target
= control target key end

     0   :  { %s16653_s0 = inlined_call_operand.vmem [shape: f32[2,64,12], index: 0, kind: input, shape index: {}]   ;;  %s16654_s1 = inlined_call_operand.vmem [shape: bf16[12,64], index: 1, kind: input, shape index: {}]   ;;  %s16655_s2 = inlined_call_operand.vmem [shape: f32[1,64], index: 2, kind: input, shape index: {}, may-alias: {2,22}]   ;;  %s16656_s3 = inlined_call_operand.vmem [shape: f32[1,64], index: 3, kind: input, shape index: {}]   ;;  %s16657_s4 = inlined_call_operand.vmem [shape: f32[65,64], index: 4, kind: input, shape index: {}]   ;;  %s16658_s5 = inlined_call_operand.vmem [shape: f32[2,1,64], index: 5, kind: input, shape index: {}, may-alias: {5,15}]   ;;  %s16659_s6 = inlined_call_operand.vmem [shape: f32[2,1,64], index: 6, kind: input, shape index: {}, may-alias: {6,14,16,20}]   ;;  %s16660_s7 = inlined_call_operand.vmem [shape: bf16[2,4,64,16], index: 7, kind: input, shape index: {}]   ;;  %s16661_s8 = inlined_call_operand.vmem [shape: f32[2,4,1,16], index: 8, kind: input, shape index: {}, may-alias: {8,10,12}]   ;;  %s16662_s9 = inlined_call_operand.vmem [shape: bf16[2,4,64,16], index: 9, kind: input, shape index: {}]   ;;  %s16663_s10 = inlined_call_operand.vmem [shape: f32[2,4,1,16], index: 10, kind: input, shape index: {}, may-alias: {8,10,12}]   ;;  %s16664_s11 = inlined_call_operand.vmem [shape: bf16[2,4,64,16], index: 11, kind: input, shape index: {}]   ;;  %s16665_s12 = inlined_call_operand.vmem [shape: f32[2,4,1,16], index: 12, kind: input, shape index: {}, may-alias: {8,10,12}]   ;;  %s16666_s13 = inlined_call_operand.vmem [shape: bf16[2,4,16,64], index: 13, kind: input, shape index: {}]   ;;  %s16667_s14 = inlined_call_operand.vmem [shape: f32[2,1,64], index: 14, kind: input, shape index: {}, may-alias: {6,14,16,20}]   ;;  %s16668_s15 = inlined_call_operand.vmem [shape: f32[2,1,64], index: 15, kind: input, shape index: {}, may-alias: {5,15}]   ;;  %s16669_s16 = inlined_call_operand.vmem [shape: f32[2,1,64], index: 16, kind: input, shape index: {}, may-alias: {6,14,16,20}]   ;;  %s16670_s17 = inlined_call_operand.vmem [shape: bf16[2,64,256], index: 17, kind: input, shape index: {}]   ;;  %s16671_s18 = inlined_call_operand.vmem [shape: f32[2,1,256], index: 18, kind: input, shape index: {}]   ;;  %s16672_s19 = inlined_call_operand.vmem [shape: bf16[2,256,64], index: 19, kind: input, shape index: {}]   ;;  %s16673_s20 = inlined_call_operand.vmem [shape: f32[2,1,64], index: 20, kind: input, shape index: {}, may-alias: {6,14,16,20}]   ;;  %s16674_s21 = inlined_call_operand.vmem [shape: f32[1,64], index: 21, kind: input, shape index: {}]   ;;  %s16675_s22 = inlined_call_operand.vmem [shape: f32[1,64], index: 22, kind: input, shape index: {}, may-alias: {2,22}]   ;;  %s16676_s23 = inlined_call_operand.vmem [shape: bf16[64,128], index: 23, kind: input, shape index: {}]   ;;  %s16677_s24 = inlined_call_operand.vmem [shape: f32[1,128], index: 24, kind: input, shape index: {}]   ;;  %s16678_s25 = inlined_call_operand.hbm [shape: f32[2,1,128], index: 25, kind: output, shape index: {}]  }
   0x1   :  { %16781 = sst [smem:[#allocation53_spill]] %s16653_s0 }
   0x2   :  { %16782 = sst [smem:[#allocation54_spill]] %s16654_s1 }
   0x3   :  { %16783 = sst [smem:[#allocation55_spill]] %s16655_s2 }
   0x4   :  { %16784 = sst [smem:[#allocation56_spill]] %s16656_s3 }
   0x5   :  { %16785 = sst [smem:[#allocation57_spill]] %s16657_s4 }
   0x6   :  { %16786 = sst [smem:[#allocation58_spill]] %s16658_s5 }
   0x7   :  { %16787 = sst [smem:[#allocation59_spill]] %s16659_s6 }
   0x8   :  { %16788 = sst [smem:[#allocation60_spill]] %s16660_s7 }
   0x9   :  { %16789 = sst [smem:[#allocation61_spill]] %s16661_s8 }
   0xa   :  { %16790 = sst [smem:[#allocation62_spill]] %s16662_s9 }
   0xb   :  { %16791 = sst [smem:[#allocation63_spill]] %s16677_s24 }
   0xc   :  { %16792 = sst [smem:[#allocation64_spill]] %s16678_s25 }
   0xd   :  { %30 = vsyncpa [#allocation3], 0 }
   0xe   :  { %32 = vsyncpa [#allocation3 + $0x1], 0  ;;  %s12221_s29 = smov 0   ;;  %s12223_s2 = smov 0  }
   0xf   :  { %s12225_s6 = smov 0   ;;  %s12227_s30 = smov 0  }
  0x10 LB: > { %16793 = sst [smem:[#allocation5_spill]] %s12073_s29  ;;  %s12242_s7 = sadd.s32 4294967295, %s12085_s30   ;;  %s12085_s30 = sphi %s12227_s30, %s17033_s30   ;;  %s12081_s6 = sphi %s12225_s6, %s17035_s6   ;;  %s12077_s2 = sphi %s12223_s2, %s17037_s2   ;;  %s12073_s29 = sphi %s12221_s29, %s17036_s29  }
  0x11   : > { %16794 = sst [smem:[#allocation6_spill]] %s12081_s6  ;;  %s8877_s3 = sadd.s32 4294967294, %s12085_s30  }
  0x12   : > { %16795 = sst [smem:[#allocation7_spill]] %s12085_s30  ;;  %s12246_s26 = sadd.s32 1, %s12085_s30  }
  0x13   : > { %16796 = sst [smem:[#allocation8_spill]] %s12246_s26  ;;  %s575_s1 = sadd.s32 1, %s12081_s6 }
  0x14   : > { %s572_s8 = ssub.s32 %s12085_s30, %s12246_s26  ;;  %p585_p0 = scmp.ne.s32.totalorder %s12081_s6, %s12077_s2 }
  0x15   : > { %p573_p1 = scmp.eq.s32.totalorder %s572_s8, 0  ;;  %p586_p2 = scmp.eq.s32.totalorder %s12242_s7, 1 }
  0x16   : > { %p591_p3 = scmp.ne.s32.totalorder %s12077_s2, %s12073_s29  ;;  %p592_p4 = scmp.eq.s32.totalorder %s8877_s3, 1 }
  0x17   : > { %s12257_s27 = scalar_select %p573_p1, %s12081_s6, %s575_s1  }
  0x18   : > { %p12259_p5 = por %p586_p2, %p585_p0  ;;  %p12263_p6 = por %p592_p4, %p591_p3 }
  0x19   : > { %16797 = sst [smem:[#allocation9_spill]] %s12257_s27  ;;  %p8880_p7 = scmp.ge.s32.totalorder %s12085_s30, 1 }
  0x1a   : > { %s16798_s4 = scalar_select %p12259_p5, 1, 0 }
  0x1b   : > { %s16800_s28 = scalar_select %p12263_p6, 1, 0 }
  0x1c   : > { %16799 = sst [smem:[#allocation10_spill]] %s16798_s4  ;;  %p690_p8 = scmp.lt.s32.totalorder %s12085_s30, 3 }
  0x1d   : > { %16801 = sst [smem:[#allocation11_spill]] %s16800_s28 }
  0x1e   : > { %p691_p9 = pnand %p8880_p7, %p690_p8 }
  0x20   : > { %694 = sbr.rel (%p691_p9) target bundleno = 7107 (0x1bc3), region = 120 }
  0x25   : > { %s16802_s0 = sld [smem:[#allocation54_spill]]  ;;  %vm802_vm0 = vcmask 1045504   ;;  %p757_p10 = scmp.lt.s32.totalorder %s12242_s7, 1  ;;  %vm789_vm1 = vcmask 97280   ;;  %vm880_vm2 = vcmask 1040384   ;;  %vm926_vm3 = vcmask 523264  }
  0x26   : > { %s16803_s6 = sld [smem:[#allocation53_spill]]  ;;  %vm951_vm4 = vcmask 516096   ;;  %vm12088_vm5 = vmmov 0   ;;  %vm1528_vm6 = vcmask 130048   ;;  %vm2885_vm7 = vcmask 531456  }
  0x27   : > { %s758_s3 = scalar_select %p757_p10, %s12242_s7, 1  ;;  %vm2910_vm8 = vcmask 524288  }
  0x28   : > { %s16804_s9 = sld [smem:[#allocation55_spill]] }
  0x29   : > { %s9498_s1 = sshll.u32 %s758_s3, 6  ;;  %s16805_s3 = sld [smem:[#allocation56_spill]] }
  0x2a   : > { %s16806_s8 = sld [smem:[#allocation57_spill]] }
  0x2b   : > { %v11418_v0 = vld [vmem:[%s16802_s0] sm:$0x3f]   ;;  %s16818_s5 = sld [smem:[#allocation58_spill]] }
  0x2c   : > { %11375 = vmatprep.subr.msk.bf16.mxu0 %vm802_vm0, %v11418_v0  ;;  %v804_v1 = vsel %vm802_vm0, %v11418_v0, 0  ;;  %s761_s26 = scalar_lea.vmem %s16803_s6, %s9498_s1  ;;  %s16819_s1 = sld [smem:[#allocation59_spill]] }
  0x2d   : > { %10026 = vmatpush3.bf16.msra.mxu0 %v804_v1  ;;  %v763_v2 = vld [vmem:[%s761_s26] sm:$0xff]  ;;  %v764_v3 = vld [vmem:[%s761_s26 + $0x8] sm:$0xff]  ;;  %v765_v4 = vld [vmem:[%s761_s26 + $0x10] sm:$0xff]  ;;  %s16820_s27 = sld [smem:[#allocation61_spill]] }
  0x2e   : > { %v773_v5 = vpack.c.bf16 %v764_v3, %v763_v2  ;;  %v766_v6 = vld [vmem:[%s761_s26 + $0x18] sm:$0xff]  ;;  %v767_v7 = vld [vmem:[%s761_s26 + $0x20] sm:$0xff]  ;;  %v768_v8 = vld [vmem:[%s761_s26 + $0x28] sm:$0xff]  ;;  %s17028_s0 = sld [smem:[#allocation63_spill]] }
  0x2f   : > { %v774_v9 = vpack.c.bf16 %v766_v6, %v765_v4  ;;  %v775_v10 = vpack.c.bf16 %v768_v8, %v767_v7  ;;  %v769_v11 = vld [vmem:[%s761_s26 + $0x30] sm:$0xff]  ;;  %v770_v12 = vld [vmem:[%s761_s26 + $0x38] sm:$0xff]  ;;  %v8883_v15 = vld [vmem:[%s16804_s9] ss:$0 sm:$0xff]  ;;  %s16816_s9 = sld [smem:[#allocation60_spill]]  ;;  %s9495_s26 = sshll.u32 %s12242_s7, 4 }
  0x30   : > { %10027 = vmatprep.mubr.msk.bf16.mxu0 %vm789_vm1, %v773_v5  ;;  %v776_v13 = vpack.c.bf16 %v770_v12, %v769_v11  ;;  %v871_v20 = vld [vmem:[%s16805_s3] sm:$0x1]  ;;  %v908_v32 = vld [vmem:[%s16806_s8 + $0x10] sm:$0xff]  ;;  %v907_v33 = vld [vmem:[%s16806_s8 + $0x8] sm:$0xff]  ;;  %s16817_s3 = sld [smem:[#allocation62_spill]]  ;;  %s12090_s7 = smov [#allocation2]  }
  0x31   : > { %10028 = vmatmul.mubr.msk.bf16.vlgmr.msra.gmra.mxu0 %vm789_vm1, %v774_v9  ;;  %v906_v23 = vld [vmem:[%s16806_s8] sm:$0xff]  ;;  %v909_v41 = vld [vmem:[%s16806_s8 + $0x18] sm:$0xff]  ;;  %v911_v58 = vld [vmem:[%s16806_s8 + $0x28] sm:$0xff]  ;;  %s17029_s25 = sld [smem:[#allocation64_spill]] }
  0x32   : > { %10031 = vmatprep.mubr.msk.bf16.mxu0 %vm789_vm1, %v775_v10  ;;  %v910_v47 = vld [vmem:[%s16806_s8 + $0x20] sm:$0xff]  ;;  %v912_v59 = vld [vmem:[%s16806_s8 + $0x30] sm:$0xff]  ;;  %v913_v2 = vld [vmem:[%s16806_s8 + $0x38] sm:$0xff] }
  0x33   : > { %v914_v63 = vld [vmem:[%s16806_s8 + $0x40] sm:$0x1]  ;;  %s755_s8 = sand.u32 1, %s12077_s2  }
  0x34   : > { %s8810_s24 = scalar_lea.sflag [#allocation3], %s755_s8 }
  0x37   : > { %s16612_s30 = scalar_lea.hbm %s17029_s25, %s9495_s26 }
  0x39   : > { %10032 = vmatmul.mubr.msk.bf16.gmra.mxu0 %vm789_vm1, %v776_v13 }
  0xf1   : > { %v10029_v14 = vpop.f32.mrf.mxu0 }
  0xf2   : > { %v849_v18 = vadd.f32 %v10029_v14, %v8883_v15 }
  0xf3   : > { %v840_v16 = vpop.f32.mrf.mxu0 }
  0xf4   : > { %v841_v17 = vadd.f32 %v8883_v15, %v840_v16  ;;  %v884_v28 = vrot.slane %v849_v18, 7 }
  0xf5   : > { %v10030_v19 = vpop.f32.mrf.mxu0 }
  0xf6   : > { %v881_v21 = vrot.slane %v841_v17, 7  ;;  %v852_v22 = vadd.f32 %v10030_v19, %v8883_v15 }
  0xf7   : > { %v843_v24 = vpop.f32.mrf.mxu0 }
  0xf8   : > { %v886_v25 = vrot.slane %v852_v22, 7  ;;  %v844_v26 = vadd.f32 %v8883_v15, %v843_v24  ;;  %v905_v27 = vsel %vm880_vm2, %v871_v20, %v881_v21 }
  0xf9   : > { %v10033_v29 = vpop.f32.mrf.mxu0  ;;  %v12287_v30 = vadd.f32 %v906_v23, %v905_v27 }
  0xfa   : > { %v882_v31 = vrot.slane %v844_v26, 7  ;;  %v887_v34 = vsel %vm880_vm2, %v884_v28, %v886_v25  ;;  %v865_v37 = vadd.f32 %v10033_v29, %v8883_v15 }
  0xfb   : > { %16807 = vst [vmem:[#allocation12_spill] sm:$0xff] %v12287_v30  ;;  %v856_v35 = vpop.f32.mrf.mxu0  ;;  %v927_v36 = vsel %vm926_vm3, %v12287_v30, 0.0  ;;  %v12314_v51 = vadd.f32 %v909_v41, %v887_v34 }
  0xfc   : > { %v857_v38 = vadd.f32 %v8883_v15, %v856_v35  ;;  %928 = vadd.xlane.f32.xlu0 %v927_v36  ;;  %v885_v39 = vsel %vm880_vm2, %v882_v31, %v884_v28  ;;  %v883_v40 = vsel %vm880_vm2, %v881_v21, %v882_v31  ;;  %v892_v52 = vrot.slane %v865_v37, 7 }
  0xfd   : > { %v10034_v42 = vpop.f32.mrf.mxu0  ;;  %v12303_v43 = vadd.f32 %v908_v32, %v885_v39  ;;  %v12305_v44 = vadd.f32 %v907_v33, %v883_v40  ;;  %16810 = vst [vmem:[#allocation15_spill] sm:$0xff] %v12314_v51  ;;  %v936_v60 = vsel %vm926_vm3, %v12314_v51, 0.0 }
  0xfe   : > { %v888_v45 = vrot.slane %v857_v38, 7  ;;  %v868_v46 = vadd.f32 %v10034_v42, %v8883_v15 }
  0xff   : > { %16808 = vst [vmem:[#allocation13_spill] sm:$0xff] %v12303_v43  ;;  %16809 = vst [vmem:[#allocation14_spill] sm:$0xff] %v12305_v44  ;;  %v859_v48 = vpop.f32.mrf.mxu0  ;;  %v933_v49 = vsel %vm926_vm3, %v12303_v43, 0.0  ;;  %v930_v50 = vsel %vm926_vm3, %v12305_v44, 0.0 }
 0x100   : > { %v889_v53 = vsel %vm880_vm2, %v886_v25, %v888_v45  ;;  %v894_v54 = vrot.slane %v868_v46, 7  ;;  %v860_v55 = vadd.f32 %v8883_v15, %v859_v48  ;;  %934 = vadd.xlane.f32.xlu1 %v933_v49  ;;  %931 = vadd.xlane.f32.xlu0 %v930_v50 }
 0x101   : > { %v12317_v56 = vadd.f32 %v910_v47, %v889_v53 }
 0x102   : > { %v890_v57 = vrot.slane %v860_v55, 7  ;;  %v895_v62 = vsel %vm880_vm2, %v892_v52, %v894_v54  ;;  %v12342_v5 = vadd.f32 %v914_v63, %v894_v54  ;;  %v16693_v63 = vmov 0.0  }
 0x103   : > { %16811 = vst [vmem:[#allocation16_spill] sm:$0xff] %v12317_v56  ;;  %v939_v61 = vsel %vm926_vm3, %v12317_v56, 0.0  ;;  %v12348_v8 = vadd.f32 %v913_v2, %v895_v62  ;;  %v11420_v62 = vld [vmem:[%s16817_s3 + $0x18] sm:$0xff]   ;;  %10035 = vmatprep.subr.bf16.mxu1 %v16693_v63  ;;  %10063 = vmatprep.subr.bf16.mxu0 %v16693_v63  ;;  %v11423_v2 = vld [vmem:[%s16816_s9 + $0x8] sm:$0xff]  }
 0x104   : > { %937 = vadd.xlane.f32.xlu1 %v936_v60  ;;  %940 = vadd.xlane.f32.xlu0 %v939_v61  ;;  %v891_v0 = vsel %vm880_vm2, %v888_v45, %v890_v57  ;;  %v893_v1 = vsel %vm880_vm2, %v890_v57, %v892_v52  ;;  %16814 = vst [vmem:[#allocation19_spill] sm:$0xff] %v12342_v5  ;;  %v952_v10 = vsel %vm951_vm4, %v12342_v5, 0.0  ;;  %v11419_v61 = vld [vmem:[%s16816_s9 + $0x18] sm:$0xff]  }
 0x105   : > { %v12338_v3 = vadd.f32 %v911_v58, %v891_v0  ;;  %v12340_v4 = vadd.f32 %v912_v59, %v893_v1  ;;  %16815 = vst [vmem:[#allocation20_spill] sm:$0xff] %v12348_v8  ;;  %v948_v9 = vsel %vm926_vm3, %v12348_v8, 0.0  ;;  %10036 = vmatpush3.bf16.msra.mxu1 %v11419_v61  ;;  %10064 = vmatpush3.bf16.msra.mxu0 %v11420_v62  ;;  %v11421_v0 = vld [vmem:[%s16816_s9 + $0x10] sm:$0xff]  }
 0x106   : > { %10037 = vmatprep.subr.bf16.mxu1 %v16693_v63  ;;  %10065 = vmatprep.subr.bf16.mxu0 %v16693_v63  ;;  %v11422_v1 = vld [vmem:[%s16817_s3 + $0x10] sm:$0xff]  }
 0x107   : > { %16812 = vst [vmem:[#allocation17_spill] sm:$0xff] %v12338_v3  ;;  %16813 = vst [vmem:[#allocation18_spill] sm:$0xff] %v12340_v4  ;;  %v942_v6 = vsel %vm926_vm3, %v12338_v3, 0.0  ;;  %v945_v7 = vsel %vm926_vm3, %v12340_v4, 0.0  ;;  %10043 = vmatprep.mubr.msk.bf16.mxu1 %vm12088_vm5, %v16693_v63  ;;  %10071 = vmatprep.mubr.msk.bf16.mxu0 %vm12088_vm5, %v16693_v63 }
 0x108   : > { %943 = vadd.xlane.f32.xlu1 %v942_v6  ;;  %946 = vadd.xlane.f32.xlu0 %v945_v7  ;;  %v11424_v6 = vld [vmem:[%s16817_s3 + $0x8] sm:$0xff]   ;;  %v11425_v7 = vld [vmem:[%s16816_s9] sm:$0xff]  }
 0x109   : > { %10038 = vmatpush3.bf16.msra.mxu1 %v11421_v0  ;;  %10066 = vmatpush3.bf16.msra.mxu0 %v11422_v1 }
 0x10a   : > { %10039 = vmatprep.subr.bf16.mxu1 %v16693_v63  ;;  %10067 = vmatprep.subr.bf16.mxu0 %v16693_v63 }
 0x10c   : > { %949 = vadd.xlane.f32.xlu1 %v948_v9  ;;  %953 = vadd.xlane.f32.xlu0 %v952_v10  ;;  %v11426_v9 = vld [vmem:[%s16817_s3] sm:$0xff]  }
 0x10d   : > { %10040 = vmatpush3.bf16.msra.mxu1 %v11423_v2  ;;  %10068 = vmatpush3.bf16.msra.mxu0 %v11424_v6  ;;  %v11427_v2 = vld [vmem:[%s16664_s11 + $0x18] sm:$0xff]  }
 0x10e   : > { %10041 = vmatprep.subr.bf16.mxu1 %v16693_v63  ;;  %10069 = vmatprep.subr.bf16.mxu0 %v16693_v63 }
 0x111   : > { %10042 = vmatpush3.bf16.msra.mxu1 %v11425_v7  ;;  %10070 = vmatpush3.bf16.msra.mxu0 %v11426_v9 }
 0x112   : > { %10091 = vmatprep.subr.bf16.mxu1 %v16693_v63  ;;  %10119 = vmatprep.subr.bf16.mxu0 %v16693_v63 }
 0x185   : > { %v929_v11 = vpop.xlane.xlu0 %928 }
 0x186   : > { %v956_v12 = vmul.f32 0.015625, %v929_v11 }
 0x188   : > { %v12355_v13 = vsub.f32 %v12287_v30, %v956_v12 }
 0x189   : > { %v935_v14 = vpop.xlane.xlu1 %934  ;;  %v932_v15 = vpop.xlane.xlu0 %931 }
 0x18a   : > { %v958_v16 = vmul.f32 0.015625, %v935_v14  ;;  %v957_v17 = vmul.f32 0.015625, %v932_v15  ;;  %v974_v18 = vmul.f32 %v12355_v13, %v12355_v13 }
 0x18c   : > { %v12360_v19 = vsub.f32 %v12303_v43, %v958_v16  ;;  %v12363_v20 = vsub.f32 %v12305_v44, %v957_v17  ;;  %v983_v21 = vsel %vm926_vm3, %v974_v18, 0.0 }
 0x18d   : > { %v938_v22 = vpop.xlane.xlu1 %937  ;;  %984 = vadd.xlane.f32.xlu1 %v983_v21  ;;  %v941_v23 = vpop.xlane.xlu0 %940 }
 0x18e   : > { %v959_v24 = vmul.f32 0.015625, %v938_v22  ;;  %v960_v25 = vmul.f32 0.015625, %v941_v23  ;;  %v976_v26 = vmul.f32 %v12360_v19, %v12360_v19  ;;  %v975_v27 = vmul.f32 %v12363_v20, %v12363_v20 }
 0x190   : > { %v12371_v28 = vsub.f32 %v12314_v51, %v959_v24  ;;  %v12374_v29 = vsub.f32 %v12317_v56, %v960_v25  ;;  %v989_v31 = vsel %vm926_vm3, %v976_v26, 0.0  ;;  %v986_v32 = vsel %vm926_vm3, %v975_v27, 0.0 }
 0x191   : > { %v944_v33 = vpop.xlane.xlu1 %943  ;;  %990 = vadd.xlane.f32.xlu1 %v989_v31  ;;  %987 = vadd.xlane.f32.xlu0 %v986_v32  ;;  %v947_v34 = vpop.xlane.xlu0 %946 }
 0x192   : > { %v961_v35 = vmul.f32 0.015625, %v944_v33  ;;  %v962_v36 = vmul.f32 0.015625, %v947_v34  ;;  %v977_v37 = vmul.f32 %v12371_v28, %v12371_v28  ;;  %v978_v38 = vmul.f32 %v12374_v29, %v12374_v29 }
 0x194   : > { %v12383_v39 = vsub.f32 %v12338_v3, %v961_v35  ;;  %v12386_v40 = vsub.f32 %v12340_v4, %v962_v36  ;;  %v992_v41 = vsel %vm926_vm3, %v977_v37, 0.0  ;;  %v995_v42 = vsel %vm926_vm3, %v978_v38, 0.0 }
 0x195   : > { %v950_v45 = vpop.xlane.xlu1 %949  ;;  %993 = vadd.xlane.f32.xlu0 %v992_v41  ;;  %996 = vadd.xlane.f32.xlu1 %v995_v42  ;;  %v954_v46 = vpop.xlane.xlu0 %953  ;;  %v12450_v42 = vld [vmem:[%s16818_s5] ss:$0 sm:$0xff] }
 0x196   : > { %v963_v47 = vmul.f32 0.015625, %v950_v45  ;;  %v964_v48 = vmul.f32 0.015625, %v954_v46  ;;  %v979_v49 = vmul.f32 %v12383_v39, %v12383_v39  ;;  %v980_v50 = vmul.f32 %v12386_v40, %v12386_v40 }
 0x198   : > { %v12395_v52 = vsub.f32 %v12348_v8, %v963_v47  ;;  %v12398_v53 = vsub.f32 %v12342_v5, %v964_v48  ;;  %v998_v54 = vsel %vm926_vm3, %v979_v49, 0.0  ;;  %v1001_v55 = vsel %vm926_vm3, %v980_v50, 0.0 }
 0x199   : > { %999 = vadd.xlane.f32.xlu0 %v998_v54  ;;  %1002 = vadd.xlane.f32.xlu1 %v1001_v55  ;;  %v12457_v55 = vld [vmem:[%s16819_s1] ss:$0 sm:$0xff] }
 0x19a   : > { %v981_v57 = vmul.f32 %v12395_v52, %v12395_v52  ;;  %v982_v58 = vmul.f32 %v12398_v53, %v12398_v53 }
 0x19c   : > { %v1004_v59 = vsel %vm926_vm3, %v981_v57, 0.0  ;;  %v1007_v60 = vsel %vm951_vm4, %v982_v58, 0.0 }
 0x19d   : > { %1005 = vadd.xlane.f32.xlu0 %v1004_v59  ;;  %1008 = vadd.xlane.f32.xlu1 %v1007_v60 }
 0x216   : > { %v985_v10 = vpop.xlane.xlu1 %984 }
 0x217   : > { %v1010_v11 = vmul.f32 0.015625, %v985_v10  ;;  %v11428_v10 = vld [vmem:[%s16664_s11 + $0x10] sm:$0xff]  }
 0x219   : > { %v1019_v12 = vadd.f32 1e-05, %v1010_v11 }
 0x21a   : > { %v991_v14 = vpop.xlane.xlu1 %990  ;;  %v988_v15 = vpop.xlane.xlu0 %987 }
 0x21b   : > { %11583 = vrsqrt.f32 %v1019_v12  ;;  %v1012_v16 = vmul.f32 0.015625, %v991_v14  ;;  %v1011_v17 = vmul.f32 0.015625, %v988_v15 }
 0x21d   : > { %v1020_v18 = vadd.f32 1e-05, %v1011_v17  ;;  %v1021_v21 = vadd.f32 1e-05, %v1012_v16 }
 0x21e   : > { %v994_v22 = vpop.xlane.xlu0 %993  ;;  %v997_v23 = vpop.xlane.xlu1 %996 }
 0x21f   : > { %v1013_v24 = vmul.f32 0.015625, %v994_v22  ;;  %11585 = vrsqrt.f32 %v1020_v18  ;;  %v1014_v26 = vmul.f32 0.015625, %v997_v23  ;;  %v11430_v22 = vld [vmem:[%s16664_s11] sm:$0xff]  }
 0x220   : > { %11587 = vrsqrt.f32 %v1021_v21 }
 0x221   : > { %v1022_v25 = vadd.f32 1e-05, %v1013_v24  ;;  %v1023_v33 = vadd.f32 1e-05, %v1014_v26 }
 0x222   : > { %v1000_v27 = vpop.xlane.xlu0 %999  ;;  %v1003_v34 = vpop.xlane.xlu1 %1002 }
 0x223   : > { %v1015_v31 = vmul.f32 0.015625, %v1000_v27  ;;  %11589 = vrsqrt.f32 %v1022_v25  ;;  %v1016_v38 = vmul.f32 0.015625, %v1003_v34 }
 0x225   : > { %v1024_v32 = vadd.f32 1e-05, %v1015_v31  ;;  %v1025_v47 = vadd.f32 1e-05, %v1016_v38  ;;  %v11433_v38 = vld [vmem:[%s16816_s9 + $0x28] sm:$0xff]  }
 0x226   : > { %v1006_v35 = vpop.xlane.xlu0 %1005  ;;  %v1009_v48 = vpop.xlane.xlu1 %1008 }
 0x227   : > { %11591 = vrsqrt.f32 %v1024_v32  ;;  %v1017_v37 = vmul.f32 0.015625, %v1006_v35  ;;  %v1018_v57 = vmul.f32 0.015625, %v1009_v48  ;;  %v11439_v48 = vld [vmem:[%s16816_s9 + $0x58] sm:$0xff]  }
 0x228   : > { %v11584_v36 = vpop.eup %11583  ;;  %11593 = vrsqrt.f32 %v1023_v33 }
 0x229   : > { %v1037_v41 = vmul.f32 %v11584_v36, %v12355_v13  ;;  %v1026_v45 = vadd.f32 1e-05, %v1017_v37  ;;  %v1027_v1 = vadd.f32 1e-05, %v1018_v57  ;;  %v11431_v36 = vld [vmem:[%s16816_s9 + $0x38] sm:$0xff]   ;;  %v11432_v37 = vld [vmem:[%s16816_s9 + $0x30] sm:$0xff]  }
 0x22a   : > { %v11445_v57 = vld [vmem:[%s16664_s11 + $0x48] sm:$0xff]  }
 0x22b   : > { %v1052_v49 = vmul.f32 %v12450_v42, %v1037_v41  ;;  %11595 = vrsqrt.f32 %v1026_v45  ;;  %v11434_v41 = vld [vmem:[%s16816_s9 + $0x20] sm:$0xff]   ;;  %v11436_v45 = vld [vmem:[%s16664_s11 + $0x30] sm:$0xff]  }
 0x22c   : > { %v11586_v46 = vpop.eup %11585  ;;  %11597 = vrsqrt.f32 %v1025_v47  ;;  %v11438_v47 = vld [vmem:[%s16664_s11 + $0x20] sm:$0xff]  }
 0x22d   : > { %v1038_v50 = vmul.f32 %v11586_v46, %v12363_v20  ;;  %v11588_v54 = vpop.eup %11587  ;;  %v1067_v59 = vadd.f32 %v12457_v55, %v1052_v49  ;;  %11599 = vrsqrt.f32 %v1027_v1  ;;  %v11437_v46 = vld [vmem:[%s16664_s11 + $0x28] sm:$0xff]   ;;  %v11440_v49 = vld [vmem:[%s16816_s9 + $0x50] sm:$0xff]  }
 0x22e   : > { %v1039_v60 = vmul.f32 %v11588_v54, %v12360_v19  ;;  %v11442_v54 = vld [vmem:[%s16816_s9 + $0x40] sm:$0xff]  }
 0x22f   : > { %v1053_v13 = vmul.f32 %v12450_v42, %v1038_v50  ;;  %v11441_v50 = vld [vmem:[%s16816_s9 + $0x48] sm:$0xff]  }
 0x230   : > { %v11590_v58 = vpop.eup %11589  ;;  %v1054_v7 = vmul.f32 %v12450_v42, %v1039_v60 }
 0x231   : > { %v1068_v61 = vadd.f32 %v12457_v55, %v1053_v13  ;;  %v1040_v20 = vmul.f32 %v11590_v58, %v12371_v28  ;;  %v11444_v13 = vld [vmem:[%s16664_s11 + $0x50] sm:$0xff]   ;;  %v11446_v58 = vld [vmem:[%s16664_s11 + $0x40] sm:$0xff]  }
 0x232   : > { %v1069_v11 = vadd.f32 %v12457_v55, %v1054_v7 }
 0x233   : > { %v12464_v62 = vpack.c.bf16 %v1068_v61, %v1067_v59  ;;  %v1055_v0 = vmul.f32 %v12450_v42, %v1040_v20  ;;  %v12698_v61 = vld [vmem:[%s16820_s27] ss:$0 sm:$0xff] }
 0x234   : > { %v11592_v6 = vpop.eup %11591 }
 0x235   : > { %10044 = vmatmul.mubr.msk.bf16.vlgmr.msra.gmra.mxu1 %vm926_vm3, %v12464_v62  ;;  %10072 = vmatmul.mubr.msk.bf16.vlgmr.msra.gmra.mxu0 %vm926_vm3, %v12464_v62  ;;  %v11594_v19 = vpop.eup %11593  ;;  %v1070_v28 = vadd.f32 %v12457_v55, %v1055_v0  ;;  %v1042_v9 = vmul.f32 %v11592_v6, %v12383_v39  ;;  %v11429_v39 = vld [vmem:[%s16664_s11 + $0x8] sm:$0xff]  }
 0x236   : > { %10047 = vmatprep.mubr.msk.bf16.mxu1 %vm12088_vm5, %v16693_v63  ;;  %10075 = vmatprep.mubr.msk.bf16.mxu0 %vm12088_vm5, %v16693_v63  ;;  %v1041_v12 = vmul.f32 %v11594_v19, %v12374_v29  ;;  %v11447_v19 = vld [vmem:[%s16816_s9 + $0x78] sm:$0xff]  }
 0x237   : > { %10092 = vmatpush3.bf16.msra.mxu1 %v11427_v2  ;;  %v12487_v14 = vpack.c.bf16 %v1070_v28, %v1069_v11  ;;  %v1057_v15 = vmul.f32 %v12450_v42, %v1042_v9 }
 0x238   : > { %10093 = vmatprep.subr.bf16.mxu1 %v16693_v63  ;;  %v11596_v16 = vpop.eup %11595  ;;  %v1056_v18 = vmul.f32 %v12450_v42, %v1041_v12 }
 0x239   : > { %v11598_v17 = vpop.eup %11597  ;;  %v1072_v29 = vadd.f32 %v12457_v55, %v1057_v15  ;;  %v1044_v21 = vmul.f32 %v11596_v16, %v12395_v52  ;;  %v11448_v15 = vld [vmem:[%s16816_s9 + $0x70] sm:$0xff]  }
 0x23a   : > { %v1071_v23 = vadd.f32 %v12457_v55, %v1056_v18  ;;  %v1043_v24 = vmul.f32 %v11598_v17, %v12386_v40  ;;  %v11600_v27 = vpop.eup %11599 }
 0x23b   : > { %10094 = vmatpush3.bf16.msra.mxu1 %v11428_v10  ;;  %v1059_v26 = vmul.f32 %v12450_v42, %v1044_v21  ;;  %v1045_v40 = vmul.f32 %v11600_v27, %v12398_v53 }
 0x23c   : > { %10095 = vmatprep.subr.bf16.mxu1 %v16693_v63  ;;  %v12511_v25 = vpack.c.bf16 %v1072_v29, %v1071_v23  ;;  %v1058_v52 = vmul.f32 %v12450_v42, %v1043_v24 }
 0x23d   : > { %10048 = vmatmul.mubr.msk.bf16.gmra.mxu1 %vm926_vm3, %v12487_v14  ;;  %10076 = vmatmul.mubr.msk.bf16.gmra.mxu0 %vm926_vm3, %v12487_v14  ;;  %v1074_v31 = vadd.f32 %v12457_v55, %v1059_v26  ;;  %v1060_v33 = vmul.f32 %v12450_v42, %v1045_v40  ;;  %v11435_v42 = vld [vmem:[%s16664_s11 + $0x38] sm:$0xff]   ;;  %v11450_v40 = vld [vmem:[%s16816_s9 + $0x60] sm:$0xff]  }
 0x23e   : > { %10051 = vmatprep.mubr.msk.bf16.mxu1 %vm12088_vm5, %v16693_v63  ;;  %10079 = vmatprep.mubr.msk.bf16.mxu0 %vm12088_vm5, %v16693_v63  ;;  %v1073_v32 = vadd.f32 %v12457_v55, %v1058_v52 }
 0x23f   : > { %10096 = vmatpush3.bf16.msra.mxu1 %v11429_v39  ;;  %v1075_v53 = vadd.f32 %v12457_v55, %v1060_v33  ;;  %v11443_v55 = vld [vmem:[%s16664_s11 + $0x58] sm:$0xff]  }
 0x240   : > { %10097 = vmatprep.subr.bf16.mxu1 %v16693_v63  ;;  %v12528_v34 = vpack.c.bf16 %v1074_v31, %v1073_v32 }
 0x241   : > { %v12539_v35 = vpack.c.bf16 %v1075_v53, %v1075_v53 }
 0x243   : > { %10098 = vmatpush3.bf16.msra.mxu1 %v11430_v22  ;;  %v11449_v22 = vld [vmem:[%s16816_s9 + $0x68] sm:$0xff]  }
 0x244   : > { %10149 = vmatprep.subr.bf16.mxu1 %v16693_v63 }
 0x245   : > { %10052 = vmatmul.mubr.msk.bf16.gmra.mxu1 %vm926_vm3, %v12511_v25  ;;  %10080 = vmatmul.mubr.msk.bf16.gmra.mxu0 %vm926_vm3, %v12511_v25 }
 0x246   : > { %10055 = vmatprep.mubr.msk.bf16.mxu1 %vm12088_vm5, %v16693_v63  ;;  %10083 = vmatprep.mubr.msk.bf16.mxu0 %vm12088_vm5, %v16693_v63 }
 0x24d   : > { %10056 = vmatmul.mubr.msk.bf16.gmra.mxu1 %vm926_vm3, %v12528_v34  ;;  %10084 = vmatmul.mubr.msk.bf16.gmra.mxu0 %vm926_vm3, %v12528_v34 }
 0x24e   : > { %10059 = vmatprep.mubr.msk.bf16.mxu1 %vm12088_vm5, %v16693_v63  ;;  %10087 = vmatprep.mubr.msk.bf16.mxu0 %vm12088_vm5, %v16693_v63 }
 0x255   : > { %10060 = vmatmul.mubr.msk.bf16.gmra.mxu1 %vm926_vm3, %v12539_v35  ;;  %10088 = vmatmul.mubr.msk.bf16.gmra.mxu0 %vm926_vm3, %v12539_v35 }
 0x256   : > { %10099 = vmatprep.mubr.msk.bf16.mxu1 %vm12088_vm5, %v16693_v63  ;;  %10129 = vmatprep.mubr.msk.bf16.mxu0 %vm12088_vm5, %v16693_v63 }
 0x25d   : > { %10100 = vmatmul.mubr.msk.bf16.vlgmr.msra.gmra.mxu1 %vm926_vm3, %v12464_v62 }
 0x25e   : > { %10103 = vmatprep.mubr.msk.bf16.mxu1 %vm12088_vm5, %v16693_v63  ;;  %10150 = vmatpush3.bf16.msra.mxu1 %v11431_v36 }
 0x25f   : > { %10151 = vmatprep.subr.bf16.mxu1 %v16693_v63 }
 0x262   : > { %10152 = vmatpush3.bf16.msra.mxu1 %v11432_v37 }
 0x263   : > { %10153 = vmatprep.subr.bf16.mxu1 %v16693_v63 }
 0x265   : > { %10104 = vmatmul.mubr.msk.bf16.gmra.mxu1 %vm926_vm3, %v12487_v14 }
 0x266   : > { %10107 = vmatprep.mubr.msk.bf16.mxu1 %vm12088_vm5, %v16693_v63  ;;  %10154 = vmatpush3.bf16.msra.mxu1 %v11433_v38 }
 0x267   : > { %10155 = vmatprep.subr.bf16.mxu1 %v16693_v63 }
 0x26a   : > { %10156 = vmatpush3.bf16.msra.mxu1 %v11434_v41 }
 0x26b   : > { %10205 = vmatprep.subr.bf16.mxu1 %v16693_v63 }
 0x26d   : > { %10108 = vmatmul.mubr.msk.bf16.gmra.mxu1 %vm926_vm3, %v12511_v25 }
 0x26e   : > { %10111 = vmatprep.mubr.msk.bf16.mxu1 %vm12088_vm5, %v16693_v63 }
 0x275   : > { %10112 = vmatmul.mubr.msk.bf16.gmra.mxu1 %vm926_vm3, %v12528_v34 }
 0x276   : > { %10115 = vmatprep.mubr.msk.bf16.mxu1 %vm12088_vm5, %v16693_v63 }
 0x27d   : > { %10116 = vmatmul.mubr.msk.bf16.gmra.mxu1 %vm926_vm3, %v12539_v35 }
 0x27e   : > { %10157 = vmatprep.mubr.msk.bf16.mxu1 %vm12088_vm5, %v16693_v63 }
 0x285   : > { %10158 = vmatmul.mubr.msk.bf16.vlgmr.msra.gmra.mxu1 %vm926_vm3, %v12464_v62 }
 0x286   : > { %10161 = vmatprep.mubr.msk.bf16.mxu1 %vm12088_vm5, %v16693_v63  ;;  %10206 = vmatpush3.bf16.msra.mxu1 %v11435_v42 }
 0x287   : > { %10207 = vmatprep.subr.bf16.mxu1 %v16693_v63 }
 0x28a   : > { %10208 = vmatpush3.bf16.msra.mxu1 %v11436_v45 }
 0x28b   : > { %10209 = vmatprep.subr.bf16.mxu1 %v16693_v63 }
 0x28d   : > { %10162 = vmatmul.mubr.msk.bf16.gmra.mxu1 %vm926_vm3, %v12487_v14 }
 0x28e   : > { %10165 = vmatprep.mubr.msk.bf16.mxu1 %vm12088_vm5, %v16693_v63  ;;  %10210 = vmatpush3.bf16.msra.mxu1 %v11437_v46 }
 0x28f   : > { %10211 = vmatprep.subr.bf16.mxu1 %v16693_v63 }
 0x292   : > { %10212 = vmatpush3.bf16.msra.mxu1 %v11438_v47 }
 0x293   : > { %10263 = vmatprep.subr.bf16.mxu1 %v16693_v63 }
 0x295   : > { %10166 = vmatmul.mubr.msk.bf16.gmra.mxu1 %vm926_vm3, %v12511_v25 }
 0x296   : > { %10169 = vmatprep.mubr.msk.bf16.mxu1 %vm12088_vm5, %v16693_v63 }
 0x29d   : > { %10170 = vmatmul.mubr.msk.bf16.gmra.mxu1 %vm926_vm3, %v12528_v34 }
 0x29e   : > { %10173 = vmatprep.mubr.msk.bf16.mxu1 %vm12088_vm5, %v16693_v63 }
 0x2a5   : > { %10174 = vmatmul.mubr.msk.bf16.gmra.mxu1 %vm926_vm3, %v12539_v35 }
 0x2a6   : > { %10213 = vmatprep.mubr.msk.bf16.mxu1 %vm12088_vm5, %v16693_v63 }
 0x2ad   : > { %10214 = vmatmul.mubr.msk.bf16.vlgmr.msra.gmra.mxu1 %vm926_vm3, %v12464_v62 }
 0x2ae   : > { %10217 = vmatprep.mubr.msk.bf16.mxu1 %vm12088_vm5, %v16693_v63  ;;  %10264 = vmatpush3.bf16.msra.mxu1 %v11439_v48 }
 0x2af   : > { %10265 = vmatprep.subr.bf16.mxu1 %v16693_v63 }
 0x2b2   : > { %10266 = vmatpush3.bf16.msra.mxu1 %v11440_v49 }
 0x2b3   : > { %10267 = vmatprep.subr.bf16.mxu1 %v16693_v63 }
 0x2b5   : > { %10218 = vmatmul.mubr.msk.bf16.gmra.mxu1 %vm926_vm3, %v12487_v14 }
 0x2b6   : > { %10221 = vmatprep.mubr.msk.bf16.mxu1 %vm12088_vm5, %v16693_v63  ;;  %10268 = vmatpush3.bf16.msra.mxu1 %v11441_v50 }
 0x2b7   : > { %10269 = vmatprep.subr.bf16.mxu1 %v16693_v63 }
 0x2ba   : > { %10270 = vmatpush3.bf16.msra.mxu1 %v11442_v54 }
 0x2bb   : > { %10319 = vmatprep.subr.bf16.mxu1 %v16693_v63 }
 0x2bd   : > { %10222 = vmatmul.mubr.msk.bf16.gmra.mxu1 %vm926_vm3, %v12511_v25 }
 0x2be   : > { %10225 = vmatprep.mubr.msk.bf16.mxu1 %vm12088_vm5, %v16693_v63 }
 0x2c5   : > { %10226 = vmatmul.mubr.msk.bf16.gmra.mxu1 %vm926_vm3, %v12528_v34 }
 0x2c6   : > { %10229 = vmatprep.mubr.msk.bf16.mxu1 %vm12088_vm5, %v16693_v63 }
 0x2cd   : > { %10230 = vmatmul.mubr.msk.bf16.gmra.mxu1 %vm926_vm3, %v12539_v35 }
 0x2ce   : > { %10271 = vmatprep.mubr.msk.bf16.mxu1 %vm12088_vm5, %v16693_v63 }
 0x2d5   : > { %10272 = vmatmul.mubr.msk.bf16.vlgmr.msra.gmra.mxu1 %vm926_vm3, %v12464_v62 }
 0x2d6   : > { %10275 = vmatprep.mubr.msk.bf16.mxu1 %vm12088_vm5, %v16693_v63  ;;  %10320 = vmatpush3.bf16.msra.mxu1 %v11443_v55 }
 0x2d7   : > { %10321 = vmatprep.subr.bf16.mxu1 %v16693_v63 }
 0x2da   : > { %10322 = vmatpush3.bf16.msra.mxu1 %v11444_v13 }
 0x2db   : > { %10323 = vmatprep.subr.bf16.mxu1 %v16693_v63 }
 0x2dd   : > { %10276 = vmatmul.mubr.msk.bf16.gmra.mxu1 %vm926_vm3, %v12487_v14 }
 0x2de   : > { %10279 = vmatprep.mubr.msk.bf16.mxu1 %vm12088_vm5, %v16693_v63  ;;  %10324 = vmatpush3.bf16.msra.mxu1 %v11445_v57 }
 0x2df   : > { %10325 = vmatprep.subr.bf16.mxu1 %v16693_v63 }
 0x2e2   : > { %10326 = vmatpush3.bf16.msra.mxu1 %v11446_v58 }
 0x2e3   : > { %10377 = vmatprep.subr.bf16.mxu1 %v16693_v63 }
 0x2e5   : > { %10280 = vmatmul.mubr.msk.bf16.gmra.mxu1 %vm926_vm3, %v12511_v25 }
 0x2e6   : > { %10283 = vmatprep.mubr.msk.bf16.mxu1 %vm12088_vm5, %v16693_v63 }
 0x2ed   : > { %10284 = vmatmul.mubr.msk.bf16.gmra.mxu1 %vm926_vm3, %v12528_v34 }
 0x2ee   : > { %10287 = vmatprep.mubr.msk.bf16.mxu1 %vm12088_vm5, %v16693_v63 }
 0x2f5   : > { %v1276_v59 = vpop.f32.mrf.mxu1  ;;  %v12689_v60 = vpop.f32.mrf.mxu0  ;;  %10288 = vmatmul.mubr.msk.bf16.gmra.mxu1 %vm926_vm3, %v12539_v35 }
 0x2f6   : > { %10327 = vmatprep.mubr.msk.bf16.mxu1 %vm12088_vm5, %v16693_v63  ;;  %v12703_v6 = vadd.f32 %v12698_v61, %v1276_v59  ;;  %v12769_v59 = vld [vmem:[%s16663_s10] ss:$0 sm:$0xff] }
 0x2f7   : > { %v10045_v20 = vpop.f32.mrf.mxu1  ;;  %v10073_v0 = vpop.f32.mrf.mxu0 }
 0x2f9   : > { %v1279_v1 = vpop.f32.mrf.mxu1  ;;  %v12700_v2 = vpop.f32.mrf.mxu0 }
 0x2fa   : > { %v12706_v7 = vadd.f32 %v12698_v61, %v1279_v1 }
 0x2fb   : > { %v10046_v28 = vpop.f32.mrf.mxu1  ;;  %v10074_v9 = vpop.f32.mrf.mxu0 }
 0x2fc   : > { %v1518_v10 = vpack.c.bf16 %v12706_v7, %v12703_v6  ;;  %v12874_v7 = vld [vmem:[%s16820_s27 + $0x1] ss:$0 sm:$0xff] }
 0x2fd   : > { %v1284_v11 = vpop.f32.mrf.mxu1  ;;  %v12713_v12 = vpop.f32.mrf.mxu0  ;;  %10328 = vmatmul.mubr.msk.bf16.vlgmr.msra.gmra.mxu1 %vm926_vm3, %v12464_v62 }
 0x2fe   : > { %10331 = vmatprep.mubr.msk.bf16.mxu1 %vm12088_vm5, %v16693_v63  ;;  %10378 = vmatpush3.bf16.msra.mxu1 %v11447_v19  ;;  %v12726_v29 = vadd.f32 %v12698_v61, %v1284_v11 }
 0x2ff   : > { %v10049_v39 = vpop.f32.mrf.mxu1  ;;  %v10077_v16 = vpop.f32.mrf.mxu0  ;;  %10379 = vmatprep.subr.bf16.mxu1 %v16693_v63 }
 0x301   : > { %v1287_v17 = vpop.f32.mrf.mxu1  ;;  %v12723_v18 = vpop.f32.mrf.mxu0 }
 0x302   : > { %v12729_v21 = vadd.f32 %v12698_v61, %v1287_v17  ;;  %10380 = vmatpush3.bf16.msra.mxu1 %v11448_v15 }
 0x303   : > { %v10050_v23 = vpop.f32.mrf.mxu1  ;;  %v10078_v24 = vpop.f32.mrf.mxu0  ;;  %10381 = vmatprep.subr.bf16.mxu1 %v16693_v63 }
 0x304   : > { %v1519_v26 = vpack.c.bf16 %v12729_v21, %v12726_v29 }
 0x305   : > { %v1292_v27 = vpop.f32.mrf.mxu1  ;;  %v1394_v52 = vpop.f32.mrf.mxu0  ;;  %10332 = vmatmul.mubr.msk.bf16.gmra.mxu1 %vm926_vm3, %v12487_v14 }
 0x306   : > { %10335 = vmatprep.mubr.msk.bf16.mxu1 %vm12088_vm5, %v16693_v63  ;;  %10382 = vmatpush3.bf16.msra.mxu1 %v11449_v22  ;;  %v12746_v36 = vadd.f32 %v12698_v61, %v1292_v27 }
 0x307   : > { %v10053_v31 = vpop.f32.mrf.mxu1  ;;  %v10081_v32 = vpop.f32.mrf.mxu0  ;;  %10383 = vmatprep.subr.bf16.mxu1 %v16693_v63 }
 0x309   : > { %v1295_v33 = vpop.f32.mrf.mxu1  ;;  %v1397_v53 = vpop.f32.mrf.mxu0 }
 0x30a   : > { %v12749_v37 = vadd.f32 %v12698_v61, %v1295_v33  ;;  %10384 = vmatpush3.bf16.msra.mxu1 %v11450_v40  ;;  %v1398_v32 = vadd.f32 %v12769_v59, %v1397_v53  ;;  %v11452_v53 = vld [vmem:[%s16664_s11 + $0x70] sm:$0xff]  }
 0x30b   : > { %v10054_v38 = vpop.f32.mrf.mxu1  ;;  %v10082_v41 = vpop.f32.mrf.mxu0  ;;  %10433 = vmatprep.subr.bf16.mxu1 %v16693_v63 }
 0x30c   : > { %v1520_v42 = vpack.c.bf16 %v12749_v37, %v12746_v36  ;;  %v11451_v38 = vld [vmem:[%s16664_s11 + $0x78] sm:$0xff]  }
 0x30d   : > { %v1300_v45 = vpop.f32.mrf.mxu1  ;;  %v1402_v46 = vpop.f32.mrf.mxu0  ;;  %10336 = vmatmul.mubr.msk.bf16.gmra.mxu1 %vm926_vm3, %v12511_v25 }
 0x30e   : > { %10339 = vmatprep.mubr.msk.bf16.mxu1 %vm12088_vm5, %v16693_v63  ;;  %v12759_v54 = vadd.f32 %v12698_v61, %v1300_v45  ;;  %v1403_v23 = vadd.f32 %v12769_v59, %v1402_v46  ;;  %v1395_v45 = vadd.f32 %v12769_v59, %v1394_v52 }
 0x30f   : > { %v10057_v47 = vpop.f32.mrf.mxu1  ;;  %v10085_v48 = vpop.f32.mrf.mxu0 }
 0x310   : > { %v1525_v47 = vpack.c.bf16 %v1398_v32, %v1395_v45 }
 0x311   : > { %v1303_v49 = vpop.f32.mrf.mxu1  ;;  %v1405_v50 = vpop.f32.mrf.mxu0 }
 0x312   : > { %v12762_v55 = vadd.f32 %v12698_v61, %v1303_v49  ;;  %v1406_v39 = vadd.f32 %v12769_v59, %v1405_v50  ;;  %v1390_v49 = vadd.f32 %v12769_v59, %v12723_v18  ;;  %v1551_v50 = vsel %vm1528_vm6, %v1525_v47, 0  ;;  %v11457_v47 = vld [vmem:[%s16817_s3 + $0x28] sm:$0xff]  }
 0x313   : > { %v10058_v13 = vpop.f32.mrf.mxu1  ;;  %v10086_v57 = vpop.f32.mrf.mxu0 }
 0x314   : > { %v1521_v58 = vpack.c.bf16 %v12762_v55, %v12759_v54  ;;  %v1526_v27 = vpack.c.bf16 %v1406_v39, %v1403_v23  ;;  %v11454_v13 = vld [vmem:[%s16664_s11 + $0x68] sm:$0xff]   ;;  %v1379_v39 = vadd.f32 %v12769_v59, %v12689_v60 }
 0x315   : > { %v12771_v20 = vpop.f32.mrf.mxu1  ;;  %v1410_v0 = vpop.f32.mrf.mxu0  ;;  %10340 = vmatmul.mubr.msk.bf16.gmra.mxu1 %vm926_vm3, %v12528_v34 }
 0x316   : > { %v1411_v1 = vadd.f32 %v12769_v59, %v1410_v0  ;;  %10343 = vmatprep.mubr.msk.bf16.mxu1 %vm12088_vm5, %v16693_v63  ;;  %v1554_v33 = vsel %vm1528_vm6, %v1526_v27, 0  ;;  %v1387_v0 = vadd.f32 %v12769_v59, %v12713_v12 }
 0x317   : > { %v10061_v19 = vpop.f32.mrf.mxu1  ;;  %v10089_v28 = vpop.f32.mrf.mxu0 }
 0x318   : > { %v1527_v9 = vpack.c.bf16 %v1411_v1, %v1411_v1  ;;  %v1524_v18 = vpack.c.bf16 %v1390_v49, %v1387_v0  ;;  %v11455_v19 = vld [vmem:[%s16664_s11 + $0x60] sm:$0xff]  }
 0x319   : > { %v1311_v11 = vpop.f32.mrf.mxu1  ;;  %v1413_v15 = vpop.f32.mrf.mxu0 }
 0x31a   : > { %v1557_v16 = vsel %vm1528_vm6, %v1527_v9, 0  ;;  %v1382_v9 = vadd.f32 %v12769_v59, %v12700_v2  ;;  %v1548_v11 = vsel %vm1528_vm6, %v1524_v18, 0  ;;  %v11453_v59 = vld [vmem:[%s16817_s3 + $0x38] sm:$0xff]   ;;  %v11458_v18 = vld [vmem:[%s16817_s3 + $0x20] sm:$0xff]  }
 0x31b   : > { %v10062_v17 = vpop.f32.mrf.mxu1  ;;  %v10090_v22 = vpop.f32.mrf.mxu0  ;;  %10120 = vmatpush3.bf16.xpose.msra.mxu0 %v1557_v16 }
 0x31c   : > { %10121 = vmatprep.subr.bf16.mxu0 %v16693_v63  ;;  %v1523_v17 = vpack.c.bf16 %v1382_v9, %v1379_v39 }
 0x31d   : > { %v12782_v24 = vpop.f32.mrf.mxu1  ;;  %10344 = vmatmul.mubr.msk.bf16.gmra.mxu1 %vm926_vm3, %v12539_v35 }
 0x31e   : > { %10385 = vmatprep.mubr.msk.bf16.mxu1 %vm12088_vm5, %v16693_v63  ;;  %v1545_v23 = vsel %vm1528_vm6, %v1523_v17, 0 }
 0x31f   : > { %v10101_v40 = vpop.f32.mrf.mxu1 }
 0x321   : > { %v12788_v31 = vpop.f32.mrf.mxu1 }
 0x323   : > { %v10102_v41 = vpop.f32.mrf.mxu1  ;;  %10122 = vmatpush3.bf16.xpose.msra.mxu0 %v1554_v33  ;;  %v12858_v33 = vld [vmem:[%s16665_s12] ss:$0 sm:$0xff] }
 0x324   : > { %10123 = vmatprep.subr.bf16.mxu0 %v16693_v63  ;;  %v11456_v41 = vld [vmem:[%s16817_s3 + $0x30] sm:$0xff]  }
 0x325   : > { %v12797_v46 = vpop.f32.mrf.mxu1  ;;  %10386 = vmatmul.mubr.msk.bf16.vlgmr.msra.gmra.mxu1 %vm926_vm3, %v12464_v62 }
 0x326   : > { %10389 = vmatprep.mubr.msk.bf16.mxu1 %vm12088_vm5, %v16693_v63  ;;  %10434 = vmatpush3.bf16.msra.mxu1 %v11451_v38  ;;  %v1489_v36 = vadd.f32 %v12858_v33, %v12797_v46 }
 0x327   : > { %v10105_v48 = vpop.f32.mrf.mxu1  ;;  %10435 = vmatprep.subr.bf16.mxu1 %v16693_v63 }
 0x328   : > { %v16691_v48 = vmov 0  }
 0x329   : > { %v12807_v52 = vpop.f32.mrf.mxu1  ;;  %v12882_v49 = vsel %vm880_vm2, 65535, %v16691_v48 }
 0x32a   : > { %10436 = vmatpush3.bf16.msra.mxu1 %v11452_v53 }
 0x32b   : > { %v10106_v57 = vpop.f32.mrf.mxu1  ;;  %10124 = vmatpush3.bf16.xpose.msra.mxu0 %v1551_v50  ;;  %10437 = vmatprep.subr.bf16.mxu1 %v16693_v63 }
 0x32c   : > { %10125 = vmatprep.subr.bf16.mxu0 %v16693_v63 }
 0x32d   : > { %v12819_v1 = vpop.f32.mrf.mxu1  ;;  %10390 = vmatmul.mubr.msk.bf16.gmra.mxu1 %vm926_vm3, %v12487_v14 }
 0x32e   : > { %10393 = vmatprep.mubr.msk.bf16.mxu1 %vm12088_vm5, %v16693_v63  ;;  %10438 = vmatpush3.bf16.msra.mxu1 %v11454_v13  ;;  %v1497_v17 = vadd.f32 %v12858_v33, %v12819_v1  ;;  %v1492_v1 = vadd.f32 %v12858_v33, %v12807_v52 }
 0x32f   : > { %v10109_v28 = vpop.f32.mrf.mxu1  ;;  %10439 = vmatprep.subr.bf16.mxu1 %v16693_v63 }
 0x330   : > { %v3289_v52 = vpack.c.bf16 %v1492_v1, %v1489_v36 }
 0x331   : > { %v12829_v12 = vpop.f32.mrf.mxu1 }
 0x332   : > { %10440 = vmatpush3.bf16.msra.mxu1 %v11455_v19 }
 0x333   : > { %v10110_v15 = vpop.f32.mrf.mxu1  ;;  %10126 = vmatpush3.bf16.xpose.msra.mxu0 %v1548_v11  ;;  %10491 = vmatprep.subr.bf16.mxu1 %v16693_v63  ;;  %v1500_v11 = vadd.f32 %v12858_v33, %v12829_v12 }
 0x334   : > { %10127 = vmatprep.subr.bf16.mxu0 %v16693_v63 }
 0x335   : > { %v1504_v16 = vpop.f32.mrf.mxu1  ;;  %10394 = vmatmul.mubr.msk.bf16.gmra.mxu1 %vm926_vm3, %v12511_v25 }
 0x336   : > { %10397 = vmatprep.mubr.msk.bf16.mxu1 %vm12088_vm5, %v16693_v63  ;;  %v1505_v21 = vadd.f32 %v12858_v33, %v1504_v16 }
 0x337   : > { %v10113_v2 = vpop.f32.mrf.mxu1 }
 0x339   : > { %v1507_v22 = vpop.f32.mrf.mxu1 }
 0x33a   : > { %v1508_v19 = vadd.f32 %v12858_v33, %v1507_v22  ;;  %v3290_v22 = vpack.c.bf16 %v1500_v11, %v1497_v17 }
 0x33b   : > { %v10114_v27 = vpop.f32.mrf.mxu1  ;;  %10128 = vmatpush3.bf16.xpose.msra.mxu0 %v1545_v23 }
 0x33c   : > { %10177 = vmatprep.subr.bf16.mxu0 %v16693_v63  ;;  %v3291_v15 = vpack.c.bf16 %v1508_v19, %v1505_v21 }
 0x33d   : > { %v1512_v40 = vpop.f32.mrf.mxu1  ;;  %10398 = vmatmul.mubr.msk.bf16.gmra.mxu1 %vm926_vm3, %v12528_v34 }
 0x33e   : > { %10401 = vmatprep.mubr.msk.bf16.mxu1 %vm12088_vm5, %v16693_v63  ;;  %v1513_v45 = vadd.f32 %v12858_v33, %v1512_v40 }
 0x33f   : > { %v10117_v60 = vpop.f32.mrf.mxu1 }
 0x340   : > { %v3292_v53 = vpack.c.bf16 %v1513_v45, %v1513_v45  ;;  %v1481_v60 = vadd.f32 %v12858_v33, %v12782_v24  ;;  %v1309_v24 = vadd.f32 %v12698_v61, %v12771_v20 }
 0x341   : > { %v1515_v32 = vpop.f32.mrf.mxu1 }
 0x342   : > { %10130 = vmatmul.mubr.msk.bf16.vlgmr.msra.gmra.mxu0 %vm1528_vm6, %v1518_v10  ;;  %v3311_v28 = vand.u32 %v12882_v49, %v3292_v53  ;;  %v1522_v55 = vpack.c.bf16 %v1309_v24, %v1309_v24 }
 0x343   : > { %v10118_v38 = vpop.f32.mrf.mxu1  ;;  %10178 = vmatpush3.bf16.msra.mxu0 %v11453_v59  ;;  %10133 = vmatprep.mubr.msk.bf16.mxu0 %vm12088_vm5, %v16693_v63 }
 0x344   : > { %10179 = vmatprep.subr.bf16.mxu0 %v16693_v63 }
 0x345   : > { %v1695_v6 = vpop.f32.mrf.mxu1  ;;  %10402 = vmatmul.mubr.msk.bf16.gmra.mxu1 %vm926_vm3, %v12539_v35 }
 0x346   : > { %10441 = vmatprep.mubr.msk.bf16.mxu1 %vm12088_vm5, %v16693_v63  ;;  %v12885_v13 = vadd.f32 %v12874_v7, %v1695_v6 }
 0x347   : > { %v10159_v10 = vpop.f32.mrf.mxu1  ;;  %10180 = vmatpush3.bf16.msra.mxu0 %v11456_v41 }
 0x348   : > { %10181 = vmatprep.subr.bf16.mxu0 %v16693_v63 }
 0x349   : > { %v1698_v50 = vpop.f32.mrf.mxu1 }
 0x34a   : > { %v12888_v57 = vadd.f32 %v12874_v7, %v1698_v50  ;;  %10134 = vmatmul.mubr.msk.bf16.gmra.mxu0 %vm1528_vm6, %v1519_v26 }
 0x34b   : > { %v10160_v0 = vpop.f32.mrf.mxu1  ;;  %10137 = vmatprep.mubr.msk.bf16.mxu0 %vm12088_vm5, %v16693_v63  ;;  %10182 = vmatpush3.bf16.msra.mxu0 %v11457_v47 }
 0x34c   : > { %10183 = vmatprep.subr.bf16.mxu0 %v16693_v63  ;;  %v8946_v0 = vld [vmem:[%s16665_s12 + $0x1] ss:$0 sm:$0xff] }
 0x34d   : > { %v1703_v29 = vpop.f32.mrf.mxu1  ;;  %10442 = vmatmul.mubr.msk.bf16.vlgmr.msra.gmra.mxu1 %vm926_vm3, %v12464_v62 }
 0x34e   : > { %10492 = vmatpush3.bf16.msra.mxu1 %v3311_v28  ;;  %10445 = vmatprep.mubr.msk.bf16.mxu1 %vm12088_vm5, %v16693_v63  ;;  %v12916_v16 = vadd.f32 %v12874_v7, %v1703_v29 }
 0x34f   : > { %v10163_v26 = vpop.f32.mrf.mxu1  ;;  %10493 = vmatprep.subr.bf16.mxu1 %v16693_v63  ;;  %10184 = vmatpush3.bf16.msra.mxu0 %v11458_v18 }
 0x350   : > { %10233 = vmatprep.subr.bf16.mxu0 %v16693_v63 }
 0x351   : > { %v1706_v39 = vpop.f32.mrf.mxu1 }
 0x352   : > { %v12919_v2 = vadd.f32 %v12874_v7, %v1706_v39  ;;  %10494 = vmatpush3.bf16.msra.mxu1 %v3291_v15  ;;  %10138 = vmatmul.mubr.msk.bf16.gmra.mxu0 %vm1528_vm6, %v1520_v42  ;;  %v1484_v42 = vadd.f32 %v12858_v33, %v12788_v31 }
 0x353   : > { %v10164_v12 = vpop.f32.mrf.mxu1  ;;  %10495 = vmatprep.subr.bf16.mxu1 %v16693_v63  ;;  %10141 = vmatprep.mubr.msk.bf16.mxu0 %vm12088_vm5, %v16693_v63 }
 0x354   : > { %v3288_v31 = vpack.c.bf16 %v1484_v42, %v1481_v60 }
 0x355   : > { %v1711_v27 = vpop.f32.mrf.mxu1  ;;  %10446 = vmatmul.mubr.msk.bf16.gmra.mxu1 %vm926_vm3, %v12487_v14 }
 0x356   : > { %10496 = vmatpush3.bf16.msra.mxu1 %v3290_v22  ;;  %10449 = vmatprep.mubr.msk.bf16.mxu1 %vm12088_vm5, %v16693_v63  ;;  %v12944_v59 = vadd.f32 %v12874_v7, %v1711_v27 }
 0x357   : > { %v10167_v37 = vpop.f32.mrf.mxu1  ;;  %10497 = vmatprep.subr.bf16.mxu1 %v16693_v63 }
 0x359   : > { %v1714_v40 = vpop.f32.mrf.mxu1 }
 0x35a   : > { %v12947_v46 = vadd.f32 %v12874_v7, %v1714_v40  ;;  %10498 = vmatpush3.bf16.msra.mxu1 %v3289_v52  ;;  %10142 = vmatmul.mubr.msk.bf16.gmra.mxu0 %vm1528_vm6, %v1521_v58 }
 0x35b   : > { %v10168_v32 = vpop.f32.mrf.mxu1  ;;  %10499 = vmatprep.subr.bf16.mxu1 %v16693_v63  ;;  %10145 = vmatprep.mubr.msk.bf16.mxu0 %vm12088_vm5, %v16693_v63 }
 0x35d   : > { %v1719_v38 = vpop.f32.mrf.mxu1  ;;  %10450 = vmatmul.mubr.msk.bf16.gmra.mxu1 %vm926_vm3, %v12511_v25 }
 0x35e   : > { %10500 = vmatpush3.bf16.msra.mxu1 %v3288_v31  ;;  %10453 = vmatprep.mubr.msk.bf16.mxu1 %vm12088_vm5, %v16693_v63  ;;  %v12966_v41 = vadd.f32 %v12874_v7, %v1719_v38 }
 0x35f   : > { %v10171_v54 = vpop.f32.mrf.mxu1  ;;  %10551 = vmatprep.subr.bf16.mxu1 %v16693_v63 }
 0x361   : > { %v1722_v58 = vpop.f32.mrf.mxu1 }
 0x362   : > { %v12969_v61 = vadd.f32 %v12874_v7, %v1722_v58  ;;  %10146 = vmatmul.mubr.msk.bf16.gmra.mxu0 %vm1528_vm6, %v1522_v55 }
 0x363   : > { %v10172_v20 = vpop.f32.mrf.mxu1  ;;  %10185 = vmatprep.mubr.msk.bf16.mxu0 %vm12088_vm5, %v16693_v63 }
 0x365   : > { %v12976_v6 = vpop.f32.mrf.mxu1  ;;  %10454 = vmatmul.mubr.msk.bf16.gmra.mxu1 %vm926_vm3, %v12528_v34 }
 0x366   : > { %10457 = vmatprep.mubr.msk.bf16.mxu1 %vm12088_vm5, %v16693_v63 }
 0x367   : > { %v10175_v10 = vpop.f32.mrf.mxu1 }
 0x369   : > { %v1730_v47 = vpop.f32.mrf.mxu1 }
 0x36a   : > { %10186 = vmatmul.mubr.msk.bf16.vlgmr.msra.gmra.mxu0 %vm926_vm3, %v12464_v62 }
 0x36b   : > { %v10176_v53 = vpop.f32.mrf.mxu1  ;;  %10189 = vmatprep.mubr.msk.bf16.mxu0 %vm12088_vm5, %v16693_v63 }
 0x36d   : > { %v1899_v50 = vpop.f32.mrf.mxu1  ;;  %10458 = vmatmul.mubr.msk.bf16.gmra.mxu1 %vm926_vm3, %v12539_v35 }
 0x36e   : > { %10501 = vmatprep.mubr.msk.bf16.mxu1 %vm12088_vm5, %v16693_v63  ;;  %v12993_v28 = vadd.f32 %v8946_v0, %v1899_v50 }
 0x36f   : > { %v10215_v18 = vpop.f32.mrf.mxu1 }
 0x370   : > { %16821 = vst [vmem:[#allocation21_spill] sm:$0xff] %v12993_v28 }
 0x371   : > { %v1902_v19 = vpop.f32.mrf.mxu1 }
 0x372   : > { %v12995_v29 = vadd.f32 %v8946_v0, %v1902_v19  ;;  %10190 = vmatmul.mubr.msk.bf16.gmra.mxu0 %vm926_vm3, %v12487_v14 }
 0x373   : > { %v10216_v21 = vpop.f32.mrf.mxu1  ;;  %10193 = vmatprep.mubr.msk.bf16.mxu0 %vm12088_vm5, %v16693_v63 }
 0x374   : > { %16822 = vst [vmem:[#allocation22_spill] sm:$0xff] %v12995_v29 }
 0x375   : > { %v1907_v11 = vpop.f32.mrf.mxu1 }
 0x376   : > { %v13003_v17 = vadd.f32 %v8946_v0, %v1907_v11 }
 0x377   : > { %v10219_v15 = vpop.f32.mrf.mxu1 }
 0x378   : > { %16823 = vst [vmem:[#allocation23_spill] sm:$0xff] %v13003_v17 }
 0x379   : > { %v1910_v39 = vpop.f32.mrf.mxu1 }
 0x37a   : > { %v13005_v12 = vadd.f32 %v8946_v0, %v1910_v39  ;;  %10194 = vmatmul.mubr.msk.bf16.gmra.mxu0 %vm926_vm3, %v12511_v25 }
 0x37b   : > { %v10220_v1 = vpop.f32.mrf.mxu1  ;;  %10197 = vmatprep.mubr.msk.bf16.mxu0 %vm12088_vm5, %v16693_v63 }
 0x37c   : > { %16824 = vst [vmem:[#allocation24_spill] sm:$0xff] %v13005_v12 }
 0x37d   : > { %v1915_v27 = vpop.f32.mrf.mxu1 }
 0x37e   : > { %v13013_v42 = vadd.f32 %v8946_v0, %v1915_v27 }
 0x37f   : > { %v10223_v36 = vpop.f32.mrf.mxu1 }
 0x380   : > { %16825 = vst [vmem:[#allocation25_spill] sm:$0xff] %v13013_v42 }
 0x381   : > { %v1918_v37 = vpop.f32.mrf.mxu1 }
 0x382   : > { %v13015_v52 = vadd.f32 %v8946_v0, %v1918_v37  ;;  %10198 = vmatmul.mubr.msk.bf16.gmra.mxu0 %vm926_vm3, %v12528_v34 }
 0x383   : > { %v10224_v40 = vpop.f32.mrf.mxu1  ;;  %10201 = vmatprep.mubr.msk.bf16.mxu0 %vm12088_vm5, %v16693_v63 }
 0x384   : > { %16826 = vst [vmem:[#allocation26_spill] sm:$0xff] %v13015_v52 }
 0x385   : > { %v1923_v32 = vpop.f32.mrf.mxu1 }
 0x386   : > { %v13023_v38 = vadd.f32 %v8946_v0, %v1923_v32 }
 0x387   : > { %v10227_v24 = vpop.f32.mrf.mxu1 }
 0x389   : > { %v1926_v31 = vpop.f32.mrf.mxu1 }
 0x38a   : > { %v13025_v54 = vadd.f32 %v8946_v0, %v1926_v31  ;;  %10202 = vmatmul.mubr.msk.bf16.gmra.mxu0 %vm926_vm3, %v12539_v35  ;;  %v13038_v0 = vld [vmem:[%s16820_s27 + $0x2] ss:$0 sm:$0xff] }
 0x38b   : > { %v10228_v55 = vpop.f32.mrf.mxu1  ;;  %10243 = vmatprep.mubr.msk.bf16.mxu0 %vm12088_vm5, %v16693_v63 }
 0x38d   : > { %v13033_v20 = vpop.f32.mrf.mxu1 }
 0x38f   : > { %v10231_v10 = vpop.f32.mrf.mxu1 }
 0x391   : > { %v1934_v47 = vpop.f32.mrf.mxu1 }
 0x393   : > { %v10232_v53 = vpop.f32.mrf.mxu1 }
 0x395   : > { %v2113_v50 = vpop.f32.mrf.mxu1 }
 0x396   : > { %v13041_v21 = vadd.f32 %v13038_v0, %v2113_v50 }
 0x397   : > { %v10273_v18 = vpop.f32.mrf.mxu1 }
 0x399   : > { %v2116_v19 = vpop.f32.mrf.mxu1 }
 0x39a   : > { %v13044_v11 = vadd.f32 %v13038_v0, %v2116_v19 }
 0x39b   : > { %v10274_v15 = vpop.f32.mrf.mxu1 }
 0x39d   : > { %v2121_v1 = vpop.f32.mrf.mxu1 }
 0x39e   : > { %v13049_v37 = vadd.f32 %v13038_v0, %v2121_v1 }
 0x39f   : > { %v10277_v27 = vpop.f32.mrf.mxu1 }
 0x3a1   : > { %v2124_v36 = vpop.f32.mrf.mxu1 }
 0x3a2   : > { %v13052_v40 = vadd.f32 %v13038_v0, %v2124_v36 }
 0x3a3   : > { %v10278_v32 = vpop.f32.mrf.mxu1 }
 0x3a5   : > { %v2129_v31 = vpop.f32.mrf.mxu1 }
 0x3a6   : > { %v13057_v47 = vadd.f32 %v13038_v0, %v2129_v31 }
 0x3a7   : > { %v10281_v55 = vpop.f32.mrf.mxu1 }
 0x3a9   : > { %v2132_v10 = vpop.f32.mrf.mxu1 }
 0x3aa   : > { %v13060_v53 = vadd.f32 %v13038_v0, %v2132_v10 }
 0x3ab   : > { %v10282_v50 = vpop.f32.mrf.mxu1 }
 0x3ad   : > { %v2137_v19 = vpop.f32.mrf.mxu1 }
 0x3ae   : > { %v13065_v27 = vadd.f32 %v13038_v0, %v2137_v19 }
 0x3af   : > { %v10285_v15 = vpop.f32.mrf.mxu1 }
 0x3b0   : > { %v8981_v15 = vld [vmem:[%s16665_s12 + $0x2] ss:$0 sm:$0xff] }
 0x3b1   : > { %v2140_v1 = vpop.f32.mrf.mxu1 }
 0x3b2   : > { %v13068_v36 = vadd.f32 %v13038_v0, %v2140_v1 }
 0x3b3   : > { %v10286_v32 = vpop.f32.mrf.mxu1 }
 0x3b5   : > { %v13072_v55 = vpop.f32.mrf.mxu1 }
 0x3b7   : > { %v10289_v10 = vpop.f32.mrf.mxu1 }
 0x3b9   : > { %v2148_v50 = vpop.f32.mrf.mxu1 }
 0x3bb   : > { %v10290_v48 = vpop.f32.mrf.mxu1 }
 0x3bd   : > { %v2317_v26 = vpop.f32.mrf.mxu1 }
 0x3be   : > { %v13077_v60 = vadd.f32 %v8981_v15, %v2317_v26 }
 0x3bf   : > { %v10329_v22 = vpop.f32.mrf.mxu1 }
 0x3c0   : > { %16827 = vst [vmem:[#allocation27_spill] sm:$0xff] %v13077_v60 }
 0x3c1   : > { %v2320_v19 = vpop.f32.mrf.mxu1 }
 0x3c2   : > { %v13079_v1 = vadd.f32 %v8981_v15, %v2320_v19 }
 0x3c3   : > { %v10330_v32 = vpop.f32.mrf.mxu1 }
 0x3c4   : > { %16828 = vst [vmem:[#allocation28_spill] sm:$0xff] %v13079_v1 }
 0x3c5   : > { %v2325_v31 = vpop.f32.mrf.mxu1 }
 0x3c6   : > { %v13083_v50 = vadd.f32 %v8981_v15, %v2325_v31 }
 0x3c7   : > { %v10333_v18 = vpop.f32.mrf.mxu1 }
 0x3c8   : > { %16829 = vst [vmem:[#allocation29_spill] sm:$0xff] %v13083_v50  ;;  %v8996_v18 = vld [vmem:[%s16820_s27 + $0x3] ss:$0 sm:$0xff] }
 0x3c9   : > { %v2328_v10 = vpop.f32.mrf.mxu1 }
 0x3ca   : > { %v13085_v48 = vadd.f32 %v8981_v15, %v2328_v10 }
 0x3cb   : > { %v10334_v24 = vpop.f32.mrf.mxu1 }
 0x3cc   : > { %16830 = vst [vmem:[#allocation30_spill] sm:$0xff] %v13085_v48 }
 0x3cd   : > { %v2333_v39 = vpop.f32.mrf.mxu1 }
 0x3ce   : > { %v13089_v19 = vadd.f32 %v8981_v15, %v2333_v39 }
 0x3cf   : > { %v10337_v26 = vpop.f32.mrf.mxu1 }
 0x3d0   : > { %16831 = vst [vmem:[#allocation31_spill] sm:$0xff] %v13089_v19 }
 0x3d1   : > { %v2336_v45 = vpop.f32.mrf.mxu1 }
 0x3d2   : > { %v13091_v32 = vadd.f32 %v8981_v15, %v2336_v45 }
 0x3d3   : > { %v10338_v33 = vpop.f32.mrf.mxu1 }
 0x3d4   : > { %16832 = vst [vmem:[#allocation32_spill] sm:$0xff] %v13091_v32 }
 0x3d5   : > { %v2341_v58 = vpop.f32.mrf.mxu1 }
 0x3d6   : > { %v13095_v10 = vadd.f32 %v8981_v15, %v2341_v58 }
 0x3d7   : > { %v10341_v31 = vpop.f32.mrf.mxu1 }
 0x3d8   : > { %16833 = vst [vmem:[#allocation33_spill] sm:$0xff] %v13095_v10 }
 0x3d9   : > { %v2344_v23 = vpop.f32.mrf.mxu1 }
 0x3da   : > { %v13097_v24 = vadd.f32 %v8981_v15, %v2344_v23 }
 0x3db   : > { %v10342_v9 = vpop.f32.mrf.mxu1 }
 0x3dc   : > { %16834 = vst [vmem:[#allocation34_spill] sm:$0xff] %v13097_v24 }
 0x3dd   : > { %v13101_v22 = vpop.f32.mrf.mxu1 }
 0x3de   : > { %16835 = vst [vmem:[#allocation35_spill] sm:$0xff] %v13101_v22 }
 0x3df   : > { %v10345_v39 = vpop.f32.mrf.mxu1 }
 0x3e1   : > { %v2352_v45 = vpop.f32.mrf.mxu1 }
 0x3e3   : > { %v10346_v63 = vpop.f32.mrf.mxu1 }
 0x3e5   : > { %v2531_v33 = vpop.f32.mrf.mxu1 }
 0x3e6   : > { %v13106_v58 = vadd.f32 %v8996_v18, %v2531_v33 }
 0x3e7   : > { %v10387_v31 = vpop.f32.mrf.mxu1 }
 0x3e9   : > { %v2534_v5 = vpop.f32.mrf.mxu1 }
 0x3ea   : > { %v13108_v23 = vadd.f32 %v8996_v18, %v2534_v5 }
 0x3eb   : > { %v10388_v9 = vpop.f32.mrf.mxu1 }
 0x3ed   : > { %v2539_v26 = vpop.f32.mrf.mxu1 }
 0x3ee   : > { %v13112_v45 = vadd.f32 %v8996_v18, %v2539_v26 }
 0x3ef   : > { %v10391_v8 = vpop.f32.mrf.mxu1 }
 0x3f0   : > { %16836 = vst [vmem:[#allocation36_spill] sm:$0xff] %v13112_v45 }
 0x3f1   : > { %v2542_v39 = vpop.f32.mrf.mxu1 }
 0x3f2   : > { %v13114_v63 = vadd.f32 %v8996_v18, %v2542_v39 }
 0x3f3   : > { %v10392_v4 = vpop.f32.mrf.mxu1 }
 0x3f5   : > { %v2547_v3 = vpop.f32.mrf.mxu1 }
 0x3f6   : > { %v13118_v5 = vadd.f32 %v8996_v18, %v2547_v3 }
 0x3f7   : > { %v10395_v33 = vpop.f32.mrf.mxu1 }
 0x3f8   : > { %16837 = vst [vmem:[#allocation37_spill] sm:$0xff] %v13118_v5 }
 0x3f9   : > { %v2550_v56 = vpop.f32.mrf.mxu1 }
 0x3fa   : > { %v13120_v9 = vadd.f32 %v8996_v18, %v2550_v56 }
 0x3fb   : > { %v10396_v51 = vpop.f32.mrf.mxu1 }
 0x3fc   : > { %16838 = vst [vmem:[#allocation38_spill] sm:$0xff] %v13120_v9 }
 0x3fd   : > { %v2555_v15 = vpop.f32.mrf.mxu1 }
 0x3fe   : > { %v13124_v39 = vadd.f32 %v8996_v18, %v2555_v15 }
 0x3ff   : > { %v10399_v26 = vpop.f32.mrf.mxu1 }
 0x400   : > { %16839 = vst [vmem:[#allocation39_spill] sm:$0xff] %v13124_v39 }
 0x401   : > { %v2558_v43 = vpop.f32.mrf.mxu1 }
 0x402   : > { %v13126_v4 = vadd.f32 %v8996_v18, %v2558_v43  ;;  %v13128_v44 = vpop.f32.mrf.mxu0 }
 0x403   : > { %v10400_v31 = vpop.f32.mrf.mxu1 }
 0x404   : > { %16840 = vst [vmem:[#allocation40_spill] sm:$0xff] %v13126_v4  ;;  %v10131_v33 = vpop.f32.mrf.mxu0  ;;  %v9016_v31 = vld [vmem:[%s16665_s12 + $0x3] ss:$0 sm:$0xff] }
 0x405   : > { %v13132_v56 = vpop.f32.mrf.mxu1 }
 0x406   : > { %16841 = vst [vmem:[#allocation41_spill] sm:$0xff] %v13132_v56  ;;  %v13134_v51 = vpop.f32.mrf.mxu0 }
 0x407   : > { %v10403_v30 = vpop.f32.mrf.mxu1 }
 0x408   : > { %v10132_v8 = vpop.f32.mrf.mxu0 }
 0x409   : > { %v2566_v60 = vpop.f32.mrf.mxu1 }
 0x40a   : > { %v13136_v26 = vpop.f32.mrf.mxu0 }
 0x40b   : > { %v10404_v15 = vpop.f32.mrf.mxu1 }
 0x40c   : > { %v10135_v1 = vpop.f32.mrf.mxu0 }
 0x40d   : > { %v2735_v43 = vpop.f32.mrf.mxu1 }
 0x40e   : > { %v13138_v18 = vpop.f32.mrf.mxu0  ;;  %v13143_v48 = vadd.f32 %v9016_v31, %v2735_v43 }
 0x40f   : > { %v10443_v3 = vpop.f32.mrf.mxu1 }
 0x410   : > { %v10136_v33 = vpop.f32.mrf.mxu0  ;;  %16842 = vst [vmem:[#allocation42_spill] sm:$0xff] %v13143_v48 }
 0x411   : > { %v2738_v50 = vpop.f32.mrf.mxu1 }
 0x412   : > { %v13145_v19 = vadd.f32 %v9016_v31, %v2738_v50  ;;  %v13147_v30 = vpop.f32.mrf.mxu0 }
 0x413   : > { %v10444_v60 = vpop.f32.mrf.mxu1 }
 0x414   : > { %16843 = vst [vmem:[#allocation43_spill] sm:$0xff] %v13145_v19  ;;  %v10139_v8 = vpop.f32.mrf.mxu0 }
 0x415   : > { %v2743_v15 = vpop.f32.mrf.mxu1 }
 0x416   : > { %v13151_v32 = vpop.f32.mrf.mxu0  ;;  %v13153_v3 = vadd.f32 %v9016_v31, %v2743_v15 }
 0x417   : > { %v10447_v10 = vpop.f32.mrf.mxu1 }
 0x418   : > { %v10140_v24 = vpop.f32.mrf.mxu0  ;;  %16844 = vst [vmem:[#allocation44_spill] sm:$0xff] %v13153_v3 }
 0x419   : > { %v2746_v22 = vpop.f32.mrf.mxu1 }
 0x41a   : > { %v13155_v33 = vadd.f32 %v9016_v31, %v2746_v22  ;;  %v13157_v43 = vpop.f32.mrf.mxu0 }
 0x41b   : > { %v10448_v50 = vpop.f32.mrf.mxu1 }
 0x41c   : > { %16845 = vst [vmem:[#allocation45_spill] sm:$0xff] %v13155_v33  ;;  %v10143_v56 = vpop.f32.mrf.mxu0 }
 0x41d   : > { %v2751_v39 = vpop.f32.mrf.mxu1 }
 0x41e   : > { %v13161_v1 = vpop.f32.mrf.mxu0  ;;  %v13163_v10 = vadd.f32 %v9016_v31, %v2751_v39 }
 0x41f   : > { %v10451_v8 = vpop.f32.mrf.mxu1 }
 0x420   : > { %v10144_v48 = vpop.f32.mrf.mxu0  ;;  %16846 = vst [vmem:[#allocation46_spill] sm:$0xff] %v13163_v10 }
 0x421   : > { %v2754_v19 = vpop.f32.mrf.mxu1 }
 0x422   : > { %v13165_v24 = vadd.f32 %v9016_v31, %v2754_v19  ;;  %v13167_v15 = vpop.f32.mrf.mxu0 }
 0x423   : > { %v10452_v22 = vpop.f32.mrf.mxu1 }
 0x424   : > { %16847 = vst [vmem:[#allocation47_spill] sm:$0xff] %v13165_v24  ;;  %v10147_v4 = vpop.f32.mrf.mxu0 }
 0x425   : > { %v2759_v28 = vpop.f32.mrf.mxu1 }
 0x426   : > { %v1628_v60 = vpop.f32.mrf.mxu0  ;;  %v13171_v29 = vadd.f32 %v9016_v31, %v2759_v28 }
 0x427   : > { %v10455_v56 = vpop.f32.mrf.mxu1 }
 0x428   : > { %v10148_v3 = vpop.f32.mrf.mxu0  ;;  %16848 = vst [vmem:[#allocation48_spill] sm:$0xff] %v13171_v29 }
 0x429   : > { %v2762_v33 = vpop.f32.mrf.mxu1 }
 0x42a   : > { %v13173_v48 = vadd.f32 %v9016_v31, %v2762_v33  ;;  %v1797_v39 = vpop.f32.mrf.mxu0 }
 0x42b   : > { %v10456_v8 = vpop.f32.mrf.mxu1 }
 0x42c   : > { %16849 = vst [vmem:[#allocation49_spill] sm:$0xff] %v13173_v48  ;;  %v10187_v5 = vpop.f32.mrf.mxu0 }
 0x42d   : > { %v13177_v22 = vpop.f32.mrf.mxu1  ;;  %v8936_v5 = vld [vmem:[%s16663_s10 + $0x1] ss:$0 sm:$0xff] }
 0x42e   : > { %16850 = vst [vmem:[#allocation50_spill] sm:$0xff] %v13177_v22  ;;  %v1800_v9 = vpop.f32.mrf.mxu0 }
 0x42f   : > { %v10459_v50 = vpop.f32.mrf.mxu1 }
 0x430   : > { %v10188_v4 = vpop.f32.mrf.mxu0 }
 0x431   : > { %v2770_v10 = vpop.f32.mrf.mxu1 }
 0x432   : > { %v1805_v60 = vpop.f32.mrf.mxu0 }
 0x433   : > { %v10460_v56 = vpop.f32.mrf.mxu1 }
 0x434   : > { %v10191_v3 = vpop.f32.mrf.mxu0 }
 0x436   : > { %v1808_v24 = vpop.f32.mrf.mxu0 }
 0x438   : > { %v10192_v28 = vpop.f32.mrf.mxu0 }
 0x43a   : > { %v1813_v17 = vpop.f32.mrf.mxu0 }
 0x43b   : > { %v1814_v45 = vadd.f32 %v8936_v5, %v1813_v17 }
 0x43c   : > { %v10195_v31 = vpop.f32.mrf.mxu0 }
 0x43e   : > { %v1816_v33 = vpop.f32.mrf.mxu0 }
 0x43f   : > { %v1817_v22 = vadd.f32 %v8936_v5, %v1816_v33  ;;  %v1798_v33 = vadd.f32 %v8936_v5, %v1797_v39  ;;  %v11461_v39 = vld [vmem:[%s16817_s3 + $0x48] sm:$0xff]  }
 0x440   : > { %v10196_v12 = vpop.f32.mrf.mxu0 }
 0x441   : > { %v16851_v12 = vmov 0.0  }
 0x442   : > { %v1821_v8 = vpop.f32.mrf.mxu0 }
 0x443   : > { %v1822_v31 = vadd.f32 %v8936_v5, %v1821_v8 }
 0x444   : > { %v10199_v42 = vpop.f32.mrf.mxu0 }
 0x446   : > { %v1824_v52 = vpop.f32.mrf.mxu0 }
 0x447   : > { %v1825_v3 = vadd.f32 %v8936_v5, %v1824_v52  ;;  %v1806_v52 = vadd.f32 %v8936_v5, %v1805_v60 }
 0x448   : > { %v10200_v19 = vpop.f32.mrf.mxu0 }
 0x449   : > { %v1945_v42 = vpack.c.bf16 %v1825_v3, %v1822_v31 }
 0x44a   : > { %v1829_v50 = vpop.f32.mrf.mxu0 }
 0x44b   : > { %v1830_v4 = vadd.f32 %v8936_v5, %v1829_v50  ;;  %v1972_v19 = vsel %vm1528_vm6, %v1945_v42, 0  ;;  %v1944_v50 = vpack.c.bf16 %v1817_v22, %v1814_v45  ;;  %v11459_v45 = vld [vmem:[%s16817_s3 + $0x58] sm:$0xff]   ;;  %v16854_v22 = vpack.c.bf16 %v12947_v46, %v12944_v59 }
 0x44c   : > { %v10203_v10 = vpop.f32.mrf.mxu0 }
 0x44d   : > { %v1946_v29 = vpack.c.bf16 %v1830_v4, %v1830_v4  ;;  %v1809_v10 = vadd.f32 %v8936_v5, %v1808_v24  ;;  %v1969_v4 = vsel %vm1528_vm6, %v1944_v50, 0  ;;  %v16852_v24 = vpack.c.bf16 %v12888_v57, %v12885_v13  ;;  %v11462_v57 = vld [vmem:[%s16817_s3 + $0x40] sm:$0xff]  }
 0x44e   : > { %v1832_v56 = vpop.f32.mrf.mxu0  ;;  %v16853_v13 = vpack.c.bf16 %v12919_v2, %v12916_v16  ;;  %v16855_v16 = vpack.c.bf16 %v12969_v61, %v12966_v41  ;;  %v1728_v2 = vadd.f32 %v12874_v7, %v12976_v6 }
 0x44f   : > { %v1975_v28 = vsel %vm1528_vm6, %v1946_v29, 0  ;;  %v1943_v29 = vpack.c.bf16 %v1809_v10, %v1806_v52 }
 0x450   : > { %v10204_v48 = vpop.f32.mrf.mxu0  ;;  %10234 = vmatpush3.bf16.xpose.msra.mxu0 %v1975_v28  ;;  %v1941_v60 = vpack.c.bf16 %v1728_v2, %v1728_v2 }
 0x451   : > { %10235 = vmatprep.subr.bf16.mxu0 %v16851_v12  ;;  %v1801_v48 = vadd.f32 %v8936_v5, %v1800_v9  ;;  %v1966_v8 = vsel %vm1528_vm6, %v1943_v29, 0  ;;  %v11460_v9 = vld [vmem:[%s16817_s3 + $0x50] sm:$0xff]  }
 0x453   : > { %v1942_v56 = vpack.c.bf16 %v1801_v48, %v1798_v33 }
 0x455   : > { %v1963_v17 = vsel %vm1528_vm6, %v1942_v56, 0 }
 0x458   : > { %10236 = vmatpush3.bf16.xpose.msra.mxu0 %v1972_v19 }
 0x459   : > { %10237 = vmatprep.subr.bf16.mxu0 %v16851_v12 }
 0x460   : > { %10238 = vmatpush3.bf16.xpose.msra.mxu0 %v1969_v4 }
 0x461   : > { %10239 = vmatprep.subr.bf16.mxu0 %v16851_v12 }
 0x468   : > { %10240 = vmatpush3.bf16.xpose.msra.mxu0 %v1966_v8 }
 0x469   : > { %10241 = vmatprep.subr.bf16.mxu0 %v16851_v12 }
 0x470   : > { %10242 = vmatpush3.bf16.xpose.msra.mxu0 %v1963_v17 }
 0x471   : > { %10291 = vmatprep.subr.bf16.mxu0 %v16851_v12 }
 0x477   : > { %10244 = vmatmul.mubr.msk.bf16.vlgmr.msra.gmra.mxu0 %vm1528_vm6, %v16852_v24 }
 0x478   : > { %10292 = vmatpush3.bf16.msra.mxu0 %v11459_v45  ;;  %10247 = vmatprep.mubr.msk.bf16.mxu0 %vm12088_vm5, %v16851_v12 }
 0x479   : > { %10293 = vmatprep.subr.bf16.mxu0 %v16851_v12 }
 0x47c   : > { %10294 = vmatpush3.bf16.msra.mxu0 %v11460_v9 }
 0x47d   : > { %10295 = vmatprep.subr.bf16.mxu0 %v16851_v12 }
 0x47f   : > { %10248 = vmatmul.mubr.msk.bf16.gmra.mxu0 %vm1528_vm6, %v16853_v13 }
 0x480   : > { %10251 = vmatprep.mubr.msk.bf16.mxu0 %vm12088_vm5, %v16851_v12  ;;  %10296 = vmatpush3.bf16.msra.mxu0 %v11461_v39 }
 0x481   : > { %10297 = vmatprep.subr.bf16.mxu0 %v16851_v12 }
 0x484   : > { %10298 = vmatpush3.bf16.msra.mxu0 %v11462_v57 }
 0x485   : > { %10347 = vmatprep.subr.bf16.mxu0 %v16851_v12 }
 0x487   : > { %10252 = vmatmul.mubr.msk.bf16.gmra.mxu0 %vm1528_vm6, %v16854_v22 }
 0x488   : > { %10255 = vmatprep.mubr.msk.bf16.mxu0 %vm12088_vm5, %v16851_v12 }
 0x48f   : > { %10256 = vmatmul.mubr.msk.bf16.gmra.mxu0 %vm1528_vm6, %v16855_v16 }
 0x490   : > { %10259 = vmatprep.mubr.msk.bf16.mxu0 %vm12088_vm5, %v16851_v12 }
 0x497   : > { %10260 = vmatmul.mubr.msk.bf16.gmra.mxu0 %vm1528_vm6, %v1941_v60 }
 0x498   : > { %10299 = vmatprep.mubr.msk.bf16.mxu0 %vm12088_vm5, %v16851_v12 }
 0x49f   : > { %10300 = vmatmul.mubr.msk.bf16.vlgmr.msra.gmra.mxu0 %vm926_vm3, %v12464_v62 }
 0x4a0   : > { %10303 = vmatprep.mubr.msk.bf16.mxu0 %vm12088_vm5, %v16851_v12 }
 0x4a7   : > { %10304 = vmatmul.mubr.msk.bf16.gmra.mxu0 %vm926_vm3, %v12487_v14 }
 0x4a8   : > { %10307 = vmatprep.mubr.msk.bf16.mxu0 %vm12088_vm5, %v16851_v12 }
 0x4af   : > { %10308 = vmatmul.mubr.msk.bf16.gmra.mxu0 %vm926_vm3, %v12511_v25 }
 0x4b0   : > { %10311 = vmatprep.mubr.msk.bf16.mxu0 %vm12088_vm5, %v16851_v12 }
 0x4b7   : > { %10312 = vmatmul.mubr.msk.bf16.gmra.mxu0 %vm926_vm3, %v12528_v34 }
 0x4b8   : > { %10315 = vmatprep.mubr.msk.bf16.mxu0 %vm12088_vm5, %v16851_v12 }
 0x4bf   : > { %10316 = vmatmul.mubr.msk.bf16.gmra.mxu0 %vm926_vm3, %v12539_v35 }
 0x4c0   : > { %10357 = vmatprep.mubr.msk.bf16.mxu0 %vm12088_vm5, %v16851_v12 }
 0x537   : > { %v13257_v7 = vpop.f32.mrf.mxu0 }
 0x538   : > { %v2914_v59 = vsel %vm2885_vm7, %v13257_v7, -inf }
 0x539   : > { %2915 = vmax.xlane.f32.xlu0 %v2914_v59  ;;  %v10245_v46 = vpop.f32.mrf.mxu0 }
 0x53b   : > { %v13261_v41 = vpop.f32.mrf.mxu0 }
 0x53c   : > { %v2917_v61 = vsel %vm2885_vm7, %v13261_v41, -inf }
 0x53d   : > { %2918 = vmax.xlane.f32.xlu1 %v2917_v61  ;;  %v10246_v6 = vpop.f32.mrf.mxu0 }
 0x53f   : > { %v13265_v5 = vpop.f32.mrf.mxu0 }
 0x540   : > { %v2920_v3 = vsel %vm2885_vm7, %v13265_v5, -inf }
 0x541   : > { %2921 = vmax.xlane.f32.xlu0 %v2920_v3  ;;  %v10249_v28 = vpop.f32.mrf.mxu0 }
 0x543   : > { %v13269_v31 = vpop.f32.mrf.mxu0 }
 0x544   : > { %v2923_v42 = vsel %vm2885_vm7, %v13269_v31, -inf }
 0x545   : > { %2924 = vmax.xlane.f32.xlu1 %v2923_v42  ;;  %v10250_v19 = vpop.f32.mrf.mxu0 }
 0x547   : > { %v13273_v50 = vpop.f32.mrf.mxu0 }
 0x548   : > { %v2926_v10 = vsel %vm2885_vm7, %v13273_v50, -inf }
 0x549   : > { %2927 = vmax.xlane.f32.xlu0 %v2926_v10  ;;  %v10253_v4 = vpop.f32.mrf.mxu0 }
 0x54b   : > { %v13277_v52 = vpop.f32.mrf.mxu0 }
 0x54c   : > { %v2929_v29 = vsel %vm2885_vm7, %v13277_v52, -inf }
 0x54d   : > { %2930 = vmax.xlane.f32.xlu1 %v2929_v29  ;;  %v10254_v48 = vpop.f32.mrf.mxu0 }
 0x54f   : > { %v13281_v8 = vpop.f32.mrf.mxu0 }
 0x550   : > { %v2932_v33 = vsel %vm2885_vm7, %v13281_v8, -inf }
 0x551   : > { %2933 = vmax.xlane.f32.xlu0 %v2932_v33  ;;  %v10257_v56 = vpop.f32.mrf.mxu0 }
 0x552   : > { %v8971_v56 = vld [vmem:[%s16663_s10 + $0x2] ss:$0 sm:$0xff] }
 0x553   : > { %v13285_v17 = vpop.f32.mrf.mxu0 }
 0x554   : > { %v2935_v45 = vsel %vm2885_vm7, %v13285_v17, -inf }
 0x555   : > { %2936 = vmax.xlane.f32.xlu1 %v2935_v45  ;;  %v10258_v24 = vpop.f32.mrf.mxu0 }
 0x557   : > { %v13289_v9 = vpop.f32.mrf.mxu0 }
 0x558   : > { %v2938_v39 = vsel %vm2910_vm8, %v13289_v9, -inf }
 0x559   : > { %2939 = vmax.xlane.f32.xlu0 %v2938_v39  ;;  %v10261_v13 = vpop.f32.mrf.mxu0 }
 0x55b   : > { %v2046_v57 = vpop.f32.mrf.mxu0 }
 0x55d   : > { %v10262_v22 = vpop.f32.mrf.mxu0 }
 0x55f   : > { %v2215_v16 = vpop.f32.mrf.mxu0 }
 0x561   : > { %v10301_v2 = vpop.f32.mrf.mxu0 }
 0x563   : > { %v2218_v60 = vpop.f32.mrf.mxu0 }
 0x565   : > { %v10302_v59 = vpop.f32.mrf.mxu0 }
 0x567   : > { %v2223_v46 = vpop.f32.mrf.mxu0 }
 0x569   : > { %v10305_v61 = vpop.f32.mrf.mxu0 }
 0x56b   : > { %v2226_v6 = vpop.f32.mrf.mxu0 }
 0x56d   : > { %v10306_v3 = vpop.f32.mrf.mxu0 }
 0x56f   : > { %v2231_v28 = vpop.f32.mrf.mxu0 }
 0x571   : > { %v10309_v42 = vpop.f32.mrf.mxu0 }
 0x573   : > { %v2234_v19 = vpop.f32.mrf.mxu0 }
 0x574   : > { %v2235_v42 = vadd.f32 %v8971_v56, %v2234_v19  ;;  %v2216_v19 = vadd.f32 %v8971_v56, %v2215_v16  ;;  %v11464_v16 = vld [vmem:[%s16817_s3 + $0x70] sm:$0xff]  }
 0x575   : > { %v10310_v10 = vpop.f32.mrf.mxu0 }
 0x577   : > { %v2239_v4 = vpop.f32.mrf.mxu0 }
 0x578   : > { %v2240_v61 = vadd.f32 %v8971_v56, %v2239_v4  ;;  %v2219_v4 = vadd.f32 %v8971_v56, %v2218_v60  ;;  %v11465_v60 = vld [vmem:[%s16817_s3 + $0x68] sm:$0xff]  }
 0x579   : > { %v10313_v29 = vpop.f32.mrf.mxu0 }
 0x57a   : > { %v2232_v29 = vadd.f32 %v8971_v56, %v2231_v28 }
 0x57b   : > { %v2242_v48 = vpop.f32.mrf.mxu0 }
 0x57c   : > { %v2243_v22 = vadd.f32 %v8971_v56, %v2242_v48  ;;  %v2224_v48 = vadd.f32 %v8971_v56, %v2223_v46  ;;  %v11463_v46 = vld [vmem:[%s16817_s3 + $0x78] sm:$0xff]  }
 0x57d   : > { %v10314_v33 = vpop.f32.mrf.mxu0 }
 0x57e   : > { %v2363_v3 = vpack.c.bf16 %v2243_v22, %v2240_v61  ;;  %v2362_v33 = vpack.c.bf16 %v2235_v42, %v2232_v29  ;;  %v16859_v22 = vpack.c.bf16 %v13068_v36, %v13065_v27 }
 0x57f   : > { %v2247_v45 = vpop.f32.mrf.mxu0 }
 0x580   : > { %v2248_v24 = vadd.f32 %v8971_v56, %v2247_v45  ;;  %v2390_v10 = vsel %vm1528_vm6, %v2363_v3, 0  ;;  %v2227_v45 = vadd.f32 %v8971_v56, %v2226_v6  ;;  %v16856_v6 = vpack.c.bf16 %v13044_v11, %v13041_v21  ;;  %v11466_v11 = vld [vmem:[%s16817_s3 + $0x60] sm:$0xff]  }
 0x581   : > { %v10317_v39 = vpop.f32.mrf.mxu0  ;;  %v16857_v21 = vpack.c.bf16 %v13052_v40, %v13049_v37  ;;  %v16858_v56 = vpack.c.bf16 %v13060_v53, %v13057_v47  ;;  %v2146_v47 = vadd.f32 %v13038_v0, %v13072_v55 }
 0x582   : > { %v2364_v13 = vpack.c.bf16 %v2248_v24, %v2248_v24  ;;  %v2387_v24 = vsel %vm1528_vm6, %v2362_v33, 0  ;;  %v2361_v39 = vpack.c.bf16 %v2227_v45, %v2224_v48 }
 0x583   : > { %v2250_v57 = vpop.f32.mrf.mxu0  ;;  %v2359_v3 = vpack.c.bf16 %v2146_v47, %v2146_v47  ;;  %v2889_v47 = vsel %vm2885_vm7, %v13134_v51, -inf }
 0x584   : > { %v2393_v2 = vsel %vm1528_vm6, %v2364_v13, 0  ;;  %v2384_v13 = vsel %vm1528_vm6, %v2361_v39, 0  ;;  %v2360_v57 = vpack.c.bf16 %v2219_v4, %v2216_v19 }
 0x585   : > { %v10318_v59 = vpop.f32.mrf.mxu0  ;;  %10348 = vmatpush3.bf16.xpose.msra.mxu0 %v2393_v2 }
 0x586   : > { %10349 = vmatprep.subr.bf16.mxu0 %v16851_v12  ;;  %v2381_v28 = vsel %vm1528_vm6, %v2360_v57, 0 }
 0x58d   : > { %10350 = vmatpush3.bf16.xpose.msra.mxu0 %v2390_v10 }
 0x58e   : > { %10351 = vmatprep.subr.bf16.mxu0 %v16851_v12 }
 0x595   : > { %10352 = vmatpush3.bf16.xpose.msra.mxu0 %v2387_v24 }
 0x596   : > { %10353 = vmatprep.subr.bf16.mxu0 %v16851_v12 }
 0x59d   : > { %10354 = vmatpush3.bf16.xpose.msra.mxu0 %v2384_v13 }
 0x59e   : > { %10355 = vmatprep.subr.bf16.mxu0 %v16851_v12 }
 0x5a5   : > { %10356 = vmatpush3.bf16.xpose.msra.mxu0 %v2381_v28 }
 0x5a6   : > { %10405 = vmatprep.subr.bf16.mxu0 %v16851_v12 }
 0x5ac   : > { %10358 = vmatmul.mubr.msk.bf16.vlgmr.msra.gmra.mxu0 %vm1528_vm6, %v16856_v6 }
 0x5ad   : > { %10406 = vmatpush3.bf16.msra.mxu0 %v11463_v46  ;;  %10361 = vmatprep.mubr.msk.bf16.mxu0 %vm12088_vm5, %v16851_v12 }
 0x5ae   : > { %10407 = vmatprep.subr.bf16.mxu0 %v16851_v12 }
 0x5b1   : > { %10408 = vmatpush3.bf16.msra.mxu0 %v11464_v16 }
 0x5b2   : > { %10409 = vmatprep.subr.bf16.mxu0 %v16851_v12 }
 0x5b4   : > { %10362 = vmatmul.mubr.msk.bf16.gmra.mxu0 %vm1528_vm6, %v16857_v21 }
 0x5b5   : > { %10365 = vmatprep.mubr.msk.bf16.mxu0 %vm12088_vm5, %v16851_v12  ;;  %10410 = vmatpush3.bf16.msra.mxu0 %v11465_v60 }
 0x5b6   : > { %10411 = vmatprep.subr.bf16.mxu0 %v16851_v12 }
 0x5b9   : > { %10412 = vmatpush3.bf16.msra.mxu0 %v11466_v11 }
 0x5ba   : > { %10461 = vmatprep.subr.bf16.mxu0 %v16851_v12 }
 0x5bc   : > { %10366 = vmatmul.mubr.msk.bf16.gmra.mxu0 %vm1528_vm6, %v16858_v56 }
 0x5bd   : > { %10369 = vmatprep.mubr.msk.bf16.mxu0 %vm12088_vm5, %v16851_v12 }
 0x5c2   : > { %v2916_v37 = vpop.xlane.xlu0 %2915 }
 0x5c3   : > { %v3004_v40 = vsub.f32 %v13257_v7, %v2916_v37 }
 0x5c4   : > { %10370 = vmatmul.mubr.msk.bf16.gmra.mxu0 %vm1528_vm6, %v16859_v22 }
 0x5c5   : > { %v3049_v2 = vmul.f32 1.442695, %v3004_v40  ;;  %10373 = vmatprep.mubr.msk.bf16.mxu0 %vm12088_vm5, %v16851_v12 }
 0x5c6   : > { %v2919_v53 = vpop.xlane.xlu1 %2918 }
 0x5c7   : > { %11601 = vpow2.f32 %v3049_v2  ;;  %v3005_v59 = vsub.f32 %v13261_v41, %v2919_v53  ;;  %v2892_v2 = vsel %vm2885_vm7, %v13136_v26, -inf  ;;  %v2895_v53 = vsel %vm2885_vm7, %v13138_v18, -inf }
 0x5c9   : > { %v3051_v61 = vmul.f32 1.442695, %v3005_v59  ;;  %v2904_v59 = vsel %vm2885_vm7, %v13157_v43, -inf }
 0x5ca   : > { %v2922_v42 = vpop.xlane.xlu0 %2921 }
 0x5cb   : > { %11603 = vpow2.f32 %v3051_v61  ;;  %v3006_v7 = vsub.f32 %v13265_v5, %v2922_v42  ;;  %v2901_v61 = vsel %vm2885_vm7, %v13151_v32, -inf  ;;  %v2907_v42 = vsel %vm2885_vm7, %v13161_v1, -inf }
 0x5cc   : > { %10374 = vmatmul.mubr.msk.bf16.gmra.mxu0 %vm1528_vm6, %v2359_v3  ;;  %v2911_v3 = vsel %vm2910_vm8, %v13167_v15, -inf }
 0x5cd   : > { %v3053_v27 = vmul.f32 1.442695, %v3006_v7  ;;  %10413 = vmatprep.mubr.msk.bf16.mxu0 %vm12088_vm5, %v16851_v12 }
 0x5ce   : > { %v2925_v36 = vpop.xlane.xlu1 %2924 }
 0x5cf   : > { %11605 = vpow2.f32 %v3053_v27  ;;  %v3007_v0 = vsub.f32 %v13269_v31, %v2925_v36 }
 0x5d1   : > { %v3055_v55 = vmul.f32 1.442695, %v3007_v0 }
 0x5d2   : > { %v2928_v10 = vpop.xlane.xlu0 %2927 }
 0x5d3   : > { %11607 = vpow2.f32 %v3055_v55  ;;  %v3008_v41 = vsub.f32 %v13273_v50, %v2928_v10 }
 0x5d4   : > { %v13356_v29 = vpop.eup %11601  ;;  %10414 = vmatmul.mubr.msk.bf16.vlgmr.msra.gmra.mxu0 %vm926_vm3, %v12464_v62 }
 0x5d5   : > { %v3057_v5 = vmul.f32 1.442695, %v3008_v41  ;;  %v3130_v33 = vsel %vm2885_vm7, %v13356_v29, 0.0  ;;  %10417 = vmatprep.mubr.msk.bf16.mxu0 %vm12088_vm5, %v16851_v12 }
 0x5d6   : > { %v2931_v45 = vpop.xlane.xlu1 %2930  ;;  %3131 = vadd.xlane.f32.xlu1 %v3130_v33 }
 0x5d7   : > { %11609 = vpow2.f32 %v3057_v5  ;;  %v3009_v31 = vsub.f32 %v13277_v52, %v2931_v45 }
 0x5d8   : > { %v13365_v24 = vpop.eup %11603 }
 0x5d9   : > { %v3059_v50 = vmul.f32 1.442695, %v3009_v31  ;;  %v3133_v48 = vsel %vm2885_vm7, %v13365_v24, 0.0 }
 0x5da   : > { %v2934_v39 = vpop.xlane.xlu0 %2933  ;;  %3134 = vadd.xlane.f32.xlu0 %v3133_v48 }
 0x5db   : > { %11611 = vpow2.f32 %v3059_v50  ;;  %v3010_v62 = vsub.f32 %v13281_v8, %v2934_v39 }
 0x5dc   : > { %v13370_v4 = vpop.eup %11605  ;;  %10418 = vmatmul.mubr.msk.bf16.gmra.mxu0 %vm926_vm3, %v12487_v14 }
 0x5dd   : > { %v3061_v13 = vmul.f32 1.442695, %v3010_v62  ;;  %v3136_v52 = vsel %vm2885_vm7, %v13370_v4, 0.0  ;;  %10421 = vmatprep.mubr.msk.bf16.mxu0 %vm12088_vm5, %v16851_v12 }
 0x5de   : > { %3137 = vadd.xlane.f32.xlu1 %v3136_v52  ;;  %v2937_v19 = vpop.xlane.xlu1 %2936 }
 0x5df   : > { %11613 = vpow2.f32 %v3061_v13  ;;  %v3011_v57 = vsub.f32 %v13285_v17, %v2937_v19 }
 0x5e0   : > { %v13379_v28 = vpop.eup %11607 }
 0x5e1   : > { %v3063_v8 = vmul.f32 1.442695, %v3011_v57  ;;  %v3139_v46 = vsel %vm2885_vm7, %v13379_v28, 0.0 }
 0x5e2   : > { %3140 = vadd.xlane.f32.xlu0 %v3139_v46  ;;  %v2940_v14 = vpop.xlane.xlu0 %2939 }
 0x5e3   : > { %11615 = vpow2.f32 %v3063_v8  ;;  %v3012_v6 = vsub.f32 %v13289_v9, %v2940_v14 }
 0x5e4   : > { %v13384_v16 = vpop.eup %11609  ;;  %10422 = vmatmul.mubr.msk.bf16.gmra.mxu0 %vm926_vm3, %v12511_v25 }
 0x5e5   : > { %v3065_v60 = vmul.f32 1.442695, %v3012_v6  ;;  %v3142_v17 = vsel %vm2885_vm7, %v13384_v16, 0.0  ;;  %10425 = vmatprep.mubr.msk.bf16.mxu0 %vm12088_vm5, %v16851_v12 }
 0x5e6   : > { %3143 = vadd.xlane.f32.xlu1 %v3142_v17 }
 0x5e7   : > { %11617 = vpow2.f32 %v3065_v60 }
 0x5e8   : > { %v13392_v21 = vpop.eup %11611 }
 0x5e9   : > { %v3145_v11 = vsel %vm2885_vm7, %v13392_v21, 0.0 }
 0x5ea   : > { %3146 = vadd.xlane.f32.xlu0 %v3145_v11 }
 0x5ec   : > { %v13396_v9 = vpop.eup %11613  ;;  %10426 = vmatmul.mubr.msk.bf16.gmra.mxu0 %vm926_vm3, %v12528_v34  ;;  %v2886_v34 = vsel %vm2885_vm7, %v13128_v44, -inf }
 0x5ed   : > { %v3148_v25 = vsel %vm2885_vm7, %v13396_v9, 0.0  ;;  %10429 = vmatprep.mubr.msk.bf16.mxu0 %vm12088_vm5, %v16851_v12 }
 0x5ee   : > { %3149 = vadd.xlane.f32.xlu1 %v3148_v25 }
 0x5f0   : > { %v13404_v56 = vpop.eup %11615 }
 0x5f1   : > { %v3151_v37 = vsel %vm2885_vm7, %v13404_v56, 0.0 }
 0x5f2   : > { %3152 = vadd.xlane.f32.xlu0 %v3151_v37 }
 0x5f4   : > { %v13408_v40 = vpop.eup %11617  ;;  %10430 = vmatmul.mubr.msk.bf16.gmra.mxu0 %vm926_vm3, %v12539_v35  ;;  %v2898_v35 = vsel %vm2885_vm7, %v13147_v30, -inf }
 0x5f5   : > { %v3154_v22 = vsel %vm2910_vm8, %v13408_v40, 0.0  ;;  %10471 = vmatprep.mubr.msk.bf16.mxu0 %vm12088_vm5, %v16851_v12 }
 0x5f6   : > { %2887 = vmax.xlane.f32.xlu0 %v2886_v34  ;;  %3155 = vadd.xlane.f32.xlu1 %v3154_v22 }
 0x5fa   : > { %2893 = vmax.xlane.f32.xlu0 %v2892_v2  ;;  %2890 = vmax.xlane.f32.xlu1 %v2889_v47 }
 0x5fe   : > { %2899 = vmax.xlane.f32.xlu0 %v2898_v35  ;;  %2896 = vmax.xlane.f32.xlu1 %v2895_v53 }
 0x602   : > { %2905 = vmax.xlane.f32.xlu0 %v2904_v59  ;;  %2902 = vmax.xlane.f32.xlu1 %v2901_v61 }
 0x606   : > { %2912 = vmax.xlane.f32.xlu0 %v2911_v3  ;;  %2908 = vmax.xlane.f32.xlu1 %v2907_v42 }
 0x65f   : > { %v13438_v0 = vpop.xlane.xlu1 %3131 }
 0x663   : > { %v13440_v55 = vpop.xlane.xlu0 %3134 }
 0x667   : > { %v13446_v33 = vpop.xlane.xlu1 %3137 }
 0x66b   : > { %v13448_v45 = vpop.xlane.xlu0 %3140 }
 0x66c   : > { %v13434_v7 = vpop.f32.mrf.mxu0 }
 0x66d   : > { %v2941_v27 = vsel %vm2885_vm7, %v13434_v7, -inf }
 0x66e   : > { %2942 = vmax.xlane.f32.xlu1 %v2941_v27  ;;  %v10359_v36 = vpop.f32.mrf.mxu0 }
 0x66f   : > { %v13454_v39 = vpop.xlane.xlu1 %3143 }
 0x670   : > { %v13442_v10 = vpop.f32.mrf.mxu0 }
 0x671   : > { %v2944_v41 = vsel %vm2885_vm7, %v13442_v10, -inf }
 0x672   : > { %2945 = vmax.xlane.f32.xlu0 %v2944_v41  ;;  %v10360_v5 = vpop.f32.mrf.mxu0 }
 0x673   : > { %v13456_v62 = vpop.xlane.xlu0 %3146 }
 0x674   : > { %v13450_v31 = vpop.f32.mrf.mxu0 }
 0x675   : > { %v2947_v50 = vsel %vm2885_vm7, %v13450_v31, -inf }
 0x676   : > { %2948 = vmax.xlane.f32.xlu1 %v2947_v50  ;;  %v10363_v48 = vpop.f32.mrf.mxu0 }
 0x677   : > { %v13462_v57 = vpop.xlane.xlu1 %3149 }
 0x678   : > { %v13458_v13 = vpop.f32.mrf.mxu0 }
 0x679   : > { %v2950_v52 = vsel %vm2885_vm7, %v13458_v13, -inf }
 0x67a   : > { %2951 = vmax.xlane.f32.xlu0 %v2950_v52  ;;  %v10364_v19 = vpop.f32.mrf.mxu0 }
 0x67b   : > { %v13464_v8 = vpop.xlane.xlu0 %3152 }
 0x67c   : > { %v13466_v46 = vpop.f32.mrf.mxu0 }
 0x67e   : > { %v10367_v14 = vpop.f32.mrf.mxu0 }
 0x67f   : > { %v13468_v6 = vpop.xlane.xlu1 %3155  ;;  %v2888_v60 = vpop.xlane.xlu0 %2887 }
 0x680   : > { %v2995_v17 = vsub.f32 %v13128_v44, %v2888_v60  ;;  %v13471_v11 = vpop.f32.mrf.mxu0 }
 0x682   : > { %v3031_v25 = vmul.f32 1.442695, %v2995_v17  ;;  %v10368_v37 = vpop.f32.mrf.mxu0 }
 0x683   : > { %v2891_v34 = vpop.xlane.xlu1 %2890  ;;  %v2894_v22 = vpop.xlane.xlu0 %2893 }
 0x684   : > { %11619 = vpow2.f32 %v3031_v25  ;;  %v2996_v2 = vsub.f32 %v13134_v51, %v2891_v34  ;;  %v2997_v47 = vsub.f32 %v13136_v26, %v2894_v22  ;;  %v13475_v35 = vpop.f32.mrf.mxu0 }
 0x686   : > { %v3033_v53 = vmul.f32 1.442695, %v2996_v2  ;;  %v3035_v59 = vmul.f32 1.442695, %v2997_v47  ;;  %v10371_v61 = vpop.f32.mrf.mxu0 }
 0x687   : > { %v2897_v3 = vpop.xlane.xlu1 %2896  ;;  %v2900_v42 = vpop.xlane.xlu0 %2899 }
 0x688   : > { %11621 = vpow2.f32 %v3033_v53  ;;  %v2998_v44 = vsub.f32 %v13138_v18, %v2897_v3  ;;  %v13478_v27 = vpop.f32.mrf.mxu0  ;;  %v2999_v41 = vsub.f32 %v13147_v30, %v2900_v42 }
 0x689   : > { %16860 = vst [vmem:[#allocation51_spill] sm:$0xff] %v13478_v27  ;;  %11623 = vpow2.f32 %v3035_v59  ;;  %v2953_v59 = vsel %vm2885_vm7, %v13466_v46, -inf }
 0x68a   : > { %v3037_v36 = vmul.f32 1.442695, %v2998_v44  ;;  %v10372_v5 = vpop.f32.mrf.mxu0  ;;  %v3039_v26 = vmul.f32 1.442695, %v2999_v41  ;;  %v2956_v44 = vsel %vm2885_vm7, %v13471_v11, -inf }
 0x68b   : > { %v2903_v51 = vpop.xlane.xlu1 %2902  ;;  %v2906_v52 = vpop.xlane.xlu0 %2905 }
 0x68c   : > { %v13481_v50 = vpop.f32.mrf.mxu0  ;;  %11625 = vpow2.f32 %v3037_v36  ;;  %v3000_v48 = vsub.f32 %v13151_v32, %v2903_v51  ;;  %v3001_v18 = vsub.f32 %v13157_v43, %v2906_v52 }
 0x68d   : > { %16861 = vst [vmem:[#allocation52_spill] sm:$0xff] %v13481_v50  ;;  %11627 = vpow2.f32 %v3039_v26  ;;  %v2959_v26 = vsel %vm2885_vm7, %v13475_v35, -inf }
 0x68e   : > { %v10375_v19 = vpop.f32.mrf.mxu0  ;;  %v3041_v25 = vmul.f32 1.442695, %v3000_v48  ;;  %v3043_v2 = vmul.f32 1.442695, %v3001_v18 }
 0x68f   : > { %v2909_v14 = vpop.xlane.xlu1 %2908 }
 0x690   : > { %v2464_v60 = vpop.f32.mrf.mxu0  ;;  %v3002_v30 = vsub.f32 %v13161_v1, %v2909_v14  ;;  %11629 = vpow2.f32 %v3041_v25 }
 0x691   : > { %v13484_v17 = vpop.eup %11619  ;;  %11631 = vpow2.f32 %v3043_v2  ;;  %v2962_v60 = vsel %vm2885_vm7, %v13478_v27, -inf  ;;  %v2965_v2 = vsel %vm2910_vm8, %v13481_v50, -inf }
 0x692   : > { %v10376_v37 = vpop.f32.mrf.mxu0  ;;  %v3103_v34 = vsel %vm2885_vm7, %v13484_v17, 0.0  ;;  %v3045_v47 = vmul.f32 1.442695, %v3002_v30 }
 0x693   : > { %3104 = vadd.xlane.f32.xlu1 %v3103_v34 }
 0x694   : > { %v13490_v22 = vpop.f32.mrf.mxu0  ;;  %11633 = vpow2.f32 %v3045_v47 }
 0x695   : > { %v13492_v32 = vpop.eup %11621  ;;  %11635 = vrcp.f32 %v13440_v55 }
 0x696   : > { %v10415_v53 = vpop.f32.mrf.mxu0  ;;  %v3106_v43 = vsel %vm2885_vm7, %v13492_v32, 0.0  ;;  %v13498_v1 = vpop.eup %11623  ;;  %11637 = vrcp.f32 %v13438_v0 }
 0x697   : > { %3107 = vadd.xlane.f32.xlu0 %v3106_v43  ;;  %2954 = vmax.xlane.f32.xlu1 %v2953_v59  ;;  %v3109_v42 = vsel %vm2885_vm7, %v13498_v1, 0.0  ;;  %11639 = vrcp.f32 %v13448_v45 }
 0x698   : > { %v13500_v61 = vpop.f32.mrf.mxu0  ;;  %11641 = vrcp.f32 %v13446_v33 }
 0x699   : > { %v13506_v36 = vpop.eup %11625  ;;  %11643 = vrcp.f32 %v13456_v62 }
 0x69a   : > { %v10416_v3 = vpop.f32.mrf.mxu0  ;;  %v3112_v51 = vsel %vm2885_vm7, %v13506_v36, 0.0  ;;  %v13512_v48 = vpop.eup %11627  ;;  %11645 = vrcp.f32 %v13454_v39 }
 0x69b   : > { %3110 = vadd.xlane.f32.xlu1 %v3109_v42  ;;  %2957 = vmax.xlane.f32.xlu0 %v2956_v44  ;;  %v3115_v14 = vsel %vm2885_vm7, %v13512_v48, 0.0  ;;  %11647 = vrcp.f32 %v13464_v8 }
 0x69c   : > { %v2641_v41 = vpop.f32.mrf.mxu0  ;;  %11649 = vrcp.f32 %v13462_v57 }
 0x69d   : > { %v13518_v18 = vpop.eup %11629  ;;  %11651 = vrcp.f32 %v13468_v6 }
 0x69e   : > { %v10419_v5 = vpop.f32.mrf.mxu0  ;;  %v13520_v30 = vpop.eup %11631  ;;  %v3118_v34 = vsel %vm2885_vm7, %v13518_v18, 0.0 }
 0x69f   : > { %3113 = vadd.xlane.f32.xlu0 %v3112_v51  ;;  %2960 = vmax.xlane.f32.xlu1 %v2959_v26  ;;  %v3121_v59 = vsel %vm2885_vm7, %v13520_v30, 0.0  ;;  %v9006_v26 = vld [vmem:[%s16663_s10 + $0x3] ss:$0 sm:$0xff] }
 0x6a0   : > { %v2644_v52 = vpop.f32.mrf.mxu0 }
 0x6a1   : > { %v13526_v47 = vpop.eup %11633 }
 0x6a2   : > { %v10420_v19 = vpop.f32.mrf.mxu0  ;;  %v3124_v3 = vsel %vm2885_vm7, %v13526_v47, 0.0  ;;  %v11636_v0 = vpop.eup %11635 }
 0x6a3   : > { %3116 = vadd.xlane.f32.xlu1 %v3115_v14  ;;  %2963 = vmax.xlane.f32.xlu0 %v2962_v60 }
 0x6a4   : > { %v2649_v25 = vpop.f32.mrf.mxu0 }
 0x6a5   : > { %v2650_v27 = vadd.f32 %v9006_v26, %v2649_v25 }
 0x6a6   : > { %v10423_v37 = vpop.f32.mrf.mxu0 }
 0x6a7   : > { %3119 = vadd.xlane.f32.xlu0 %v3118_v34  ;;  %2966 = vmax.xlane.f32.xlu1 %v2965_v2 }
 0x6a8   : > { %v2652_v53 = vpop.f32.mrf.mxu0 }
 0x6aa   : > { %v10424_v43 = vpop.f32.mrf.mxu0 }
 0x6ab   : > { %3122 = vadd.xlane.f32.xlu0 %v3121_v59  ;;  %3125 = vadd.xlane.f32.xlu1 %v3124_v3 }
 0x6ac   : > { %v2657_v42 = vpop.f32.mrf.mxu0 }
 0x6ad   : > { %v2658_v59 = vadd.f32 %v9006_v26, %v2657_v42  ;;  %v2637_v42 = vadd.f32 %v9006_v26, %v13500_v61 }
 0x6ae   : > { %v10427_v44 = vpop.f32.mrf.mxu0 }
 0x6af   : > { %v2653_v44 = vadd.f32 %v9006_v26, %v2652_v53  ;;  %v2634_v53 = vadd.f32 %v9006_v26, %v13490_v22  ;;  %v16862_v22 = vpack.c.bf16 %v13108_v23, %v13106_v58  ;;  %v16866_v58 = vld [vmem:[#allocation26_spill] sm:$0xff]  ;;  %v16867_v23 = vld [vmem:[#allocation25_spill] sm:$0xff] }
 0x6b0   : > { %v2660_v5 = vpop.f32.mrf.mxu0 }
 0x6b1   : > { %v2661_v2 = vadd.f32 %v9006_v26, %v2660_v5  ;;  %v2642_v5 = vadd.f32 %v9006_v26, %v2641_v41  ;;  %v2778_v25 = vpack.c.bf16 %v2637_v42, %v2634_v53  ;;  %v12018_v42 = vld [vmem:[%s16820_s27 + $0x3] ss:$0 sm:$0xff] }
 0x6b2   : > { %v10428_v51 = vpop.f32.mrf.mxu0 }
 0x6b3   : > { %v2781_v3 = vpack.c.bf16 %v2661_v2, %v2658_v59  ;;  %v2799_v41 = vsel %vm1528_vm6, %v2778_v25, 0  ;;  %v16869_v59 = vld [vmem:[#allocation24_spill] sm:$0xff]  ;;  %v11638_v25 = vpop.eup %11637 }
 0x6b4   : > { %v2665_v19 = vpop.f32.mrf.mxu0  ;;  %v11640_v45 = vpop.eup %11639 }
 0x6b5   : > { %v2666_v14 = vadd.f32 %v9006_v26, %v2665_v19  ;;  %v2808_v51 = vsel %vm1528_vm6, %v2781_v3, 0  ;;  %v2780_v19 = vpack.c.bf16 %v2653_v44, %v2650_v27  ;;  %v12017_v27 = vld [vmem:[%s16665_s12 + $0x1] ss:$0 sm:$0xff]  ;;  %v16873_v44 = vld [vmem:[#allocation37_spill] sm:$0xff]  ;;  %v11642_v33 = vpop.eup %11641 }
 0x6b6   : > { %v10431_v60 = vpop.f32.mrf.mxu0  ;;  %v16870_v3 = vld [vmem:[#allocation23_spill] sm:$0xff] }
 0x6b7   : > { %v2782_v37 = vpack.c.bf16 %v2666_v14, %v2666_v14  ;;  %v2645_v60 = vadd.f32 %v9006_v26, %v2644_v52  ;;  %v2805_v14 = vsel %vm1528_vm6, %v2780_v19, 0  ;;  %v1932_v52 = vadd.f32 %v12017_v27, %v13033_v20  ;;  %v16864_v26 = vld [vmem:[#allocation36_spill] sm:$0xff]  ;;  %v16876_v19 = vld [vmem:[#allocation21_spill] sm:$0xff] }
 0x6b8   : > { %v2668_v34 = vpop.f32.mrf.mxu0  ;;  %v16863_v20 = vpack.c.bf16 %v13025_v54, %v13023_v38  ;;  %v16865_v2 = vpack.c.bf16 %v13114_v63, %v16864_v26  ;;  %v16871_v38 = vpack.c.bf16 %v16869_v59, %v16870_v3  ;;  %v16872_v54 = vld [vmem:[#allocation38_spill] sm:$0xff]  ;;  %v3257_v27 = vmul.f32 %v11636_v0, %v13365_v24 }
 0x6b9   : > { %v2811_v43 = vsel %vm1528_vm6, %v2782_v37, 0  ;;  %v3399_v61 = vpack.c.bf16 %v1932_v52, %v1932_v52  ;;  %v16874_v63 = vpack.c.bf16 %v16872_v54, %v16873_v44  ;;  %v3256_v52 = vmul.f32 %v11638_v25, %v13356_v29  ;;  %v11644_v29 = vpop.eup %11643 }
 0x6ba   : > { %v10432_v50 = vpop.f32.mrf.mxu0  ;;  %10462 = vmatpush3.bf16.xpose.msra.mxu0 %v2811_v43  ;;  %v16868_v43 = vpack.c.bf16 %v16866_v58, %v16867_v23  ;;  %v3258_v24 = vmul.f32 %v11642_v33, %v13370_v4  ;;  %v11646_v39 = vpop.eup %11645 }
 0x6bb   : > { %10463 = vmatprep.subr.bf16.mxu0 %v16851_v12  ;;  %v2779_v50 = vpack.c.bf16 %v2645_v60, %v2642_v5  ;;  %v3416_v34 = vand.u32 %v3399_v61, %v12882_v49  ;;  %v16879_v5 = vld [vmem:[#allocation39_spill] sm:$0xff]  ;;  %v3259_v61 = vmul.f32 %v11640_v45, %v13379_v28  ;;  %v3260_v28 = vmul.f32 %v11646_v39, %v13384_v16  ;;  %v11648_v4 = vpop.eup %11647 }
 0x6bd   : > { %v2802_v37 = vsel %vm1528_vm6, %v2779_v50, 0  ;;  %v3391_v62 = vpack.c.bf16 %v3259_v61, %v3258_v24 }
 0x6c2   : > { %10464 = vmatpush3.bf16.xpose.msra.mxu0 %v2808_v51  ;;  %v16875_v51 = vld [vmem:[#allocation22_spill] sm:$0xff] }
 0x6c3   : > { %10465 = vmatprep.subr.bf16.mxu0 %v16851_v12  ;;  %v16877_v60 = vpack.c.bf16 %v16875_v51, %v16876_v19 }
 0x6ca   : > { %10466 = vmatpush3.bf16.xpose.msra.mxu0 %v2805_v14  ;;  %v16878_v14 = vld [vmem:[#allocation40_spill] sm:$0xff] }
 0x6cb   : > { %10467 = vmatprep.subr.bf16.mxu0 %v16851_v12  ;;  %v16880_v50 = vpack.c.bf16 %v16878_v14, %v16879_v5 }
 0x6d2   : > { %10468 = vmatpush3.bf16.xpose.msra.mxu0 %v2802_v37  ;;  %v16881_v37 = vld [vmem:[#allocation41_spill] sm:$0xff] }
 0x6d3   : > { %10469 = vmatprep.subr.bf16.mxu0 %v16851_v12  ;;  %v2564_v53 = vadd.f32 %v12018_v42, %v16881_v37 }
 0x6d5   : > { %v2777_v55 = vpack.c.bf16 %v2564_v53, %v2564_v53 }
 0x6da   : > { %10470 = vmatpush3.bf16.xpose.msra.mxu0 %v2799_v41  ;;  %v3390_v41 = vpack.c.bf16 %v3257_v27, %v3256_v52 }
 0x6db   : > { %10521 = vmatprep.subr.bf16.mxu0 %v16851_v12 }
 0x6e1   : > { %10472 = vmatmul.mubr.msk.bf16.vlgmr.msra.gmra.mxu0 %vm1528_vm6, %v16862_v22  ;;  %v13620_v22 = vpop.xlane.xlu0 %2912 }
 0x6e2   : > { %10522 = vmatpush3.bf16.msra.mxu0 %v3416_v34  ;;  %10475 = vmatprep.mubr.msk.bf16.mxu0 %vm12088_vm5, %v16851_v12  ;;  %v3261_v34 = vmul.f32 %v11644_v29, %v13392_v21  ;;  %v3263_v21 = vmul.f32 %v11648_v4, %v13404_v56 }
 0x6e3   : > { %10523 = vmatprep.subr.bf16.mxu0 %v16851_v12 }
 0x6e4   : > { %v3392_v57 = vpack.c.bf16 %v3261_v34, %v3260_v28 }
 0x6e6   : > { %10524 = vmatpush3.bf16.msra.mxu0 %v16863_v20 }
 0x6e7   : > { %10525 = vmatprep.subr.bf16.mxu0 %v16851_v12 }
 0x6e9   : > { %10476 = vmatmul.mubr.msk.bf16.gmra.mxu0 %vm1528_vm6, %v16865_v2  ;;  %v11650_v2 = vpop.eup %11649 }
 0x6ea   : > { %10526 = vmatpush3.bf16.msra.mxu0 %v16868_v43  ;;  %10479 = vmatprep.mubr.msk.bf16.mxu0 %vm12088_vm5, %v16851_v12  ;;  %v3262_v23 = vmul.f32 %v11650_v2, %v13396_v9  ;;  %v11652_v43 = vpop.eup %11651 }
 0x6eb   : > { %10527 = vmatprep.subr.bf16.mxu0 %v16851_v12 }
 0x6ec   : > { %v3393_v16 = vpack.c.bf16 %v3263_v21, %v3262_v23 }
 0x6ee   : > { %10528 = vmatpush3.bf16.msra.mxu0 %v16871_v38  ;;  %v3264_v38 = vmul.f32 %v11652_v43, %v13408_v40 }
 0x6ef   : > { %10529 = vmatprep.subr.bf16.mxu0 %v16851_v12 }
 0x6f0   : > { %v3394_v44 = vpack.c.bf16 %v3264_v38, %v3264_v38 }
 0x6f1   : > { %10480 = vmatmul.mubr.msk.bf16.gmra.mxu0 %vm1528_vm6, %v16874_v63 }
 0x6f2   : > { %10530 = vmatpush3.bf16.msra.mxu0 %v16877_v60  ;;  %10483 = vmatprep.mubr.msk.bf16.mxu0 %vm12088_vm5, %v16851_v12 }
 0x6f3   : > { %10573 = vmatprep.subr.bf16.mxu0 %v16851_v12 }
 0x6f7   : > { %v13622_v8 = vpop.xlane.xlu1 %2942 }
 0x6f8   : > { %v3013_v21 = vsub.f32 %v13434_v7, %v13622_v8 }
 0x6f9   : > { %10484 = vmatmul.mubr.msk.bf16.gmra.mxu0 %vm1528_vm6, %v16880_v50 }
 0x6fa   : > { %10487 = vmatprep.mubr.msk.bf16.mxu0 %vm12088_vm5, %v16851_v12 }
 0x6fb   : > { %v13625_v20 = vpop.xlane.xlu0 %2945 }
 0x6ff   : > { %v13627_v26 = vpop.xlane.xlu1 %2948 }
 0x700   : > { %v3015_v38 = vsub.f32 %v13450_v31, %v13627_v26 }
 0x701   : > { %10488 = vmatmul.mubr.msk.bf16.gmra.mxu0 %vm1528_vm6, %v2777_v55 }
 0x702   : > { %10531 = vmatprep.mubr.msk.bf16.mxu0 %vm12088_vm5, %v16851_v12 }
 0x703   : > { %v13633_v6 = vpop.xlane.xlu0 %2951 }
 0x704   : > { %v3016_v8 = vsub.f32 %v13458_v13, %v13633_v6 }
 0x706   : > { %v3073_v26 = vmul.f32 1.442695, %v3016_v8 }
 0x709   : > { %10532 = vmatmul.mubr.msk.bf16.vlgmr.msra.gmra.mxu0 %vm2885_vm7, %v3390_v41 }
 0x70a   : > { %10535 = vmatprep.mubr.msk.bf16.mxu0 %vm12088_vm5, %v16851_v12 }
 0x711   : > { %10536 = vmatmul.mubr.msk.bf16.gmra.mxu0 %vm2885_vm7, %v3391_v62 }
 0x712   : > { %10539 = vmatprep.mubr.msk.bf16.mxu0 %vm12088_vm5, %v16851_v12 }
 0x719   : > { %10540 = vmatmul.mubr.msk.bf16.gmra.mxu0 %vm2885_vm7, %v3392_v57 }
 0x71a   : > { %10543 = vmatprep.mubr.msk.bf16.mxu0 %vm12088_vm5, %v16851_v12 }
 0x71c   : > { %v3105_v58 = vpop.xlane.xlu1 %3104 }
 0x71d   : > { %11653 = vrcp.f32 %v3105_v58 }
 0x720   : > { %v3108_v59 = vpop.xlane.xlu0 %3107  ;;  %v13636_v3 = vpop.xlane.xlu1 %2954 }
 0x721   : > { %11655 = vrcp.f32 %v3108_v59  ;;  %10544 = vmatmul.mubr.msk.bf16.gmra.mxu0 %vm2885_vm7, %v3393_v16  ;;  %v3014_v16 = vsub.f32 %v13442_v10, %v13625_v20  ;;  %v3067_v59 = vmul.f32 1.442695, %v3013_v21  ;;  %v3017_v10 = vsub.f32 %v13466_v46, %v13636_v3 }
 0x722   : > { %10547 = vmatprep.mubr.msk.bf16.mxu0 %vm12088_vm5, %v16851_v12 }
 0x723   : > { %v3069_v7 = vmul.f32 1.442695, %v3014_v16  ;;  %v3075_v13 = vmul.f32 1.442695, %v3017_v10 }
 0x724   : > { %v3111_v56 = vpop.xlane.xlu1 %3110  ;;  %v13642_v54 = vpop.xlane.xlu0 %2957 }
 0x725   : > { %11657 = vrcp.f32 %v3111_v56 }
 0x728   : > { %v3114_v9 = vpop.xlane.xlu0 %3113  ;;  %v13644_v63 = vpop.xlane.xlu1 %2960 }
 0x729   : > { %10548 = vmatmul.mubr.msk.bf16.gmra.mxu0 %vm2885_vm7, %v3394_v44  ;;  %11659 = vrcp.f32 %v3114_v9  ;;  %v3019_v6 = vsub.f32 %v13475_v35, %v13644_v63 }
 0x72a   : > { %10575 = vmatprep.mubr.msk.bf16.mxu0 %vm12088_vm5, %v16851_v12  ;;  %v11654_v51 = vpop.eup %11653 }
 0x72b   : > { %v3247_v40 = vmul.f32 %v11654_v51, %v13484_v17  ;;  %v3071_v51 = vmul.f32 1.442695, %v3015_v38 }
 0x72c   : > { %v3117_v19 = vpop.xlane.xlu1 %3116  ;;  %v13649_v60 = vpop.xlane.xlu0 %2963 }
 0x72d   : > { %11661 = vrcp.f32 %v3117_v19  ;;  %v3018_v19 = vsub.f32 %v13471_v11, %v13642_v54  ;;  %v3079_v11 = vmul.f32 1.442695, %v3019_v6  ;;  %v16883_v54 = vld [vmem:[#allocation52_spill] sm:$0xff] }
 0x72e   : > { %v11656_v14 = vpop.eup %11655 }
 0x72f   : > { %v3248_v5 = vmul.f32 %v11656_v14, %v13492_v32 }
 0x730   : > { %v3120_v50 = vpop.xlane.xlu0 %3119  ;;  %v13653_v42 = vpop.xlane.xlu1 %2966 }
 0x731   : > { %v3283_v37 = vpack.c.bf16 %v3248_v5, %v3247_v40  ;;  %11663 = vrcp.f32 %v3120_v50  ;;  %v3077_v40 = vmul.f32 1.442695, %v3018_v19  ;;  %v16882_v5 = vld [vmem:[#allocation51_spill] sm:$0xff] }
 0x732   : > { %v11658_v0 = vpop.eup %11657  ;;  %v3020_v50 = vsub.f32 %v16882_v5, %v13649_v60 }
 0x733   : > { %10502 = vmatmul.mubr.msk.bf16.vlgmr.msra.gmra.mxu1 %vm2885_vm7, %v3283_v37  ;;  %v3249_v17 = vmul.f32 %v11658_v0, %v13498_v1 }
 0x734   : > { %v3123_v53 = vpop.xlane.xlu0 %3122  ;;  %v3126_v55 = vpop.xlane.xlu1 %3125  ;;  %10505 = vmatprep.mubr.msk.bf16.mxu1 %vm12088_vm5, %v16851_v12 }
 0x735   : > { %11665 = vrcp.f32 %v3123_v53  ;;  %v3021_v53 = vsub.f32 %v16883_v54, %v13653_v42 }
 0x736   : > { %v11660_v25 = vpop.eup %11659  ;;  %11667 = vrcp.f32 %v3126_v55  ;;  %v3081_v55 = vmul.f32 1.442695, %v3020_v50 }
 0x737   : > { %v3250_v32 = vmul.f32 %v11660_v25, %v13506_v36  ;;  %v3083_v25 = vmul.f32 1.442695, %v3021_v53 }
 0x739   : > { %v3284_v27 = vpack.c.bf16 %v3250_v32, %v3249_v17 }
 0x73a   : > { %v11662_v52 = vpop.eup %11661 }
 0x73b   : > { %10506 = vmatmul.mubr.msk.bf16.gmra.mxu1 %vm2885_vm7, %v3284_v27  ;;  %v3251_v45 = vmul.f32 %v11662_v52, %v13512_v48  ;;  %v11467_v48 = vld [vmem:[%s16666_s13] sm:$0xff]  }
 0x73c   : > { %10509 = vmatprep.mubr.msk.bf16.mxu1 %vm12088_vm5, %v16851_v12  ;;  %10574 = vmatpush3.bf16.msra.mxu0 %v11467_v48  ;;  %v11468_v48 = vld [vmem:[%s16666_s13 + $0x8] sm:$0xff]  }
 0x73d   : > { %10625 = vmatprep.subr.bf16.mxu0 %v16851_v12  ;;  %10552 = vmatpush3.bf16.msra.mxu1 %v11468_v48 }
 0x73e   : > { %v11664_v41 = vpop.eup %11663  ;;  %10595 = vmatprep.subr.bf16.mxu1 %v16851_v12 }
 0x73f   : > { %v3252_v33 = vmul.f32 %v11664_v41, %v13518_v18  ;;  %v3003_v18 = vsub.f32 %v13167_v15, %v13620_v22 }
 0x741   : > { %v3285_v61 = vpack.c.bf16 %v3252_v33, %v3251_v45  ;;  %v3047_v39 = vmul.f32 1.442695, %v3003_v18 }
 0x742   : > { %v11666_v24 = vpop.eup %11665 }
 0x743   : > { %v11668_v62 = vpop.eup %11667  ;;  %10510 = vmatmul.mubr.msk.bf16.gmra.mxu1 %vm2885_vm7, %v3285_v61  ;;  %v3253_v1 = vmul.f32 %v11666_v24, %v13520_v30  ;;  %11669 = vpow2.f32 %v3047_v39 }
 0x744   : > { %10513 = vmatprep.mubr.msk.bf16.mxu1 %vm12088_vm5, %v16851_v12  ;;  %v3254_v36 = vmul.f32 %v11668_v62, %v13526_v47  ;;  %11671 = vpow2.f32 %v3067_v59 }
 0x745   : > { %11673 = vpow2.f32 %v3069_v7 }
 0x746   : > { %v3286_v29 = vpack.c.bf16 %v3254_v36, %v3253_v1  ;;  %11675 = vpow2.f32 %v3071_v51 }
 0x747   : > { %11677 = vpow2.f32 %v3073_v26 }
 0x748   : > { %11679 = vpow2.f32 %v3075_v13 }
 0x749   : > { %11681 = vpow2.f32 %v3077_v40 }
 0x74a   : > { %11683 = vpow2.f32 %v3079_v11 }
 0x74b   : > { %10514 = vmatmul.mubr.msk.bf16.gmra.mxu1 %vm2885_vm7, %v3286_v29  ;;  %11685 = vpow2.f32 %v3081_v55 }
 0x74c   : > { %10517 = vmatprep.mubr.msk.bf16.mxu1 %vm12088_vm5, %v16851_v12  ;;  %11687 = vpow2.f32 %v3083_v25 }
 0x750   : > { %v13683_v34 = vpop.eup %11669 }
 0x751   : > { %v3127_v4 = vsel %vm2910_vm8, %v13683_v34, 0.0  ;;  %v13733_v17 = vpop.eup %11671 }
 0x752   : > { %v13737_v27 = vpop.eup %11673  ;;  %v3157_v52 = vsel %vm2885_vm7, %v13733_v17, 0.0 }
 0x753   : > { %v13743_v45 = vpop.eup %11675  ;;  %v3160_v1 = vsel %vm2885_vm7, %v13737_v27, 0.0 }
 0x754   : > { %v13745_v24 = vpop.eup %11677  ;;  %v3163_v62 = vsel %vm2885_vm7, %v13743_v45, 0.0 }
 0x755   : > { %v13751_v36 = vpop.eup %11679 }
 0x756   : > { %v13758_v39 = vpop.eup %11681 }
 0x757   : > { %v3172_v16 = vsel %vm2885_vm7, %v13758_v39, 0.0 }
 0x7a1   : > { %v13679_v30 = vpop.f32.mrf.mxu0 }
 0x7a2   : > { %v2968_v47 = vsel %vm2885_vm7, %v13679_v30, -inf }
 0x7a3   : > { %2969 = vmax.xlane.f32.xlu0 %v2968_v47  ;;  %v10473_v28 = vpop.f32.mrf.mxu0  ;;  %v3169_v47 = vsel %vm2885_vm7, %v13751_v36, 0.0 }
 0x7a4   : > { %v3166_v28 = vsel %vm2885_vm7, %v13745_v24, 0.0 }
 0x7a5   : > { %v13685_v57 = vpop.f32.mrf.mxu0 }
 0x7a6   : > { %v2971_v2 = vsel %vm2885_vm7, %v13685_v57, -inf }
 0x7a7   : > { %3128 = vadd.xlane.f32.xlu0 %v3127_v4  ;;  %2972 = vmax.xlane.f32.xlu1 %v2971_v2  ;;  %v10474_v15 = vpop.f32.mrf.mxu0  ;;  %v13765_v4 = vpop.eup %11683 }
 0x7a8   : > { %v13769_v21 = vpop.eup %11685 }
 0x7a9   : > { %v13691_v22 = vpop.f32.mrf.mxu0  ;;  %v13777_v59 = vpop.eup %11687  ;;  %v3178_v7 = vsel %vm2885_vm7, %v13769_v21, 0.0 }
 0x7aa   : > { %v2974_v58 = vsel %vm2885_vm7, %v13691_v22, -inf }
 0x7ab   : > { %2975 = vmax.xlane.f32.xlu1 %v2974_v58  ;;  %v10477_v23 = vpop.f32.mrf.mxu0 }
 0x7ac   : > { %v3175_v23 = vsel %vm2885_vm7, %v13765_v4, 0.0 }
 0x7ad   : > { %v13699_v43 = vpop.f32.mrf.mxu0 }
 0x7ae   : > { %v2977_v56 = vsel %vm2885_vm7, %v13699_v43, -inf }
 0x7af   : > { %2978 = vmax.xlane.f32.xlu0 %v2977_v56  ;;  %v10478_v44 = vpop.f32.mrf.mxu0 }
 0x7b0   : > { %v3181_v44 = vsel %vm2910_vm8, %v13777_v59, 0.0 }
 0x7b1   : > { %v13707_v9 = vpop.f32.mrf.mxu0 }
 0x7b2   : > { %v2980_v20 = vsel %vm2885_vm7, %v13707_v9, -inf }
 0x7b3   : > { %2981 = vmax.xlane.f32.xlu1 %v2980_v20  ;;  %v10481_v31 = vpop.f32.mrf.mxu0 }
 0x7b5   : > { %v13715_v14 = vpop.f32.mrf.mxu0 }
 0x7b6   : > { %v2983_v46 = vsel %vm2885_vm7, %v13715_v14, -inf }
 0x7b7   : > { %2984 = vmax.xlane.f32.xlu0 %v2983_v46  ;;  %v10482_v3 = vpop.f32.mrf.mxu0 }
 0x7b9   : > { %v13723_v37 = vpop.f32.mrf.mxu0 }
 0x7ba   : > { %v2986_v35 = vsel %vm2885_vm7, %v13723_v37, -inf }
 0x7bb   : > { %2987 = vmax.xlane.f32.xlu1 %v2986_v35  ;;  %v10485_v63 = vpop.f32.mrf.mxu0 }
 0x7bd   : > { %v13729_v0 = vpop.f32.mrf.mxu0 }
 0x7be   : > { %v2989_v60 = vsel %vm2885_vm7, %v13729_v0, -inf }
 0x7bf   : > { %2990 = vmax.xlane.f32.xlu0 %v2989_v60  ;;  %v10486_v32 = vpop.f32.mrf.mxu0 }
 0x7c1   : > { %v13735_v42 = vpop.f32.mrf.mxu0 }
 0x7c2   : > { %v2992_v41 = vsel %vm2910_vm8, %v13735_v42, -inf }
 0x7c3   : > { %3158 = vadd.xlane.f32.xlu0 %v3157_v52  ;;  %2993 = vmax.xlane.f32.xlu1 %v2992_v41  ;;  %v10489_v33 = vpop.f32.mrf.mxu0 }
 0x7c5   : > { %v2882_v61 = vpop.f32.mrf.mxu0 }
 0x7c7   : > { %3164 = vadd.xlane.f32.xlu0 %v3163_v62  ;;  %3161 = vadd.xlane.f32.xlu1 %v3160_v1  ;;  %v10490_v29 = vpop.f32.mrf.mxu0 }
 0x7c9   : > { %v13756_v18 = vpop.f32.mrf.mxu0 }
 0x7cb   : > { %3170 = vadd.xlane.f32.xlu0 %v3169_v47  ;;  %3167 = vadd.xlane.f32.xlu1 %v3166_v28  ;;  %v10533_v2 = vpop.f32.mrf.mxu0 }
 0x7cd   : > { %v13767_v15 = vpop.f32.mrf.mxu0 }
 0x7ce   : > { %v3490_v58 = vpack.c.bf16 %v13767_v15, %v13756_v18  ;;  %v16885_v18 = vld [vmem:[#allocation34_spill] sm:$0xff]  ;;  %v16886_v15 = vld [vmem:[#allocation33_spill] sm:$0xff] }
 0x7cf   : > { %3176 = vadd.xlane.f32.xlu0 %v3175_v23  ;;  %3173 = vadd.xlane.f32.xlu1 %v3172_v16  ;;  %v10534_v38 = vpop.f32.mrf.mxu0 }
 0x7d1   : > { %v13779_v56 = vpop.f32.mrf.mxu0 }
 0x7d3   : > { %3182 = vadd.xlane.f32.xlu0 %v3181_v44  ;;  %3179 = vadd.xlane.f32.xlu1 %v3178_v7  ;;  %v10537_v8 = vpop.f32.mrf.mxu0 }
 0x7d5   : > { %v13785_v51 = vpop.f32.mrf.mxu0 }
 0x7d6   : > { %v3491_v10 = vpack.c.bf16 %v13785_v51, %v13779_v56  ;;  %v16892_v56 = vld [vmem:[#allocation29_spill] sm:$0xff] }
 0x7d7   : > { %v10538_v20 = vpop.f32.mrf.mxu0 }
 0x7d9   : > { %v13789_v31 = vpop.f32.mrf.mxu0 }
 0x7db   : > { %v10541_v26 = vpop.f32.mrf.mxu0 }
 0x7dd   : > { %v13791_v19 = vpop.f32.mrf.mxu0 }
 0x7de   : > { %v3492_v13 = vpack.c.bf16 %v13791_v19, %v13789_v31 }
 0x7df   : > { %v10542_v6 = vpop.f32.mrf.mxu0 }
 0x7e1   : > { %v13795_v46 = vpop.f32.mrf.mxu0 }
 0x7e3   : > { %v10545_v3 = vpop.f32.mrf.mxu0 }
 0x7e5   : > { %v13797_v40 = vpop.f32.mrf.mxu0 }
 0x7e6   : > { %v3493_v5 = vpack.c.bf16 %v13797_v40, %v13795_v46 }
 0x7e7   : > { %v10546_v50 = vpop.f32.mrf.mxu0 }
 0x7e9   : > { %v13801_v11 = vpop.f32.mrf.mxu0 }
 0x7eb   : > { %v10549_v54 = vpop.f32.mrf.mxu0 }
 0x7ed   : > { %v3487_v53 = vpop.f32.mrf.mxu0 }
 0x7ef   : > { %v10550_v35 = vpop.f32.mrf.mxu0 }
 0x7f3   : > { %v3347_v63 = vpop.f32.mrf.mxu1 }
 0x7f5   : > { %v10503_v55 = vpop.f32.mrf.mxu1 }
 0x7f7   : > { %v3350_v25 = vpop.f32.mrf.mxu1 }
 0x7f8   : > { %v3385_v60 = vpack.c.bf16 %v3350_v25, %v3347_v63 }
 0x7f9   : > { %v10504_v32 = vpop.f32.mrf.mxu1 }
 0x7fa   : > { %10576 = vmatmul.mubr.msk.bf16.vlgmr.msra.gmra.mxu0 %vm1528_vm6, %v3385_v60 }
 0x7fb   : > { %10579 = vmatprep.mubr.msk.bf16.mxu0 %vm12088_vm5, %v16851_v12  ;;  %v3355_v52 = vpop.f32.mrf.mxu1 }
 0x7fd   : > { %v10507_v41 = vpop.f32.mrf.mxu1 }
 0x7ff   : > { %v3358_v33 = vpop.f32.mrf.mxu1 }
 0x800   : > { %v3386_v61 = vpack.c.bf16 %v3358_v33, %v3355_v52 }
 0x801   : > { %v10508_v62 = vpop.f32.mrf.mxu1 }
 0x802   : > { %10580 = vmatmul.mubr.msk.bf16.gmra.mxu0 %vm1528_vm6, %v3386_v61 }
 0x803   : > { %v3363_v1 = vpop.f32.mrf.mxu1  ;;  %10583 = vmatprep.mubr.msk.bf16.mxu0 %vm12088_vm5, %v16851_v12 }
 0x805   : > { %v10511_v29 = vpop.f32.mrf.mxu1 }
 0x807   : > { %v3366_v48 = vpop.f32.mrf.mxu1 }
 0x808   : > { %v3387_v47 = vpack.c.bf16 %v3366_v48, %v3363_v1  ;;  %v16884_v1 = vld [vmem:[#allocation35_spill] sm:$0xff] }
 0x809   : > { %v10512_v28 = vpop.f32.mrf.mxu1 }
 0x80a   : > { %10584 = vmatmul.mubr.msk.bf16.gmra.mxu0 %vm1528_vm6, %v3387_v47 }
 0x80b   : > { %v3371_v2 = vpop.f32.mrf.mxu1  ;;  %10587 = vmatprep.mubr.msk.bf16.mxu0 %vm12088_vm5, %v16851_v12 }
 0x80d   : > { %v10515_v23 = vpop.f32.mrf.mxu1 }
 0x80f   : > { %v3374_v16 = vpop.f32.mrf.mxu1 }
 0x810   : > { %v3388_v38 = vpack.c.bf16 %v3374_v16, %v3371_v2 }
 0x811   : > { %v10516_v44 = vpop.f32.mrf.mxu1 }
 0x812   : > { %10588 = vmatmul.mubr.msk.bf16.gmra.mxu0 %vm1528_vm6, %v3388_v38 }
 0x813   : > { %10591 = vmatprep.mubr.msk.bf16.mxu0 %vm12088_vm5, %v16851_v12 }
 0x82c   : > { %v2970_v7 = vpop.xlane.xlu0 %2969 }
 0x82d   : > { %v3022_v8 = vsub.f32 %v13679_v30, %v2970_v7 }
 0x82f   : > { %v3085_v20 = vmul.f32 1.442695, %v3022_v8 }
 0x830   : > { %v3129_v26 = vpop.xlane.xlu0 %3128  ;;  %v2973_v6 = vpop.xlane.xlu1 %2972 }
 0x831   : > { %11689 = vpow2.f32 %v3085_v20  ;;  %v3023_v3 = vsub.f32 %v13685_v57, %v2973_v6 }
 0x832   : > { %11691 = vrcp.f32 %v3129_v26 }
 0x833   : > { %v3087_v50 = vmul.f32 1.442695, %v3023_v3 }
 0x834   : > { %v2976_v54 = vpop.xlane.xlu1 %2975 }
 0x835   : > { %11693 = vpow2.f32 %v3087_v50  ;;  %v3024_v53 = vsub.f32 %v13691_v22, %v2976_v54 }
 0x837   : > { %v3089_v35 = vmul.f32 1.442695, %v3024_v53  ;;  %v16888_v53 = vld [vmem:[#allocation32_spill] sm:$0xff] }
 0x838   : > { %v2979_v63 = vpop.xlane.xlu0 %2978 }
 0x839   : > { %11695 = vpow2.f32 %v3089_v35  ;;  %v3025_v55 = vsub.f32 %v13699_v43, %v2979_v63  ;;  %v16889_v35 = vld [vmem:[#allocation31_spill] sm:$0xff] }
 0x83a   : > { %v16890_v63 = vpack.c.bf16 %v16888_v53, %v16889_v35  ;;  %v16905_v53 = vld [vmem:[#allocation44_spill] sm:$0xff] }
 0x83b   : > { %v3091_v25 = vmul.f32 1.442695, %v3025_v55 }
 0x83c   : > { %v2982_v60 = vpop.xlane.xlu1 %2981 }
 0x83d   : > { %11697 = vpow2.f32 %v3091_v25  ;;  %v3026_v30 = vsub.f32 %v13707_v9, %v2982_v60  ;;  %v12019_v9 = vld [vmem:[%s16665_s12 + $0x2] ss:$0 sm:$0xff]  ;;  %v16891_v60 = vld [vmem:[#allocation30_spill] sm:$0xff] }
 0x83e   : > { %v13820_v32 = vpop.eup %11689  ;;  %v2350_v29 = vadd.f32 %v12019_v9, %v16884_v1  ;;  %v16893_v51 = vpack.c.bf16 %v16891_v60, %v16892_v56  ;;  %v12020_v1 = vld [vmem:[%s16665_s12 + $0x3] ss:$0 sm:$0xff]  ;;  %v16907_v56 = vld [vmem:[#allocation43_spill] sm:$0xff] }
 0x83f   : > { %v11692_v52 = vpop.eup %11691  ;;  %v3093_v57 = vmul.f32 1.442695, %v3026_v30  ;;  %v3184_v41 = vsel %vm2885_vm7, %v13820_v32, 0.0 }
 0x840   : > { %v2985_v33 = vpop.xlane.xlu0 %2984  ;;  %3185 = vadd.xlane.f32.xlu1 %v3184_v41  ;;  %v3255_v22 = vmul.f32 %v11692_v52, %v13683_v34  ;;  %v3690_v2 = vpack.c.bf16 %v2350_v29, %v2350_v29  ;;  %v16894_v41 = vld [vmem:[#allocation28_spill] sm:$0xff]  ;;  %v16897_v29 = vld [vmem:[#allocation50_spill] sm:$0xff] }
 0x841   : > { %11699 = vpow2.f32 %v3093_v57  ;;  %v3027_v61 = vsub.f32 %v13715_v14, %v2985_v33  ;;  %v16895_v33 = vld [vmem:[#allocation27_spill] sm:$0xff] }
 0x842   : > { %v13826_v43 = vpop.eup %11693  ;;  %v3287_v62 = vpack.c.bf16 %v3255_v22, %v3255_v22  ;;  %v3707_v8 = vand.u32 %v3690_v2, %v12882_v49  ;;  %v16896_v22 = vpack.c.bf16 %v16894_v41, %v16895_v33 }
 0x843   : > { %v3095_v48 = vmul.f32 1.442695, %v3027_v61  ;;  %v3187_v47 = vsel %vm2885_vm7, %v13826_v43, 0.0 }
 0x844   : > { %10518 = vmatmul.mubr.msk.bf16.gmra.mxu1 %vm2885_vm7, %v3287_v62  ;;  %v2988_v28 = vpop.xlane.xlu1 %2987  ;;  %3188 = vadd.xlane.f32.xlu0 %v3187_v47 }
 0x845   : > { %11701 = vpow2.f32 %v3095_v48  ;;  %v3028_v34 = vsub.f32 %v13723_v37, %v2988_v28  ;;  %10553 = vmatprep.mubr.msk.bf16.mxu1 %vm12088_vm5, %v16851_v12  ;;  %v2768_v48 = vadd.f32 %v12020_v1, %v16897_v29 }
 0x846   : > { %v13838_v14 = vpop.eup %11695 }
 0x847   : > { %v3097_v23 = vmul.f32 1.442695, %v3028_v34  ;;  %v3190_v16 = vsel %vm2885_vm7, %v13838_v14, 0.0  ;;  %v3897_v28 = vpack.c.bf16 %v2768_v48, %v2768_v48 }
 0x848   : > { %v2991_v38 = vpop.xlane.xlu0 %2990  ;;  %3191 = vadd.xlane.f32.xlu1 %v3190_v16 }
 0x849   : > { %11703 = vpow2.f32 %v3097_v23  ;;  %v3029_v44 = vsub.f32 %v13729_v0, %v2991_v38  ;;  %v3914_v23 = vand.u32 %v3897_v28, %v12882_v49 }
 0x84a   : > { %v13843_v7 = vpop.eup %11697 }
 0x84b   : > { %v3099_v37 = vmul.f32 1.442695, %v3029_v44  ;;  %v3193_v20 = vsel %vm2885_vm7, %v13843_v7, 0.0 }
 0x84c   : > { %10554 = vmatmul.mubr.msk.bf16.vlgmr.msra.gmra.mxu1 %vm1528_vm6, %v3490_v58  ;;  %3194 = vadd.xlane.f32.xlu0 %v3193_v20  ;;  %v2994_v26 = vpop.xlane.xlu1 %2993  ;;  %v16887_v58 = vpack.c.bf16 %v16885_v18, %v16886_v15  ;;  %v3159_v57 = vpop.xlane.xlu0 %3158  ;;  %v16901_v18 = vld [vmem:[#allocation47_spill] sm:$0xff]  ;;  %v16902_v15 = vld [vmem:[#allocation46_spill] sm:$0xff] }
 0x84d   : > { %11705 = vpow2.f32 %v3099_v37  ;;  %10596 = vmatpush3.bf16.msra.mxu1 %v3707_v8  ;;  %v3030_v6 = vsub.f32 %v13735_v42, %v2994_v26  ;;  %10557 = vmatprep.mubr.msk.bf16.mxu1 %vm12088_vm5, %v16851_v12  ;;  %v16898_v8 = vld [vmem:[#allocation49_spill] sm:$0xff]  ;;  %v16899_v37 = vld [vmem:[#allocation48_spill] sm:$0xff] }
 0x84e   : > { %v13855_v0 = vpop.eup %11699  ;;  %10597 = vmatprep.subr.bf16.mxu1 %v16851_v12  ;;  %v16900_v20 = vpack.c.bf16 %v16898_v8, %v16899_v37 }
 0x84f   : > { %v3101_v3 = vmul.f32 1.442695, %v3030_v6  ;;  %v3196_v50 = vsel %vm2885_vm7, %v13855_v0, 0.0 }
 0x850   : > { %3197 = vadd.xlane.f32.xlu1 %v3196_v50  ;;  %v3162_v30 = vpop.xlane.xlu1 %3161  ;;  %v3165_v19 = vpop.xlane.xlu0 %3164 }
 0x851   : > { %11707 = vpow2.f32 %v3101_v3  ;;  %10598 = vmatpush3.bf16.msra.mxu1 %v16887_v58  ;;  %v16903_v58 = vpack.c.bf16 %v16901_v18, %v16902_v15 }
 0x852   : > { %v13863_v54 = vpop.eup %11701  ;;  %10599 = vmatprep.subr.bf16.mxu1 %v16851_v12  ;;  %11709 = vrcp.f32 %v3162_v30 }
 0x853   : > { %v3199_v42 = vsel %vm2885_vm7, %v13863_v54, 0.0  ;;  %11711 = vrcp.f32 %v3159_v57 }
 0x854   : > { %10558 = vmatmul.mubr.msk.bf16.gmra.mxu1 %vm1528_vm6, %v3491_v10  ;;  %3200 = vadd.xlane.f32.xlu0 %v3199_v42  ;;  %v3168_v31 = vpop.xlane.xlu1 %3167  ;;  %v3171_v40 = vpop.xlane.xlu0 %3170  ;;  %v16904_v42 = vld [vmem:[#allocation45_spill] sm:$0xff] }
 0x855   : > { %10600 = vmatpush3.bf16.msra.mxu1 %v16890_v63  ;;  %10561 = vmatprep.mubr.msk.bf16.mxu1 %vm12088_vm5, %v16851_v12  ;;  %11713 = vrcp.f32 %v3168_v31  ;;  %v16906_v35 = vpack.c.bf16 %v16904_v42, %v16905_v53 }
 0x856   : > { %v13877_v55 = vpop.eup %11703  ;;  %10601 = vmatprep.subr.bf16.mxu1 %v16851_v12  ;;  %11715 = vrcp.f32 %v3165_v19 }
 0x857   : > { %v3202_v25 = vsel %vm2885_vm7, %v13877_v55, 0.0 }
 0x858   : > { %3203 = vadd.xlane.f32.xlu1 %v3202_v25  ;;  %v3174_v47 = vpop.xlane.xlu1 %3173  ;;  %v3177_v44 = vpop.xlane.xlu0 %3176 }
 0x859   : > { %10602 = vmatpush3.bf16.msra.mxu1 %v16893_v51  ;;  %11717 = vrcp.f32 %v3174_v47  ;;  %v16908_v51 = vld [vmem:[#allocation42_spill] sm:$0xff] }
 0x85a   : > { %v13885_v10 = vpop.eup %11705  ;;  %10603 = vmatprep.subr.bf16.mxu1 %v16851_v12  ;;  %11719 = vrcp.f32 %v3171_v40  ;;  %v16909_v30 = vpack.c.bf16 %v16907_v56, %v16908_v51 }
 0x85b   : > { %v3205_v52 = vsel %vm2885_vm7, %v13885_v10, 0.0 }
 0x85c   : > { %10562 = vmatmul.mubr.msk.bf16.gmra.mxu1 %vm1528_vm6, %v3492_v13  ;;  %3206 = vadd.xlane.f32.xlu0 %v3205_v52  ;;  %v3494_v13 = vpack.c.bf16 %v13801_v11, %v13801_v11  ;;  %v3180_v16 = vpop.xlane.xlu1 %3179  ;;  %v3183_v3 = vpop.xlane.xlu0 %3182 }
 0x85d   : > { %10604 = vmatpush3.bf16.msra.mxu1 %v16896_v22  ;;  %10565 = vmatprep.mubr.msk.bf16.mxu1 %vm12088_vm5, %v16851_v12  ;;  %11721 = vrcp.f32 %v3180_v16 }
 0x85e   : > { %v13899_v61 = vpop.eup %11707  ;;  %10647 = vmatprep.subr.bf16.mxu1 %v16851_v12  ;;  %11723 = vrcp.f32 %v3177_v44 }
 0x85f   : > { %v3208_v62 = vsel %vm2910_vm8, %v13899_v61, 0.0  ;;  %v11710_v9 = vpop.eup %11709  ;;  %11725 = vrcp.f32 %v3183_v3 }
 0x860   : > { %3209 = vadd.xlane.f32.xlu1 %v3208_v62  ;;  %v11712_v46 = vpop.eup %11711 }
 0x861   : > { %v3265_v11 = vmul.f32 %v11712_v46, %v13733_v17 }
 0x862   : > { %v11714_v2 = vpop.eup %11713 }
 0x863   : > { %v11716_v38 = vpop.eup %11715 }
 0x864   : > { %10566 = vmatmul.mubr.msk.bf16.gmra.mxu1 %vm1528_vm6, %v3493_v5  ;;  %v3266_v5 = vmul.f32 %v11710_v9, %v13737_v27  ;;  %v3268_v27 = vmul.f32 %v11714_v2, %v13745_v24  ;;  %v3267_v17 = vmul.f32 %v11716_v38, %v13743_v45 }
 0x865   : > { %10569 = vmatprep.mubr.msk.bf16.mxu1 %vm12088_vm5, %v16851_v12 }
 0x866   : > { %v3681_v34 = vpack.c.bf16 %v3266_v5, %v3265_v11  ;;  %v3682_v26 = vpack.c.bf16 %v3268_v27, %v3267_v17  ;;  %v11718_v6 = vpop.eup %11717 }
 0x867   : > { %v11720_v50 = vpop.eup %11719  ;;  %v3270_v45 = vmul.f32 %v11718_v6, %v13758_v39 }
 0x868   : > { %v3269_v24 = vmul.f32 %v11720_v50, %v13751_v36 }
 0x86a   : > { %v3683_v63 = vpack.c.bf16 %v3270_v45, %v3269_v24  ;;  %v11722_v25 = vpop.eup %11721 }
 0x86b   : > { %v11724_v60 = vpop.eup %11723  ;;  %v3272_v36 = vmul.f32 %v11722_v25, %v13769_v21  ;;  %v11469_v21 = vld [vmem:[%s16666_s13 + $0x10] sm:$0xff]  }
 0x86c   : > { %10570 = vmatmul.mubr.msk.bf16.gmra.mxu1 %vm1528_vm6, %v3494_v13  ;;  %v3271_v39 = vmul.f32 %v11724_v60, %v13765_v4  ;;  %v11726_v57 = vpop.eup %11725  ;;  %10626 = vmatpush3.bf16.msra.mxu0 %v11469_v21  ;;  %v16910_v60 = vmov 0  }
 0x86d   : > { %10605 = vmatprep.mubr.msk.bf16.mxu1 %vm12088_vm5, %v16851_v12  ;;  %v3273_v41 = vmul.f32 %v11726_v57, %v13777_v59  ;;  %10677 = vmatprep.subr.bf16.mxu0 %v16851_v12 }
 0x86e   : > { %v3684_v52 = vpack.c.bf16 %v3272_v36, %v3271_v39 }
 0x86f   : > { %v3685_v33 = vpack.c.bf16 %v3273_v41, %v3273_v41 }
 0x874   : > { %10606 = vmatmul.mubr.msk.bf16.vlgmr.msra.gmra.mxu1 %vm2885_vm7, %v3681_v34 }
 0x875   : > { %10648 = vmatpush3.bf16.msra.mxu1 %v3914_v23  ;;  %10609 = vmatprep.mubr.msk.bf16.mxu1 %vm12088_vm5, %v16851_v12 }
 0x876   : > { %10649 = vmatprep.subr.bf16.mxu1 %v16851_v12 }
 0x879   : > { %10650 = vmatpush3.bf16.msra.mxu1 %v16900_v20 }
 0x87a   : > { %10651 = vmatprep.subr.bf16.mxu1 %v16851_v12 }
 0x87c   : > { %10610 = vmatmul.mubr.msk.bf16.gmra.mxu1 %vm2885_vm7, %v3682_v26 }
 0x87d   : > { %10652 = vmatpush3.bf16.msra.mxu1 %v16903_v58  ;;  %10613 = vmatprep.mubr.msk.bf16.mxu1 %vm12088_vm5, %v16851_v12 }
 0x87e   : > { %10653 = vmatprep.subr.bf16.mxu1 %v16851_v12 }
 0x881   : > { %10654 = vmatpush3.bf16.msra.mxu1 %v16906_v35 }
 0x882   : > { %10655 = vmatprep.subr.bf16.mxu1 %v16851_v12 }
 0x884   : > { %10614 = vmatmul.mubr.msk.bf16.gmra.mxu1 %vm2885_vm7, %v3683_v63 }
 0x885   : > { %10656 = vmatpush3.bf16.msra.mxu1 %v16909_v30  ;;  %10617 = vmatprep.mubr.msk.bf16.mxu1 %vm12088_vm5, %v16851_v12 }
 0x88c   : > { %10618 = vmatmul.mubr.msk.bf16.gmra.mxu1 %vm2885_vm7, %v3684_v52 }
 0x88d   : > { %10621 = vmatprep.mubr.msk.bf16.mxu1 %vm12088_vm5, %v16851_v12 }
 0x894   : > { %10622 = vmatmul.mubr.msk.bf16.gmra.mxu1 %vm2885_vm7, %v3685_v33 }
 0x895   : > { %10657 = vmatprep.mubr.msk.bf16.mxu1 %vm12088_vm5, %v16851_v12 }
 0x8ba   : > { %v13963_v4 = vpop.f32.mrf.mxu0 }
 0x8bc   : > { %v10577_v22 = vpop.f32.mrf.mxu0 }
 0x8be   : > { %v13966_v62 = vpop.f32.mrf.mxu0 }
 0x8c0   : > { %v10578_v31 = vpop.f32.mrf.mxu0 }
 0x8c2   : > { %v13968_v59 = vpop.f32.mrf.mxu0 }
 0x8c4   : > { %v10581_v19 = vpop.f32.mrf.mxu0 }
 0x8c6   : > { %v13970_v13 = vpop.f32.mrf.mxu0 }
 0x8c8   : > { %v10582_v9 = vpop.f32.mrf.mxu0 }
 0x8c9   : > { %v3186_v1 = vpop.xlane.xlu1 %3185 }
 0x8ca   : > { %v13972_v29 = vpop.f32.mrf.mxu0  ;;  %11727 = vrcp.f32 %v3186_v1 }
 0x8cc   : > { %v10585_v48 = vpop.f32.mrf.mxu0 }
 0x8cd   : > { %v3189_v47 = vpop.xlane.xlu0 %3188 }
 0x8ce   : > { %11729 = vrcp.f32 %v3189_v47  ;;  %v13974_v46 = vpop.f32.mrf.mxu0 }
 0x8d0   : > { %v10586_v40 = vpop.f32.mrf.mxu0 }
 0x8d1   : > { %v3192_v5 = vpop.xlane.xlu1 %3191 }
 0x8d2   : > { %v13976_v28 = vpop.f32.mrf.mxu0  ;;  %11731 = vrcp.f32 %v3192_v5 }
 0x8d4   : > { %v10589_v11 = vpop.f32.mrf.mxu0 }
 0x8d5   : > { %v3195_v34 = vpop.xlane.xlu0 %3194 }
 0x8d6   : > { %11733 = vrcp.f32 %v3195_v34  ;;  %v13978_v2 = vpop.f32.mrf.mxu0 }
 0x8d7   : > { %v11728_v23 = vpop.eup %11727 }
 0x8d8   : > { %v10590_v16 = vpop.f32.mrf.mxu0  ;;  %v3274_v27 = vmul.f32 %v11728_v23, %v13820_v32 }
 0x8d9   : > { %v3198_v38 = vpop.xlane.xlu1 %3197 }
 0x8da   : > { %11735 = vrcp.f32 %v3198_v38 }
 0x8db   : > { %v11730_v44 = vpop.eup %11729 }
 0x8dc   : > { %v3275_v17 = vmul.f32 %v11730_v44, %v13826_v43 }
 0x8dd   : > { %v3201_v8 = vpop.xlane.xlu0 %3200 }
 0x8de   : > { %v3888_v37 = vpack.c.bf16 %v3275_v17, %v3274_v27  ;;  %11737 = vrcp.f32 %v3201_v8  ;;  %v11470_v27 = vld [vmem:[%s16666_s13 + $0x18] sm:$0xff]  }
 0x8df   : > { %v11732_v20 = vpop.eup %11731 }
 0x8e0   : > { %10658 = vmatmul.mubr.msk.bf16.vlgmr.msra.gmra.mxu1 %vm2885_vm7, %v3888_v37  ;;  %v3276_v3 = vmul.f32 %v11732_v20, %v13838_v14 }
 0x8e1   : > { %v3204_v26 = vpop.xlane.xlu1 %3203  ;;  %10661 = vmatprep.mubr.msk.bf16.mxu1 %vm12088_vm5, %v16851_v12 }
 0x8e2   : > { %11739 = vrcp.f32 %v3204_v26 }
 0x8e3   : > { %v11734_v6 = vpop.eup %11733 }
 0x8e4   : > { %v3277_v50 = vmul.f32 %v11734_v6, %v13843_v7 }
 0x8e5   : > { %v3207_v32 = vpop.xlane.xlu0 %3206 }
 0x8e6   : > { %11741 = vrcp.f32 %v3207_v32  ;;  %v3889_v43 = vpack.c.bf16 %v3277_v50, %v3276_v3 }
 0x8e7   : > { %v11736_v18 = vpop.eup %11735 }
 0x8e8   : > { %10662 = vmatmul.mubr.msk.bf16.gmra.mxu1 %vm2885_vm7, %v3889_v43  ;;  %v3278_v45 = vmul.f32 %v11736_v18, %v13855_v0 }
 0x8e9   : > { %v3210_v15 = vpop.xlane.xlu1 %3209  ;;  %10665 = vmatprep.mubr.msk.bf16.mxu1 %vm12088_vm5, %v16851_v12 }
 0x8ea   : > { %11743 = vrcp.f32 %v3210_v15 }
 0x8eb   : > { %v11738_v58 = vpop.eup %11737 }
 0x8ec   : > { %v3279_v24 = vmul.f32 %v11738_v58, %v13863_v54 }
 0x8ee   : > { %v3890_v42 = vpack.c.bf16 %v3279_v24, %v3278_v45 }
 0x8ef   : > { %v11740_v14 = vpop.eup %11739 }
 0x8f0   : > { %10666 = vmatmul.mubr.msk.bf16.gmra.mxu1 %vm2885_vm7, %v3890_v42  ;;  %v3280_v53 = vmul.f32 %v11740_v14, %v13877_v55 }
 0x8f1   : > { %10669 = vmatprep.mubr.msk.bf16.mxu1 %vm12088_vm5, %v16851_v12 }
 0x8f3   : > { %v11742_v7 = vpop.eup %11741 }
 0x8f4   : > { %v3281_v35 = vmul.f32 %v11742_v7, %v13885_v10 }
 0x8f6   : > { %v3891_v63 = vpack.c.bf16 %v3281_v35, %v3280_v53 }
 0x8f7   : > { %v11744_v25 = vpop.eup %11743 }
 0x8f8   : > { %10670 = vmatmul.mubr.msk.bf16.gmra.mxu1 %vm2885_vm7, %v3891_v63  ;;  %v3282_v0 = vmul.f32 %v11744_v25, %v13899_v61 }
 0x8f9   : > { %10673 = vmatprep.mubr.msk.bf16.mxu1 %vm12088_vm5, %v16851_v12 }
 0x8fa   : > { %v3892_v54 = vpack.c.bf16 %v3282_v0, %v3282_v0 }
 0x900   : > { %10674 = vmatmul.mubr.msk.bf16.gmra.mxu1 %vm2885_vm7, %v3892_v54 }
 0x901   : > { %4381 = vmatprep.mubr.bf16.mxu1 %v16910_v60 }
 0x904   : > { %v3379_v56 = vpop.f32.mrf.mxu1 }
 0x905   : > { %v3389_v51 = vpack.c.bf16 %v3379_v56, %v3379_v56 }
 0x906   : > { %v10519_v30 = vpop.f32.mrf.mxu1 }
 0x907   : > { %10592 = vmatmul.mubr.msk.bf16.gmra.mxu0 %vm1528_vm6, %v3389_v51 }
 0x908   : > { %v3382_v55 = vpop.f32.mrf.mxu1  ;;  %10627 = vmatprep.mubr.msk.bf16.mxu0 %vm12088_vm5, %v16851_v12 }
 0x90a   : > { %v10520_v10 = vpop.f32.mrf.mxu1 }
 0x90c   : > { %v14006_v36 = vpop.f32.mrf.mxu1 }
 0x90e   : > { %v10555_v39 = vpop.f32.mrf.mxu1 }
 0x910   : > { %v14008_v52 = vpop.f32.mrf.mxu1 }
 0x912   : > { %v10556_v61 = vpop.f32.mrf.mxu1 }
 0x914   : > { %v14010_v57 = vpop.f32.mrf.mxu1 }
 0x916   : > { %v10559_v41 = vpop.f32.mrf.mxu1 }
 0x918   : > { %v14012_v33 = vpop.f32.mrf.mxu1 }
 0x91a   : > { %v10560_v21 = vpop.f32.mrf.mxu1 }
 0x91c   : > { %v14014_v22 = vpop.f32.mrf.mxu1 }
 0x91e   : > { %v10563_v31 = vpop.f32.mrf.mxu1 }
 0x920   : > { %v14016_v19 = vpop.f32.mrf.mxu1 }
 0x922   : > { %v10564_v9 = vpop.f32.mrf.mxu1 }
 0x924   : > { %v14018_v1 = vpop.f32.mrf.mxu1 }
 0x926   : > { %v10567_v48 = vpop.f32.mrf.mxu1 }
 0x928   : > { %v14020_v47 = vpop.f32.mrf.mxu1 }
 0x92a   : > { %v10568_v40 = vpop.f32.mrf.mxu1 }
 0x92c   : > { %v14022_v5 = vpop.f32.mrf.mxu1 }
 0x92e   : > { %v10571_v11 = vpop.f32.mrf.mxu1 }
 0x930   : > { %v3585_v34 = vpop.f32.mrf.mxu1 }
 0x932   : > { %v10572_v23 = vpop.f32.mrf.mxu1 }
 0x934   : > { %v3743_v16 = vpop.f32.mrf.mxu1 }
 0x936   : > { %v10607_v38 = vpop.f32.mrf.mxu1 }
 0x938   : > { %v3746_v44 = vpop.f32.mrf.mxu1 }
 0x939   : > { %v3781_v17 = vpack.c.bf16 %v3746_v44, %v3743_v16 }
 0x93a   : > { %v10608_v8 = vpop.f32.mrf.mxu1 }
 0x93b   : > { %10628 = vmatmul.mubr.msk.bf16.vlgmr.msra.gmra.mxu0 %vm1528_vm6, %v3781_v17 }
 0x93c   : > { %v3751_v37 = vpop.f32.mrf.mxu1  ;;  %10631 = vmatprep.mubr.msk.bf16.mxu0 %vm12088_vm5, %v16851_v12  ;;  %10678 = vmatpush3.bf16.msra.mxu0 %v11470_v27 }
 0x93e   : > { %v10611_v20 = vpop.f32.mrf.mxu1 }
 0x940   : > { %v3754_v26 = vpop.f32.mrf.mxu1 }
 0x941   : > { %v3782_v6 = vpack.c.bf16 %v3754_v26, %v3751_v37 }
 0x942   : > { %v10612_v3 = vpop.f32.mrf.mxu1 }
 0x943   : > { %10632 = vmatmul.mubr.msk.bf16.gmra.mxu0 %vm1528_vm6, %v3782_v6 }
 0x944   : > { %v3759_v50 = vpop.f32.mrf.mxu1  ;;  %10635 = vmatprep.mubr.msk.bf16.mxu0 %vm12088_vm5, %v16851_v12 }
 0x946   : > { %v10615_v32 = vpop.f32.mrf.mxu1 }
 0x948   : > { %v3762_v43 = vpop.f32.mrf.mxu1 }
 0x949   : > { %v3783_v18 = vpack.c.bf16 %v3762_v43, %v3759_v50  ;;  %v3644_v50 = vadd.f32 %v13963_v4, %v14006_v36 }
 0x94a   : > { %v10616_v15 = vpop.f32.mrf.mxu1 }
 0x94b   : > { %10636 = vmatmul.mubr.msk.bf16.gmra.mxu0 %vm1528_vm6, %v3783_v18  ;;  %v3647_v15 = vadd.f32 %v13966_v62, %v14008_v52 }
 0x94c   : > { %v3767_v58 = vpop.f32.mrf.mxu1  ;;  %10639 = vmatprep.mubr.msk.bf16.mxu0 %vm12088_vm5, %v16851_v12 }
 0x94e   : > { %v10619_v45 = vpop.f32.mrf.mxu1 }
 0x950   : > { %v3770_v24 = vpop.f32.mrf.mxu1 }
 0x951   : > { %v3784_v42 = vpack.c.bf16 %v3770_v24, %v3767_v58 }
 0x952   : > { %v10620_v14 = vpop.f32.mrf.mxu1 }
 0x953   : > { %10640 = vmatmul.mubr.msk.bf16.gmra.mxu0 %vm1528_vm6, %v3784_v42  ;;  %v3652_v42 = vadd.f32 %v13968_v59, %v14010_v57 }
 0x954   : > { %v3775_v7 = vpop.f32.mrf.mxu1  ;;  %10643 = vmatprep.mubr.msk.bf16.mxu0 %vm12088_vm5, %v16851_v12 }
 0x955   : > { %v3785_v63 = vpack.c.bf16 %v3775_v7, %v3775_v7 }
 0x956   : > { %v10623_v53 = vpop.f32.mrf.mxu1 }
 0x958   : > { %v3778_v35 = vpop.f32.mrf.mxu1 }
 0x959   : > { %v3655_v35 = vadd.f32 %v13970_v13, %v14012_v33 }
 0x95a   : > { %v10624_v25 = vpop.f32.mrf.mxu1 }
 0x95b   : > { %10644 = vmatmul.mubr.msk.bf16.gmra.mxu0 %vm1528_vm6, %v3785_v63  ;;  %v3660_v25 = vadd.f32 %v13972_v29, %v14014_v22 }
 0x95c   : > { %10679 = vmatprep.mubr.msk.bf16.mxu0 %vm12088_vm5, %v16851_v12 }
 0x9a0   : > { %v3950_v0 = vpop.f32.mrf.mxu1 }
 0x9a2   : > { %v10659_v54 = vpop.f32.mrf.mxu1 }
 0x9a3   : > { %v3663_v54 = vadd.f32 %v13974_v46, %v14016_v19 }
 0x9a4   : > { %v3953_v56 = vpop.f32.mrf.mxu1 }
 0x9a5   : > { %v3988_v51 = vpack.c.bf16 %v3953_v56, %v3950_v0 }
 0x9a6   : > { %v10660_v30 = vpop.f32.mrf.mxu1 }
 0x9a7   : > { %10680 = vmatmul.mubr.msk.bf16.vlgmr.msra.gmra.mxu0 %vm1528_vm6, %v3988_v51  ;;  %v3668_v51 = vadd.f32 %v13976_v28, %v14018_v1  ;;  %v9075_v28 = vld [vmem:[%s16667_s14] ss:$0 sm:$0xff] }
 0x9a8   : > { %v3958_v55 = vpop.f32.mrf.mxu1  ;;  %10683 = vmatprep.mubr.msk.bf16.mxu0 %vm12088_vm5, %v16851_v12 }
 0x9aa   : > { %v10663_v10 = vpop.f32.mrf.mxu1 }
 0x9ac   : > { %v3961_v39 = vpop.f32.mrf.mxu1 }
 0x9ad   : > { %v3989_v61 = vpack.c.bf16 %v3961_v39, %v3958_v55  ;;  %v3671_v55 = vadd.f32 %v13978_v2, %v14020_v47 }
 0x9ae   : > { %v10664_v41 = vpop.f32.mrf.mxu1 }
 0x9af   : > { %10684 = vmatmul.mubr.msk.bf16.gmra.mxu0 %vm1528_vm6, %v3989_v61 }
 0x9b0   : > { %v3966_v21 = vpop.f32.mrf.mxu1  ;;  %10687 = vmatprep.mubr.msk.bf16.mxu0 %vm12088_vm5, %v16851_v12 }
 0x9b2   : > { %v10667_v31 = vpop.f32.mrf.mxu1 }
 0x9b4   : > { %v3969_v9 = vpop.f32.mrf.mxu1 }
 0x9b5   : > { %v3990_v48 = vpack.c.bf16 %v3969_v9, %v3966_v21 }
 0x9b6   : > { %v10668_v40 = vpop.f32.mrf.mxu1 }
 0x9b7   : > { %10688 = vmatmul.mubr.msk.bf16.gmra.mxu0 %vm1528_vm6, %v3990_v48  ;;  %v16911_v48 = vld [vmem:[#allocation12_spill] sm:$0xff] }
 0x9b8   : > { %v3974_v11 = vpop.f32.mrf.mxu1  ;;  %10691 = vmatprep.mubr.msk.bf16.mxu0 %vm12088_vm5, %v16851_v12 }
 0x9ba   : > { %v10671_v34 = vpop.f32.mrf.mxu1 }
 0x9bc   : > { %v3977_v23 = vpop.f32.mrf.mxu1 }
 0x9bd   : > { %v3991_v16 = vpack.c.bf16 %v3977_v23, %v3974_v11 }
 0x9be   : > { %v10672_v38 = vpop.f32.mrf.mxu1 }
 0x9bf   : > { %10692 = vmatmul.mubr.msk.bf16.gmra.mxu0 %vm1528_vm6, %v3991_v16 }
 0x9c0   : > { %v3982_v44 = vpop.f32.mrf.mxu1  ;;  %10695 = vmatprep.mubr.msk.bf16.mxu0 %vm12088_vm5, %v16851_v12 }
 0x9c1   : > { %v3992_v8 = vpack.c.bf16 %v3982_v44, %v3982_v44 }
 0x9c2   : > { %v10675_v27 = vpop.f32.mrf.mxu1 }
 0x9c4   : > { %v3985_v17 = vpop.f32.mrf.mxu1 }
 0x9c6   : > { %v10676_v37 = vpop.f32.mrf.mxu1 }
 0x9c7   : > { %v3675_v20 = vpop.f32.mrf.mxu0  ;;  %10696 = vmatmul.mubr.msk.bf16.gmra.mxu0 %vm1528_vm6, %v3992_v8  ;;  %v16913_v8 = vld [vmem:[#allocation13_spill] sm:$0xff] }
 0x9c8   : > { %v3676_v39 = vadd.f32 %v3675_v20, %v14022_v5  ;;  %v16912_v5 = vld [vmem:[#allocation14_spill] sm:$0xff] }
 0x9c9   : > { %v10593_v26 = vpop.f32.mrf.mxu0 }
 0x9cb   : > { %v3678_v6 = vpop.f32.mrf.mxu0 }
 0x9cd   : > { %v10594_v3 = vpop.f32.mrf.mxu0 }
 0x9fb   : > { %v3841_v32 = vpop.f32.mrf.mxu0 }
 0x9fc   : > { %v3879_v43 = vadd.f32 %v3841_v32, %v3644_v50  ;;  %v16914_v32 = vld [vmem:[#allocation15_spill] sm:$0xff] }
 0x9fd   : > { %v10629_v18 = vpop.f32.mrf.mxu0 }
 0x9ff   : > { %v3844_v58 = vpop.f32.mrf.mxu0 }
 0xa00   : > { %v3880_v45 = vadd.f32 %v3844_v58, %v3647_v15 }
 0xa01   : > { %v10630_v24 = vpop.f32.mrf.mxu0 }
 0xa03   : > { %v3849_v14 = vpop.f32.mrf.mxu0 }
 0xa04   : > { %v3881_v7 = vadd.f32 %v3849_v14, %v3652_v42  ;;  %v16915_v42 = vld [vmem:[#allocation16_spill] sm:$0xff] }
 0xa05   : > { %v10633_v53 = vpop.f32.mrf.mxu0 }
 0xa07   : > { %v3852_v63 = vpop.f32.mrf.mxu0 }
 0xa08   : > { %v3882_v4 = vadd.f32 %v3852_v63, %v3655_v35 }
 0xa09   : > { %v10634_v36 = vpop.f32.mrf.mxu0 }
 0xa0a   : > { %v16916_v36 = vld [vmem:[#allocation17_spill] sm:$0xff] }
 0xa0b   : > { %v3857_v0 = vpop.f32.mrf.mxu0 }
 0xa0c   : > { %v3883_v62 = vadd.f32 %v3857_v0, %v3660_v25 }
 0xa0d   : > { %v10637_v52 = vpop.f32.mrf.mxu0 }
 0xa0f   : > { %v3860_v56 = vpop.f32.mrf.mxu0 }
 0xa10   : > { %v3884_v59 = vadd.f32 %v3860_v56, %v3663_v54 }
 0xa11   : > { %v10638_v57 = vpop.f32.mrf.mxu0 }
 0xa12   : > { %v16917_v57 = vld [vmem:[#allocation18_spill] sm:$0xff] }
 0xa13   : > { %v3865_v30 = vpop.f32.mrf.mxu0 }
 0xa14   : > { %v3885_v13 = vadd.f32 %v3865_v30, %v3668_v51 }
 0xa15   : > { %v10641_v33 = vpop.f32.mrf.mxu0 }
 0xa17   : > { %v3868_v10 = vpop.f32.mrf.mxu0 }
 0xa18   : > { %v3886_v29 = vadd.f32 %v3868_v10, %v3671_v55 }
 0xa19   : > { %v10642_v22 = vpop.f32.mrf.mxu0 }
 0xa1a   : > { %v16918_v22 = vld [vmem:[#allocation20_spill] sm:$0xff] }
 0xa1b   : > { %v3873_v61 = vpop.f32.mrf.mxu0 }
 0xa1c   : > { %v3887_v41 = vadd.f32 %v3873_v61, %v3676_v39 }
 0xa1d   : > { %v10645_v46 = vpop.f32.mrf.mxu0 }
 0xa1f   : > { %v3876_v19 = vpop.f32.mrf.mxu0 }
 0xa21   : > { %v10646_v21 = vpop.f32.mrf.mxu0 }
 0xa67   : > { %v4048_v31 = vpop.f32.mrf.mxu0 }
 0xa68   : > { %v4086_v9 = vadd.f32 %v4048_v31, %v3879_v43  ;;  %v16919_v31 = vld [vmem:[#allocation19_spill] sm:$0xff] }
 0xa69   : > { %v10681_v1 = vpop.f32.mrf.mxu0 }
 0xa6a   : > { %v4095_v40 = vadd.f32 %v4086_v9, %v16911_v48 }
 0xa6b   : > { %v4051_v2 = vpop.f32.mrf.mxu0 }
 0xa6c   : > { %v14076_v47 = vadd.f32 %v9075_v28, %v4095_v40  ;;  %v4087_v11 = vadd.f32 %v4051_v2, %v3880_v45 }
 0xa6d   : > { %v10682_v34 = vpop.f32.mrf.mxu0 }
 0xa6e   : > { %v4096_v23 = vadd.f32 %v4087_v11, %v16912_v5  ;;  %v4122_v16 = vsel %vm926_vm3, %v14076_v47, 0.0  ;;  %v11471_v11 = vld [vmem:[%s16670_s17 + $0x30] ss:$8 sps:$4 sm:$0xff]  }
 0xa6f   : > { %4123 = vadd.xlane.f32.xlu0 %v4122_v16  ;;  %v4056_v38 = vpop.f32.mrf.mxu0 }
 0xa70   : > { %v14081_v44 = vadd.f32 %v9075_v28, %v4096_v23  ;;  %v4088_v27 = vadd.f32 %v4056_v38, %v3881_v7 }
 0xa71   : > { %v10685_v17 = vpop.f32.mrf.mxu0 }
 0xa72   : > { %v4097_v37 = vadd.f32 %v4088_v27, %v16913_v8  ;;  %v4125_v20 = vsel %vm926_vm3, %v14081_v44, 0.0 }
 0xa73   : > { %4126 = vadd.xlane.f32.xlu1 %v4125_v20  ;;  %v4059_v26 = vpop.f32.mrf.mxu0 }
 0xa74   : > { %v14086_v6 = vadd.f32 %v9075_v28, %v4097_v37  ;;  %v4089_v3 = vadd.f32 %v4059_v26, %v3882_v4 }
 0xa75   : > { %v10686_v50 = vpop.f32.mrf.mxu0 }
 0xa76   : > { %v4098_v43 = vadd.f32 %v4089_v3, %v16914_v32  ;;  %v4128_v18 = vsel %vm926_vm3, %v14086_v6, 0.0 }
 0xa77   : > { %4129 = vadd.xlane.f32.xlu0 %v4128_v18  ;;  %v4064_v15 = vpop.f32.mrf.mxu0 }
 0xa78   : > { %v14091_v58 = vadd.f32 %v9075_v28, %v4098_v43  ;;  %v4090_v45 = vadd.f32 %v4064_v15, %v3883_v62 }
 0xa79   : > { %v10689_v24 = vpop.f32.mrf.mxu0 }
 0xa7a   : > { %v4099_v14 = vadd.f32 %v4090_v45, %v16915_v42  ;;  %v4131_v7 = vsel %vm926_vm3, %v14091_v58, 0.0 }
 0xa7b   : > { %4132 = vadd.xlane.f32.xlu1 %v4131_v7  ;;  %v4067_v53 = vpop.f32.mrf.mxu0 }
 0xa7c   : > { %v14096_v35 = vadd.f32 %v9075_v28, %v4099_v14  ;;  %v4091_v63 = vadd.f32 %v4067_v53, %v3884_v59 }
 0xa7d   : > { %v10690_v4 = vpop.f32.mrf.mxu0 }
 0xa7e   : > { %v4100_v25 = vadd.f32 %v4091_v63, %v16916_v36  ;;  %v4134_v0 = vsel %vm926_vm3, %v14096_v35, 0.0 }
 0xa7f   : > { %4135 = vadd.xlane.f32.xlu0 %v4134_v0  ;;  %v4072_v52 = vpop.f32.mrf.mxu0 }
 0xa80   : > { %v14101_v62 = vadd.f32 %v9075_v28, %v4100_v25  ;;  %v4092_v54 = vadd.f32 %v4072_v52, %v3885_v13 }
 0xa81   : > { %v10693_v56 = vpop.f32.mrf.mxu0 }
 0xa82   : > { %v4101_v51 = vadd.f32 %v4092_v54, %v16917_v57  ;;  %v4137_v30 = vsel %vm926_vm3, %v14101_v62, 0.0 }
 0xa83   : > { %4138 = vadd.xlane.f32.xlu1 %v4137_v30  ;;  %v4075_v33 = vpop.f32.mrf.mxu0 }
 0xa84   : > { %v14106_v59 = vadd.f32 %v9075_v28, %v4101_v51  ;;  %v4093_v55 = vadd.f32 %v4075_v33, %v3886_v29 }
 0xa85   : > { %v10694_v10 = vpop.f32.mrf.mxu0 }
 0xa86   : > { %v4102_v39 = vadd.f32 %v4093_v55, %v16918_v22  ;;  %v4140_v61 = vsel %vm926_vm3, %v14106_v59, 0.0 }
 0xa87   : > { %4141 = vadd.xlane.f32.xlu0 %v4140_v61  ;;  %v4080_v46 = vpop.f32.mrf.mxu0 }
 0xa88   : > { %v14111_v13 = vadd.f32 %v9075_v28, %v4102_v39  ;;  %v4094_v19 = vadd.f32 %v4080_v46, %v3887_v41  ;;  %v11473_v41 = vld [vmem:[%s16670_s17 + $0x34] ss:$8 sps:$4 sm:$0xff]  }
 0xa89   : > { %v10697_v21 = vpop.f32.mrf.mxu0  ;;  %4357 = vmatprep.subr.bf16.mxu1 %v11473_v41 }
 0xa8a   : > { %v4103_v9 = vadd.f32 %v4094_v19, %v16919_v31  ;;  %v4143_v1 = vsel %vm926_vm3, %v14111_v13, 0.0  ;;  %4358 = vmatpush1.bf16.msra.mxu1 %v11471_v11  ;;  %v11476_v21 = vld [vmem:[%s16670_s17 + $0x24] ss:$8 sps:$4 sm:$0xff]   ;;  %v11480_v11 = vld [vmem:[%s16670_s17] ss:$8 sps:$4 sm:$0xff]  }
 0xa8b   : > { %4144 = vadd.xlane.f32.xlu1 %v4143_v1  ;;  %v4083_v48 = vpop.f32.mrf.mxu0  ;;  %4359 = vmatprep.subr.bf16.mxu1 %v11476_v21 }
 0xa8c   : > { %v14116_v29 = vadd.f32 %v9075_v28, %v4103_v9  ;;  %v11474_v9 = vld [vmem:[%s16670_s17 + $0x20] ss:$8 sps:$4 sm:$0xff]   ;;  %v11479_v48 = vld [vmem:[%s16670_s17 + $0x14] ss:$8 sps:$4 sm:$0xff]  }
 0xa8d   : > { %v10698_v40 = vpop.f32.mrf.mxu0 }
 0xa8e   : > { %v4146_v2 = vsel %vm951_vm4, %v14116_v29, 0.0  ;;  %4360 = vmatpush1.bf16.msra.mxu1 %v11474_v9  ;;  %v11477_v40 = vld [vmem:[%s16670_s17 + $0x10] ss:$8 sps:$4 sm:$0xff]  }
 0xa8f   : > { %4147 = vadd.xlane.f32.xlu0 %v4146_v2  ;;  %4361 = vmatprep.subr.bf16.mxu1 %v11479_v48  ;;  %v11482_v2 = vld [vmem:[%s16670_s17 + $0x4] ss:$8 sps:$4 sm:$0xff]  }
 0xa92   : > { %4362 = vmatpush1.bf16.msra.mxu1 %v11477_v40 }
 0xa93   : > { %4363 = vmatprep.subr.bf16.mxu1 %v11482_v2 }
 0xa96   : > { %4364 = vmatpush1.bf16.msra.mxu1 %v11480_v11 }
 0xa97   : > { %10699 = vmatprep.subr.bf16.mxu1 %v16851_v12 }
 0xaf8   : > { %v4124_v34 = vpop.xlane.xlu0 %4123 }
 0xaf9   : > { %v4149_v5 = vmul.f32 0.015625, %v4124_v34 }
 0xafb   : > { %v14127_v28 = vsub.f32 %v14076_v47, %v4149_v5 }
 0xafc   : > { %v4127_v23 = vpop.xlane.xlu1 %4126 }
 0xafd   : > { %v4150_v16 = vmul.f32 0.015625, %v4127_v23  ;;  %v4167_v38 = vmul.f32 %v14127_v28, %v14127_v28 }
 0xaff   : > { %v14132_v27 = vsub.f32 %v14081_v44, %v4150_v16  ;;  %v4176_v17 = vsel %vm926_vm3, %v4167_v38, 0.0 }
 0xb00   : > { %v4130_v8 = vpop.xlane.xlu0 %4129  ;;  %4177 = vadd.xlane.f32.xlu1 %v4176_v17 }
 0xb01   : > { %v4151_v37 = vmul.f32 0.015625, %v4130_v8  ;;  %v4168_v20 = vmul.f32 %v14132_v27, %v14132_v27 }
 0xb03   : > { %v14138_v26 = vsub.f32 %v14086_v6, %v4151_v37  ;;  %v4179_v3 = vsel %vm926_vm3, %v4168_v20, 0.0 }
 0xb04   : > { %v4133_v50 = vpop.xlane.xlu1 %4132  ;;  %4180 = vadd.xlane.f32.xlu0 %v4179_v3 }
 0xb05   : > { %v4152_v32 = vmul.f32 0.015625, %v4133_v50  ;;  %v4169_v43 = vmul.f32 %v14138_v26, %v14138_v26 }
 0xb07   : > { %v14144_v18 = vsub.f32 %v14091_v58, %v4152_v32  ;;  %v4182_v15 = vsel %vm926_vm3, %v4169_v43, 0.0 }
 0xb08   : > { %v4136_v45 = vpop.xlane.xlu0 %4135  ;;  %4183 = vadd.xlane.f32.xlu1 %v4182_v15 }
 0xb09   : > { %v4153_v24 = vmul.f32 0.015625, %v4136_v45  ;;  %v4170_v42 = vmul.f32 %v14144_v18, %v14144_v18 }
 0xb0b   : > { %v14150_v14 = vsub.f32 %v14096_v35, %v4153_v24  ;;  %v4185_v7 = vsel %vm926_vm3, %v4170_v42, 0.0  ;;  %v9076_v42 = vld [vmem:[%s16668_s15] ss:$0 sm:$0xff] }
 0xb0c   : > { %v4139_v53 = vpop.xlane.xlu1 %4138  ;;  %4186 = vadd.xlane.f32.xlu0 %v4185_v7 }
 0xb0d   : > { %v4154_v63 = vmul.f32 0.015625, %v4139_v53  ;;  %v4171_v4 = vmul.f32 %v14150_v14, %v14150_v14 }
 0xb0f   : > { %v14156_v36 = vsub.f32 %v14101_v62, %v4154_v63  ;;  %v4188_v25 = vsel %vm926_vm3, %v4171_v4, 0.0 }
 0xb10   : > { %v4142_v0 = vpop.xlane.xlu0 %4141  ;;  %4189 = vadd.xlane.f32.xlu1 %v4188_v25 }
 0xb11   : > { %v4155_v52 = vmul.f32 0.015625, %v4142_v0  ;;  %v4172_v54 = vmul.f32 %v14156_v36, %v14156_v36 }
 0xb13   : > { %v14162_v56 = vsub.f32 %v14106_v59, %v4155_v52  ;;  %v4191_v57 = vsel %vm926_vm3, %v4172_v54, 0.0  ;;  %v9077_v52 = vld [vmem:[%s16669_s16] ss:$0 sm:$0xff] }
 0xb14   : > { %v4145_v51 = vpop.xlane.xlu1 %4144  ;;  %4192 = vadd.xlane.f32.xlu0 %v4191_v57 }
 0xb15   : > { %v4156_v30 = vmul.f32 0.015625, %v4145_v51  ;;  %v4173_v33 = vmul.f32 %v14162_v56, %v14162_v56 }
 0xb17   : > { %v14168_v55 = vsub.f32 %v14111_v13, %v4156_v30  ;;  %v4194_v10 = vsel %vm926_vm3, %v4173_v33, 0.0 }
 0xb18   : > { %4195 = vadd.xlane.f32.xlu1 %v4194_v10  ;;  %v4148_v22 = vpop.xlane.xlu0 %4147 }
 0xb19   : > { %v4157_v39 = vmul.f32 0.015625, %v4148_v22  ;;  %v4174_v61 = vmul.f32 %v14168_v55, %v14168_v55 }
 0xb1b   : > { %v14174_v46 = vsub.f32 %v14116_v29, %v4157_v39  ;;  %v4197_v19 = vsel %vm926_vm3, %v4174_v61, 0.0 }
 0xb1c   : > { %4198 = vadd.xlane.f32.xlu0 %v4197_v19 }
 0xb1d   : > { %v4175_v31 = vmul.f32 %v14174_v46, %v14174_v46 }
 0xb1f   : > { %v4200_v1 = vsel %vm951_vm4, %v4175_v31, 0.0 }
 0xb20   : > { %4201 = vadd.xlane.f32.xlu1 %v4200_v1 }
 0xb89   : > { %v4178_v41 = vpop.xlane.xlu1 %4177 }
 0xb8a   : > { %v4203_v34 = vmul.f32 0.015625, %v4178_v41 }
 0xb8c   : > { %v4212_v5 = vadd.f32 1e-05, %v4203_v34 }
 0xb8d   : > { %v4181_v23 = vpop.xlane.xlu0 %4180 }
 0xb8e   : > { %11745 = vrsqrt.f32 %v4212_v5  ;;  %v4204_v16 = vmul.f32 0.015625, %v4181_v23 }
 0xb90   : > { %v4213_v38 = vadd.f32 1e-05, %v4204_v16 }
 0xb91   : > { %v4184_v17 = vpop.xlane.xlu1 %4183 }
 0xb92   : > { %11747 = vrsqrt.f32 %v4213_v38  ;;  %v4205_v8 = vmul.f32 0.015625, %v4184_v17 }
 0xb94   : > { %v4214_v37 = vadd.f32 1e-05, %v4205_v8 }
 0xb95   : > { %v4187_v20 = vpop.xlane.xlu0 %4186 }
 0xb96   : > { %11749 = vrsqrt.f32 %v4214_v37  ;;  %v4206_v3 = vmul.f32 0.015625, %v4187_v20 }
 0xb98   : > { %v4215_v50 = vadd.f32 1e-05, %v4206_v3 }
 0xb99   : > { %v4190_v32 = vpop.xlane.xlu1 %4189 }
 0xb9a   : > { %11751 = vrsqrt.f32 %v4215_v50  ;;  %v4207_v43 = vmul.f32 0.015625, %v4190_v32 }
 0xb9b   : > { %v11746_v15 = vpop.eup %11745 }
 0xb9c   : > { %v4230_v45 = vmul.f32 %v11746_v15, %v14127_v28  ;;  %v4216_v24 = vadd.f32 1e-05, %v4207_v43 }
 0xb9d   : > { %v4193_v7 = vpop.xlane.xlu0 %4192 }
 0xb9e   : > { %11753 = vrsqrt.f32 %v4216_v24  ;;  %v4208_v53 = vmul.f32 0.015625, %v4193_v7  ;;  %v4245_v4 = vmul.f32 %v9076_v42, %v4230_v45 }
 0xb9f   : > { %v11748_v63 = vpop.eup %11747 }
 0xba0   : > { %v4231_v25 = vmul.f32 %v11748_v63, %v14132_v27  ;;  %v4217_v0 = vadd.f32 1e-05, %v4208_v53  ;;  %v4260_v30 = vadd.f32 %v9077_v52, %v4245_v4  ;;  %v11486_v4 = vld [vmem:[%s16672_s19 + $0x30] sm:$0xff]  }
 0xba1   : > { %v4196_v54 = vpop.xlane.xlu1 %4195 }
 0xba2   : > { %v4246_v57 = vmul.f32 %v9076_v42, %v4231_v25  ;;  %11755 = vrsqrt.f32 %v4217_v0  ;;  %v4209_v28 = vmul.f32 0.015625, %v4196_v54  ;;  %v11487_v25 = vld [vmem:[%s16672_s19 + $0x68] sm:$0xff]   ;;  %v11490_v54 = vld [vmem:[%s16672_s19 + $0x20] sm:$0xff]  }
 0xba3   : > { %v11750_v51 = vpop.eup %11749  ;;  %v11488_v0 = vld [vmem:[%s16672_s19 + $0x28] sm:$0xff]  }
 0xba4   : > { %v4261_v33 = vadd.f32 %v9077_v52, %v4246_v57  ;;  %v4232_v10 = vmul.f32 %v11750_v51, %v14138_v26  ;;  %v4218_v22 = vadd.f32 1e-05, %v4209_v28  ;;  %v11491_v57 = vld [vmem:[%s16672_s19 + $0x58] sm:$0xff]   ;;  %v11493_v51 = vld [vmem:[%s16672_s19 + $0x50] sm:$0xff]  }
 0xba5   : > { %v4199_v39 = vpop.xlane.xlu0 %4198  ;;  %v11492_v28 = vld [vmem:[%s16672_s19 + $0x18] sm:$0xff]  }
 0xba6   : > { %v4277_v61 = vpack.c.bf16 %v4261_v33, %v4260_v30  ;;  %11757 = vrsqrt.f32 %v4218_v22  ;;  %v4210_v19 = vmul.f32 0.015625, %v4199_v39  ;;  %v4247_v9 = vmul.f32 %v9076_v42, %v4232_v10  ;;  %v11494_v30 = vld [vmem:[%s16672_s19 + $0x10] sm:$0xff]   ;;  %v11495_v33 = vld [vmem:[%s16672_s19 + $0x48] sm:$0xff]   ;;  %v11497_v22 = vld [vmem:[%s16672_s19 + $0x40] sm:$0xff]  }
 0xba7   : > { %v11752_v27 = vpop.eup %11751  ;;  %v11496_v10 = vld [vmem:[%s16672_s19 + $0x8] sm:$0xff]   ;;  %v11498_v39 = vld [vmem:[%s16672_s19] sm:$0xff]  }
 0xba8   : > { %v4233_v21 = vmul.f32 %v11752_v27, %v14144_v18  ;;  %v4219_v31 = vadd.f32 1e-05, %v4210_v19  ;;  %9086 = vmatmul.mubr.msk.bf16.vlgmr.msra.gmra.mxu1 %vm926_vm3, %v4277_v61  ;;  %v4262_v41 = vadd.f32 %v9077_v52, %v4247_v9  ;;  %v4284_v61 = vlaneseq }
 0xba9   : > { %v4202_v1 = vpop.xlane.xlu1 %4201  ;;  %4391 = vmatprep.mubr.bf16.mxu1 %v16910_v60 }
 0xbaa   : > { %11759 = vrsqrt.f32 %v4219_v31  ;;  %v4211_v48 = vmul.f32 0.015625, %v4202_v1  ;;  %v4248_v40 = vmul.f32 %v9076_v42, %v4233_v21  ;;  %v14274_v19 = vshrl.u32 %v4284_v61, 7  ;;  %v4282_v21 = vld [vmem:[%s16671_s18] sm:$0x3] }
 0xbab   : > { %v11754_v2 = vpop.eup %11753 }
 0xbac   : > { %v4234_v26 = vmul.f32 %v11754_v2, %v14150_v14  ;;  %v4220_v11 = vadd.f32 1e-05, %v4211_v48  ;;  %v4263_v34 = vadd.f32 %v9077_v52, %v4248_v40  ;;  %16920 = vst [vmem:[#allocation36_spill] sm:$0xff] %v14274_v19  ;;  %v16738_v27 = vsub.s32 0, %v14274_v19 }
 0xbad   : > { %v16737_v31 = vsub.s32 1, %v14274_v19 }
 0xbae   : > { %11761 = vrsqrt.f32 %v4220_v11  ;;  %v4278_v5 = vpack.c.bf16 %v4263_v34, %v4262_v41  ;;  %v4249_v16 = vmul.f32 %v9076_v42, %v4234_v26  ;;  %v14283_v9 = vrot.slane %v4282_v21, %v16738_v27 }
 0xbaf   : > { %v11756_v23 = vpop.eup %11755  ;;  %v14287_v1 = vrot.slane %v4282_v21, %v16737_v31 }
 0xbb0   : > { %v4235_v18 = vmul.f32 %v11756_v23, %v14156_v36  ;;  %9087 = vmatmul.mubr.msk.bf16.gmra.mxu1 %vm926_vm3, %v4278_v5  ;;  %v4264_v37 = vadd.f32 %v9077_v52, %v4249_v16 }
 0xbb1   : > { %4401 = vmatprep.mubr.bf16.mxu1 %v16910_v60 }
 0xbb2   : > { %v4250_v38 = vmul.f32 %v9076_v42, %v4235_v18 }
 0xbb3   : > { %v11758_v17 = vpop.eup %11757 }
 0xbb4   : > { %v4236_v8 = vmul.f32 %v11758_v17, %v14162_v56  ;;  %v4265_v20 = vadd.f32 %v9077_v52, %v4250_v38 }
 0xbb6   : > { %v4279_v14 = vpack.c.bf16 %v4265_v20, %v4264_v37  ;;  %v4251_v32 = vmul.f32 %v9076_v42, %v4236_v8 }
 0xbb7   : > { %v11760_v3 = vpop.eup %11759 }
 0xbb8   : > { %v4237_v50 = vmul.f32 %v11760_v3, %v14168_v55  ;;  %9088 = vmatmul.mubr.msk.bf16.gmra.mxu1 %vm926_vm3, %v4279_v14  ;;  %v4266_v15 = vadd.f32 %v9077_v52, %v4251_v32  ;;  %v11483_v55 = vld [vmem:[%s16672_s19 + $0x78] sm:$0xff]  }
 0xbb9   : > { %4411 = vmatprep.mubr.bf16.mxu1 %v16910_v60  ;;  %9716 = vmatprep.subr.bf16.mxu0 %v11483_v55 }
 0xbba   : > { %v4252_v36 = vmul.f32 %v9076_v42, %v4237_v50 }
 0xbbb   : > { %v11762_v43 = vpop.eup %11761 }
 0xbbc   : > { %v4267_v45 = vadd.f32 %v9077_v52, %v4252_v36  ;;  %v4238_v24 = vmul.f32 %v11762_v43, %v14174_v46  ;;  %v11484_v46 = vld [vmem:[%s16672_s19 + $0x38] sm:$0xff]  }
 0xbbd   : > { %9717 = vmatpush3.bf16.msra.mxu0 %v11484_v46 }
 0xbbe   : > { %v4280_v7 = vpack.c.bf16 %v4267_v45, %v4266_v15  ;;  %v4253_v53 = vmul.f32 %v9076_v42, %v4238_v24  ;;  %v11485_v42 = vld [vmem:[%s16672_s19 + $0x70] sm:$0xff]  }
 0xbbf   : > { %9718 = vmatprep.subr.bf16.mxu0 %v11485_v42 }
 0xbc0   : > { %9089 = vmatmul.mubr.msk.bf16.gmra.mxu1 %vm926_vm3, %v4280_v7  ;;  %v4268_v56 = vadd.f32 %v9077_v52, %v4253_v53  ;;  %v11489_v52 = vld [vmem:[%s16672_s19 + $0x60] sm:$0xff]  }
 0xbc1   : > { %4421 = vmatprep.mubr.bf16.mxu1 %v16910_v60  ;;  %9719 = vmatpush3.bf16.msra.mxu0 %v11486_v4 }
 0xbc2   : > { %v4281_v63 = vpack.c.bf16 %v4268_v56, %v4268_v56  ;;  %9720 = vmatprep.subr.bf16.mxu0 %v11487_v25 }
 0xbc5   : > { %9721 = vmatpush3.bf16.msra.mxu0 %v11488_v0 }
 0xbc6   : > { %9722 = vmatprep.subr.bf16.mxu0 %v11489_v52 }
 0xbc8   : > { %9090 = vmatmul.mubr.msk.bf16.gmra.mxu1 %vm926_vm3, %v4281_v63 }
 0xbc9   : > { %10707 = vmatprep.mubr.msk.bf16.mxu1 %vm12088_vm5, %v16851_v12  ;;  %9723 = vmatpush3.bf16.msra.mxu0 %v11490_v54 }
 0xbca   : > { %9724 = vmatprep.subr.bf16.mxu0 %v11491_v57 }
 0xbcd   : > { %9725 = vmatpush3.bf16.msra.mxu0 %v11492_v28 }
 0xbce   : > { %9726 = vmatprep.subr.bf16.mxu0 %v11493_v51 }
 0xbd1   : > { %9727 = vmatpush3.bf16.msra.mxu0 %v11494_v30 }
 0xbd2   : > { %9728 = vmatprep.subr.bf16.mxu0 %v11495_v33 }
 0xbd5   : > { %9729 = vmatpush3.bf16.msra.mxu0 %v11496_v10 }
 0xbd6   : > { %9730 = vmatprep.subr.bf16.mxu0 %v11497_v22 }
 0xbd9   : > { %9731 = vmatpush3.bf16.msra.mxu0 %v11498_v39 }
 0xbda   : > { %10727 = vmatprep.subr.bf16.mxu0 %v16851_v12 }
 0xc68   : > { %v4383_v48 = vpop.f32.mrf.mxu1 }
 0xc69   : > { %v14290_v40 = vadd.f32 %v4383_v48, %v14283_v9 }
 0xc6a   : > { %v4385_v2 = vpop.f32.mrf.mxu1 }
 0xc6b   : > { %v4448_v26 = vmul.f32 0.044715, %v14290_v40  ;;  %v14294_v11 = vadd.f32 %v4385_v2, %v14287_v1 }
 0xc6c   : > { %v4387_v41 = vpop.f32.mrf.mxu1 }
 0xc6d   : > { %v4466_v34 = vmul.f32 %v4448_v26, %v14290_v40  ;;  %v4449_v5 = vmul.f32 0.044715, %v14294_v11  ;;  %v14299_v23 = vadd.f32 %v4387_v41, %v14283_v9 }
 0xc6e   : > { %v4389_v18 = vpop.f32.mrf.mxu1 }
 0xc6f   : > { %v4484_v16 = vmul.f32 %v4466_v34, %v14290_v40  ;;  %v4467_v38 = vmul.f32 %v4449_v5, %v14294_v11  ;;  %v4450_v17 = vmul.f32 0.044715, %v14299_v23  ;;  %v14305_v8 = vadd.f32 %v4389_v18, %v14287_v1 }
 0xc70   : > { %v4393_v37 = vpop.f32.mrf.mxu1 }
 0xc71   : > { %v4502_v20 = vadd.f32 %v4484_v16, %v14290_v40  ;;  %v4485_v14 = vmul.f32 %v4467_v38, %v14294_v11  ;;  %v4468_v3 = vmul.f32 %v4450_v17, %v14299_v23  ;;  %v14311_v50 = vadd.f32 %v4393_v37, %v14283_v9 }
 0xc72   : > { %v4451_v32 = vmul.f32 0.044715, %v14305_v8  ;;  %v4395_v36 = vpop.f32.mrf.mxu1 }
 0xc73   : > { %v4520_v43 = vmul.f32 0.7978846, %v4502_v20  ;;  %v4486_v15 = vmul.f32 %v4468_v3, %v14299_v23  ;;  %v4452_v45 = vmul.f32 0.044715, %v14311_v50  ;;  %v14317_v24 = vadd.f32 %v4395_v36, %v14287_v1 }
 0xc74   : > { %v4469_v7 = vmul.f32 %v4451_v32, %v14305_v8  ;;  %v4397_v53 = vpop.f32.mrf.mxu1  ;;  %v4503_v56 = vadd.f32 %v4485_v14, %v14294_v11 }
 0xc75   : > { %11763 = vtanh.f32 %v4520_v43  ;;  %v4504_v63 = vadd.f32 %v4486_v15, %v14299_v23  ;;  %v4470_v55 = vmul.f32 %v4452_v45, %v14311_v50  ;;  %v4453_v46 = vmul.f32 0.044715, %v14317_v24 }
 0xc76   : > { %v4487_v42 = vmul.f32 %v4469_v7, %v14305_v8  ;;  %v14326_v4 = vadd.f32 %v4397_v53, %v14283_v9  ;;  %v4399_v25 = vpop.f32.mrf.mxu1  ;;  %v4521_v0 = vmul.f32 0.7978846, %v4503_v56 }
 0xc77   : > { %v4522_v52 = vmul.f32 0.7978846, %v4504_v63  ;;  %v4488_v54 = vmul.f32 %v4470_v55, %v14311_v50  ;;  %v4471_v57 = vmul.f32 %v4453_v46, %v14317_v24  ;;  %v14331_v28 = vadd.f32 %v4399_v25, %v14287_v1 }
 0xc78   : > { %v4454_v51 = vmul.f32 0.044715, %v14326_v4  ;;  %v4403_v30 = vpop.f32.mrf.mxu1  ;;  %v4505_v33 = vadd.f32 %v4487_v42, %v14305_v8  ;;  %11765 = vtanh.f32 %v4521_v0  ;;  %v4430_v0 = vmul.f32 0.5, %v14290_v40 }
 0xc79   : > { %11767 = vtanh.f32 %v4522_v52  ;;  %v4506_v10 = vadd.f32 %v4488_v54, %v14311_v50  ;;  %v4489_v22 = vmul.f32 %v4471_v57, %v14317_v24  ;;  %v4455_v39 = vmul.f32 0.044715, %v14331_v28 }
 0xc7a   : > { %v4472_v61 = vmul.f32 %v4454_v51, %v14326_v4  ;;  %v14340_v21 = vadd.f32 %v4403_v30, %v14283_v9  ;;  %v4405_v48 = vpop.f32.mrf.mxu1  ;;  %v4523_v2 = vmul.f32 0.7978846, %v4505_v33  ;;  %v4431_v33 = vmul.f32 0.5, %v14294_v11 }
 0xc7b   : > { %v4473_v26 = vmul.f32 %v4455_v39, %v14331_v28  ;;  %v14344_v41 = vadd.f32 %v4405_v48, %v14287_v1  ;;  %v4507_v34 = vadd.f32 %v4489_v22, %v14317_v24  ;;  %v4524_v38 = vmul.f32 0.7978846, %v4506_v10 }
 0xc7c   : > { %v4490_v5 = vmul.f32 %v4472_v61, %v14326_v4  ;;  %v4456_v18 = vmul.f32 0.044715, %v14340_v21  ;;  %v4407_v16 = vpop.f32.mrf.mxu1  ;;  %11769 = vtanh.f32 %v4523_v2  ;;  %v4432_v2 = vmul.f32 0.5, %v14299_v23 }
 0xc7d   : > { %v4491_v17 = vmul.f32 %v4473_v26, %v14331_v28  ;;  %v4457_v37 = vmul.f32 0.044715, %v14344_v41  ;;  %v14352_v20 = vadd.f32 %v4407_v16, %v14283_v9  ;;  %v4525_v36 = vmul.f32 0.7978846, %v4507_v34 }
 0xc7e   : > { %v4508_v14 = vadd.f32 %v4490_v5, %v14326_v4  ;;  %v4474_v3 = vmul.f32 %v4456_v18, %v14340_v21  ;;  %v4409_v32 = vpop.f32.mrf.mxu1  ;;  %v4436_v23 = vmul.f32 0.5, %v14326_v4 }
 0xc7f   : > { %v4458_v43 = vmul.f32 0.044715, %v14352_v20  ;;  %v14358_v15 = vadd.f32 %v4409_v32, %v14287_v1  ;;  %v4509_v45 = vadd.f32 %v4491_v17, %v14331_v28  ;;  %v4475_v56 = vmul.f32 %v4457_v37, %v14344_v41 }
 0xc80   : > { %v4526_v7 = vmul.f32 0.7978846, %v4508_v14  ;;  %v4492_v53 = vmul.f32 %v4474_v3, %v14340_v21  ;;  %v4413_v63 = vpop.f32.mrf.mxu1  ;;  %11771 = vtanh.f32 %v4525_v36 }
 0xc81   : > { %11773 = vtanh.f32 %v4524_v38  ;;  %v4476_v55 = vmul.f32 %v4458_v43, %v14352_v20  ;;  %v4459_v46 = vmul.f32 0.044715, %v14358_v15  ;;  %v14366_v42 = vadd.f32 %v4413_v63, %v14283_v9 }
 0xc82   : > { %v11764_v25 = vpop.eup %11763  ;;  %11775 = vtanh.f32 %v4526_v7  ;;  %v4415_v52 = vpop.f32.mrf.mxu1  ;;  %v4527_v54 = vmul.f32 0.7978846, %v4509_v45  ;;  %v4510_v10 = vadd.f32 %v4492_v53, %v14340_v21  ;;  %v4493_v22 = vmul.f32 %v4475_v56, %v14344_v41 }
 0xc83   : > { %v4494_v57 = vmul.f32 %v4476_v55, %v14352_v20  ;;  %v4477_v51 = vmul.f32 %v4459_v46, %v14358_v15  ;;  %v4460_v30 = vmul.f32 0.044715, %v14366_v42  ;;  %v14376_v39 = vadd.f32 %v4415_v52, %v14287_v1 }
 0xc84   : > { %v4417_v61 = vpop.f32.mrf.mxu1  ;;  %11777 = vtanh.f32 %v4527_v54  ;;  %v4556_v48 = vadd.f32 1.0, %v11764_v25  ;;  %v4433_v38 = vmul.f32 0.5, %v14305_v8  ;;  %v4528_v32 = vmul.f32 0.7978846, %v4510_v10 }
 0xc85   : > { %v11766_v40 = vpop.eup %11765  ;;  %v4512_v26 = vadd.f32 %v4494_v57, %v14352_v20  ;;  %v4478_v34 = vmul.f32 %v4460_v30, %v14366_v42  ;;  %v4461_v11 = vmul.f32 0.044715, %v14376_v39  ;;  %v14383_v18 = vadd.f32 %v4417_v61, %v14283_v9 }
 0xc86   : > { %v11768_v5 = vpop.eup %11767  ;;  %v4419_v16 = vpop.f32.mrf.mxu1  ;;  %v4557_v17 = vadd.f32 1.0, %v11766_v40  ;;  %v4495_v14 = vmul.f32 %v4477_v51, %v14358_v15  ;;  %v4511_v7 = vadd.f32 %v4493_v22, %v14344_v41  ;;  %v4574_v56 = vmul.f32 %v4556_v48, %v4430_v0 }
 0xc87   : > { %v4558_v37 = vadd.f32 1.0, %v11768_v5  ;;  %v14388_v3 = vadd.f32 %v4419_v16, %v14287_v1  ;;  %v4530_v36 = vmul.f32 0.7978846, %v4512_v26  ;;  %v4462_v43 = vmul.f32 0.044715, %v14383_v18 }
 0xc88   : > { %v4423_v45 = vpop.f32.mrf.mxu1  ;;  %v4496_v8 = vmul.f32 %v4478_v34, %v14366_v42  ;;  %v4479_v63 = vmul.f32 %v4461_v11, %v14376_v39  ;;  %v4575_v54 = vmul.f32 %v4557_v17, %v4431_v33  ;;  %v4513_v0 = vadd.f32 %v4495_v14, %v14358_v15 }
 0xc89   : > { %v11770_v53 = vpop.eup %11769  ;;  %v4463_v55 = vmul.f32 0.044715, %v14388_v3  ;;  %v4480_v46 = vmul.f32 %v4462_v43, %v14383_v18  ;;  %v14398_v25 = vadd.f32 %v4423_v45, %v14283_v9  ;;  %v4576_v57 = vmul.f32 %v4558_v37, %v4432_v2 }
 0xc8a   : > { %v4425_v4 = vpop.f32.mrf.mxu1  ;;  %v4559_v52 = vadd.f32 1.0, %v11770_v53  ;;  %11779 = vtanh.f32 %v4530_v36  ;;  %v4497_v48 = vmul.f32 %v4479_v63, %v14376_v39  ;;  %v4529_v2 = vmul.f32 0.7978846, %v4511_v7 }
 0xc8b   : > { %v4481_v51 = vmul.f32 %v4463_v55, %v14388_v3  ;;  %v14402_v30 = vadd.f32 %v4425_v4, %v14287_v1  ;;  %v4498_v10 = vmul.f32 %v4480_v46, %v14383_v18  ;;  %v4464_v22 = vmul.f32 0.044715, %v14398_v25 }
 0xc8c   : > { %v4427_v61 = vpop.f32.mrf.mxu1  ;;  %v4577_v40 = vmul.f32 %v4559_v52, %v4433_v38  ;;  %11781 = vtanh.f32 %v4528_v32  ;;  %v4514_v1 = vadd.f32 %v4496_v8, %v14366_v42  ;;  %v4624_v37 = vpack.c.bf16 %v4576_v57, %v4574_v56 }
 0xc8d   : > { %v11772_v9 = vpop.eup %11771  ;;  %v4465_v33 = vmul.f32 0.044715, %v14402_v30  ;;  %v4516_v34 = vadd.f32 %v4498_v10, %v14383_v18  ;;  %v4482_v5 = vmul.f32 %v4464_v22, %v14398_v25  ;;  %v4499_v38 = vmul.f32 %v4481_v51, %v14388_v3 }
 0xc8e   : > { %v11774_v26 = vpop.eup %11773  ;;  %v4428_v11 = vpop.f32.mrf.mxu1  ;;  %v4625_v16 = vpack.c.bf16 %v4577_v40, %v4575_v54  ;;  %v4531_v14 = vmul.f32 0.7978846, %v4513_v0  ;;  %11783 = vtanh.f32 %v4529_v2  ;;  %v4561_v43 = vadd.f32 1.0, %v11772_v9 }
 0xc8f   : > { %v11776_v17 = vpop.eup %11775  ;;  %v4534_v32 = vmul.f32 0.7978846, %v4516_v34  ;;  %v4500_v36 = vmul.f32 %v4482_v5, %v14398_v25  ;;  %v4483_v53 = vmul.f32 %v4465_v33, %v14402_v30  ;;  %v4560_v8 = vadd.f32 1.0, %v11774_v26 }
 0xc90   : > { %4762 = vmatprep.mubr.bf16.mxu0 %v4625_v16  ;;  %v4562_v45 = vadd.f32 1.0, %v11776_v17  ;;  %11785 = vtanh.f32 %v4531_v14  ;;  %v4515_v63 = vadd.f32 %v4497_v48, %v14376_v39  ;;  %v4532_v55 = vmul.f32 0.7978846, %v4514_v1 }
 0xc91   : > { %v11778_v7 = vpop.eup %11777  ;;  %4763 = vmatmul.mubr.bf16.vlgmr.msra.gmra.mxu0 %v4624_v37  ;;  %v4435_v56 = vmul.f32 0.5, %v14317_v24  ;;  %v4437_v46 = vmul.f32 0.5, %v14331_v28  ;;  %v4434_v52 = vmul.f32 0.5, %v14311_v50  ;;  %v4517_v57 = vadd.f32 %v4499_v38, %v14388_v3 }
 0xc92   : > { %v4563_v4 = vadd.f32 1.0, %v11778_v7  ;;  %v4580_v54 = vmul.f32 %v4562_v45, %v4436_v23  ;;  %v4533_v51 = vmul.f32 0.7978846, %v4515_v63  ;;  %11787 = vtanh.f32 %v4534_v32 }
 0xc93   : > { %v4518_v0 = vadd.f32 %v4500_v36, %v14398_v25  ;;  %v4579_v10 = vmul.f32 %v4561_v43, %v4435_v56  ;;  %v4578_v61 = vmul.f32 %v4560_v8, %v4434_v52  ;;  %v4535_v40 = vmul.f32 0.7978846, %v4517_v57 }
 0xc94   : > { %v4581_v22 = vmul.f32 %v4563_v4, %v4437_v46  ;;  %11789 = vtanh.f32 %v4533_v51  ;;  %v4501_v9 = vmul.f32 %v4483_v53, %v14402_v30  ;;  %v4440_v11 = vmul.f32 0.5, %v14352_v20 }
 0xc95   : > { %11791 = vtanh.f32 %v4532_v55  ;;  %v4626_v28 = vpack.c.bf16 %v4580_v54, %v4578_v61  ;;  %v4536_v23 = vmul.f32 0.7978846, %v4518_v0  ;;  %v4439_v17 = vmul.f32 0.5, %v14344_v41 }
 0xc96   : > { %v4627_v24 = vpack.c.bf16 %v4581_v22, %v4579_v10  ;;  %11793 = vtanh.f32 %v4535_v40  ;;  %v4519_v50 = vadd.f32 %v4501_v9, %v14402_v30  ;;  %v4441_v37 = vmul.f32 0.5, %v14358_v15 }
 0xc97   : > { %v11780_v48 = vpop.eup %11779  ;;  %v4438_v14 = vmul.f32 0.5, %v14340_v21  ;;  %v4443_v41 = vmul.f32 0.5, %v14376_v39  ;;  %v4445_v15 = vmul.f32 0.5, %v14388_v3  ;;  %v4444_v21 = vmul.f32 0.5, %v14383_v18 }
 0xc98   : > { %4770 = vmatprep.mubr.bf16.mxu0 %v4627_v24  ;;  %v4537_v33 = vmul.f32 0.7978846, %v4519_v50  ;;  %v4566_v1 = vadd.f32 1.0, %v11780_v48  ;;  %v4442_v0 = vmul.f32 0.5, %v14366_v42  ;;  %v4447_v40 = vmul.f32 0.5, %v14402_v30 }
 0xc99   : > { %4771 = vmatmul.mubr.bf16.gmra.mxu0 %v4626_v28  ;;  %v11782_v2 = vpop.eup %11781  ;;  %v4446_v18 = vmul.f32 0.5, %v14398_v25 }
 0xc9a   : > { %11795 = vtanh.f32 %v4537_v33  ;;  %v4564_v16 = vadd.f32 1.0, %v11782_v2  ;;  %v4584_v32 = vmul.f32 %v4566_v1, %v4440_v11  ;;  %v9107_v2 = vld [vmem:[%s16673_s20] ss:$0 sm:$0xff] }
 0xc9b   : > { %v11784_v26 = vpop.eup %11783  ;;  %11797 = vtanh.f32 %v4536_v23 }
 0xc9c   : > { %v4565_v34 = vadd.f32 1.0, %v11784_v26  ;;  %v4582_v53 = vmul.f32 %v4564_v16, %v4438_v14 }
 0xc9d   : > { %v11786_v5 = vpop.eup %11785 }
 0xc9e   : > { %v4567_v38 = vadd.f32 1.0, %v11786_v5  ;;  %v4583_v43 = vmul.f32 %v4565_v34, %v4439_v17  ;;  %v4628_v46 = vpack.c.bf16 %v4584_v32, %v4582_v53 }
 0xc9f   : > { %v11788_v36 = vpop.eup %11787 }
 0xca0   : > { %v4585_v45 = vmul.f32 %v4567_v38, %v4441_v37  ;;  %v4570_v20 = vadd.f32 1.0, %v11788_v36 }
 0xca1   : > { %v11790_v7 = vpop.eup %11789 }
 0xca2   : > { %v11792_v8 = vpop.eup %11791  ;;  %v4629_v63 = vpack.c.bf16 %v4585_v45, %v4583_v43  ;;  %v4569_v55 = vadd.f32 1.0, %v11790_v7  ;;  %v4588_v10 = vmul.f32 %v4570_v20, %v4444_v21 }
 0xca3   : > { %v11794_v56 = vpop.eup %11793  ;;  %v4568_v52 = vadd.f32 1.0, %v11792_v8 }
 0xca4   : > { %4778 = vmatprep.mubr.bf16.mxu0 %v4629_v63  ;;  %v4571_v4 = vadd.f32 1.0, %v11794_v56  ;;  %v4587_v54 = vmul.f32 %v4569_v55, %v4443_v41 }
 0xca5   : > { %4779 = vmatmul.mubr.bf16.gmra.mxu0 %v4628_v46  ;;  %v4586_v24 = vmul.f32 %v4568_v52, %v4442_v0 }
 0xca6   : > { %v4589_v57 = vmul.f32 %v4571_v4, %v4445_v15 }
 0xca7   : > { %v11796_v51 = vpop.eup %11795  ;;  %v4630_v3 = vpack.c.bf16 %v4588_v10, %v4586_v24 }
 0xca8   : > { %v11798_v22 = vpop.eup %11797  ;;  %v4631_v61 = vpack.c.bf16 %v4589_v57, %v4587_v54  ;;  %v4573_v9 = vadd.f32 1.0, %v11796_v51 }
 0xca9   : > { %v4572_v28 = vadd.f32 1.0, %v11798_v22 }
 0xcaa   : > { %4786 = vmatprep.mubr.bf16.mxu0 %v4631_v61  ;;  %v4591_v39 = vmul.f32 %v4573_v9, %v4447_v40 }
 0xcab   : > { %v4590_v23 = vmul.f32 %v4572_v28, %v4446_v18 }
 0xcac   : > { %v4633_v50 = vpack.c.bf16 %v4591_v39, %v4591_v39 }
 0xcad   : > { %4787 = vmatmul.mubr.bf16.gmra.mxu0 %v4630_v3  ;;  %v4632_v48 = vpack.c.bf16 %v4590_v23, %v4590_v23 }
 0xcae   : > { %4794 = vmatprep.mubr.bf16.mxu0 %v4633_v50 }
 0xcb5   : > { %4795 = vmatmul.mubr.bf16.gmra.mxu0 %v4632_v48 }
 0xcb6   : > { %10735 = vmatprep.mubr.msk.bf16.mxu0 %vm12088_vm5, %v16851_v12 }
 0xd51   : > { %v9732_v42 = vpop.f32.mrf.mxu0 }
 0xd53   : > { %v9733_v33 = vpop.f32.mrf.mxu0 }
 0xd54   : > { %v9734_v30 = vadd.f32 %v9733_v33, %v9732_v42  ;;  %v11499_v42 = vld [vmem:[%s16817_s3 + $0x98] sm:$0xff]  }
 0xd55   : > { %v9735_v26 = vpop.f32.mrf.mxu0  ;;  %10728 = vmatpush3.bf16.msra.mxu0 %v11499_v42  ;;  %v11503_v42 = vld [vmem:[%s16816_s9 + $0x90] sm:$0xff]  }
 0xd56   : > { %v4802_v1 = vadd.f32 %v9734_v30, %v14076_v47  ;;  %10729 = vmatprep.subr.bf16.mxu0 %v16851_v12 }
 0xd57   : > { %v9736_v34 = vpop.f32.mrf.mxu0 }
 0xd58   : > { %v14439_v5 = vadd.f32 %v9107_v2, %v4802_v1  ;;  %v9737_v25 = vadd.f32 %v9736_v34, %v9735_v26 }
 0xd59   : > { %v9738_v11 = vpop.f32.mrf.mxu0 }
 0xd5a   : > { %16921 = vst [vmem:[#allocation26_spill] sm:$0xff] %v14439_v5  ;;  %v4803_v16 = vadd.f32 %v9737_v25, %v14081_v44  ;;  %v4831_v17 = vsel %vm926_vm3, %v14439_v5, 0.0 }
 0xd5b   : > { %v9739_v37 = vpop.f32.mrf.mxu0  ;;  %4832 = vadd.xlane.f32.xlu0 %v4831_v17 }
 0xd5c   : > { %v14444_v38 = vadd.f32 %v9107_v2, %v4803_v16  ;;  %v9740_v14 = vadd.f32 %v9739_v37, %v9738_v11 }
 0xd5d   : > { %v9741_v32 = vpop.f32.mrf.mxu0 }
 0xd5e   : > { %16922 = vst [vmem:[#allocation25_spill] sm:$0xff] %v14444_v38  ;;  %v4804_v36 = vadd.f32 %v9740_v14, %v14086_v6  ;;  %v4834_v47 = vsel %vm926_vm3, %v14444_v38, 0.0 }
 0xd5f   : > { %v9742_v43 = vpop.f32.mrf.mxu0  ;;  %4835 = vadd.xlane.f32.xlu1 %v4834_v47 }
 0xd60   : > { %v14449_v45 = vadd.f32 %v9107_v2, %v4804_v36  ;;  %v9743_v7 = vadd.f32 %v9742_v43, %v9741_v32 }
 0xd62   : > { %16923 = vst [vmem:[#allocation24_spill] sm:$0xff] %v14449_v45  ;;  %v4805_v44 = vadd.f32 %v9743_v7, %v14091_v58  ;;  %v4837_v53 = vsel %vm926_vm3, %v14449_v45, 0.0 }
 0xd63   : > { %4838 = vadd.xlane.f32.xlu0 %v4837_v53 }
 0xd64   : > { %v14454_v8 = vadd.f32 %v9107_v2, %v4805_v44 }
 0xd65   : > { %v9744_v63 = vpop.f32.mrf.mxu0 }
 0xd66   : > { %16924 = vst [vmem:[#allocation23_spill] sm:$0xff] %v14454_v8  ;;  %v4840_v6 = vsel %vm926_vm3, %v14454_v8, 0.0 }
 0xd67   : > { %4841 = vadd.xlane.f32.xlu1 %v4840_v6  ;;  %v9745_v55 = vpop.f32.mrf.mxu0 }
 0xd68   : > { %v9746_v56 = vadd.f32 %v9745_v55, %v9744_v63 }
 0xd69   : > { %v9747_v46 = vpop.f32.mrf.mxu0 }
 0xd6a   : > { %v4806_v20 = vadd.f32 %v9746_v56, %v14096_v35 }
 0xd6b   : > { %v9748_v41 = vpop.f32.mrf.mxu0 }
 0xd6c   : > { %v14459_v15 = vadd.f32 %v9107_v2, %v4806_v20  ;;  %v9749_v58 = vadd.f32 %v9748_v41, %v9747_v46 }
 0xd6d   : > { %v9750_v4 = vpop.f32.mrf.mxu0 }
 0xd6e   : > { %16925 = vst [vmem:[#allocation38_spill] sm:$0xff] %v14459_v15  ;;  %v4807_v21 = vadd.f32 %v9749_v58, %v14101_v62  ;;  %v4843_v52 = vsel %vm926_vm3, %v14459_v15, 0.0 }
 0xd6f   : > { %v9751_v54 = vpop.f32.mrf.mxu0  ;;  %4844 = vadd.xlane.f32.xlu0 %v4843_v52 }
 0xd70   : > { %v14464_v57 = vadd.f32 %v9107_v2, %v4807_v21  ;;  %v9752_v51 = vadd.f32 %v9751_v54, %v9750_v4 }
 0xd71   : > { %v9753_v0 = vpop.f32.mrf.mxu0 }
 0xd72   : > { %16926 = vst [vmem:[#allocation37_spill] sm:$0xff] %v14464_v57  ;;  %v4808_v10 = vadd.f32 %v9752_v51, %v14106_v59  ;;  %v4846_v35 = vsel %vm926_vm3, %v14464_v57, 0.0 }
 0xd73   : > { %v9754_v22 = vpop.f32.mrf.mxu0  ;;  %4847 = vadd.xlane.f32.xlu1 %v4846_v35 }
 0xd74   : > { %v14469_v61 = vadd.f32 %v9107_v2, %v4808_v10  ;;  %v9755_v40 = vadd.f32 %v9754_v22, %v9753_v0 }
 0xd75   : > { %v9756_v62 = vpop.f32.mrf.mxu0 }
 0xd76   : > { %16927 = vst [vmem:[#allocation22_spill] sm:$0xff] %v14469_v61  ;;  %v4809_v9 = vadd.f32 %v9755_v40, %v14111_v13  ;;  %v4849_v24 = vsel %vm926_vm3, %v14469_v61, 0.0 }
 0xd77   : > { %v9757_v39 = vpop.f32.mrf.mxu0  ;;  %4850 = vadd.xlane.f32.xlu0 %v4849_v24 }
 0xd78   : > { %v14474_v3 = vadd.f32 %v9107_v2, %v4809_v9  ;;  %v9758_v28 = vadd.f32 %v9757_v39, %v9756_v62 }
 0xd79   : > { %v9759_v59 = vpop.f32.mrf.mxu0 }
 0xd7a   : > { %16928 = vst [vmem:[#allocation21_spill] sm:$0xff] %v14474_v3  ;;  %v4810_v50 = vadd.f32 %v9758_v28, %v14116_v29  ;;  %v4852_v18 = vsel %vm926_vm3, %v14474_v3, 0.0  ;;  %v11500_v59 = vld [vmem:[%s16817_s3 + $0x90] sm:$0xff]  }
 0xd7b   : > { %v9760_v23 = vpop.f32.mrf.mxu0  ;;  %4853 = vadd.xlane.f32.xlu1 %v4852_v18  ;;  %10730 = vmatpush3.bf16.msra.mxu0 %v11500_v59 }
 0xd7c   : > { %v14479_v48 = vadd.f32 %v9107_v2, %v4810_v50  ;;  %10731 = vmatprep.subr.bf16.mxu0 %v16851_v12  ;;  %v11502_v23 = vld [vmem:[%s16816_s9 + $0x98] sm:$0xff]  }
 0xd7d   : > { %10700 = vmatpush3.bf16.msra.mxu1 %v11502_v23 }
 0xd7e   : > { %16929 = vst [vmem:[#allocation40_spill] sm:$0xff] %v14479_v48  ;;  %v4855_v13 = vsel %vm951_vm4, %v14479_v48, 0.0  ;;  %10701 = vmatprep.subr.bf16.mxu1 %v16851_v12 }
 0xd7f   : > { %4856 = vadd.xlane.f32.xlu0 %v4855_v13  ;;  %v11501_v13 = vld [vmem:[%s16817_s3 + $0x88] sm:$0xff]  }
 0xd80   : > { %10732 = vmatpush3.bf16.msra.mxu0 %v11501_v13 }
 0xd81   : > { %10733 = vmatprep.subr.bf16.mxu0 %v16851_v12  ;;  %10702 = vmatpush3.bf16.msra.mxu1 %v11503_v42 }
 0xd82   : > { %10703 = vmatprep.subr.bf16.mxu1 %v16851_v12 }
 0xde4   : > { %v4833_v33 = vpop.xlane.xlu0 %4832 }
 0xde5   : > { %v4858_v29 = vmul.f32 0.015625, %v4833_v33  ;;  %v11505_v33 = vld [vmem:[%s16816_s9 + $0x88] sm:$0xff]  }
 0xde6   : > { %10704 = vmatpush3.bf16.msra.mxu1 %v11505_v33 }
 0xde7   : > { %v14488_v30 = vsub.f32 %v14439_v5, %v4858_v29  ;;  %10705 = vmatprep.subr.bf16.mxu1 %v16851_v12  ;;  %v11504_v29 = vld [vmem:[%s16817_s3 + $0x80] sm:$0xff]  }
 0xde8   : > { %v4836_v26 = vpop.xlane.xlu1 %4835  ;;  %10734 = vmatpush3.bf16.msra.mxu0 %v11504_v29 }
 0xde9   : > { %v4859_v1 = vmul.f32 0.015625, %v4836_v26  ;;  %v4876_v2 = vmul.f32 %v14488_v30, %v14488_v30  ;;  %v11506_v26 = vld [vmem:[%s16816_s9 + $0x80] sm:$0xff]   ;;  %10783 = vmatprep.subr.bf16.mxu0 %v16851_v12 }
 0xdea   : > { %10706 = vmatpush3.bf16.msra.mxu1 %v11506_v26 }
 0xdeb   : > { %v14493_v34 = vsub.f32 %v14444_v38, %v4859_v1  ;;  %v4885_v25 = vsel %vm926_vm3, %v4876_v2, 0.0  ;;  %10755 = vmatprep.subr.bf16.mxu1 %v16851_v12 }
 0xdec   : > { %4886 = vadd.xlane.f32.xlu1 %v4885_v25  ;;  %v4839_v11 = vpop.xlane.xlu0 %4838 }
 0xded   : > { %v4860_v16 = vmul.f32 0.015625, %v4839_v11  ;;  %v4877_v17 = vmul.f32 %v14493_v34, %v14493_v34 }
 0xdef   : > { %v14499_v37 = vsub.f32 %v14449_v45, %v4860_v16  ;;  %v4888_v14 = vsel %vm926_vm3, %v4877_v17, 0.0 }
 0xdf0   : > { %v4842_v32 = vpop.xlane.xlu1 %4841  ;;  %4889 = vadd.xlane.f32.xlu0 %v4888_v14 }
 0xdf1   : > { %v4861_v36 = vmul.f32 0.015625, %v4842_v32  ;;  %v4878_v47 = vmul.f32 %v14499_v37, %v14499_v37 }
 0xdf3   : > { %v14505_v43 = vsub.f32 %v14454_v8, %v4861_v36  ;;  %v4891_v7 = vsel %vm926_vm3, %v4878_v47, 0.0 }
 0xdf4   : > { %4892 = vadd.xlane.f32.xlu1 %v4891_v7 }
 0xdf5   : > { %v4879_v44 = vmul.f32 %v14505_v43, %v14505_v43 }
 0xdf7   : > { %v4894_v53 = vsel %vm926_vm3, %v4879_v44, 0.0 }
 0xdf8   : > { %4895 = vadd.xlane.f32.xlu0 %v4894_v53  ;;  %v4845_v63 = vpop.xlane.xlu0 %4844 }
 0xdf9   : > { %v4862_v6 = vmul.f32 0.015625, %v4845_v63 }
 0xdfb   : > { %v14512_v55 = vsub.f32 %v14459_v15, %v4862_v6  ;;  %v14573_v6 = vld [vmem:[%s16818_s5 + $0x1] ss:$0 sm:$0xff] }
 0xdfc   : > { %v4848_v56 = vpop.xlane.xlu1 %4847 }
 0xdfd   : > { %v4863_v46 = vmul.f32 0.015625, %v4848_v56  ;;  %v4880_v20 = vmul.f32 %v14512_v55, %v14512_v55 }
 0xdff   : > { %v14517_v41 = vsub.f32 %v14464_v57, %v4863_v46  ;;  %v4897_v58 = vsel %vm926_vm3, %v4880_v20, 0.0 }
 0xe00   : > { %4898 = vadd.xlane.f32.xlu1 %v4897_v58  ;;  %v4851_v4 = vpop.xlane.xlu0 %4850 }
 0xe01   : > { %v4864_v21 = vmul.f32 0.015625, %v4851_v4  ;;  %v4881_v52 = vmul.f32 %v14517_v41, %v14517_v41 }
 0xe03   : > { %v14523_v54 = vsub.f32 %v14469_v61, %v4864_v21  ;;  %v4900_v51 = vsel %vm926_vm3, %v4881_v52, 0.0  ;;  %v14580_v21 = vld [vmem:[%s16819_s1 + $0x1] ss:$0 sm:$0xff]  ;;  %s756_s1 = scalar_lea.vmem [#allocation2], %s755_s8 }
 0xe04   : > { %v4854_v0 = vpop.xlane.xlu1 %4853  ;;  %4901 = vadd.xlane.f32.xlu0 %v4900_v51  ;;  %s8822_s29 = sshll.u32 %s756_s1, 4  ;;  %s16614_s29 = int_to_ptr.vmem [resolvable:$true] %s8822_s29 }
 0xe05   : > { %v4865_v10 = vmul.f32 0.015625, %v4854_v0  ;;  %v4882_v35 = vmul.f32 %v14523_v54, %v14523_v54  ;;  %s12025_s4 = scalar_lea.vmem %s16614_s29, 16 }
 0xe06   : > { %p12026_p11 = scmp.ne.s32.totalorder %s16614_s29, %s12025_s4 }
 0xe07   : > { %v14529_v22 = vsub.f32 %v14474_v3, %v4865_v10  ;;  %v4903_v40 = vsel %vm926_vm3, %v4882_v35, 0.0 }
 0xe08   : > { %4904 = vadd.xlane.f32.xlu1 %v4903_v40  ;;  %v4857_v62 = vpop.xlane.xlu0 %4856  ;;  %p12027_p12 = pnand %p12026_p11, %p12259_p5 }
 0xe09   : > { %v4866_v9 = vmul.f32 0.015625, %v4857_v62  ;;  %v4883_v24 = vmul.f32 %v14529_v22, %v14529_v22 }
 0xe0a   : > { %p12028_p13 = pneg %p12027_p12 }
 0xe0b   : > { %v14535_v39 = vsub.f32 %v14479_v48, %v4866_v9  ;;  %v4906_v28 = vsel %vm926_vm3, %v4883_v24, 0.0 }
 0xe0c   : > { %4907 = vadd.xlane.f32.xlu0 %v4906_v28  ;;  %v11507_v28 = vld [vmem:[%s16664_s11 + $0x98] sm:$0xff]  }
 0xe0d   : > { %v4884_v50 = vmul.f32 %v14535_v39, %v14535_v39 }
 0xe0f   : > { %v4909_v18 = vsel %vm951_vm4, %v4884_v50, 0.0 }
 0xe10   : > { %4910 = vadd.xlane.f32.xlu1 %v4909_v18 }
 0xe75   : > { %v4887_v1 = vpop.xlane.xlu1 %4886 }
 0xe76   : > { %v4912_v2 = vmul.f32 0.015625, %v4887_v1 }
 0xe78   : > { %v4921_v25 = vadd.f32 1e-05, %v4912_v2 }
 0xe79   : > { %v4890_v11 = vpop.xlane.xlu0 %4889 }
 0xe7a   : > { %11799 = vrsqrt.f32 %v4921_v25  ;;  %v4913_v16 = vmul.f32 0.015625, %v4890_v11  ;;  %v11509_v11 = vld [vmem:[%s16664_s11 + $0x88] sm:$0xff]  }
 0xe7c   : > { %v4922_v17 = vadd.f32 1e-05, %v4913_v16 }
 0xe7d   : > { %v4893_v14 = vpop.xlane.xlu1 %4892 }
 0xe7e   : > { %11801 = vrsqrt.f32 %v4922_v17  ;;  %v4914_v32 = vmul.f32 0.015625, %v4893_v14 }
 0xe80   : > { %v4923_v36 = vadd.f32 1e-05, %v4914_v32 }
 0xe81   : > { %v4896_v47 = vpop.xlane.xlu0 %4895 }
 0xe82   : > { %11803 = vrsqrt.f32 %v4923_v36  ;;  %v4915_v7 = vmul.f32 0.015625, %v4896_v47  ;;  %v11510_v36 = vld [vmem:[%s16664_s11 + $0x80] sm:$0xff]  }
 0xe84   : > { %v4924_v44 = vadd.f32 1e-05, %v4915_v7 }
 0xe86   : > { %11805 = vrsqrt.f32 %v4924_v44 }
 0xe87   : > { %v11800_v53 = vpop.eup %11799 }
 0xe88   : > { %v4939_v63 = vmul.f32 %v11800_v53, %v14488_v30 }
 0xe89   : > { %v4899_v56 = vpop.xlane.xlu1 %4898 }
 0xe8a   : > { %v4916_v20 = vmul.f32 0.015625, %v4899_v56  ;;  %v4954_v58 = vmul.f32 %v14573_v6, %v4939_v63 }
 0xe8b   : > { %v11802_v46 = vpop.eup %11801 }
 0xe8c   : > { %v4940_v4 = vmul.f32 %v11802_v46, %v14493_v34  ;;  %v4925_v52 = vadd.f32 1e-05, %v4916_v20  ;;  %v4969_v35 = vadd.f32 %v14580_v21, %v4954_v58 }
 0xe8d   : > { %v4902_v51 = vpop.xlane.xlu0 %4901 }
 0xe8e   : > { %v4955_v30 = vmul.f32 %v14573_v6, %v4940_v4  ;;  %11807 = vrsqrt.f32 %v4925_v52  ;;  %v4917_v10 = vmul.f32 0.015625, %v4902_v51 }
 0xe8f   : > { %v11804_v0 = vpop.eup %11803 }
 0xe90   : > { %v4970_v40 = vadd.f32 %v14580_v21, %v4955_v30  ;;  %v4941_v62 = vmul.f32 %v11804_v0, %v14499_v37  ;;  %v4926_v9 = vadd.f32 1e-05, %v4917_v10 }
 0xe91   : > { %v4905_v24 = vpop.xlane.xlu1 %4904 }
 0xe92   : > { %v14586_v34 = vpack.c.bf16 %v4970_v40, %v4969_v35  ;;  %11809 = vrsqrt.f32 %v4926_v9  ;;  %v4918_v50 = vmul.f32 0.015625, %v4905_v24  ;;  %v4956_v18 = vmul.f32 %v14573_v6, %v4941_v62  ;;  %v11514_v62 = vld [vmem:[%s16816_s9 + $0xa0] sm:$0xff]   ;;  %v11515_v9 = vld [vmem:[%s16664_s11 + $0xb8] sm:$0xff]   ;;  %v11516_v24 = vld [vmem:[%s16664_s11 + $0xb0] sm:$0xff]  }
 0xe93   : > { %v11806_v59 = vpop.eup %11805 }
 0xe94   : > { %v4942_v23 = vmul.f32 %v11806_v59, %v14505_v43  ;;  %10708 = vmatmul.mubr.msk.bf16.vlgmr.msra.gmra.mxu1 %vm926_vm3, %v14586_v34  ;;  %10736 = vmatmul.mubr.msk.bf16.vlgmr.msra.gmra.mxu0 %vm926_vm3, %v14586_v34  ;;  %v4927_v37 = vadd.f32 1e-05, %v4918_v50  ;;  %v11508_v43 = vld [vmem:[%s16664_s11 + $0x90] sm:$0xff]   ;;  %v4971_v29 = vadd.f32 %v14580_v21, %v4956_v18  ;;  %v11518_v59 = vld [vmem:[%s16664_s11 + $0xa0] sm:$0xff]   ;;  %v11519_v50 = vld [vmem:[%s16816_s9 + $0xd8] sm:$0xff]  }
 0xe95   : > { %10711 = vmatprep.mubr.msk.bf16.mxu1 %vm12088_vm5, %v16851_v12  ;;  %10739 = vmatprep.mubr.msk.bf16.mxu0 %vm12088_vm5, %v16851_v12  ;;  %v4908_v42 = vpop.xlane.xlu0 %4907  ;;  %v11520_v18 = vld [vmem:[%s16816_s9 + $0xd0] sm:$0xff]  }
 0xe96   : > { %v4957_v13 = vmul.f32 %v14573_v6, %v4942_v23  ;;  %10756 = vmatpush3.bf16.msra.mxu1 %v11507_v28  ;;  %11811 = vrsqrt.f32 %v4927_v37  ;;  %v4919_v33 = vmul.f32 0.015625, %v4908_v42  ;;  %v11517_v28 = vld [vmem:[%s16664_s11 + $0xa8] sm:$0xff]   ;;  %v11522_v37 = vld [vmem:[%s16816_s9 + $0xc0] sm:$0xff]   ;;  %v11524_v42 = vld [vmem:[%s16664_s11 + $0xd0] sm:$0xff]  }
 0xe97   : > { %10757 = vmatprep.subr.bf16.mxu1 %v16851_v12  ;;  %v11521_v23 = vld [vmem:[%s16816_s9 + $0xc8] sm:$0xff]  }
 0xe98   : > { %v4972_v26 = vadd.f32 %v14580_v21, %v4957_v13  ;;  %v4928_v1 = vadd.f32 1e-05, %v4919_v33  ;;  %v11523_v13 = vld [vmem:[%s16664_s11 + $0xd8] sm:$0xff]   ;;  %v11526_v33 = vld [vmem:[%s16664_s11 + $0xc0] sm:$0xff]  }
 0xe99   : > { %v4911_v25 = vpop.xlane.xlu1 %4910 }
 0xe9a   : > { %v14608_v2 = vpack.c.bf16 %v4972_v26, %v4971_v29  ;;  %10758 = vmatpush3.bf16.msra.mxu1 %v11508_v43  ;;  %11813 = vrsqrt.f32 %v4928_v1  ;;  %v4920_v16 = vmul.f32 0.015625, %v4911_v25  ;;  %v11525_v43 = vld [vmem:[%s16664_s11 + $0xc8] sm:$0xff]   ;;  %v14815_v1 = vld [vmem:[%s16820_s27 + $0x4] ss:$0 sm:$0xff] }
 0xe9b   : > { %10759 = vmatprep.subr.bf16.mxu1 %v16851_v12  ;;  %v11808_v17 = vpop.eup %11807  ;;  %v14820_v25 = vld [vmem:[%s16663_s10 + $0x4] ss:$0 sm:$0xff] }
 0xe9c   : > { %10712 = vmatmul.mubr.msk.bf16.gmra.mxu1 %vm926_vm3, %v14608_v2  ;;  %10740 = vmatmul.mubr.msk.bf16.gmra.mxu0 %vm926_vm3, %v14608_v2  ;;  %v4943_v14 = vmul.f32 %v11808_v17, %v14512_v55  ;;  %v4929_v32 = vadd.f32 1e-05, %v4920_v16 }
 0xe9d   : > { %10715 = vmatprep.mubr.msk.bf16.mxu1 %vm12088_vm5, %v16851_v12  ;;  %10743 = vmatprep.mubr.msk.bf16.mxu0 %vm12088_vm5, %v16851_v12 }
 0xe9e   : > { %10760 = vmatpush3.bf16.msra.mxu1 %v11509_v11  ;;  %11815 = vrsqrt.f32 %v4929_v32  ;;  %v4958_v7 = vmul.f32 %v14573_v6, %v4943_v14 }
 0xe9f   : > { %10761 = vmatprep.subr.bf16.mxu1 %v16851_v12  ;;  %v11810_v47 = vpop.eup %11809 }
 0xea0   : > { %v4944_v55 = vmul.f32 %v11810_v47, %v14517_v41  ;;  %v4973_v63 = vadd.f32 %v14580_v21, %v4958_v7 }
 0xea2   : > { %10762 = vmatpush3.bf16.msra.mxu1 %v11510_v36  ;;  %v4959_v44 = vmul.f32 %v14573_v6, %v4944_v55 }
 0xea3   : > { %10813 = vmatprep.subr.bf16.mxu1 %v16851_v12  ;;  %v11812_v53 = vpop.eup %11811 }
 0xea4   : > { %v4974_v56 = vadd.f32 %v14580_v21, %v4959_v44  ;;  %v4945_v46 = vmul.f32 %v11812_v53, %v14523_v54 }
 0xea6   : > { %v14634_v20 = vpack.c.bf16 %v4974_v56, %v4973_v63  ;;  %v4960_v4 = vmul.f32 %v14573_v6, %v4945_v46 }
 0xea7   : > { %v11814_v58 = vpop.eup %11813 }
 0xea8   : > { %v4946_v52 = vmul.f32 %v11814_v58, %v14529_v22  ;;  %10716 = vmatmul.mubr.msk.bf16.gmra.mxu1 %vm926_vm3, %v14634_v20  ;;  %10744 = vmatmul.mubr.msk.bf16.gmra.mxu0 %vm926_vm3, %v14634_v20  ;;  %v4975_v30 = vadd.f32 %v14580_v21, %v4960_v4 }
 0xea9   : > { %10719 = vmatprep.mubr.msk.bf16.mxu1 %vm12088_vm5, %v16851_v12  ;;  %10747 = vmatprep.mubr.msk.bf16.mxu0 %vm12088_vm5, %v16851_v12 }
 0xeaa   : > { %v4961_v41 = vmul.f32 %v14573_v6, %v4946_v52  ;;  %v11527_v52 = vld [vmem:[%s16816_s9 + $0xf8] sm:$0xff]  }
 0xeab   : > { %v11816_v54 = vpop.eup %11815 }
 0xeac   : > { %v4976_v51 = vadd.f32 %v14580_v21, %v4961_v41  ;;  %v4947_v22 = vmul.f32 %v11816_v54, %v14535_v39  ;;  %v11511_v39 = vld [vmem:[%s16816_s9 + $0xb8] sm:$0xff]  }
 0xeae   : > { %v14650_v0 = vpack.c.bf16 %v4976_v51, %v4975_v30  ;;  %v4962_v10 = vmul.f32 %v14573_v6, %v4947_v22  ;;  %v11512_v6 = vld [vmem:[%s16816_s9 + $0xb0] sm:$0xff]  }
 0xeb0   : > { %10720 = vmatmul.mubr.msk.bf16.gmra.mxu1 %vm926_vm3, %v14650_v0  ;;  %10748 = vmatmul.mubr.msk.bf16.gmra.mxu0 %vm926_vm3, %v14650_v0  ;;  %v4977_v35 = vadd.f32 %v14580_v21, %v4962_v10  ;;  %v11513_v21 = vld [vmem:[%s16816_s9 + $0xa8] sm:$0xff]  }
 0xeb1   : > { %10723 = vmatprep.mubr.msk.bf16.mxu1 %vm12088_vm5, %v16851_v12  ;;  %10751 = vmatprep.mubr.msk.bf16.mxu0 %vm12088_vm5, %v16851_v12 }
 0xeb2   : > { %v14662_v40 = vpack.c.bf16 %v4977_v35, %v4977_v35  ;;  %v11528_v35 = vld [vmem:[%s16816_s9 + $0xf0] sm:$0xff]  }
 0xeb8   : > { %10724 = vmatmul.mubr.msk.bf16.gmra.mxu1 %vm926_vm3, %v14662_v40  ;;  %10752 = vmatmul.mubr.msk.bf16.gmra.mxu0 %vm926_vm3, %v14662_v40 }
 0xeb9   : > { %10763 = vmatprep.mubr.msk.bf16.mxu1 %vm12088_vm5, %v16851_v12  ;;  %10793 = vmatprep.mubr.msk.bf16.mxu0 %vm12088_vm5, %v16851_v12 }
 0xec0   : > { %10764 = vmatmul.mubr.msk.bf16.vlgmr.msra.gmra.mxu1 %vm926_vm3, %v14586_v34 }
 0xec1   : > { %10767 = vmatprep.mubr.msk.bf16.mxu1 %vm12088_vm5, %v16851_v12  ;;  %10814 = vmatpush3.bf16.msra.mxu1 %v11511_v39 }
 0xec2   : > { %10815 = vmatprep.subr.bf16.mxu1 %v16851_v12 }
 0xec5   : > { %10816 = vmatpush3.bf16.msra.mxu1 %v11512_v6  ;;  %v11529_v6 = vld [vmem:[%s16816_s9 + $0xe8] sm:$0xff]  }
 0xec6   : > { %10817 = vmatprep.subr.bf16.mxu1 %v16851_v12 }
 0xec8   : > { %10768 = vmatmul.mubr.msk.bf16.gmra.mxu1 %vm926_vm3, %v14608_v2 }
 0xec9   : > { %10771 = vmatprep.mubr.msk.bf16.mxu1 %vm12088_vm5, %v16851_v12  ;;  %10818 = vmatpush3.bf16.msra.mxu1 %v11513_v21 }
 0xeca   : > { %10819 = vmatprep.subr.bf16.mxu1 %v16851_v12 }
 0xecd   : > { %10820 = vmatpush3.bf16.msra.mxu1 %v11514_v62 }
 0xece   : > { %10869 = vmatprep.subr.bf16.mxu1 %v16851_v12 }
 0xed0   : > { %10772 = vmatmul.mubr.msk.bf16.gmra.mxu1 %vm926_vm3, %v14634_v20 }
 0xed1   : > { %10775 = vmatprep.mubr.msk.bf16.mxu1 %vm12088_vm5, %v16851_v12 }
 0xed8   : > { %10776 = vmatmul.mubr.msk.bf16.gmra.mxu1 %vm926_vm3, %v14650_v0 }
 0xed9   : > { %10779 = vmatprep.mubr.msk.bf16.mxu1 %vm12088_vm5, %v16851_v12 }
 0xee0   : > { %10780 = vmatmul.mubr.msk.bf16.gmra.mxu1 %vm926_vm3, %v14662_v40 }
 0xee1   : > { %10821 = vmatprep.mubr.msk.bf16.mxu1 %vm12088_vm5, %v16851_v12 }
 0xee8   : > { %10822 = vmatmul.mubr.msk.bf16.vlgmr.msra.gmra.mxu1 %vm926_vm3, %v14586_v34 }
 0xee9   : > { %10825 = vmatprep.mubr.msk.bf16.mxu1 %vm12088_vm5, %v16851_v12  ;;  %10870 = vmatpush3.bf16.msra.mxu1 %v11515_v9  ;;  %v11530_v9 = vld [vmem:[%s16816_s9 + $0xe0] sm:$0xff]  }
 0xeea   : > { %10871 = vmatprep.subr.bf16.mxu1 %v16851_v12 }
 0xeed   : > { %10872 = vmatpush3.bf16.msra.mxu1 %v11516_v24 }
 0xeee   : > { %10873 = vmatprep.subr.bf16.mxu1 %v16851_v12 }
 0xef0   : > { %10826 = vmatmul.mubr.msk.bf16.gmra.mxu1 %vm926_vm3, %v14608_v2 }
 0xef1   : > { %10829 = vmatprep.mubr.msk.bf16.mxu1 %vm12088_vm5, %v16851_v12  ;;  %10874 = vmatpush3.bf16.msra.mxu1 %v11517_v28 }
 0xef2   : > { %10875 = vmatprep.subr.bf16.mxu1 %v16851_v12 }
 0xef5   : > { %10876 = vmatpush3.bf16.msra.mxu1 %v11518_v59 }
 0xef6   : > { %10927 = vmatprep.subr.bf16.mxu1 %v16851_v12 }
 0xef8   : > { %10830 = vmatmul.mubr.msk.bf16.gmra.mxu1 %vm926_vm3, %v14634_v20 }
 0xef9   : > { %10833 = vmatprep.mubr.msk.bf16.mxu1 %vm12088_vm5, %v16851_v12 }
 0xf00   : > { %10834 = vmatmul.mubr.msk.bf16.gmra.mxu1 %vm926_vm3, %v14650_v0 }
 0xf01   : > { %10837 = vmatprep.mubr.msk.bf16.mxu1 %vm12088_vm5, %v16851_v12 }
 0xf08   : > { %10838 = vmatmul.mubr.msk.bf16.gmra.mxu1 %vm926_vm3, %v14662_v40 }
 0xf09   : > { %10877 = vmatprep.mubr.msk.bf16.mxu1 %vm12088_vm5, %v16851_v12 }
 0xf10   : > { %10878 = vmatmul.mubr.msk.bf16.vlgmr.msra.gmra.mxu1 %vm926_vm3, %v14586_v34 }
 0xf11   : > { %10881 = vmatprep.mubr.msk.bf16.mxu1 %vm12088_vm5, %v16851_v12  ;;  %10928 = vmatpush3.bf16.msra.mxu1 %v11519_v50 }
 0xf12   : > { %10929 = vmatprep.subr.bf16.mxu1 %v16851_v12 }
 0xf15   : > { %10930 = vmatpush3.bf16.msra.mxu1 %v11520_v18 }
 0xf16   : > { %10931 = vmatprep.subr.bf16.mxu1 %v16851_v12 }
 0xf18   : > { %10882 = vmatmul.mubr.msk.bf16.gmra.mxu1 %vm926_vm3, %v14608_v2 }
 0xf19   : > { %10885 = vmatprep.mubr.msk.bf16.mxu1 %vm12088_vm5, %v16851_v12  ;;  %10932 = vmatpush3.bf16.msra.mxu1 %v11521_v23 }
 0xf1a   : > { %10933 = vmatprep.subr.bf16.mxu1 %v16851_v12 }
 0xf1d   : > { %10934 = vmatpush3.bf16.msra.mxu1 %v11522_v37 }
 0xf1e   : > { %10983 = vmatprep.subr.bf16.mxu1 %v16851_v12 }
 0xf20   : > { %10886 = vmatmul.mubr.msk.bf16.gmra.mxu1 %vm926_vm3, %v14634_v20 }
 0xf21   : > { %10889 = vmatprep.mubr.msk.bf16.mxu1 %vm12088_vm5, %v16851_v12 }
 0xf28   : > { %10890 = vmatmul.mubr.msk.bf16.gmra.mxu1 %vm926_vm3, %v14650_v0 }
 0xf29   : > { %10893 = vmatprep.mubr.msk.bf16.mxu1 %vm12088_vm5, %v16851_v12 }
 0xf30   : > { %10894 = vmatmul.mubr.msk.bf16.gmra.mxu1 %vm926_vm3, %v14662_v40 }
 0xf31   : > { %10935 = vmatprep.mubr.msk.bf16.mxu1 %vm12088_vm5, %v16851_v12 }
 0xf38   : > { %10936 = vmatmul.mubr.msk.bf16.vlgmr.msra.gmra.mxu1 %vm926_vm3, %v14586_v34 }
 0xf39   : > { %10939 = vmatprep.mubr.msk.bf16.mxu1 %vm12088_vm5, %v16851_v12  ;;  %10984 = vmatpush3.bf16.msra.mxu1 %v11523_v13 }
 0xf3a   : > { %10985 = vmatprep.subr.bf16.mxu1 %v16851_v12 }
 0xf3d   : > { %10986 = vmatpush3.bf16.msra.mxu1 %v11524_v42 }
 0xf3e   : > { %10987 = vmatprep.subr.bf16.mxu1 %v16851_v12 }
 0xf40   : > { %10940 = vmatmul.mubr.msk.bf16.gmra.mxu1 %vm926_vm3, %v14608_v2 }
 0xf41   : > { %10943 = vmatprep.mubr.msk.bf16.mxu1 %vm12088_vm5, %v16851_v12  ;;  %10988 = vmatpush3.bf16.msra.mxu1 %v11525_v43 }
 0xf42   : > { %10989 = vmatprep.subr.bf16.mxu1 %v16851_v12 }
 0xf45   : > { %10990 = vmatpush3.bf16.msra.mxu1 %v11526_v33 }
 0xf46   : > { %11041 = vmatprep.subr.bf16.mxu1 %v16851_v12 }
 0xf48   : > { %10944 = vmatmul.mubr.msk.bf16.gmra.mxu1 %vm926_vm3, %v14634_v20 }
 0xf49   : > { %10947 = vmatprep.mubr.msk.bf16.mxu1 %vm12088_vm5, %v16851_v12 }
 0xf50   : > { %10948 = vmatmul.mubr.msk.bf16.gmra.mxu1 %vm926_vm3, %v14650_v0 }
 0xf51   : > { %10951 = vmatprep.mubr.msk.bf16.mxu1 %vm12088_vm5, %v16851_v12 }
 0xf54   : > { %v5185_v29 = vpop.f32.mrf.mxu1  ;;  %v5287_v26 = vpop.f32.mrf.mxu0 }
 0xf55   : > { %v14823_v32 = vadd.f32 %v14815_v1, %v5185_v29  ;;  %v14826_v36 = vadd.f32 %v14820_v25, %v5287_v26 }
 0xf56   : > { %v10709_v11 = vpop.f32.mrf.mxu1  ;;  %v10737_v16 = vpop.f32.mrf.mxu0 }
 0xf58   : > { %v5188_v17 = vpop.f32.mrf.mxu1  ;;  %v5290_v14 = vpop.f32.mrf.mxu0  ;;  %10952 = vmatmul.mubr.msk.bf16.gmra.mxu1 %vm926_vm3, %v14662_v40 }
 0xf59   : > { %v14831_v47 = vadd.f32 %v14815_v1, %v5188_v17  ;;  %v14834_v7 = vadd.f32 %v14820_v25, %v5290_v14  ;;  %10991 = vmatprep.mubr.msk.bf16.mxu1 %vm12088_vm5, %v16851_v12 }
 0xf5a   : > { %v10710_v55 = vpop.f32.mrf.mxu1  ;;  %v10738_v44 = vpop.f32.mrf.mxu0 }
 0xf5b   : > { %v5427_v53 = vpack.c.bf16 %v14831_v47, %v14823_v32  ;;  %v5432_v63 = vpack.c.bf16 %v14834_v7, %v14826_v36  ;;  %v9248_v36 = vld [vmem:[%s16665_s12 + $0x4] ss:$0 sm:$0xff]  ;;  %v14995_v32 = vld [vmem:[%s16820_s27 + $0x5] ss:$0 sm:$0xff] }
 0xf5c   : > { %v5193_v56 = vpop.f32.mrf.mxu1  ;;  %v14842_v46 = vpop.f32.mrf.mxu0 }
 0xf5d   : > { %v14850_v30 = vadd.f32 %v14815_v1, %v5193_v56 }
 0xf5e   : > { %v10713_v58 = vpop.f32.mrf.mxu1  ;;  %v10741_v4 = vpop.f32.mrf.mxu0 }
 0xf60   : > { %v5196_v41 = vpop.f32.mrf.mxu1  ;;  %v14847_v54 = vpop.f32.mrf.mxu0  ;;  %10992 = vmatmul.mubr.msk.bf16.vlgmr.msra.gmra.mxu1 %vm926_vm3, %v14586_v34 }
 0xf61   : > { %v14855_v51 = vadd.f32 %v14815_v1, %v5196_v41  ;;  %10995 = vmatprep.mubr.msk.bf16.mxu1 %vm12088_vm5, %v16851_v12  ;;  %11042 = vmatpush3.bf16.msra.mxu1 %v11527_v52 }
 0xf62   : > { %v10714_v22 = vpop.f32.mrf.mxu1  ;;  %v10742_v10 = vpop.f32.mrf.mxu0  ;;  %11043 = vmatprep.subr.bf16.mxu1 %v16851_v12 }
 0xf63   : > { %v5428_v39 = vpack.c.bf16 %v14855_v51, %v14850_v30 }
 0xf65   : > { %11044 = vmatpush3.bf16.msra.mxu1 %v11528_v35 }
 0xf66   : > { %11045 = vmatprep.subr.bf16.mxu1 %v16851_v12 }
 0xf68   : > { %v5201_v21 = vpop.f32.mrf.mxu1  ;;  %v5303_v62 = vpop.f32.mrf.mxu0  ;;  %10996 = vmatmul.mubr.msk.bf16.gmra.mxu1 %vm926_vm3, %v14608_v2 }
 0xf69   : > { %10999 = vmatprep.mubr.msk.bf16.mxu1 %vm12088_vm5, %v16851_v12  ;;  %11046 = vmatpush3.bf16.msra.mxu1 %v11529_v6  ;;  %v14878_v18 = vadd.f32 %v14815_v1, %v5201_v21 }
 0xf6a   : > { %v10717_v24 = vpop.f32.mrf.mxu1  ;;  %v10745_v28 = vpop.f32.mrf.mxu0  ;;  %11047 = vmatprep.subr.bf16.mxu1 %v16851_v12 }
 0xf6c   : > { %v5204_v59 = vpop.f32.mrf.mxu1  ;;  %v5306_v50 = vpop.f32.mrf.mxu0 }
 0xf6d   : > { %v14881_v23 = vadd.f32 %v14815_v1, %v5204_v59  ;;  %11048 = vmatpush3.bf16.msra.mxu1 %v11530_v9 }
 0xf6e   : > { %v10718_v37 = vpop.f32.mrf.mxu1  ;;  %v10746_v13 = vpop.f32.mrf.mxu0  ;;  %11097 = vmatprep.subr.bf16.mxu1 %v16851_v12 }
 0xf6f   : > { %v5429_v42 = vpack.c.bf16 %v14881_v23, %v14878_v18 }
 0xf70   : > { %v5209_v43 = vpop.f32.mrf.mxu1  ;;  %v5311_v33 = vpop.f32.mrf.mxu0  ;;  %11000 = vmatmul.mubr.msk.bf16.gmra.mxu1 %vm926_vm3, %v14634_v20 }
 0xf71   : > { %11003 = vmatprep.mubr.msk.bf16.mxu1 %vm12088_vm5, %v16851_v12  ;;  %v14891_v17 = vadd.f32 %v14815_v1, %v5209_v43  ;;  %v5312_v59 = vadd.f32 %v14820_v25, %v5311_v33  ;;  %v11531_v33 = vld [vmem:[%s16664_s11 + $0xf8] sm:$0xff]  }
 0xf72   : > { %v10721_v29 = vpop.f32.mrf.mxu1  ;;  %v10749_v26 = vpop.f32.mrf.mxu0 }
 0xf73   : > { %v5307_v26 = vadd.f32 %v14820_v25, %v5306_v50  ;;  %v11532_v50 = vld [vmem:[%s16664_s11 + $0xf0] sm:$0xff]  }
 0xf74   : > { %v5212_v11 = vpop.f32.mrf.mxu1  ;;  %v5314_v16 = vpop.f32.mrf.mxu0 }
 0xf75   : > { %v14894_v14 = vadd.f32 %v14815_v1, %v5212_v11  ;;  %v5315_v21 = vadd.f32 %v14820_v25, %v5314_v16 }
 0xf76   : > { %v10722_v55 = vpop.f32.mrf.mxu1  ;;  %v10750_v44 = vpop.f32.mrf.mxu0 }
 0xf77   : > { %v5430_v56 = vpack.c.bf16 %v14894_v14, %v14891_v17  ;;  %v5435_v13 = vpack.c.bf16 %v5315_v21, %v5312_v59  ;;  %v5304_v55 = vadd.f32 %v14820_v25, %v5303_v62 }
 0xf78   : > { %v14898_v58 = vpop.f32.mrf.mxu1  ;;  %v5319_v4 = vpop.f32.mrf.mxu0  ;;  %11004 = vmatmul.mubr.msk.bf16.gmra.mxu1 %vm926_vm3, %v14650_v0 }
 0xf79   : > { %v5320_v52 = vadd.f32 %v14820_v25, %v5319_v4  ;;  %11007 = vmatprep.mubr.msk.bf16.mxu1 %vm12088_vm5, %v16851_v12  ;;  %v5462_v11 = vsel %vm1528_vm6, %v5435_v13, 0  ;;  %v5434_v4 = vpack.c.bf16 %v5307_v26, %v5304_v55  ;;  %v5453_v26 = vsel %vm1528_vm6, %v5432_v63, 0  ;;  %v11533_v55 = vld [vmem:[%s16817_s3 + $0xb8] sm:$0xff]   ;;  %v11536_v63 = vld [vmem:[%s16817_s3 + $0xb0] sm:$0xff]  }
 0xf7a   : > { %v10725_v41 = vpop.f32.mrf.mxu1  ;;  %v10753_v22 = vpop.f32.mrf.mxu0 }
 0xf7b   : > { %v5436_v10 = vpack.c.bf16 %v5320_v52, %v5320_v52  ;;  %v5299_v41 = vadd.f32 %v14820_v25, %v14847_v54  ;;  %v5459_v22 = vsel %vm1528_vm6, %v5434_v4, 0 }
 0xf7c   : > { %v5220_v35 = vpop.f32.mrf.mxu1  ;;  %v5322_v6 = vpop.f32.mrf.mxu0 }
 0xf7d   : > { %v5465_v9 = vsel %vm1528_vm6, %v5436_v10, 0  ;;  %v11534_v10 = vld [vmem:[%s16664_s11 + $0xe8] sm:$0xff]   ;;  %v5296_v6 = vadd.f32 %v14820_v25, %v14842_v46 }
 0xf7e   : > { %v10726_v24 = vpop.f32.mrf.mxu1  ;;  %v10754_v28 = vpop.f32.mrf.mxu0  ;;  %10784 = vmatpush3.bf16.xpose.msra.mxu0 %v5465_v9  ;;  %v11535_v9 = vld [vmem:[%s16664_s11 + $0xe0] sm:$0xff]  }
 0xf7f   : > { %10785 = vmatprep.subr.bf16.mxu0 %v16851_v12  ;;  %v5433_v54 = vpack.c.bf16 %v5299_v41, %v5296_v6 }
 0xf80   : > { %v14909_v37 = vpop.f32.mrf.mxu1  ;;  %11008 = vmatmul.mubr.msk.bf16.gmra.mxu1 %vm926_vm3, %v14662_v40 }
 0xf81   : > { %11049 = vmatprep.mubr.msk.bf16.mxu1 %vm12088_vm5, %v16851_v12  ;;  %v5456_v46 = vsel %vm1528_vm6, %v5433_v54, 0  ;;  %v11538_v54 = vld [vmem:[%s16817_s3 + $0xa0] sm:$0xff]  }
 0xf82   : > { %v10765_v43 = vpop.f32.mrf.mxu1 }
 0xf84   : > { %v14915_v29 = vpop.f32.mrf.mxu1 }
 0xf86   : > { %v10766_v16 = vpop.f32.mrf.mxu1  ;;  %10786 = vmatpush3.bf16.xpose.msra.mxu0 %v5462_v11 }
 0xf87   : > { %10787 = vmatprep.subr.bf16.mxu0 %v16851_v12 }
 0xf88   : > { %v14924_v44 = vpop.f32.mrf.mxu1  ;;  %11050 = vmatmul.mubr.msk.bf16.vlgmr.msra.gmra.mxu1 %vm926_vm3, %v14586_v34 }
 0xf89   : > { %11053 = vmatprep.mubr.msk.bf16.mxu1 %vm12088_vm5, %v16851_v12  ;;  %11098 = vmatpush3.bf16.msra.mxu1 %v11531_v33  ;;  %v5398_v18 = vadd.f32 %v9248_v36, %v14924_v44 }
 0xf8a   : > { %v10769_v52 = vpop.f32.mrf.mxu1  ;;  %11099 = vmatprep.subr.bf16.mxu1 %v16851_v12 }
 0xf8c   : > { %v14934_v62 = vpop.f32.mrf.mxu1 }
 0xf8d   : > { %11100 = vmatpush3.bf16.msra.mxu1 %v11532_v50 }
 0xf8e   : > { %v10770_v35 = vpop.f32.mrf.mxu1  ;;  %10788 = vmatpush3.bf16.xpose.msra.mxu0 %v5459_v22  ;;  %11101 = vmatprep.subr.bf16.mxu1 %v16851_v12 }
 0xf8f   : > { %10789 = vmatprep.subr.bf16.mxu0 %v16851_v12 }
 0xf90   : > { %v14946_v21 = vpop.f32.mrf.mxu1  ;;  %11054 = vmatmul.mubr.msk.bf16.gmra.mxu1 %vm926_vm3, %v14608_v2 }
 0xf91   : > { %11057 = vmatprep.mubr.msk.bf16.mxu1 %vm12088_vm5, %v16851_v12  ;;  %11102 = vmatpush3.bf16.msra.mxu1 %v11534_v10 }
 0xf92   : > { %v10773_v24 = vpop.f32.mrf.mxu1  ;;  %11103 = vmatprep.subr.bf16.mxu1 %v16851_v12 }
 0xf94   : > { %v5408_v25 = vpop.f32.mrf.mxu1 }
 0xf95   : > { %11104 = vmatpush3.bf16.msra.mxu1 %v11535_v9 }
 0xf96   : > { %v10774_v28 = vpop.f32.mrf.mxu1  ;;  %10790 = vmatpush3.bf16.xpose.msra.mxu0 %v5456_v46  ;;  %11155 = vmatprep.subr.bf16.mxu1 %v16851_v12 }
 0xf97   : > { %10791 = vmatprep.subr.bf16.mxu0 %v16851_v12  ;;  %v5409_v28 = vadd.f32 %v9248_v36, %v5408_v25 }
 0xf98   : > { %v5413_v59 = vpop.f32.mrf.mxu1  ;;  %11058 = vmatmul.mubr.msk.bf16.gmra.mxu1 %vm926_vm3, %v14634_v20 }
 0xf99   : > { %11061 = vmatprep.mubr.msk.bf16.mxu1 %vm12088_vm5, %v16851_v12  ;;  %v5414_v51 = vadd.f32 %v9248_v36, %v5413_v59 }
 0xf9a   : > { %v10777_v13 = vpop.f32.mrf.mxu1 }
 0xf9c   : > { %v5416_v43 = vpop.f32.mrf.mxu1 }
 0xf9d   : > { %v5417_v9 = vadd.f32 %v9248_v36, %v5416_v43 }
 0xf9e   : > { %v10778_v11 = vpop.f32.mrf.mxu1  ;;  %10792 = vmatpush3.bf16.xpose.msra.mxu0 %v5453_v26  ;;  %v5406_v26 = vadd.f32 %v9248_v36, %v14946_v21  ;;  %v5401_v21 = vadd.f32 %v9248_v36, %v14934_v62 }
 0xf9f   : > { %10841 = vmatprep.subr.bf16.mxu0 %v16851_v12  ;;  %v7197_v13 = vpack.c.bf16 %v5417_v9, %v5414_v51 }
 0xfa0   : > { %v5421_v33 = vpop.f32.mrf.mxu1  ;;  %11062 = vmatmul.mubr.msk.bf16.gmra.mxu1 %vm926_vm3, %v14650_v0  ;;  %v7196_v25 = vpack.c.bf16 %v5409_v28, %v5406_v26  ;;  %v7195_v62 = vpack.c.bf16 %v5401_v21, %v5398_v18 }
 0xfa1   : > { %11065 = vmatprep.mubr.msk.bf16.mxu1 %vm12088_vm5, %v16851_v12  ;;  %v5422_v50 = vadd.f32 %v9248_v36, %v5421_v33 }
 0xfa2   : > { %v10781_v16 = vpop.f32.mrf.mxu1 }
 0xfa3   : > { %v7198_v41 = vpack.c.bf16 %v5422_v50, %v5422_v50 }
 0xfa4   : > { %v5424_v4 = vpop.f32.mrf.mxu1 }
 0xfa5   : > { %10794 = vmatmul.mubr.msk.bf16.vlgmr.msra.gmra.mxu0 %vm1528_vm6, %v5427_v53  ;;  %v11537_v53 = vld [vmem:[%s16817_s3 + $0xa8] sm:$0xff]   ;;  %v7215_v24 = vand.u32 %v7198_v41, %v12882_v49 }
 0xfa6   : > { %v10782_v7 = vpop.f32.mrf.mxu1  ;;  %10842 = vmatpush3.bf16.msra.mxu0 %v11533_v55  ;;  %10797 = vmatprep.mubr.msk.bf16.mxu0 %vm12088_vm5, %v16851_v12 }
 0xfa7   : > { %10843 = vmatprep.subr.bf16.mxu0 %v16851_v12  ;;  %v5390_v7 = vadd.f32 %v9248_v36, %v14909_v37  ;;  %v5218_v37 = vadd.f32 %v14815_v1, %v14898_v58 }
 0xfa8   : > { %v5603_v52 = vpop.f32.mrf.mxu1  ;;  %11066 = vmatmul.mubr.msk.bf16.gmra.mxu1 %vm926_vm3, %v14662_v40 }
 0xfa9   : > { %11105 = vmatprep.mubr.msk.bf16.mxu1 %vm12088_vm5, %v16851_v12  ;;  %v15002_v10 = vadd.f32 %v14995_v32, %v5603_v52  ;;  %v5431_v14 = vpack.c.bf16 %v5218_v37, %v5218_v37 }
 0xfaa   : > { %v10823_v47 = vpop.f32.mrf.mxu1  ;;  %10844 = vmatpush3.bf16.msra.mxu0 %v11536_v63 }
 0xfab   : > { %10845 = vmatprep.subr.bf16.mxu0 %v16851_v12 }
 0xfac   : > { %v5606_v22 = vpop.f32.mrf.mxu1 }
 0xfad   : > { %v15005_v35 = vadd.f32 %v14995_v32, %v5606_v22  ;;  %10798 = vmatmul.mubr.msk.bf16.gmra.mxu0 %vm1528_vm6, %v5428_v39 }
 0xfae   : > { %v10824_v6 = vpop.f32.mrf.mxu1  ;;  %10801 = vmatprep.mubr.msk.bf16.mxu0 %vm12088_vm5, %v16851_v12  ;;  %10846 = vmatpush3.bf16.msra.mxu0 %v11537_v53 }
 0xfaf   : > { %10847 = vmatprep.subr.bf16.mxu0 %v16851_v12 }
 0xfb0   : > { %v5611_v30 = vpop.f32.mrf.mxu1  ;;  %11106 = vmatmul.mubr.msk.bf16.vlgmr.msra.gmra.mxu1 %vm926_vm3, %v14586_v34 }
 0xfb1   : > { %11156 = vmatpush3.bf16.msra.mxu1 %v7215_v24  ;;  %11109 = vmatprep.mubr.msk.bf16.mxu1 %vm12088_vm5, %v16851_v12  ;;  %v15028_v11 = vadd.f32 %v14995_v32, %v5611_v30  ;;  %v9283_v24 = vld [vmem:[%s16665_s12 + $0x5] ss:$0 sm:$0xff] }
 0xfb2   : > { %v10827_v39 = vpop.f32.mrf.mxu1  ;;  %11157 = vmatprep.subr.bf16.mxu1 %v16851_v12  ;;  %10848 = vmatpush3.bf16.msra.mxu0 %v11538_v54 }
 0xfb3   : > { %10897 = vmatprep.subr.bf16.mxu0 %v16851_v12 }
 0xfb4   : > { %v5614_v43 = vpop.f32.mrf.mxu1 }
 0xfb5   : > { %v15031_v59 = vadd.f32 %v14995_v32, %v5614_v43  ;;  %11158 = vmatpush3.bf16.msra.mxu1 %v7197_v13  ;;  %10802 = vmatmul.mubr.msk.bf16.gmra.mxu0 %vm1528_vm6, %v5429_v42  ;;  %v5393_v42 = vadd.f32 %v9248_v36, %v14915_v29 }
 0xfb6   : > { %v10828_v33 = vpop.f32.mrf.mxu1  ;;  %11159 = vmatprep.subr.bf16.mxu1 %v16851_v12  ;;  %10805 = vmatprep.mubr.msk.bf16.mxu0 %vm12088_vm5, %v16851_v12 }
 0xfb7   : > { %v7194_v29 = vpack.c.bf16 %v5393_v42, %v5390_v7 }
 0xfb8   : > { %v5619_v55 = vpop.f32.mrf.mxu1  ;;  %11110 = vmatmul.mubr.msk.bf16.gmra.mxu1 %vm926_vm3, %v14608_v2 }
 0xfb9   : > { %11160 = vmatpush3.bf16.msra.mxu1 %v7196_v25  ;;  %11113 = vmatprep.mubr.msk.bf16.mxu1 %vm12088_vm5, %v16851_v12  ;;  %v15052_v63 = vadd.f32 %v14995_v32, %v5619_v55 }
 0xfba   : > { %v10831_v23 = vpop.f32.mrf.mxu1  ;;  %11161 = vmatprep.subr.bf16.mxu1 %v16851_v12 }
 0xfbc   : > { %v5622_v4 = vpop.f32.mrf.mxu1 }
 0xfbd   : > { %v15055_v50 = vadd.f32 %v14995_v32, %v5622_v4  ;;  %11162 = vmatpush3.bf16.msra.mxu1 %v7195_v62  ;;  %10806 = vmatmul.mubr.msk.bf16.gmra.mxu0 %vm1528_vm6, %v5430_v56 }
 0xfbe   : > { %v10832_v44 = vpop.f32.mrf.mxu1  ;;  %11163 = vmatprep.subr.bf16.mxu1 %v16851_v12  ;;  %10809 = vmatprep.mubr.msk.bf16.mxu0 %vm12088_vm5, %v16851_v12 }
 0xfc0   : > { %v5627_v52 = vpop.f32.mrf.mxu1  ;;  %11114 = vmatmul.mubr.msk.bf16.gmra.mxu1 %vm926_vm3, %v14634_v20 }
 0xfc1   : > { %11164 = vmatpush3.bf16.msra.mxu1 %v7194_v29  ;;  %11117 = vmatprep.mubr.msk.bf16.mxu1 %vm12088_vm5, %v16851_v12  ;;  %v15074_v47 = vadd.f32 %v14995_v32, %v5627_v52 }
 0xfc2   : > { %v10835_v17 = vpop.f32.mrf.mxu1  ;;  %11215 = vmatprep.subr.bf16.mxu1 %v16851_v12 }
 0xfc4   : > { %v5630_v56 = vpop.f32.mrf.mxu1 }
 0xfc5   : > { %v15077_v1 = vadd.f32 %v14995_v32, %v5630_v56  ;;  %10810 = vmatmul.mubr.msk.bf16.gmra.mxu0 %vm1528_vm6, %v5431_v14 }
 0xfc6   : > { %v10836_v58 = vpop.f32.mrf.mxu1  ;;  %10849 = vmatprep.mubr.msk.bf16.mxu0 %vm12088_vm5, %v16851_v12 }
 0xfc8   : > { %v15084_v41 = vpop.f32.mrf.mxu1  ;;  %11118 = vmatmul.mubr.msk.bf16.gmra.mxu1 %vm926_vm3, %v14650_v0 }
 0xfc9   : > { %11121 = vmatprep.mubr.msk.bf16.mxu1 %vm12088_vm5, %v16851_v12 }
 0xfca   : > { %v10839_v22 = vpop.f32.mrf.mxu1 }
 0xfcc   : > { %v5638_v6 = vpop.f32.mrf.mxu1 }
 0xfcd   : > { %10850 = vmatmul.mubr.msk.bf16.vlgmr.msra.gmra.mxu0 %vm926_vm3, %v14586_v34 }
 0xfce   : > { %v10840_v54 = vpop.f32.mrf.mxu1  ;;  %10853 = vmatprep.mubr.msk.bf16.mxu0 %vm12088_vm5, %v16851_v12 }
 0xfd0   : > { %v5807_v9 = vpop.f32.mrf.mxu1  ;;  %11122 = vmatmul.mubr.msk.bf16.gmra.mxu1 %vm926_vm3, %v14662_v40 }
 0xfd1   : > { %11165 = vmatprep.mubr.msk.bf16.mxu1 %vm12088_vm5, %v16851_v12  ;;  %v15101_v39 = vadd.f32 %v9283_v24, %v5807_v9 }
 0xfd2   : > { %v10879_v30 = vpop.f32.mrf.mxu1 }
 0xfd3   : > { %16930 = vst [vmem:[#allocation39_spill] sm:$0xff] %v15101_v39 }
 0xfd4   : > { %v5810_v51 = vpop.f32.mrf.mxu1 }
 0xfd5   : > { %v15103_v28 = vadd.f32 %v9283_v24, %v5810_v51  ;;  %10854 = vmatmul.mubr.msk.bf16.gmra.mxu0 %vm926_vm3, %v14608_v2 }
 0xfd6   : > { %v10880_v13 = vpop.f32.mrf.mxu1  ;;  %10857 = vmatprep.mubr.msk.bf16.mxu0 %vm12088_vm5, %v16851_v12 }
 0xfd7   : > { %16931 = vst [vmem:[#allocation41_spill] sm:$0xff] %v15103_v28 }
 0xfd8   : > { %v5815_v26 = vpop.f32.mrf.mxu1 }
 0xfd9   : > { %v15111_v25 = vadd.f32 %v9283_v24, %v5815_v26 }
 0xfda   : > { %v10883_v33 = vpop.f32.mrf.mxu1 }
 0xfdb   : > { %16932 = vst [vmem:[#allocation51_spill] sm:$0xff] %v15111_v25 }
 0xfdc   : > { %v5818_v21 = vpop.f32.mrf.mxu1 }
 0xfdd   : > { %v15113_v55 = vadd.f32 %v9283_v24, %v5818_v21  ;;  %10858 = vmatmul.mubr.msk.bf16.gmra.mxu0 %vm926_vm3, %v14634_v20 }
 0xfde   : > { %v10884_v18 = vpop.f32.mrf.mxu1  ;;  %10861 = vmatprep.mubr.msk.bf16.mxu0 %vm12088_vm5, %v16851_v12 }
 0xfdf   : > { %16933 = vst [vmem:[#allocation52_spill] sm:$0xff] %v15113_v55 }
 0xfe0   : > { %v5823_v42 = vpop.f32.mrf.mxu1 }
 0xfe1   : > { %v15121_v7 = vadd.f32 %v9283_v24, %v5823_v42 }
 0xfe2   : > { %v10887_v62 = vpop.f32.mrf.mxu1 }
 0xfe3   : > { %16934 = vst [vmem:[#allocation35_spill] sm:$0xff] %v15121_v7 }
 0xfe4   : > { %v5826_v4 = vpop.f32.mrf.mxu1 }
 0xfe5   : > { %v15123_v44 = vadd.f32 %v9283_v24, %v5826_v4  ;;  %10862 = vmatmul.mubr.msk.bf16.gmra.mxu0 %vm926_vm3, %v14650_v0 }
 0xfe6   : > { %v10888_v37 = vpop.f32.mrf.mxu1  ;;  %10865 = vmatprep.mubr.msk.bf16.mxu0 %vm12088_vm5, %v16851_v12 }
 0xfe7   : > { %16935 = vst [vmem:[#allocation34_spill] sm:$0xff] %v15123_v44 }
 0xfe8   : > { %v5831_v52 = vpop.f32.mrf.mxu1 }
 0xfe9   : > { %v15131_v56 = vadd.f32 %v9283_v24, %v5831_v52 }
 0xfea   : > { %v10891_v17 = vpop.f32.mrf.mxu1 }
 0xfec   : > { %v5834_v14 = vpop.f32.mrf.mxu1 }
 0xfed   : > { %v15133_v58 = vadd.f32 %v9283_v24, %v5834_v14  ;;  %10866 = vmatmul.mubr.msk.bf16.gmra.mxu0 %vm926_vm3, %v14662_v40  ;;  %v15146_v24 = vld [vmem:[%s16820_s27 + $0x6] ss:$0 sm:$0xff] }
 0xfee   : > { %v10892_v22 = vpop.f32.mrf.mxu1  ;;  %10907 = vmatprep.mubr.msk.bf16.mxu0 %vm12088_vm5, %v16851_v12 }
 0xff0   : > { %v15141_v54 = vpop.f32.mrf.mxu1 }
 0xff2   : > { %v10895_v9 = vpop.f32.mrf.mxu1 }
 0xff4   : > { %v5842_v30 = vpop.f32.mrf.mxu1 }
 0xff6   : > { %v10896_v51 = vpop.f32.mrf.mxu1 }
 0xff8   : > { %v6021_v13 = vpop.f32.mrf.mxu1 }
 0xff9   : > { %v15149_v21 = vadd.f32 %v15146_v24, %v6021_v13 }
 0xffa   : > { %v10937_v26 = vpop.f32.mrf.mxu1 }
 0xffc   : > { %v6024_v33 = vpop.f32.mrf.mxu1 }
 0xffd   : > { %v15152_v18 = vadd.f32 %v15146_v24, %v6024_v33 }
 0xffe   : > { %v10938_v42 = vpop.f32.mrf.mxu1 }
0x1000   : > { %v6029_v4 = vpop.f32.mrf.mxu1 }
0x1001   : > { %v15157_v17 = vadd.f32 %v15146_v24, %v6029_v4 }
0x1002   : > { %v10941_v37 = vpop.f32.mrf.mxu1 }
0x1004   : > { %v6032_v52 = vpop.f32.mrf.mxu1 }
0x1005   : > { %v15160_v14 = vadd.f32 %v15146_v24, %v6032_v52 }
0x1006   : > { %v10942_v22 = vpop.f32.mrf.mxu1 }
0x1008   : > { %v6037_v30 = vpop.f32.mrf.mxu1 }
0x1009   : > { %v15165_v26 = vadd.f32 %v15146_v24, %v6037_v30 }
0x100a   : > { %v10945_v51 = vpop.f32.mrf.mxu1 }
0x100c   : > { %v6040_v13 = vpop.f32.mrf.mxu1 }
0x100d   : > { %v15168_v33 = vadd.f32 %v15146_v24, %v6040_v13 }
0x100e   : > { %v10946_v42 = vpop.f32.mrf.mxu1 }
0x1010   : > { %v6045_v37 = vpop.f32.mrf.mxu1 }
0x1011   : > { %v15173_v22 = vadd.f32 %v15146_v24, %v6045_v37 }
0x1012   : > { %v10949_v52 = vpop.f32.mrf.mxu1 }
0x1013   : > { %v9318_v52 = vld [vmem:[%s16665_s12 + $0x6] ss:$0 sm:$0xff] }
0x1014   : > { %v6048_v31 = vpop.f32.mrf.mxu1 }
0x1015   : > { %v15176_v27 = vadd.f32 %v15146_v24, %v6048_v31 }
0x1016   : > { %v10950_v51 = vpop.f32.mrf.mxu1 }
0x1018   : > { %v15180_v43 = vpop.f32.mrf.mxu1 }
0x101a   : > { %v10953_v13 = vpop.f32.mrf.mxu1 }
0x101c   : > { %v6056_v42 = vpop.f32.mrf.mxu1 }
0x101e   : > { %v10954_v23 = vpop.f32.mrf.mxu1 }
0x1020   : > { %v6225_v29 = vpop.f32.mrf.mxu1 }
0x1021   : > { %v15185_v4 = vadd.f32 %v9318_v52, %v6225_v29 }
0x1022   : > { %v10993_v6 = vpop.f32.mrf.mxu1 }
0x1023   : > { %16936 = vst [vmem:[#allocation33_spill] sm:$0xff] %v15185_v4 }
0x1024   : > { %v6228_v37 = vpop.f32.mrf.mxu1 }
0x1025   : > { %v15187_v31 = vadd.f32 %v9318_v52, %v6228_v37 }
0x1026   : > { %v10994_v51 = vpop.f32.mrf.mxu1 }
0x1027   : > { %16937 = vst [vmem:[#allocation32_spill] sm:$0xff] %v15187_v31 }
0x1028   : > { %v6233_v9 = vpop.f32.mrf.mxu1 }
0x1029   : > { %v15191_v42 = vadd.f32 %v9318_v52, %v6233_v9 }
0x102a   : > { %v10997_v62 = vpop.f32.mrf.mxu1 }
0x102b   : > { %16938 = vst [vmem:[#allocation31_spill] sm:$0xff] %v15191_v42  ;;  %v9333_v62 = vld [vmem:[%s16820_s27 + $0x7] ss:$0 sm:$0xff] }
0x102c   : > { %v6236_v13 = vpop.f32.mrf.mxu1 }
0x102d   : > { %v15193_v23 = vadd.f32 %v9318_v52, %v6236_v13 }
0x102e   : > { %v10998_v53 = vpop.f32.mrf.mxu1 }
0x102f   : > { %16939 = vst [vmem:[#allocation30_spill] sm:$0xff] %v15193_v23 }
0x1030   : > { %v6241_v36 = vpop.f32.mrf.mxu1 }
0x1031   : > { %v15197_v37 = vadd.f32 %v9318_v52, %v6241_v36 }
0x1032   : > { %v11001_v29 = vpop.f32.mrf.mxu1 }
0x1033   : > { %16940 = vst [vmem:[#allocation29_spill] sm:$0xff] %v15197_v37 }
0x1034   : > { %v6244_v16 = vpop.f32.mrf.mxu1 }
0x1035   : > { %v15199_v51 = vadd.f32 %v9318_v52, %v6244_v16 }
0x1036   : > { %v11002_v46 = vpop.f32.mrf.mxu1 }
0x1037   : > { %16941 = vst [vmem:[#allocation28_spill] sm:$0xff] %v15199_v51 }
0x1038   : > { %v6249_v30 = vpop.f32.mrf.mxu1 }
0x1039   : > { %v15203_v13 = vadd.f32 %v9318_v52, %v6249_v30 }
0x103a   : > { %v11005_v9 = vpop.f32.mrf.mxu1 }
0x103b   : > { %16942 = vst [vmem:[#allocation27_spill] sm:$0xff] %v15203_v13 }
0x103c   : > { %v6252_v19 = vpop.f32.mrf.mxu1 }
0x103d   : > { %v15205_v53 = vadd.f32 %v9318_v52, %v6252_v19 }
0x103e   : > { %v11006_v48 = vpop.f32.mrf.mxu1 }
0x103f   : > { %16943 = vst [vmem:[#allocation50_spill] sm:$0xff] %v15205_v53 }
0x1040   : > { %v15209_v6 = vpop.f32.mrf.mxu1 }
0x1041   : > { %16944 = vst [vmem:[#allocation49_spill] sm:$0xff] %v15209_v6 }
0x1042   : > { %v11009_v36 = vpop.f32.mrf.mxu1 }
0x1044   : > { %v6260_v16 = vpop.f32.mrf.mxu1 }
0x1046   : > { %v11010_v3 = vpop.f32.mrf.mxu1 }
0x1048   : > { %v6439_v46 = vpop.f32.mrf.mxu1 }
0x1049   : > { %v15214_v30 = vadd.f32 %v9333_v62, %v6439_v46 }
0x104a   : > { %v11051_v9 = vpop.f32.mrf.mxu1 }
0x104c   : > { %v6442_v61 = vpop.f32.mrf.mxu1 }
0x104d   : > { %v15216_v19 = vadd.f32 %v9333_v62, %v6442_v61 }
0x104e   : > { %v11052_v48 = vpop.f32.mrf.mxu1 }
0x1050   : > { %v6447_v29 = vpop.f32.mrf.mxu1 }
0x1051   : > { %v15220_v16 = vadd.f32 %v9333_v62, %v6447_v29 }
0x1052   : > { %v11055_v57 = vpop.f32.mrf.mxu1 }
0x1053   : > { %16945 = vst [vmem:[#allocation48_spill] sm:$0xff] %v15220_v16 }
0x1054   : > { %v6450_v36 = vpop.f32.mrf.mxu1 }
0x1055   : > { %v15222_v3 = vadd.f32 %v9333_v62, %v6450_v36 }
0x1056   : > { %v11056_v15 = vpop.f32.mrf.mxu1 }
0x1058   : > { %v6455_v8 = vpop.f32.mrf.mxu1 }
0x1059   : > { %v15226_v61 = vadd.f32 %v9333_v62, %v6455_v8 }
0x105a   : > { %v11059_v46 = vpop.f32.mrf.mxu1 }
0x105b   : > { %16946 = vst [vmem:[#allocation47_spill] sm:$0xff] %v15226_v61 }
0x105c   : > { %v6458_v45 = vpop.f32.mrf.mxu1 }
0x105d   : > { %v15228_v48 = vadd.f32 %v9333_v62, %v6458_v45 }
0x105e   : > { %v11060_v38 = vpop.f32.mrf.mxu1 }
0x105f   : > { %16947 = vst [vmem:[#allocation46_spill] sm:$0xff] %v15228_v48 }
0x1060   : > { %v6463_v52 = vpop.f32.mrf.mxu1 }
0x1061   : > { %v15232_v36 = vadd.f32 %v9333_v62, %v6463_v52 }
0x1062   : > { %v11063_v29 = vpop.f32.mrf.mxu1 }
0x1063   : > { %16948 = vst [vmem:[#allocation45_spill] sm:$0xff] %v15232_v36 }
0x1064   : > { %v6466_v5 = vpop.f32.mrf.mxu1 }
0x1065   : > { %v15234_v15 = vadd.f32 %v9333_v62, %v6466_v5  ;;  %v15236_v60 = vpop.f32.mrf.mxu0 }
0x1066   : > { %v11064_v9 = vpop.f32.mrf.mxu1 }
0x1067   : > { %16949 = vst [vmem:[#allocation44_spill] sm:$0xff] %v15234_v15  ;;  %v10795_v46 = vpop.f32.mrf.mxu0  ;;  %v9353_v9 = vld [vmem:[%s16665_s12 + $0x7] ss:$0 sm:$0xff] }
0x1068   : > { %v15240_v45 = vpop.f32.mrf.mxu1 }
0x1069   : > { %16950 = vst [vmem:[#allocation43_spill] sm:$0xff] %v15240_v45  ;;  %v15242_v38 = vpop.f32.mrf.mxu0 }
0x106a   : > { %v11067_v4 = vpop.f32.mrf.mxu1 }
0x106b   : > { %v10796_v57 = vpop.f32.mrf.mxu0 }
0x106c   : > { %v6474_v31 = vpop.f32.mrf.mxu1 }
0x106d   : > { %v15244_v29 = vpop.f32.mrf.mxu0 }
0x106e   : > { %v11068_v52 = vpop.f32.mrf.mxu1 }
0x106f   : > { %v10799_v42 = vpop.f32.mrf.mxu0 }
0x1070   : > { %v6643_v5 = vpop.f32.mrf.mxu1 }
0x1071   : > { %v15246_v62 = vpop.f32.mrf.mxu0  ;;  %v15251_v37 = vadd.f32 %v9353_v9, %v6643_v5 }
0x1072   : > { %v11107_v8 = vpop.f32.mrf.mxu1 }
0x1073   : > { %v10800_v46 = vpop.f32.mrf.mxu0  ;;  %16951 = vst [vmem:[#allocation42_spill] sm:$0xff] %v15251_v37 }
0x1074   : > { %v6646_v23 = vpop.f32.mrf.mxu1 }
0x1075   : > { %v15253_v51 = vadd.f32 %v9353_v9, %v6646_v23  ;;  %v15255_v4 = vpop.f32.mrf.mxu0 }
0x1076   : > { %v11108_v31 = vpop.f32.mrf.mxu1 }
0x1077   : > { %16952 = vst [vmem:[#allocation12_spill] sm:$0xff] %v15253_v51  ;;  %v10803_v57 = vpop.f32.mrf.mxu0 }
0x1078   : > { %v6651_v52 = vpop.f32.mrf.mxu1 }
0x1079   : > { %v15259_v13 = vpop.f32.mrf.mxu0  ;;  %v15261_v8 = vadd.f32 %v9353_v9, %v6651_v52 }
0x107a   : > { %v11111_v53 = vpop.f32.mrf.mxu1 }
0x107b   : > { %v10804_v6 = vpop.f32.mrf.mxu0  ;;  %16953 = vst [vmem:[#allocation14_spill] sm:$0xff] %v15261_v8 }
0x107c   : > { %v6654_v45 = vpop.f32.mrf.mxu1 }
0x107d   : > { %v15263_v46 = vadd.f32 %v9353_v9, %v6654_v45  ;;  %v15265_v5 = vpop.f32.mrf.mxu0 }
0x107e   : > { %v11112_v23 = vpop.f32.mrf.mxu1 }
0x107f   : > { %16954 = vst [vmem:[#allocation13_spill] sm:$0xff] %v15263_v46  ;;  %v10807_v36 = vpop.f32.mrf.mxu0 }
0x1080   : > { %v6659_v15 = vpop.f32.mrf.mxu1 }
0x1081   : > { %v15269_v42 = vpop.f32.mrf.mxu0  ;;  %v15271_v53 = vadd.f32 %v9353_v9, %v6659_v15 }
0x1082   : > { %v11115_v57 = vpop.f32.mrf.mxu1 }
0x1083   : > { %v10808_v37 = vpop.f32.mrf.mxu0  ;;  %16955 = vst [vmem:[#allocation15_spill] sm:$0xff] %v15271_v53 }
0x1084   : > { %v6662_v51 = vpop.f32.mrf.mxu1 }
0x1085   : > { %v15273_v6 = vadd.f32 %v9353_v9, %v6662_v51  ;;  %v15275_v52 = vpop.f32.mrf.mxu0 }
0x1086   : > { %v11116_v45 = vpop.f32.mrf.mxu1 }
0x1087   : > { %16956 = vst [vmem:[#allocation16_spill] sm:$0xff] %v15273_v6  ;;  %v10811_v39 = vpop.f32.mrf.mxu0 }
0x1088   : > { %v6667_v28 = vpop.f32.mrf.mxu1 }
0x1089   : > { %v5536_v31 = vpop.f32.mrf.mxu0  ;;  %v15279_v61 = vadd.f32 %v9353_v9, %v6667_v28 }
0x108a   : > { %v11119_v36 = vpop.f32.mrf.mxu1 }
0x108b   : > { %v10812_v8 = vpop.f32.mrf.mxu0  ;;  %16957 = vst [vmem:[#allocation17_spill] sm:$0xff] %v15279_v61 }
0x108c   : > { %v6670_v46 = vpop.f32.mrf.mxu1 }
0x108d   : > { %v15281_v37 = vadd.f32 %v9353_v9, %v6670_v46  ;;  %v5705_v15 = vpop.f32.mrf.mxu0 }
0x108e   : > { %v11120_v57 = vpop.f32.mrf.mxu1 }
0x108f   : > { %16958 = vst [vmem:[#allocation18_spill] sm:$0xff] %v15281_v37  ;;  %v10851_v48 = vpop.f32.mrf.mxu0 }
0x1090   : > { %v15285_v45 = vpop.f32.mrf.mxu1  ;;  %v9273_v48 = vld [vmem:[%s16663_s10 + $0x5] ss:$0 sm:$0xff] }
0x1091   : > { %16959 = vst [vmem:[#allocation20_spill] sm:$0xff] %v15285_v45  ;;  %v5708_v25 = vpop.f32.mrf.mxu0 }
0x1092   : > { %v11123_v23 = vpop.f32.mrf.mxu1 }
0x1093   : > { %v10852_v39 = vpop.f32.mrf.mxu0 }
0x1094   : > { %v6678_v53 = vpop.f32.mrf.mxu1 }
0x1095   : > { %v5713_v31 = vpop.f32.mrf.mxu0 }
0x1096   : > { %v11124_v36 = vpop.f32.mrf.mxu1 }
0x1097   : > { %v10855_v8 = vpop.f32.mrf.mxu0 }
0x1099   : > { %v5716_v6 = vpop.f32.mrf.mxu0 }
0x109b   : > { %v10856_v28 = vpop.f32.mrf.mxu0 }
0x109d   : > { %v5721_v55 = vpop.f32.mrf.mxu0 }
0x109e   : > { %v5722_v45 = vadd.f32 %v9273_v48, %v5721_v55 }
0x109f   : > { %v10859_v9 = vpop.f32.mrf.mxu0 }
0x10a1   : > { %v5724_v46 = vpop.f32.mrf.mxu0 }
0x10a3   : > { %v10860_v7 = vpop.f32.mrf.mxu0 }
0x10a5   : > { %v5729_v57 = vpop.f32.mrf.mxu0 }
0x10a6   : > { %v5730_v9 = vadd.f32 %v9273_v48, %v5729_v57 }
0x10a7   : > { %v10863_v44 = vpop.f32.mrf.mxu0 }
0x10a8   : > { %v5725_v44 = vadd.f32 %v9273_v48, %v5724_v46  ;;  %v5706_v46 = vadd.f32 %v9273_v48, %v5705_v15  ;;  %v11541_v15 = vld [vmem:[%s16817_s3 + $0xc8] sm:$0xff]  }
0x10a9   : > { %v5732_v16 = vpop.f32.mrf.mxu0 }
0x10aa   : > { %v5733_v8 = vadd.f32 %v9273_v48, %v5732_v16  ;;  %v5714_v16 = vadd.f32 %v9273_v48, %v5713_v31  ;;  %v16962_v31 = vpack.c.bf16 %v15055_v50, %v15052_v63 }
0x10ab   : > { %v10864_v51 = vpop.f32.mrf.mxu0 }
0x10ac   : > { %v5853_v7 = vpack.c.bf16 %v5733_v8, %v5730_v9 }
0x10ad   : > { %v5737_v23 = vpop.f32.mrf.mxu0 }
0x10ae   : > { %v5738_v39 = vadd.f32 %v9273_v48, %v5737_v23  ;;  %v5880_v51 = vsel %vm1528_vm6, %v5853_v7, 0  ;;  %v5852_v23 = vpack.c.bf16 %v5725_v44, %v5722_v45  ;;  %v16960_v45 = vpack.c.bf16 %v15005_v35, %v15002_v10  ;;  %v11542_v35 = vld [vmem:[%s16817_s3 + $0xc0] sm:$0xff]  }
0x10af   : > { %v10867_v53 = vpop.f32.mrf.mxu0  ;;  %v16961_v10 = vpack.c.bf16 %v15031_v59, %v15028_v11  ;;  %v16963_v11 = vpack.c.bf16 %v15077_v1, %v15074_v47  ;;  %v5636_v59 = vadd.f32 %v14995_v32, %v15084_v41 }
0x10b0   : > { %v5854_v61 = vpack.c.bf16 %v5738_v39, %v5738_v39  ;;  %v5717_v53 = vadd.f32 %v9273_v48, %v5716_v6  ;;  %v5877_v39 = vsel %vm1528_vm6, %v5852_v23, 0  ;;  %v11539_v6 = vld [vmem:[%s16817_s3 + $0xd8] sm:$0xff]  }
0x10b1   : > { %v5740_v36 = vpop.f32.mrf.mxu0 }
0x10b2   : > { %v5883_v28 = vsel %vm1528_vm6, %v5854_v61, 0  ;;  %v5851_v61 = vpack.c.bf16 %v5717_v53, %v5714_v16 }
0x10b3   : > { %v10868_v37 = vpop.f32.mrf.mxu0  ;;  %10898 = vmatpush3.bf16.xpose.msra.mxu0 %v5883_v28 }
0x10b4   : > { %10899 = vmatprep.subr.bf16.mxu0 %v16851_v12  ;;  %v5709_v37 = vadd.f32 %v9273_v48, %v5708_v25  ;;  %v5874_v57 = vsel %vm1528_vm6, %v5851_v61, 0  ;;  %v11540_v25 = vld [vmem:[%s16817_s3 + $0xd0] sm:$0xff]   ;;  %v5849_v48 = vpack.c.bf16 %v5636_v59, %v5636_v59 }
0x10b6   : > { %v5850_v36 = vpack.c.bf16 %v5709_v37, %v5706_v46 }
0x10b8   : > { %v5871_v55 = vsel %vm1528_vm6, %v5850_v36, 0 }
0x10bb   : > { %10900 = vmatpush3.bf16.xpose.msra.mxu0 %v5880_v51 }
0x10bc   : > { %10901 = vmatprep.subr.bf16.mxu0 %v16851_v12 }
0x10c3   : > { %10902 = vmatpush3.bf16.xpose.msra.mxu0 %v5877_v39 }
0x10c4   : > { %10903 = vmatprep.subr.bf16.mxu0 %v16851_v12 }
0x10cb   : > { %10904 = vmatpush3.bf16.xpose.msra.mxu0 %v5874_v57 }
0x10cc   : > { %10905 = vmatprep.subr.bf16.mxu0 %v16851_v12 }
0x10d3   : > { %10906 = vmatpush3.bf16.xpose.msra.mxu0 %v5871_v55 }
0x10d4   : > { %10955 = vmatprep.subr.bf16.mxu0 %v16851_v12 }
0x10da   : > { %10908 = vmatmul.mubr.msk.bf16.vlgmr.msra.gmra.mxu0 %vm1528_vm6, %v16960_v45 }
0x10db   : > { %10956 = vmatpush3.bf16.msra.mxu0 %v11539_v6  ;;  %10911 = vmatprep.mubr.msk.bf16.mxu0 %vm12088_vm5, %v16851_v12 }
0x10dc   : > { %10957 = vmatprep.subr.bf16.mxu0 %v16851_v12 }
0x10df   : > { %10958 = vmatpush3.bf16.msra.mxu0 %v11540_v25 }
0x10e0   : > { %10959 = vmatprep.subr.bf16.mxu0 %v16851_v12 }
0x10e2   : > { %10912 = vmatmul.mubr.msk.bf16.gmra.mxu0 %vm1528_vm6, %v16961_v10 }
0x10e3   : > { %10915 = vmatprep.mubr.msk.bf16.mxu0 %vm12088_vm5, %v16851_v12  ;;  %10960 = vmatpush3.bf16.msra.mxu0 %v11541_v15 }
0x10e4   : > { %10961 = vmatprep.subr.bf16.mxu0 %v16851_v12 }
0x10e7   : > { %10962 = vmatpush3.bf16.msra.mxu0 %v11542_v35 }
0x10e8   : > { %11011 = vmatprep.subr.bf16.mxu0 %v16851_v12 }
0x10ea   : > { %10916 = vmatmul.mubr.msk.bf16.gmra.mxu0 %vm1528_vm6, %v16962_v31 }
0x10eb   : > { %10919 = vmatprep.mubr.msk.bf16.mxu0 %vm12088_vm5, %v16851_v12 }
0x10f2   : > { %10920 = vmatmul.mubr.msk.bf16.gmra.mxu0 %vm1528_vm6, %v16963_v11 }
0x10f3   : > { %10923 = vmatprep.mubr.msk.bf16.mxu0 %vm12088_vm5, %v16851_v12 }
0x10fa   : > { %10924 = vmatmul.mubr.msk.bf16.gmra.mxu0 %vm1528_vm6, %v5849_v48 }
0x10fb   : > { %10963 = vmatprep.mubr.msk.bf16.mxu0 %vm12088_vm5, %v16851_v12 }
0x1102   : > { %10964 = vmatmul.mubr.msk.bf16.vlgmr.msra.gmra.mxu0 %vm926_vm3, %v14586_v34 }
0x1103   : > { %10967 = vmatprep.mubr.msk.bf16.mxu0 %vm12088_vm5, %v16851_v12 }
0x110a   : > { %10968 = vmatmul.mubr.msk.bf16.gmra.mxu0 %vm926_vm3, %v14608_v2 }
0x110b   : > { %10971 = vmatprep.mubr.msk.bf16.mxu0 %vm12088_vm5, %v16851_v12 }
0x1112   : > { %10972 = vmatmul.mubr.msk.bf16.gmra.mxu0 %vm926_vm3, %v14634_v20 }
0x1113   : > { %10975 = vmatprep.mubr.msk.bf16.mxu0 %vm12088_vm5, %v16851_v12 }
0x111a   : > { %10976 = vmatmul.mubr.msk.bf16.gmra.mxu0 %vm926_vm3, %v14650_v0 }
0x111b   : > { %10979 = vmatprep.mubr.msk.bf16.mxu0 %vm12088_vm5, %v16851_v12 }
0x1122   : > { %10980 = vmatmul.mubr.msk.bf16.gmra.mxu0 %vm926_vm3, %v14662_v40 }
0x1123   : > { %11021 = vmatprep.mubr.msk.bf16.mxu0 %vm12088_vm5, %v16851_v12 }
0x119a   : > { %v15365_v32 = vpop.f32.mrf.mxu0 }
0x119b   : > { %v6820_v63 = vsel %vm2885_vm7, %v15365_v32, -inf }
0x119c   : > { %6821 = vmax.xlane.f32.xlu0 %v6820_v63  ;;  %v10909_v50 = vpop.f32.mrf.mxu0 }
0x119e   : > { %v15369_v47 = vpop.f32.mrf.mxu0 }
0x119f   : > { %v6823_v1 = vsel %vm2885_vm7, %v15369_v47, -inf }
0x11a0   : > { %6824 = vmax.xlane.f32.xlu1 %v6823_v1  ;;  %v10910_v41 = vpop.f32.mrf.mxu0 }
0x11a2   : > { %v15373_v8 = vpop.f32.mrf.mxu0 }
0x11a3   : > { %v6826_v28 = vsel %vm2885_vm7, %v15373_v8, -inf }
0x11a4   : > { %6827 = vmax.xlane.f32.xlu0 %v6826_v28  ;;  %v10913_v9 = vpop.f32.mrf.mxu0 }
0x11a6   : > { %v15377_v7 = vpop.f32.mrf.mxu0 }
0x11a7   : > { %v6829_v44 = vsel %vm2885_vm7, %v15377_v7, -inf }
0x11a8   : > { %6830 = vmax.xlane.f32.xlu1 %v6829_v44  ;;  %v10914_v51 = vpop.f32.mrf.mxu0 }
0x11aa   : > { %v15381_v23 = vpop.f32.mrf.mxu0 }
0x11ab   : > { %v6832_v53 = vsel %vm2885_vm7, %v15381_v23, -inf }
0x11ac   : > { %6833 = vmax.xlane.f32.xlu0 %v6832_v53  ;;  %v10917_v39 = vpop.f32.mrf.mxu0 }
0x11ae   : > { %v15385_v16 = vpop.f32.mrf.mxu0 }
0x11af   : > { %v6835_v61 = vsel %vm2885_vm7, %v15385_v16, -inf }
0x11b0   : > { %6836 = vmax.xlane.f32.xlu1 %v6835_v61  ;;  %v10918_v37 = vpop.f32.mrf.mxu0 }
0x11b2   : > { %v15389_v57 = vpop.f32.mrf.mxu0 }
0x11b3   : > { %v6838_v46 = vsel %vm2885_vm7, %v15389_v57, -inf }
0x11b4   : > { %6839 = vmax.xlane.f32.xlu0 %v6838_v46  ;;  %v10921_v36 = vpop.f32.mrf.mxu0 }
0x11b5   : > { %v9308_v36 = vld [vmem:[%s16663_s10 + $0x6] ss:$0 sm:$0xff] }
0x11b6   : > { %v15393_v55 = vpop.f32.mrf.mxu0 }
0x11b7   : > { %v6841_v6 = vsel %vm2885_vm7, %v15393_v55, -inf }
0x11b8   : > { %6842 = vmax.xlane.f32.xlu1 %v6841_v6  ;;  %v10922_v45 = vpop.f32.mrf.mxu0 }
0x11ba   : > { %v15397_v25 = vpop.f32.mrf.mxu0 }
0x11bb   : > { %v6844_v15 = vsel %vm2910_vm8, %v15397_v25, -inf }
0x11bc   : > { %6845 = vmax.xlane.f32.xlu0 %v6844_v15  ;;  %v10925_v10 = vpop.f32.mrf.mxu0 }
0x11be   : > { %v5954_v35 = vpop.f32.mrf.mxu0 }
0x11c0   : > { %v10926_v31 = vpop.f32.mrf.mxu0 }
0x11c2   : > { %v6123_v11 = vpop.f32.mrf.mxu0 }
0x11c4   : > { %v10965_v59 = vpop.f32.mrf.mxu0 }
0x11c6   : > { %v6126_v48 = vpop.f32.mrf.mxu0 }
0x11c8   : > { %v10966_v63 = vpop.f32.mrf.mxu0 }
0x11ca   : > { %v6131_v50 = vpop.f32.mrf.mxu0 }
0x11cc   : > { %v10969_v1 = vpop.f32.mrf.mxu0 }
0x11ce   : > { %v6134_v41 = vpop.f32.mrf.mxu0 }
0x11d0   : > { %v10970_v28 = vpop.f32.mrf.mxu0 }
0x11d2   : > { %v6139_v9 = vpop.f32.mrf.mxu0 }
0x11d4   : > { %v10973_v44 = vpop.f32.mrf.mxu0 }
0x11d6   : > { %v6142_v51 = vpop.f32.mrf.mxu0 }
0x11d7   : > { %v6143_v44 = vadd.f32 %v9308_v36, %v6142_v51  ;;  %v6124_v51 = vadd.f32 %v9308_v36, %v6123_v11  ;;  %v11544_v11 = vld [vmem:[%s16817_s3 + $0xf0] sm:$0xff]  }
0x11d8   : > { %v10974_v53 = vpop.f32.mrf.mxu0 }
0x11da   : > { %v6147_v39 = vpop.f32.mrf.mxu0 }
0x11db   : > { %v6148_v1 = vadd.f32 %v9308_v36, %v6147_v39  ;;  %v6127_v39 = vadd.f32 %v9308_v36, %v6126_v48  ;;  %v11545_v48 = vld [vmem:[%s16817_s3 + $0xe8] sm:$0xff]  }
0x11dc   : > { %v10977_v61 = vpop.f32.mrf.mxu0 }
0x11dd   : > { %v6140_v61 = vadd.f32 %v9308_v36, %v6139_v9 }
0x11de   : > { %v6150_v37 = vpop.f32.mrf.mxu0 }
0x11df   : > { %v6151_v31 = vadd.f32 %v9308_v36, %v6150_v37  ;;  %v6132_v37 = vadd.f32 %v9308_v36, %v6131_v50  ;;  %v11543_v50 = vld [vmem:[%s16817_s3 + $0xf8] sm:$0xff]  }
0x11e0   : > { %v10978_v46 = vpop.f32.mrf.mxu0 }
0x11e1   : > { %v6271_v28 = vpack.c.bf16 %v6151_v31, %v6148_v1  ;;  %v6270_v46 = vpack.c.bf16 %v6143_v44, %v6140_v61  ;;  %v16967_v31 = vpack.c.bf16 %v15176_v27, %v15173_v22 }
0x11e2   : > { %v6155_v6 = vpop.f32.mrf.mxu0 }
0x11e3   : > { %v6156_v45 = vadd.f32 %v9308_v36, %v6155_v6  ;;  %v6298_v53 = vsel %vm1528_vm6, %v6271_v28, 0  ;;  %v6135_v6 = vadd.f32 %v9308_v36, %v6134_v41  ;;  %v16964_v41 = vpack.c.bf16 %v15152_v18, %v15149_v21  ;;  %v11546_v18 = vld [vmem:[%s16817_s3 + $0xe0] sm:$0xff]  }
0x11e4   : > { %v10981_v15 = vpop.f32.mrf.mxu0  ;;  %v16965_v21 = vpack.c.bf16 %v15160_v14, %v15157_v17  ;;  %v16966_v36 = vpack.c.bf16 %v15168_v33, %v15165_v26  ;;  %v6054_v26 = vadd.f32 %v15146_v24, %v15180_v43 }
0x11e5   : > { %v6272_v10 = vpack.c.bf16 %v6156_v45, %v6156_v45  ;;  %v6295_v45 = vsel %vm1528_vm6, %v6270_v46, 0  ;;  %v6269_v15 = vpack.c.bf16 %v6135_v6, %v6132_v37 }
0x11e6   : > { %v6158_v35 = vpop.f32.mrf.mxu0  ;;  %v6267_v28 = vpack.c.bf16 %v6054_v26, %v6054_v26  ;;  %v6796_v26 = vsel %vm2885_vm7, %v15242_v38, -inf }
0x11e7   : > { %v6301_v59 = vsel %vm1528_vm6, %v6272_v10, 0  ;;  %v6292_v10 = vsel %vm1528_vm6, %v6269_v15, 0  ;;  %v6268_v35 = vpack.c.bf16 %v6127_v39, %v6124_v51 }
0x11e8   : > { %v10982_v63 = vpop.f32.mrf.mxu0  ;;  %11012 = vmatpush3.bf16.xpose.msra.mxu0 %v6301_v59 }
0x11e9   : > { %11013 = vmatprep.subr.bf16.mxu0 %v16851_v12  ;;  %v6289_v9 = vsel %vm1528_vm6, %v6268_v35, 0 }
0x11f0   : > { %11014 = vmatpush3.bf16.xpose.msra.mxu0 %v6298_v53 }
0x11f1   : > { %11015 = vmatprep.subr.bf16.mxu0 %v16851_v12 }
0x11f8   : > { %11016 = vmatpush3.bf16.xpose.msra.mxu0 %v6295_v45 }
0x11f9   : > { %11017 = vmatprep.subr.bf16.mxu0 %v16851_v12 }
0x1200   : > { %11018 = vmatpush3.bf16.xpose.msra.mxu0 %v6292_v10 }
0x1201   : > { %11019 = vmatprep.subr.bf16.mxu0 %v16851_v12 }
0x1208   : > { %11020 = vmatpush3.bf16.xpose.msra.mxu0 %v6289_v9 }
0x1209   : > { %11069 = vmatprep.subr.bf16.mxu0 %v16851_v12 }
0x120f   : > { %11022 = vmatmul.mubr.msk.bf16.vlgmr.msra.gmra.mxu0 %vm1528_vm6, %v16964_v41 }
0x1210   : > { %11070 = vmatpush3.bf16.msra.mxu0 %v11543_v50  ;;  %11025 = vmatprep.mubr.msk.bf16.mxu0 %vm12088_vm5, %v16851_v12 }
0x1211   : > { %11071 = vmatprep.subr.bf16.mxu0 %v16851_v12 }
0x1214   : > { %11072 = vmatpush3.bf16.msra.mxu0 %v11544_v11 }
0x1215   : > { %11073 = vmatprep.subr.bf16.mxu0 %v16851_v12 }
0x1217   : > { %11026 = vmatmul.mubr.msk.bf16.gmra.mxu0 %vm1528_vm6, %v16965_v21 }
0x1218   : > { %11029 = vmatprep.mubr.msk.bf16.mxu0 %vm12088_vm5, %v16851_v12  ;;  %11074 = vmatpush3.bf16.msra.mxu0 %v11545_v48 }
0x1219   : > { %11075 = vmatprep.subr.bf16.mxu0 %v16851_v12 }
0x121c   : > { %11076 = vmatpush3.bf16.msra.mxu0 %v11546_v18 }
0x121d   : > { %11125 = vmatprep.subr.bf16.mxu0 %v16851_v12 }
0x121f   : > { %11030 = vmatmul.mubr.msk.bf16.gmra.mxu0 %vm1528_vm6, %v16966_v36 }
0x1220   : > { %11033 = vmatprep.mubr.msk.bf16.mxu0 %vm12088_vm5, %v16851_v12 }
0x1225   : > { %v6822_v17 = vpop.xlane.xlu0 %6821 }
0x1226   : > { %v6910_v14 = vsub.f32 %v15365_v32, %v6822_v17 }
0x1227   : > { %11034 = vmatmul.mubr.msk.bf16.gmra.mxu0 %vm1528_vm6, %v16967_v31 }
0x1228   : > { %v6955_v59 = vmul.f32 1.442695, %v6910_v14  ;;  %11037 = vmatprep.mubr.msk.bf16.mxu0 %vm12088_vm5, %v16851_v12 }
0x1229   : > { %v6825_v33 = vpop.xlane.xlu1 %6824 }
0x122a   : > { %11817 = vpow2.f32 %v6955_v59  ;;  %v6911_v63 = vsub.f32 %v15369_v47, %v6825_v33  ;;  %v6799_v59 = vsel %vm2885_vm7, %v15244_v29, -inf  ;;  %v6802_v33 = vsel %vm2885_vm7, %v15246_v62, -inf }
0x122c   : > { %v6957_v1 = vmul.f32 1.442695, %v6911_v63  ;;  %v6811_v63 = vsel %vm2885_vm7, %v15265_v5, -inf }
0x122d   : > { %v6828_v44 = vpop.xlane.xlu0 %6827 }
0x122e   : > { %11819 = vpow2.f32 %v6957_v1  ;;  %v6912_v32 = vsub.f32 %v15373_v8, %v6828_v44  ;;  %v6808_v1 = vsel %vm2885_vm7, %v15259_v13, -inf  ;;  %v6814_v44 = vsel %vm2885_vm7, %v15269_v42, -inf }
0x122f   : > { %11038 = vmatmul.mubr.msk.bf16.gmra.mxu0 %vm1528_vm6, %v6267_v28  ;;  %v6817_v28 = vsel %vm2910_vm8, %v15275_v52, -inf }
0x1230   : > { %v6959_v27 = vmul.f32 1.442695, %v6912_v32  ;;  %11077 = vmatprep.mubr.msk.bf16.mxu0 %vm12088_vm5, %v16851_v12 }
0x1231   : > { %v6831_v22 = vpop.xlane.xlu1 %6830 }
0x1232   : > { %11821 = vpow2.f32 %v6959_v27  ;;  %v6913_v43 = vsub.f32 %v15377_v7, %v6831_v22 }
0x1234   : > { %v6961_v24 = vmul.f32 1.442695, %v6913_v43 }
0x1235   : > { %v6834_v53 = vpop.xlane.xlu0 %6833 }
0x1236   : > { %11823 = vpow2.f32 %v6961_v24  ;;  %v6914_v47 = vsub.f32 %v15381_v23, %v6834_v53 }
0x1237   : > { %v15464_v61 = vpop.eup %11817  ;;  %11078 = vmatmul.mubr.msk.bf16.vlgmr.msra.gmra.mxu0 %vm926_vm3, %v14586_v34 }
0x1238   : > { %v6963_v8 = vmul.f32 1.442695, %v6914_v47  ;;  %v7036_v46 = vsel %vm2885_vm7, %v15464_v61, 0.0  ;;  %11081 = vmatprep.mubr.msk.bf16.mxu0 %vm12088_vm5, %v16851_v12 }
0x1239   : > { %v6837_v6 = vpop.xlane.xlu1 %6836  ;;  %7037 = vadd.xlane.f32.xlu1 %v7036_v46 }
0x123a   : > { %11825 = vpow2.f32 %v6963_v8  ;;  %v6915_v7 = vsub.f32 %v15385_v16, %v6837_v6 }
0x123b   : > { %v15473_v45 = vpop.eup %11819 }
0x123c   : > { %v6965_v23 = vmul.f32 1.442695, %v6915_v7  ;;  %v7039_v37 = vsel %vm2885_vm7, %v15473_v45, 0.0 }
0x123d   : > { %v6840_v15 = vpop.xlane.xlu0 %6839  ;;  %7040 = vadd.xlane.f32.xlu0 %v7039_v37 }
0x123e   : > { %11827 = vpow2.f32 %v6965_v23  ;;  %v6916_v34 = vsub.f32 %v15389_v57, %v6840_v15 }
0x123f   : > { %v15478_v39 = vpop.eup %11821  ;;  %11082 = vmatmul.mubr.msk.bf16.gmra.mxu0 %vm926_vm3, %v14608_v2 }
0x1240   : > { %v6967_v10 = vmul.f32 1.442695, %v6916_v34  ;;  %v7042_v16 = vsel %vm2885_vm7, %v15478_v39, 0.0  ;;  %11085 = vmatprep.mubr.msk.bf16.mxu0 %vm12088_vm5, %v16851_v12 }
0x1241   : > { %7043 = vadd.xlane.f32.xlu1 %v7042_v16  ;;  %v6843_v51 = vpop.xlane.xlu1 %6842 }
0x1242   : > { %11829 = vpow2.f32 %v6967_v10  ;;  %v6917_v35 = vsub.f32 %v15393_v55, %v6843_v51 }
0x1243   : > { %v15487_v9 = vpop.eup %11823 }
0x1244   : > { %v6969_v57 = vmul.f32 1.442695, %v6917_v35  ;;  %v7045_v50 = vsel %vm2885_vm7, %v15487_v9, 0.0 }
0x1245   : > { %7046 = vadd.xlane.f32.xlu0 %v7045_v50  ;;  %v6846_v2 = vpop.xlane.xlu0 %6845 }
0x1246   : > { %11831 = vpow2.f32 %v6969_v57  ;;  %v6918_v41 = vsub.f32 %v15397_v25, %v6846_v2 }
0x1247   : > { %v15492_v11 = vpop.eup %11825  ;;  %11086 = vmatmul.mubr.msk.bf16.gmra.mxu0 %vm926_vm3, %v14634_v20 }
0x1248   : > { %v6971_v48 = vmul.f32 1.442695, %v6918_v41  ;;  %v7048_v55 = vsel %vm2885_vm7, %v15492_v11, 0.0  ;;  %11089 = vmatprep.mubr.msk.bf16.mxu0 %vm12088_vm5, %v16851_v12 }
0x1249   : > { %7049 = vadd.xlane.f32.xlu1 %v7048_v55 }
0x124a   : > { %11833 = vpow2.f32 %v6971_v48 }
0x124b   : > { %v15500_v21 = vpop.eup %11827 }
0x124c   : > { %v7051_v18 = vsel %vm2885_vm7, %v15500_v21, 0.0 }
0x124d   : > { %7052 = vadd.xlane.f32.xlu0 %v7051_v18 }
0x124f   : > { %v15504_v25 = vpop.eup %11829  ;;  %11090 = vmatmul.mubr.msk.bf16.gmra.mxu0 %vm926_vm3, %v14650_v0  ;;  %v6793_v0 = vsel %vm2885_vm7, %v15236_v60, -inf }
0x1250   : > { %v7054_v20 = vsel %vm2885_vm7, %v15504_v25, 0.0  ;;  %11093 = vmatprep.mubr.msk.bf16.mxu0 %vm12088_vm5, %v16851_v12 }
0x1251   : > { %7055 = vadd.xlane.f32.xlu1 %v7054_v20 }
0x1253   : > { %v15512_v36 = vpop.eup %11831 }
0x1254   : > { %v7057_v17 = vsel %vm2885_vm7, %v15512_v36, 0.0 }
0x1255   : > { %7058 = vadd.xlane.f32.xlu0 %v7057_v17 }
0x1257   : > { %v15516_v14 = vpop.eup %11833  ;;  %11094 = vmatmul.mubr.msk.bf16.gmra.mxu0 %vm926_vm3, %v14662_v40  ;;  %v6805_v40 = vsel %vm2885_vm7, %v15255_v4, -inf }
0x1258   : > { %v7060_v31 = vsel %vm2910_vm8, %v15516_v14, 0.0  ;;  %11135 = vmatprep.mubr.msk.bf16.mxu0 %vm12088_vm5, %v16851_v12 }
0x1259   : > { %6794 = vmax.xlane.f32.xlu0 %v6793_v0  ;;  %7061 = vadd.xlane.f32.xlu1 %v7060_v31 }
0x125d   : > { %6800 = vmax.xlane.f32.xlu0 %v6799_v59  ;;  %6797 = vmax.xlane.f32.xlu1 %v6796_v26 }
0x1261   : > { %6806 = vmax.xlane.f32.xlu0 %v6805_v40  ;;  %6803 = vmax.xlane.f32.xlu1 %v6802_v33 }
0x1265   : > { %6812 = vmax.xlane.f32.xlu0 %v6811_v63  ;;  %6809 = vmax.xlane.f32.xlu1 %v6808_v1 }
0x1269   : > { %6818 = vmax.xlane.f32.xlu0 %v6817_v28  ;;  %6815 = vmax.xlane.f32.xlu1 %v6814_v44 }
0x12c2   : > { %v7038_v32 = vpop.xlane.xlu1 %7037 }
0x12c3   : > { %11835 = vrcp.f32 %v7038_v32 }
0x12c6   : > { %v7041_v27 = vpop.xlane.xlu0 %7040 }
0x12c7   : > { %11837 = vrcp.f32 %v7041_v27 }
0x12ca   : > { %v7044_v22 = vpop.xlane.xlu1 %7043 }
0x12cb   : > { %11839 = vrcp.f32 %v7044_v22 }
0x12ce   : > { %v7047_v43 = vpop.xlane.xlu0 %7046 }
0x12cf   : > { %11841 = vrcp.f32 %v7047_v43  ;;  %v15542_v24 = vpop.f32.mrf.mxu0 }
0x12d0   : > { %v6847_v53 = vsel %vm2885_vm7, %v15542_v24, -inf  ;;  %v11836_v8 = vpop.eup %11835 }
0x12d1   : > { %6848 = vmax.xlane.f32.xlu1 %v6847_v53  ;;  %v11023_v47 = vpop.f32.mrf.mxu0  ;;  %v15551_v37 = vmul.f32 %v11836_v8, %v15464_v61 }
0x12d2   : > { %v7050_v46 = vpop.xlane.xlu1 %7049 }
0x12d3   : > { %v15546_v6 = vpop.f32.mrf.mxu0  ;;  %11843 = vrcp.f32 %v7050_v46 }
0x12d4   : > { %v11838_v7 = vpop.eup %11837  ;;  %v6850_v23 = vsel %vm2885_vm7, %v15546_v6, -inf }
0x12d5   : > { %v15554_v15 = vmul.f32 %v11838_v7, %v15473_v45  ;;  %6851 = vmax.xlane.f32.xlu0 %v6850_v23  ;;  %v11024_v34 = vpop.f32.mrf.mxu0 }
0x12d6   : > { %v7053_v10 = vpop.xlane.xlu0 %7052 }
0x12d7   : > { %v7294_v16 = vpack.c.bf16 %v15554_v15, %v15551_v37  ;;  %11845 = vrcp.f32 %v7053_v10  ;;  %v15558_v51 = vpop.f32.mrf.mxu0 }
0x12d8   : > { %v6853_v35 = vsel %vm2885_vm7, %v15558_v51, -inf  ;;  %v11840_v61 = vpop.eup %11839 }
0x12d9   : > { %6854 = vmax.xlane.f32.xlu1 %v6853_v35  ;;  %v11027_v57 = vpop.f32.mrf.mxu0  ;;  %v15567_v55 = vmul.f32 %v11840_v61, %v15478_v39 }
0x12da   : > { %v7056_v50 = vpop.xlane.xlu1 %7055 }
0x12db   : > { %v15562_v2 = vpop.f32.mrf.mxu0  ;;  %11847 = vrcp.f32 %v7056_v50 }
0x12dc   : > { %v11842_v45 = vpop.eup %11841  ;;  %v6856_v41 = vsel %vm2885_vm7, %v15562_v2, -inf }
0x12dd   : > { %6857 = vmax.xlane.f32.xlu0 %v6856_v41  ;;  %v11028_v48 = vpop.f32.mrf.mxu0  ;;  %v15570_v18 = vmul.f32 %v11842_v45, %v15487_v9 }
0x12de   : > { %v7059_v20 = vpop.xlane.xlu0 %7058 }
0x12df   : > { %11849 = vrcp.f32 %v7059_v20  ;;  %v15572_v17 = vpop.f32.mrf.mxu0  ;;  %v7295_v0 = vpack.c.bf16 %v15570_v18, %v15567_v55 }
0x12e0   : > { %v11844_v59 = vpop.eup %11843 }
0x12e1   : > { %v11031_v31 = vpop.f32.mrf.mxu0  ;;  %v15582_v28 = vmul.f32 %v11844_v59, %v15492_v11 }
0x12e2   : > { %v15576_v26 = vpop.xlane.xlu1 %7061  ;;  %v6795_v40 = vpop.xlane.xlu0 %6794 }
0x12e3   : > { %v6901_v33 = vsub.f32 %v15236_v60, %v6795_v40  ;;  %v15579_v63 = vpop.f32.mrf.mxu0 }
0x12e4   : > { %v11846_v39 = vpop.eup %11845 }
0x12e5   : > { %v6937_v1 = vmul.f32 1.442695, %v6901_v33  ;;  %v11032_v9 = vpop.f32.mrf.mxu0  ;;  %v15585_v44 = vmul.f32 %v11846_v39, %v15500_v21 }
0x12e6   : > { %v6798_v32 = vpop.xlane.xlu1 %6797  ;;  %v6801_v27 = vpop.xlane.xlu0 %6800 }
0x12e7   : > { %11851 = vpow2.f32 %v6937_v1  ;;  %v6902_v22 = vsub.f32 %v15242_v38, %v6798_v32  ;;  %v6903_v43 = vsub.f32 %v15244_v29, %v6801_v27  ;;  %v15589_v53 = vpop.f32.mrf.mxu0  ;;  %v7296_v60 = vpack.c.bf16 %v15585_v44, %v15582_v28 }
0x12e8   : > { %v11848_v47 = vpop.eup %11847 }
0x12e9   : > { %v6939_v8 = vmul.f32 1.442695, %v6902_v22  ;;  %v6941_v46 = vmul.f32 1.442695, %v6903_v43  ;;  %v11035_v11 = vpop.f32.mrf.mxu0  ;;  %v15597_v38 = vmul.f32 %v11848_v47, %v15504_v25  ;;  %v6859_v43 = vsel %vm2885_vm7, %v15572_v17, -inf }
0x12ea   : > { %v6804_v7 = vpop.xlane.xlu1 %6803  ;;  %v6807_v23 = vpop.xlane.xlu0 %6806  ;;  %v6862_v11 = vsel %vm2885_vm7, %v15579_v63, -inf }
0x12eb   : > { %11853 = vpow2.f32 %v6939_v8  ;;  %v6904_v21 = vsub.f32 %v15246_v62, %v6804_v7  ;;  %v15594_v34 = vpop.f32.mrf.mxu0  ;;  %v6905_v35 = vsub.f32 %v15255_v4, %v6807_v23 }
0x12ec   : > { %v11850_v10 = vpop.eup %11849  ;;  %11855 = vpow2.f32 %v6941_v46 }
0x12ed   : > { %v6943_v29 = vmul.f32 1.442695, %v6904_v21  ;;  %v11036_v57 = vpop.f32.mrf.mxu0  ;;  %v15601_v61 = vmul.f32 %v11850_v10, %v15512_v36  ;;  %v6945_v41 = vmul.f32 1.442695, %v6905_v35 }
0x12ee   : > { %v6810_v50 = vpop.xlane.xlu1 %6809  ;;  %v6813_v25 = vpop.xlane.xlu0 %6812 }
0x12ef   : > { %v15603_v45 = vpop.f32.mrf.mxu0  ;;  %v7297_v62 = vpack.c.bf16 %v15601_v61, %v15597_v38  ;;  %11857 = vpow2.f32 %v6943_v29  ;;  %v6906_v48 = vsub.f32 %v15259_v13, %v6810_v50  ;;  %v6907_v4 = vsub.f32 %v15265_v5, %v6813_v25 }
0x12f0   : > { %11859 = vpow2.f32 %v6945_v41  ;;  %v6865_v29 = vsel %vm2885_vm7, %v15589_v53, -inf }
0x12f1   : > { %v11039_v20 = vpop.f32.mrf.mxu0  ;;  %v6947_v36 = vmul.f32 1.442695, %v6906_v48  ;;  %v6949_v32 = vmul.f32 1.442695, %v6907_v4  ;;  %v6868_v48 = vsel %vm2885_vm7, %v15594_v34, -inf }
0x12f2   : > { %v6816_v31 = vpop.xlane.xlu1 %6815 }
0x12f3   : > { %v6372_v59 = vpop.f32.mrf.mxu0  ;;  %v6908_v33 = vsub.f32 %v15269_v42, %v6816_v31  ;;  %11861 = vpow2.f32 %v6947_v36  ;;  %v6871_v36 = vsel %vm2910_vm8, %v15603_v45, -inf }
0x12f4   : > { %v15608_v40 = vpop.eup %11851  ;;  %11863 = vpow2.f32 %v6949_v32 }
0x12f5   : > { %v11040_v39 = vpop.f32.mrf.mxu0  ;;  %v7009_v1 = vsel %vm2885_vm7, %v15608_v40, 0.0  ;;  %v6951_v27 = vmul.f32 1.442695, %v6908_v33 }
0x12f6   : > { %7010 = vadd.xlane.f32.xlu1 %v7009_v1 }
0x12f7   : > { %v15614_v9 = vpop.f32.mrf.mxu0  ;;  %11865 = vpow2.f32 %v6951_v27 }
0x12f8   : > { %v15616_v13 = vpop.eup %11853  ;;  %11867 = vrcp.f32 %v15576_v26 }
0x12f9   : > { %v11079_v22 = vpop.f32.mrf.mxu0  ;;  %v7012_v5 = vsel %vm2885_vm7, %v15616_v13, 0.0  ;;  %v15622_v42 = vpop.eup %11855 }
0x12fa   : > { %7013 = vadd.xlane.f32.xlu0 %v7012_v5  ;;  %6860 = vmax.xlane.f32.xlu1 %v6859_v43  ;;  %v7015_v46 = vsel %vm2885_vm7, %v15622_v42, 0.0 }
0x12fb   : > { %v15624_v47 = vpop.f32.mrf.mxu0 }
0x12fc   : > { %v15630_v7 = vpop.eup %11857 }
0x12fd   : > { %v11080_v8 = vpop.f32.mrf.mxu0  ;;  %v7018_v10 = vsel %vm2885_vm7, %v15630_v7, 0.0  ;;  %v15636_v35 = vpop.eup %11859 }
0x12fe   : > { %7016 = vadd.xlane.f32.xlu1 %v7015_v46  ;;  %6863 = vmax.xlane.f32.xlu0 %v6862_v11  ;;  %v7021_v41 = vsel %vm2885_vm7, %v15636_v35, 0.0  ;;  %v9343_v46 = vld [vmem:[%s16663_s10 + $0x7] ss:$0 sm:$0xff] }
0x12ff   : > { %v6549_v23 = vpop.f32.mrf.mxu0 }
0x1300   : > { %v15642_v25 = vpop.eup %11861 }
0x1301   : > { %v11083_v21 = vpop.f32.mrf.mxu0  ;;  %v15644_v31 = vpop.eup %11863  ;;  %v7024_v4 = vsel %vm2885_vm7, %v15642_v25, 0.0 }
0x1302   : > { %7019 = vadd.xlane.f32.xlu0 %v7018_v10  ;;  %6866 = vmax.xlane.f32.xlu1 %v6865_v29  ;;  %v7027_v32 = vsel %vm2885_vm7, %v15644_v31, 0.0 }
0x1303   : > { %v6552_v57 = vpop.f32.mrf.mxu0 }
0x1304   : > { %v15650_v33 = vpop.eup %11865 }
0x1305   : > { %v11084_v50 = vpop.f32.mrf.mxu0  ;;  %v7030_v27 = vsel %vm2885_vm7, %v15650_v33, 0.0  ;;  %v11868_v18 = vpop.eup %11867 }
0x1306   : > { %7022 = vadd.xlane.f32.xlu1 %v7021_v41  ;;  %6869 = vmax.xlane.f32.xlu0 %v6868_v48  ;;  %v7170_v28 = vmul.f32 %v11868_v18, %v15516_v14 }
0x1307   : > { %v6557_v20 = vpop.f32.mrf.mxu0 }
0x1309   : > { %v11087_v59 = vpop.f32.mrf.mxu0 }
0x130a   : > { %7025 = vadd.xlane.f32.xlu0 %v7024_v4  ;;  %6872 = vmax.xlane.f32.xlu1 %v6871_v36 }
0x130b   : > { %v6560_v39 = vpop.f32.mrf.mxu0 }
0x130d   : > { %v11088_v1 = vpop.f32.mrf.mxu0 }
0x130e   : > { %7028 = vadd.xlane.f32.xlu0 %v7027_v32  ;;  %7031 = vadd.xlane.f32.xlu1 %v7030_v27  ;;  %v6561_v1 = vadd.f32 %v9343_v46, %v6560_v39  ;;  %v6558_v27 = vadd.f32 %v9343_v46, %v6557_v20  ;;  %v6542_v39 = vadd.f32 %v9343_v46, %v15614_v9 }
0x130f   : > { %v6565_v22 = vpop.f32.mrf.mxu0  ;;  %v16968_v9 = vpack.c.bf16 %v15216_v19, %v15214_v30  ;;  %v16972_v30 = vld [vmem:[#allocation34_spill] sm:$0xff]  ;;  %v16973_v19 = vld [vmem:[#allocation35_spill] sm:$0xff] }
0x1310   : > { %v6566_v4 = vadd.f32 %v9343_v46, %v6565_v22  ;;  %v6545_v22 = vadd.f32 %v9343_v46, %v15624_v47 }
0x1311   : > { %v11091_v5 = vpop.f32.mrf.mxu0 }
0x1312   : > { %v6688_v5 = vpack.c.bf16 %v6561_v1, %v6558_v27  ;;  %v6686_v20 = vpack.c.bf16 %v6545_v22, %v6542_v39  ;;  %v16981_v1 = vld [vmem:[#allocation41_spill] sm:$0xff]  ;;  %v15737_v39 = vpop.xlane.xlu0 %6818 }
0x1313   : > { %v6568_v43 = vpop.f32.mrf.mxu0 }
0x1314   : > { %v6569_v41 = vadd.f32 %v9343_v46, %v6568_v43  ;;  %v6550_v43 = vadd.f32 %v9343_v46, %v6549_v23  ;;  %v6707_v23 = vsel %vm1528_vm6, %v6686_v20, 0 }
0x1315   : > { %v11092_v8 = vpop.f32.mrf.mxu0 }
0x1316   : > { %v6689_v36 = vpack.c.bf16 %v6569_v41, %v6566_v4  ;;  %v6553_v8 = vadd.f32 %v9343_v46, %v6552_v57  ;;  %v12021_v57 = vld [vmem:[%s16665_s12 + $0x5] ss:$0 sm:$0xff]  ;;  %v16976_v4 = vld [vmem:[#allocation51_spill] sm:$0xff] }
0x1317   : > { %v6573_v11 = vpop.f32.mrf.mxu0 }
0x1318   : > { %v6574_v21 = vadd.f32 %v9343_v46, %v6573_v11  ;;  %v6716_v32 = vsel %vm1528_vm6, %v6689_v36, 0  ;;  %v6713_v11 = vsel %vm1528_vm6, %v6688_v5, 0  ;;  %v16970_v46 = vld [vmem:[#allocation48_spill] sm:$0xff]  ;;  %v16979_v36 = vld [vmem:[#allocation47_spill] sm:$0xff] }
0x1319   : > { %v11095_v10 = vpop.f32.mrf.mxu0  ;;  %v16971_v41 = vpack.c.bf16 %v15222_v3, %v16970_v46  ;;  %v16984_v5 = vld [vmem:[#allocation44_spill] sm:$0xff] }
0x131a   : > { %v6690_v29 = vpack.c.bf16 %v6574_v21, %v6574_v21  ;;  %v6687_v21 = vpack.c.bf16 %v6553_v8, %v6550_v43  ;;  %v16985_v8 = vld [vmem:[#allocation45_spill] sm:$0xff]  ;;  %v12022_v43 = vld [vmem:[%s16820_s27 + $0x7] ss:$0 sm:$0xff] }
0x131b   : > { %v6576_v50 = vpop.f32.mrf.mxu0 }
0x131c   : > { %v6719_v48 = vsel %vm1528_vm6, %v6690_v29, 0  ;;  %v6710_v10 = vsel %vm1528_vm6, %v6687_v21, 0  ;;  %v5840_v29 = vadd.f32 %v12021_v57, %v15141_v54  ;;  %v16969_v54 = vpack.c.bf16 %v15133_v58, %v15131_v56  ;;  %v16978_v58 = vld [vmem:[#allocation46_spill] sm:$0xff]  ;;  %v16987_v21 = vld [vmem:[#allocation43_spill] sm:$0xff] }
0x131d   : > { %v11096_v59 = vpop.f32.mrf.mxu0  ;;  %11126 = vmatpush3.bf16.xpose.msra.mxu0 %v6719_v48  ;;  %v16974_v48 = vpack.c.bf16 %v16972_v30, %v16973_v19  ;;  %v16980_v3 = vpack.c.bf16 %v16978_v58, %v16979_v36  ;;  %v6472_v22 = vadd.f32 %v12022_v43, %v16987_v21  ;;  %v7298_v57 = vpack.c.bf16 %v7170_v28, %v7170_v28 }
0x131e   : > { %11127 = vmatprep.subr.bf16.mxu0 %v16851_v12  ;;  %v7303_v47 = vpack.c.bf16 %v5840_v29, %v5840_v29  ;;  %v16975_v59 = vld [vmem:[#allocation52_spill] sm:$0xff] }
0x131f   : > { %v16977_v56 = vpack.c.bf16 %v16975_v59, %v16976_v4 }
0x1320   : > { %v7320_v50 = vand.u32 %v7303_v47, %v12882_v49 }
0x1325   : > { %11128 = vmatpush3.bf16.xpose.msra.mxu0 %v6716_v32  ;;  %v16982_v32 = vld [vmem:[#allocation39_spill] sm:$0xff] }
0x1326   : > { %11129 = vmatprep.subr.bf16.mxu0 %v16851_v12  ;;  %v16983_v27 = vpack.c.bf16 %v16981_v1, %v16982_v32 }
0x132d   : > { %11130 = vmatpush3.bf16.xpose.msra.mxu0 %v6713_v11  ;;  %v16986_v11 = vpack.c.bf16 %v16984_v5, %v16985_v8 }
0x132e   : > { %11131 = vmatprep.subr.bf16.mxu0 %v16851_v12 }
0x1335   : > { %11132 = vmatpush3.bf16.xpose.msra.mxu0 %v6710_v10  ;;  %v6685_v10 = vpack.c.bf16 %v6472_v22, %v6472_v22 }
0x1336   : > { %11133 = vmatprep.subr.bf16.mxu0 %v16851_v12 }
0x133d   : > { %11134 = vmatpush3.bf16.xpose.msra.mxu0 %v6707_v23 }
0x133e   : > { %11185 = vmatprep.subr.bf16.mxu0 %v16851_v12 }
0x1344   : > { %11136 = vmatmul.mubr.msk.bf16.vlgmr.msra.gmra.mxu0 %vm1528_vm6, %v16968_v9 }
0x1345   : > { %11186 = vmatpush3.bf16.msra.mxu0 %v7320_v50  ;;  %11139 = vmatprep.mubr.msk.bf16.mxu0 %vm12088_vm5, %v16851_v12 }
0x1346   : > { %11187 = vmatprep.subr.bf16.mxu0 %v16851_v12 }
0x1349   : > { %11188 = vmatpush3.bf16.msra.mxu0 %v16969_v54 }
0x134a   : > { %11189 = vmatprep.subr.bf16.mxu0 %v16851_v12 }
0x134c   : > { %11140 = vmatmul.mubr.msk.bf16.gmra.mxu0 %vm1528_vm6, %v16971_v41 }
0x134d   : > { %11190 = vmatpush3.bf16.msra.mxu0 %v16974_v48  ;;  %11143 = vmatprep.mubr.msk.bf16.mxu0 %vm12088_vm5, %v16851_v12 }
0x134e   : > { %11191 = vmatprep.subr.bf16.mxu0 %v16851_v12 }
0x1351   : > { %11192 = vmatpush3.bf16.msra.mxu0 %v16977_v56 }
0x1352   : > { %11193 = vmatprep.subr.bf16.mxu0 %v16851_v12 }
0x1354   : > { %11144 = vmatmul.mubr.msk.bf16.gmra.mxu0 %vm1528_vm6, %v16980_v3 }
0x1355   : > { %11194 = vmatpush3.bf16.msra.mxu0 %v16983_v27  ;;  %11147 = vmatprep.mubr.msk.bf16.mxu0 %vm12088_vm5, %v16851_v12 }
0x1356   : > { %11237 = vmatprep.subr.bf16.mxu0 %v16851_v12 }
0x135a   : > { %v15739_v20 = vpop.xlane.xlu1 %6848 }
0x135c   : > { %11148 = vmatmul.mubr.msk.bf16.gmra.mxu0 %vm1528_vm6, %v16986_v11 }
0x135d   : > { %11151 = vmatprep.mubr.msk.bf16.mxu0 %vm12088_vm5, %v16851_v12 }
0x135e   : > { %v15741_v37 = vpop.xlane.xlu0 %6851 }
0x135f   : > { %v6920_v5 = vsub.f32 %v15546_v6, %v15741_v37 }
0x1361   : > { %v6975_v43 = vmul.f32 1.442695, %v6920_v5 }
0x1362   : > { %v15743_v15 = vpop.xlane.xlu1 %6854 }
0x1363   : > { %v6921_v11 = vsub.f32 %v15558_v51, %v15743_v15 }
0x1364   : > { %11152 = vmatmul.mubr.msk.bf16.gmra.mxu0 %vm1528_vm6, %v6685_v10 }
0x1365   : > { %11195 = vmatprep.mubr.msk.bf16.mxu0 %vm12088_vm5, %v16851_v12  ;;  %v6977_v22 = vmul.f32 1.442695, %v6921_v11 }
0x136c   : > { %11196 = vmatmul.mubr.msk.bf16.vlgmr.msra.gmra.mxu0 %vm2885_vm7, %v7294_v16  ;;  %v15751_v16 = vpop.xlane.xlu0 %6857 }
0x136d   : > { %11199 = vmatprep.mubr.msk.bf16.mxu0 %vm12088_vm5, %v16851_v12  ;;  %v6922_v21 = vsub.f32 %v15562_v2, %v15751_v16 }
0x1374   : > { %11200 = vmatmul.mubr.msk.bf16.gmra.mxu0 %vm2885_vm7, %v7295_v0 }
0x1375   : > { %11203 = vmatprep.mubr.msk.bf16.mxu0 %vm12088_vm5, %v16851_v12 }
0x137c   : > { %11204 = vmatmul.mubr.msk.bf16.gmra.mxu0 %vm2885_vm7, %v7296_v60 }
0x137d   : > { %11207 = vmatprep.mubr.msk.bf16.mxu0 %vm12088_vm5, %v16851_v12 }
0x137f   : > { %v7011_v55 = vpop.xlane.xlu1 %7010 }
0x1380   : > { %11869 = vrcp.f32 %v7011_v55 }
0x1383   : > { %v7014_v0 = vpop.xlane.xlu0 %7013  ;;  %v15753_v26 = vpop.xlane.xlu1 %6860 }
0x1384   : > { %11871 = vrcp.f32 %v7014_v0  ;;  %11208 = vmatmul.mubr.msk.bf16.gmra.mxu0 %vm2885_vm7, %v7297_v62 }
0x1385   : > { %11211 = vmatprep.mubr.msk.bf16.mxu0 %vm12088_vm5, %v16851_v12 }
0x1387   : > { %v7017_v44 = vpop.xlane.xlu1 %7016  ;;  %v15762_v60 = vpop.xlane.xlu0 %6863 }
0x1388   : > { %11873 = vrcp.f32 %v7017_v44  ;;  %v6924_v10 = vsub.f32 %v15579_v63, %v15762_v60 }
0x138b   : > { %v7020_v29 = vpop.xlane.xlu0 %7019  ;;  %v15764_v23 = vpop.xlane.xlu1 %6866 }
0x138c   : > { %11212 = vmatmul.mubr.msk.bf16.gmra.mxu0 %vm2885_vm7, %v7298_v57  ;;  %11875 = vrcp.f32 %v7020_v29  ;;  %v6925_v51 = vsub.f32 %v15589_v53, %v15764_v23 }
0x138d   : > { %11239 = vmatprep.mubr.msk.bf16.mxu0 %vm12088_vm5, %v16851_v12  ;;  %v11870_v38 = vpop.eup %11869 }
0x138e   : > { %v7153_v14 = vmul.f32 %v11870_v38, %v15608_v40 }
0x138f   : > { %v7023_v61 = vpop.xlane.xlu1 %7022  ;;  %v15769_v62 = vpop.xlane.xlu0 %6869 }
0x1390   : > { %11877 = vrcp.f32 %v7023_v61  ;;  %v6926_v2 = vsub.f32 %v15594_v34, %v15769_v62 }
0x1391   : > { %v11872_v47 = vpop.eup %11871 }
0x1392   : > { %v7154_v50 = vmul.f32 %v11872_v47, %v15616_v13 }
0x1393   : > { %v7026_v9 = vpop.xlane.xlu0 %7025  ;;  %v15773_v54 = vpop.xlane.xlu1 %6872 }
0x1394   : > { %v7189_v46 = vpack.c.bf16 %v7154_v50, %v7153_v14  ;;  %11879 = vrcp.f32 %v7026_v9  ;;  %v6927_v15 = vsub.f32 %v15603_v45, %v15773_v54 }
0x1395   : > { %v11874_v19 = vpop.eup %11873 }
0x1396   : > { %11166 = vmatmul.mubr.msk.bf16.vlgmr.msra.gmra.mxu1 %vm2885_vm7, %v7189_v46  ;;  %v7155_v40 = vmul.f32 %v11874_v19, %v15622_v42  ;;  %v6989_v18 = vmul.f32 1.442695, %v6927_v15 }
0x1397   : > { %v7029_v41 = vpop.xlane.xlu0 %7028  ;;  %v7032_v30 = vpop.xlane.xlu1 %7031  ;;  %11169 = vmatprep.mubr.msk.bf16.mxu1 %vm12088_vm5, %v16851_v12 }
0x1398   : > { %11881 = vrcp.f32 %v7029_v41 }
0x1399   : > { %v11876_v48 = vpop.eup %11875  ;;  %11883 = vrcp.f32 %v7032_v30 }
0x139a   : > { %v7156_v13 = vmul.f32 %v11876_v48, %v15630_v7 }
0x139c   : > { %v7190_v59 = vpack.c.bf16 %v7156_v13, %v7155_v40 }
0x139d   : > { %v11878_v4 = vpop.eup %11877 }
0x139e   : > { %11170 = vmatmul.mubr.msk.bf16.gmra.mxu1 %vm2885_vm7, %v7190_v59  ;;  %v7157_v58 = vmul.f32 %v11878_v4, %v15636_v35  ;;  %v11547_v35 = vld [vmem:[%s16666_s13 + $0x20] sm:$0xff]  }
0x139f   : > { %11173 = vmatprep.mubr.msk.bf16.mxu1 %vm12088_vm5, %v16851_v12  ;;  %11238 = vmatpush3.bf16.msra.mxu0 %v11547_v35 }
0x13a0   : > { %11289 = vmatprep.subr.bf16.mxu0 %v16851_v12 }
0x13a1   : > { %v11880_v56 = vpop.eup %11879 }
0x13a2   : > { %v7158_v36 = vmul.f32 %v11880_v56, %v15642_v25  ;;  %v6909_v25 = vsub.f32 %v15275_v52, %v15737_v39  ;;  %v6923_v52 = vsub.f32 %v15572_v17, %v15753_v26  ;;  %v6983_v39 = vmul.f32 1.442695, %v6924_v10 }
0x13a3   : > { %v6987_v17 = vmul.f32 1.442695, %v6926_v2 }
0x13a4   : > { %v7191_v3 = vpack.c.bf16 %v7158_v36, %v7157_v58  ;;  %v6981_v6 = vmul.f32 1.442695, %v6923_v52 }
0x13a5   : > { %v11882_v1 = vpop.eup %11881 }
0x13a6   : > { %v11884_v32 = vpop.eup %11883  ;;  %11174 = vmatmul.mubr.msk.bf16.gmra.mxu1 %vm2885_vm7, %v7191_v3  ;;  %v7159_v42 = vmul.f32 %v11882_v1, %v15644_v31  ;;  %v6919_v31 = vsub.f32 %v15542_v24, %v15739_v20  ;;  %v6979_v24 = vmul.f32 1.442695, %v6922_v21  ;;  %v6985_v20 = vmul.f32 1.442695, %v6925_v51 }
0x13a7   : > { %11177 = vmatprep.mubr.msk.bf16.mxu1 %vm12088_vm5, %v16851_v12  ;;  %v7160_v7 = vmul.f32 %v11884_v32, %v15650_v33  ;;  %v6953_v33 = vmul.f32 1.442695, %v6909_v25  ;;  %v11548_v25 = vld [vmem:[%s16666_s13 + $0x28] sm:$0xff]  }
0x13a8   : > { %v6973_v8 = vmul.f32 1.442695, %v6919_v31  ;;  %11216 = vmatpush3.bf16.msra.mxu1 %v11548_v25 }
0x13a9   : > { %v7192_v27 = vpack.c.bf16 %v7160_v7, %v7159_v42  ;;  %11885 = vpow2.f32 %v6953_v33  ;;  %11259 = vmatprep.subr.bf16.mxu1 %v16851_v12 }
0x13aa   : > { %11887 = vpow2.f32 %v6973_v8 }
0x13ab   : > { %11889 = vpow2.f32 %v6975_v43 }
0x13ac   : > { %11891 = vpow2.f32 %v6977_v22 }
0x13ad   : > { %11893 = vpow2.f32 %v6979_v24 }
0x13ae   : > { %11178 = vmatmul.mubr.msk.bf16.gmra.mxu1 %vm2885_vm7, %v7192_v27  ;;  %11895 = vpow2.f32 %v6981_v6 }
0x13af   : > { %11181 = vmatprep.mubr.msk.bf16.mxu1 %vm12088_vm5, %v16851_v12  ;;  %11897 = vpow2.f32 %v6983_v39 }
0x13b0   : > { %11899 = vpow2.f32 %v6985_v20 }
0x13b1   : > { %11901 = vpow2.f32 %v6987_v17 }
0x13b2   : > { %11903 = vpow2.f32 %v6989_v18 }
0x13b6   : > { %v15821_v16 = vpop.eup %11885 }
0x13b7   : > { %v15825_v34 = vpop.eup %11887  ;;  %v7033_v0 = vsel %vm2910_vm8, %v15821_v16, 0.0 }
0x13b8   : > { %v15831_v26 = vpop.eup %11889  ;;  %v7063_v29 = vsel %vm2885_vm7, %v15825_v34, 0.0 }
0x13b9   : > { %v15835_v60 = vpop.eup %11891  ;;  %v7066_v57 = vsel %vm2885_vm7, %v15831_v26, 0.0 }
0x13ba   : > { %v15841_v23 = vpop.eup %11893  ;;  %v7069_v14 = vsel %vm2885_vm7, %v15835_v60, 0.0 }
0x13bb   : > { %v15845_v62 = vpop.eup %11895  ;;  %v7072_v47 = vsel %vm2885_vm7, %v15841_v23, 0.0 }
0x13bc   : > { %v15851_v50 = vpop.eup %11897  ;;  %v7075_v30 = vsel %vm2885_vm7, %v15845_v62, 0.0 }
0x13bd   : > { %v15855_v46 = vpop.eup %11899  ;;  %v7078_v41 = vsel %vm2885_vm7, %v15851_v50, 0.0 }
0x13be   : > { %v15861_v19 = vpop.eup %11901  ;;  %v7081_v59 = vsel %vm2885_vm7, %v15855_v46, 0.0 }
0x13bf   : > { %v7084_v13 = vsel %vm2885_vm7, %v15861_v19, 0.0  ;;  %v15869_v4 = vpop.eup %11903 }
0x13c0   : > { %v7087_v36 = vsel %vm2910_vm8, %v15869_v4, 0.0 }
0x1404   : > { %v15815_v37 = vpop.f32.mrf.mxu0 }
0x1405   : > { %v6874_v63 = vsel %vm2885_vm7, %v15815_v37, -inf }
0x1406   : > { %6875 = vmax.xlane.f32.xlu0 %v6874_v63  ;;  %v11137_v53 = vpop.f32.mrf.mxu0 }
0x1408   : > { %v15823_v55 = vpop.f32.mrf.mxu0 }
0x1409   : > { %v6877_v45 = vsel %vm2885_vm7, %v15823_v55, -inf }
0x140a   : > { %7034 = vadd.xlane.f32.xlu0 %v7033_v0  ;;  %6878 = vmax.xlane.f32.xlu1 %v6877_v45  ;;  %v11138_v28 = vpop.f32.mrf.mxu0 }
0x140c   : > { %v15833_v44 = vpop.f32.mrf.mxu0 }
0x140e   : > { %7067 = vadd.xlane.f32.xlu0 %v7066_v57  ;;  %7064 = vadd.xlane.f32.xlu1 %v7063_v29  ;;  %v11141_v38 = vpop.f32.mrf.mxu0 }
0x1410   : > { %v15843_v61 = vpop.f32.mrf.mxu0 }
0x1412   : > { %7073 = vadd.xlane.f32.xlu0 %v7072_v47  ;;  %7070 = vadd.xlane.f32.xlu1 %v7069_v14  ;;  %v11142_v9 = vpop.f32.mrf.mxu0 }
0x1414   : > { %v15853_v54 = vpop.f32.mrf.mxu0 }
0x1416   : > { %7079 = vadd.xlane.f32.xlu0 %v7078_v41  ;;  %7076 = vadd.xlane.f32.xlu1 %v7075_v30  ;;  %v11145_v48 = vpop.f32.mrf.mxu0 }
0x1418   : > { %v15863_v40 = vpop.f32.mrf.mxu0 }
0x141a   : > { %7085 = vadd.xlane.f32.xlu0 %v7084_v13  ;;  %7082 = vadd.xlane.f32.xlu1 %v7081_v59  ;;  %v11146_v56 = vpop.f32.mrf.mxu0 }
0x141c   : > { %v15871_v58 = vpop.f32.mrf.mxu0 }
0x141e   : > { %7088 = vadd.xlane.f32.xlu1 %v7087_v36  ;;  %v11149_v3 = vpop.f32.mrf.mxu0 }
0x1420   : > { %v15875_v1 = vpop.f32.mrf.mxu0 }
0x1422   : > { %v11150_v32 = vpop.f32.mrf.mxu0 }
0x1424   : > { %v15877_v42 = vpop.f32.mrf.mxu0 }
0x1426   : > { %v11153_v7 = vpop.f32.mrf.mxu0 }
0x1428   : > { %v6790_v27 = vpop.f32.mrf.mxu0 }
0x142a   : > { %v11154_v35 = vpop.f32.mrf.mxu0 }
0x142c   : > { %v15882_v31 = vpop.f32.mrf.mxu0 }
0x142e   : > { %v11197_v33 = vpop.f32.mrf.mxu0 }
0x1430   : > { %v15885_v5 = vpop.f32.mrf.mxu0 }
0x1431   : > { %v7394_v8 = vpack.c.bf16 %v15885_v5, %v15882_v31  ;;  %v6898_v31 = vsel %vm2910_vm8, %v15877_v42, -inf  ;;  %v16989_v5 = vld [vmem:[#allocation50_spill] sm:$0xff] }
0x1432   : > { %v11198_v11 = vpop.f32.mrf.mxu0 }
0x1434   : > { %v15889_v43 = vpop.f32.mrf.mxu0 }
0x1436   : > { %v11201_v21 = vpop.f32.mrf.mxu0 }
0x1438   : > { %v15891_v22 = vpop.f32.mrf.mxu0 }
0x1439   : > { %v7395_v52 = vpack.c.bf16 %v15891_v22, %v15889_v43  ;;  %v16998_v43 = vld [vmem:[#allocation32_spill] sm:$0xff]  ;;  %v16999_v22 = vld [vmem:[#allocation33_spill] sm:$0xff] }
0x143a   : > { %v11202_v24 = vpop.f32.mrf.mxu0 }
0x143c   : > { %v15895_v10 = vpop.f32.mrf.mxu0 }
0x143e   : > { %v11205_v6 = vpop.f32.mrf.mxu0 }
0x1440   : > { %v15897_v51 = vpop.f32.mrf.mxu0 }
0x1441   : > { %v7396_v39 = vpack.c.bf16 %v15897_v51, %v15895_v10 }
0x1442   : > { %v11206_v2 = vpop.f32.mrf.mxu0 }
0x1444   : > { %v15901_v20 = vpop.f32.mrf.mxu0 }
0x1446   : > { %v11209_v17 = vpop.f32.mrf.mxu0 }
0x1448   : > { %v15903_v15 = vpop.f32.mrf.mxu0 }
0x1449   : > { %v7397_v63 = vpack.c.bf16 %v15903_v15, %v15901_v20 }
0x144a   : > { %v11210_v53 = vpop.f32.mrf.mxu0 }
0x144c   : > { %v15907_v18 = vpop.f32.mrf.mxu0 }
0x144d   : > { %v7398_v51 = vpack.c.bf16 %v15907_v18, %v15907_v18 }
0x144e   : > { %v11213_v0 = vpop.f32.mrf.mxu0 }
0x1450   : > { %v7391_v45 = vpop.f32.mrf.mxu0 }
0x1452   : > { %v11214_v28 = vpop.f32.mrf.mxu0 }
0x1456   : > { %v7251_v57 = vpop.f32.mrf.mxu1 }
0x1458   : > { %v11167_v29 = vpop.f32.mrf.mxu1 }
0x145a   : > { %v7254_v38 = vpop.f32.mrf.mxu1 }
0x145b   : > { %v7289_v47 = vpack.c.bf16 %v7254_v38, %v7251_v57  ;;  %v12023_v38 = vld [vmem:[%s16665_s12 + $0x6] ss:$0 sm:$0xff] }
0x145c   : > { %v11168_v14 = vpop.f32.mrf.mxu1 }
0x145d   : > { %11240 = vmatmul.mubr.msk.bf16.vlgmr.msra.gmra.mxu0 %vm1528_vm6, %v7289_v47 }
0x145e   : > { %11243 = vmatprep.mubr.msk.bf16.mxu0 %vm12088_vm5, %v16851_v12  ;;  %v7259_v9 = vpop.f32.mrf.mxu1 }
0x1460   : > { %v11171_v41 = vpop.f32.mrf.mxu1 }
0x1461   : > { %v6883_v41 = vsel %vm2885_vm7, %v15843_v61, -inf }
0x1462   : > { %v7262_v30 = vpop.f32.mrf.mxu1 }
0x1463   : > { %v7290_v48 = vpack.c.bf16 %v7262_v30, %v7259_v9  ;;  %v6880_v9 = vsel %vm2885_vm7, %v15833_v44, -inf  ;;  %v6886_v30 = vsel %vm2885_vm7, %v15853_v54, -inf }
0x1464   : > { %v11172_v13 = vpop.f32.mrf.mxu1 }
0x1465   : > { %11244 = vmatmul.mubr.msk.bf16.gmra.mxu0 %vm1528_vm6, %v7290_v48  ;;  %v6889_v13 = vsel %vm2885_vm7, %v15863_v40, -inf }
0x1466   : > { %v7267_v59 = vpop.f32.mrf.mxu1  ;;  %11247 = vmatprep.mubr.msk.bf16.mxu0 %vm12088_vm5, %v16851_v12 }
0x1468   : > { %v11175_v56 = vpop.f32.mrf.mxu1 }
0x1469   : > { %v6895_v56 = vsel %vm2885_vm7, %v15875_v1, -inf }
0x146a   : > { %v7270_v36 = vpop.f32.mrf.mxu1 }
0x146b   : > { %v7291_v3 = vpack.c.bf16 %v7270_v36, %v7267_v59  ;;  %v6892_v59 = vsel %vm2885_vm7, %v15871_v58, -inf }
0x146c   : > { %v11176_v32 = vpop.f32.mrf.mxu1 }
0x146d   : > { %11248 = vmatmul.mubr.msk.bf16.gmra.mxu0 %vm1528_vm6, %v7291_v3  ;;  %v16992_v3 = vld [vmem:[#allocation28_spill] sm:$0xff]  ;;  %v16993_v32 = vld [vmem:[#allocation29_spill] sm:$0xff] }
0x146e   : > { %v7275_v7 = vpop.f32.mrf.mxu1  ;;  %11251 = vmatprep.mubr.msk.bf16.mxu0 %vm12088_vm5, %v16851_v12 }
0x1470   : > { %v11179_v27 = vpop.f32.mrf.mxu1 }
0x1471   : > { %v16995_v27 = vld [vmem:[#allocation30_spill] sm:$0xff] }
0x1472   : > { %v7278_v35 = vpop.f32.mrf.mxu1 }
0x1473   : > { %v7292_v25 = vpack.c.bf16 %v7278_v35, %v7275_v7  ;;  %v16994_v7 = vpack.c.bf16 %v16992_v3, %v16993_v32  ;;  %v16996_v35 = vld [vmem:[#allocation31_spill] sm:$0xff]  ;;  %v17011_v32 = vld [vmem:[#allocation12_spill] sm:$0xff] }
0x1474   : > { %v11180_v33 = vpop.f32.mrf.mxu1 }
0x1475   : > { %11252 = vmatmul.mubr.msk.bf16.gmra.mxu0 %vm1528_vm6, %v7292_v25  ;;  %v16997_v25 = vpack.c.bf16 %v16995_v27, %v16996_v35 }
0x1476   : > { %11255 = vmatprep.mubr.msk.bf16.mxu0 %vm12088_vm5, %v16851_v12 }
0x148f   : > { %v6876_v11 = vpop.xlane.xlu0 %6875 }
0x1490   : > { %v6928_v21 = vsub.f32 %v15815_v37, %v6876_v11 }
0x1492   : > { %v6991_v24 = vmul.f32 1.442695, %v6928_v21 }
0x1493   : > { %v7035_v6 = vpop.xlane.xlu0 %7034  ;;  %v6879_v2 = vpop.xlane.xlu1 %6878 }
0x1494   : > { %11905 = vpow2.f32 %v6991_v24  ;;  %v6929_v17 = vsub.f32 %v15823_v55, %v6879_v2  ;;  %v16988_v55 = vld [vmem:[#allocation49_spill] sm:$0xff]  ;;  %v12024_v2 = vld [vmem:[%s16665_s12 + $0x7] ss:$0 sm:$0xff] }
0x1495   : > { %11907 = vrcp.f32 %v7035_v6  ;;  %v6258_v47 = vadd.f32 %v12023_v38, %v16988_v55 }
0x1496   : > { %v6993_v53 = vmul.f32 1.442695, %v6929_v17  ;;  %v17001_v17 = vld [vmem:[#allocation20_spill] sm:$0xff] }
0x1497   : > { %v7068_v33 = vpop.xlane.xlu0 %7067  ;;  %v7065_v11 = vpop.xlane.xlu1 %7064 }
0x1498   : > { %11909 = vpow2.f32 %v6993_v53  ;;  %v6676_v53 = vadd.f32 %v12024_v2, %v17001_v17 }
0x1499   : > { %11911 = vrcp.f32 %v7068_v33 }
0x149a   : > { %11913 = vrcp.f32 %v7065_v11  ;;  %v7801_v18 = vpack.c.bf16 %v6676_v53, %v6676_v53 }
0x149b   : > { %v7074_v21 = vpop.xlane.xlu0 %7073  ;;  %v7071_v24 = vpop.xlane.xlu1 %7070 }
0x149c   : > { %11915 = vrcp.f32 %v7074_v21  ;;  %v7818_v38 = vand.u32 %v7801_v18, %v12882_v49 }
0x149d   : > { %11917 = vrcp.f32 %v7071_v24 }
0x149f   : > { %v7077_v20 = vpop.xlane.xlu1 %7076 }
0x14a1   : > { %v15923_v0 = vpop.eup %11905 }
0x14a2   : > { %v11908_v45 = vpop.eup %11907  ;;  %v7090_v28 = vsel %vm2885_vm7, %v15923_v0, 0.0 }
0x14a3   : > { %7091 = vadd.xlane.f32.xlu0 %v7090_v28  ;;  %v7161_v57 = vmul.f32 %v11908_v45, %v15821_v16  ;;  %v7594_v16 = vpack.c.bf16 %v6258_v47, %v6258_v47  ;;  %v7083_v55 = vpop.xlane.xlu1 %7082  ;;  %v17002_v47 = vld [vmem:[#allocation18_spill] sm:$0xff] }
0x14a5   : > { %v15928_v29 = vpop.eup %11909  ;;  %v7193_v37 = vpack.c.bf16 %v7161_v57, %v7161_v57  ;;  %v7611_v48 = vand.u32 %v7594_v16, %v12882_v49 }
0x14a6   : > { %v7093_v14 = vsel %vm2885_vm7, %v15928_v29, 0.0  ;;  %v11912_v10 = vpop.eup %11911 }
0x14a7   : > { %11182 = vmatmul.mubr.msk.bf16.gmra.mxu1 %vm2885_vm7, %v7193_v37  ;;  %7094 = vadd.xlane.f32.xlu1 %v7093_v14  ;;  %v11914_v6 = vpop.eup %11913  ;;  %v7172_v15 = vmul.f32 %v11912_v10, %v15831_v26  ;;  %v17003_v14 = vld [vmem:[#allocation17_spill] sm:$0xff] }
0x14a8   : > { %6881 = vmax.xlane.f32.xlu0 %v6880_v9  ;;  %11217 = vmatprep.mubr.msk.bf16.mxu1 %vm12088_vm5, %v16851_v12  ;;  %v17004_v9 = vpack.c.bf16 %v17002_v47, %v17003_v14 }
0x14a9   : > { %v11916_v45 = vpop.eup %11915 }
0x14aa   : > { %v11918_v37 = vpop.eup %11917  ;;  %v7174_v26 = vmul.f32 %v11916_v45, %v15841_v23 }
0x14ab   : > { %6884 = vmax.xlane.f32.xlu1 %v6883_v41 }
0x14ac   : > { %6887 = vmax.xlane.f32.xlu0 %v6886_v30  ;;  %v7089_v30 = vpop.xlane.xlu1 %7088 }
0x14af   : > { %11218 = vmatmul.mubr.msk.bf16.vlgmr.msra.gmra.mxu1 %vm1528_vm6, %v7394_v8  ;;  %6890 = vmax.xlane.f32.xlu1 %v6889_v13  ;;  %v16990_v8 = vld [vmem:[#allocation27_spill] sm:$0xff] }
0x14b0   : > { %11260 = vmatpush3.bf16.msra.mxu1 %v7611_v48  ;;  %6893 = vmax.xlane.f32.xlu0 %v6892_v59  ;;  %v16991_v36 = vpack.c.bf16 %v16989_v5, %v16990_v8  ;;  %v17005_v48 = vld [vmem:[#allocation16_spill] sm:$0xff]  ;;  %v17006_v13 = vld [vmem:[#allocation15_spill] sm:$0xff] }
0x14b1   : > { %11261 = vmatprep.subr.bf16.mxu1 %v16851_v12  ;;  %11221 = vmatprep.mubr.msk.bf16.mxu1 %vm12088_vm5, %v16851_v12  ;;  %v17007_v59 = vpack.c.bf16 %v17005_v48, %v17006_v13 }
0x14b3   : > { %6896 = vmax.xlane.f32.xlu1 %v6895_v56  ;;  %v17008_v56 = vld [vmem:[#allocation13_spill] sm:$0xff] }
0x14b4   : > { %11262 = vmatpush3.bf16.msra.mxu1 %v16991_v36  ;;  %6899 = vmax.xlane.f32.xlu0 %v6898_v31  ;;  %v17009_v31 = vld [vmem:[#allocation14_spill] sm:$0xff] }
0x14b5   : > { %11263 = vmatprep.subr.bf16.mxu1 %v16851_v12  ;;  %v17010_v5 = vpack.c.bf16 %v17008_v56, %v17009_v31 }
0x14b7   : > { %11222 = vmatmul.mubr.msk.bf16.gmra.mxu1 %vm1528_vm6, %v7395_v52  ;;  %v17000_v52 = vpack.c.bf16 %v16998_v43, %v16999_v22 }
0x14b8   : > { %11264 = vmatpush3.bf16.msra.mxu1 %v16994_v7  ;;  %11225 = vmatprep.mubr.msk.bf16.mxu1 %vm12088_vm5, %v16851_v12  ;;  %v17012_v7 = vld [vmem:[#allocation42_spill] sm:$0xff] }
0x14b9   : > { %11265 = vmatprep.subr.bf16.mxu1 %v16851_v12  ;;  %v17013_v27 = vpack.c.bf16 %v17011_v32, %v17012_v7 }
0x14bc   : > { %11266 = vmatpush3.bf16.msra.mxu1 %v16997_v25 }
0x14bd   : > { %11267 = vmatprep.subr.bf16.mxu1 %v16851_v12 }
0x14bf   : > { %11226 = vmatmul.mubr.msk.bf16.gmra.mxu1 %vm1528_vm6, %v7396_v39  ;;  %v7080_v39 = vpop.xlane.xlu0 %7079 }
0x14c0   : > { %11268 = vmatpush3.bf16.msra.mxu1 %v17000_v52  ;;  %11229 = vmatprep.mubr.msk.bf16.mxu1 %vm12088_vm5, %v16851_v12  ;;  %11919 = vrcp.f32 %v7080_v39 }
0x14c1   : > { %11311 = vmatprep.subr.bf16.mxu1 %v16851_v12  ;;  %11921 = vrcp.f32 %v7077_v20 }
0x14c3   : > { %v7086_v57 = vpop.xlane.xlu0 %7085 }
0x14c4   : > { %11923 = vrcp.f32 %v7086_v57 }
0x14c5   : > { %11925 = vrcp.f32 %v7083_v55 }
0x14c6   : > { %11927 = vrcp.f32 %v7089_v30 }
0x14c7   : > { %11230 = vmatmul.mubr.msk.bf16.gmra.mxu1 %vm1528_vm6, %v7397_v63  ;;  %v7171_v63 = vmul.f32 %v11914_v6, %v15825_v34  ;;  %v7173_v34 = vmul.f32 %v11918_v37, %v15835_v60 }
0x14c8   : > { %11233 = vmatprep.mubr.msk.bf16.mxu1 %vm12088_vm5, %v16851_v12 }
0x14c9   : > { %v7585_v28 = vpack.c.bf16 %v7172_v15, %v7171_v63  ;;  %v7586_v16 = vpack.c.bf16 %v7174_v26, %v7173_v34 }
0x14cd   : > { %v11920_v49 = vpop.eup %11919 }
0x14ce   : > { %v11922_v41 = vpop.eup %11921  ;;  %v7176_v23 = vmul.f32 %v11920_v49, %v15851_v50 }
0x14cf   : > { %11234 = vmatmul.mubr.msk.bf16.gmra.mxu1 %vm1528_vm6, %v7398_v51  ;;  %v7175_v60 = vmul.f32 %v11922_v41, %v15845_v62 }
0x14d0   : > { %11269 = vmatprep.mubr.msk.bf16.mxu1 %vm12088_vm5, %v16851_v12 }
0x14d1   : > { %v11924_v8 = vpop.eup %11923  ;;  %v7587_v36 = vpack.c.bf16 %v7176_v23, %v7175_v60 }
0x14d2   : > { %v11926_v3 = vpop.eup %11925  ;;  %v7178_v50 = vmul.f32 %v11924_v8, %v15861_v19 }
0x14d3   : > { %v7177_v62 = vmul.f32 %v11926_v3, %v15855_v46  ;;  %v11928_v25 = vpop.eup %11927  ;;  %v11549_v46 = vld [vmem:[%s16666_s13 + $0x30] sm:$0xff]  }
0x14d4   : > { %v7179_v33 = vmul.f32 %v11928_v25, %v15869_v4  ;;  %11290 = vmatpush3.bf16.msra.mxu0 %v11549_v46 }
0x14d5   : > { %v7588_v35 = vpack.c.bf16 %v7178_v50, %v7177_v62  ;;  %11341 = vmatprep.subr.bf16.mxu0 %v16851_v12 }
0x14d6   : > { %v7589_v11 = vpack.c.bf16 %v7179_v33, %v7179_v33 }
0x14d7   : > { %11270 = vmatmul.mubr.msk.bf16.vlgmr.msra.gmra.mxu1 %vm2885_vm7, %v7585_v28 }
0x14d8   : > { %11312 = vmatpush3.bf16.msra.mxu1 %v7818_v38  ;;  %11273 = vmatprep.mubr.msk.bf16.mxu1 %vm12088_vm5, %v16851_v12 }
0x14d9   : > { %11313 = vmatprep.subr.bf16.mxu1 %v16851_v12 }
0x14dc   : > { %11314 = vmatpush3.bf16.msra.mxu1 %v17004_v9 }
0x14dd   : > { %11315 = vmatprep.subr.bf16.mxu1 %v16851_v12 }
0x14df   : > { %11274 = vmatmul.mubr.msk.bf16.gmra.mxu1 %vm2885_vm7, %v7586_v16 }
0x14e0   : > { %11316 = vmatpush3.bf16.msra.mxu1 %v17007_v59  ;;  %11277 = vmatprep.mubr.msk.bf16.mxu1 %vm12088_vm5, %v16851_v12 }
0x14e1   : > { %11317 = vmatprep.subr.bf16.mxu1 %v16851_v12 }
0x14e4   : > { %11318 = vmatpush3.bf16.msra.mxu1 %v17010_v5 }
0x14e5   : > { %11319 = vmatprep.subr.bf16.mxu1 %v16851_v12 }
0x14e7   : > { %11278 = vmatmul.mubr.msk.bf16.gmra.mxu1 %vm2885_vm7, %v7587_v36 }
0x14e8   : > { %11320 = vmatpush3.bf16.msra.mxu1 %v17013_v27  ;;  %11281 = vmatprep.mubr.msk.bf16.mxu1 %vm12088_vm5, %v16851_v12 }
0x14ef   : > { %11282 = vmatmul.mubr.msk.bf16.gmra.mxu1 %vm2885_vm7, %v7588_v35 }
0x14f0   : > { %11285 = vmatprep.mubr.msk.bf16.mxu1 %vm12088_vm5, %v16851_v12 }
0x14f7   : > { %11286 = vmatmul.mubr.msk.bf16.gmra.mxu1 %vm2885_vm7, %v7589_v11 }
0x14f8   : > { %11321 = vmatprep.mubr.msk.bf16.mxu1 %vm12088_vm5, %v16851_v12 }
0x151d   : > { %v16048_v19 = vpop.f32.mrf.mxu0 }
0x151f   : > { %v11241_v43 = vpop.f32.mrf.mxu0 }
0x1521   : > { %v16051_v22 = vpop.f32.mrf.mxu0 }
0x1523   : > { %v11242_v52 = vpop.f32.mrf.mxu0 }
0x1525   : > { %v16053_v4 = vpop.f32.mrf.mxu0 }
0x1527   : > { %v11245_v21 = vpop.f32.mrf.mxu0 }
0x1529   : > { %v16055_v24 = vpop.f32.mrf.mxu0 }
0x152b   : > { %v11246_v10 = vpop.f32.mrf.mxu0 }
0x152c   : > { %v7092_v51 = vpop.xlane.xlu0 %7091 }
0x152d   : > { %v16057_v39 = vpop.f32.mrf.mxu0  ;;  %11929 = vrcp.f32 %v7092_v51 }
0x152f   : > { %v11249_v6 = vpop.f32.mrf.mxu0 }
0x1530   : > { %v7095_v2 = vpop.xlane.xlu1 %7094 }
0x1531   : > { %11931 = vrcp.f32 %v7095_v2  ;;  %v6882_v17 = vpop.xlane.xlu0 %6881  ;;  %v16060_v20 = vpop.f32.mrf.mxu0 }
0x1532   : > { %v6930_v53 = vsub.f32 %v15833_v44, %v6882_v17 }
0x1533   : > { %v11250_v63 = vpop.f32.mrf.mxu0 }
0x1534   : > { %v6995_v15 = vmul.f32 1.442695, %v6930_v53  ;;  %v6885_v18 = vpop.xlane.xlu1 %6884 }
0x1535   : > { %v6931_v45 = vsub.f32 %v15843_v61, %v6885_v18  ;;  %v6888_v28 = vpop.xlane.xlu0 %6887  ;;  %v16064_v37 = vpop.f32.mrf.mxu0 }
0x1536   : > { %11933 = vpow2.f32 %v6995_v15  ;;  %v6932_v57 = vsub.f32 %v15853_v54, %v6888_v28 }
0x1537   : > { %v6997_v38 = vmul.f32 1.442695, %v6931_v45  ;;  %v11253_v34 = vpop.f32.mrf.mxu0 }
0x1538   : > { %v6999_v55 = vmul.f32 1.442695, %v6932_v57  ;;  %v6891_v26 = vpop.xlane.xlu1 %6890 }
0x1539   : > { %11935 = vpow2.f32 %v6997_v38  ;;  %v6933_v44 = vsub.f32 %v15863_v40, %v6891_v26  ;;  %v6894_v47 = vpop.xlane.xlu0 %6893  ;;  %v16068_v9 = vpop.f32.mrf.mxu0 }
0x153a   : > { %11937 = vpow2.f32 %v6999_v55  ;;  %v6934_v14 = vsub.f32 %v15871_v58, %v6894_v47  ;;  %v11930_v49 = vpop.eup %11929 }
0x153b   : > { %v7001_v61 = vmul.f32 1.442695, %v6933_v44  ;;  %v11254_v41 = vpop.f32.mrf.mxu0  ;;  %v7180_v40 = vmul.f32 %v11930_v49, %v15923_v0  ;;  %v11550_v49 = vld [vmem:[%s16666_s13 + $0x38] sm:$0xff]  }
0x153c   : > { %v7003_v16 = vmul.f32 1.442695, %v6934_v14  ;;  %v6897_v54 = vpop.xlane.xlu1 %6896 }
0x153d   : > { %11939 = vpow2.f32 %v7001_v61  ;;  %v6935_v30 = vsub.f32 %v15875_v1, %v6897_v54  ;;  %v6900_v48 = vpop.xlane.xlu0 %6899 }
0x153e   : > { %v11932_v13 = vpop.eup %11931  ;;  %11941 = vpow2.f32 %v7003_v16  ;;  %v6936_v59 = vsub.f32 %v15877_v42, %v6900_v48 }
0x153f   : > { %v7181_v60 = vmul.f32 %v11932_v13, %v15928_v29  ;;  %v7005_v58 = vmul.f32 1.442695, %v6935_v30 }
0x1540   : > { %v7007_v23 = vmul.f32 1.442695, %v6936_v59 }
0x1541   : > { %v7792_v56 = vpack.c.bf16 %v7181_v60, %v7180_v40  ;;  %11943 = vpow2.f32 %v7005_v58 }
0x1542   : > { %11945 = vpow2.f32 %v7007_v23 }
0x1543   : > { %v16074_v31 = vpop.eup %11933  ;;  %11322 = vmatmul.mubr.msk.bf16.vlgmr.msra.gmra.mxu1 %vm2885_vm7, %v7792_v56 }
0x1544   : > { %v7096_v1 = vsel %vm2885_vm7, %v16074_v31, 0.0  ;;  %11325 = vmatprep.mubr.msk.bf16.mxu1 %vm12088_vm5, %v16851_v12 }
0x1545   : > { %7097 = vadd.xlane.f32.xlu1 %v7096_v1 }
0x1546   : > { %v16081_v42 = vpop.eup %11935 }
0x1547   : > { %v16083_v0 = vpop.eup %11937  ;;  %v7099_v29 = vsel %vm2885_vm7, %v16081_v42, 0.0 }
0x1548   : > { %v7102_v5 = vsel %vm2885_vm7, %v16083_v0, 0.0  ;;  %7100 = vadd.xlane.f32.xlu0 %v7099_v29 }
0x1549   : > { %7103 = vadd.xlane.f32.xlu1 %v7102_v5 }
0x154a   : > { %v16089_v8 = vpop.eup %11939 }
0x154b   : > { %v16091_v36 = vpop.eup %11941  ;;  %v7105_v3 = vsel %vm2885_vm7, %v16089_v8, 0.0 }
0x154c   : > { %v7108_v32 = vsel %vm2885_vm7, %v16091_v36, 0.0  ;;  %7106 = vadd.xlane.f32.xlu0 %v7105_v3 }
0x154d   : > { %7109 = vadd.xlane.f32.xlu1 %v7108_v32 }
0x154e   : > { %v16097_v7 = vpop.eup %11943 }
0x154f   : > { %v16099_v27 = vpop.eup %11945  ;;  %v7111_v62 = vsel %vm2885_vm7, %v16097_v7, 0.0 }
0x1550   : > { %7112 = vadd.xlane.f32.xlu0 %v7111_v62  ;;  %v7114_v50 = vsel %vm2910_vm8, %v16099_v27, 0.0 }
0x1551   : > { %7115 = vadd.xlane.f32.xlu1 %v7114_v50 }
0x1567   : > { %v7283_v35 = vpop.f32.mrf.mxu1 }
0x1568   : > { %v7293_v25 = vpack.c.bf16 %v7283_v35, %v7283_v35 }
0x1569   : > { %v11183_v33 = vpop.f32.mrf.mxu1 }
0x156a   : > { %11256 = vmatmul.mubr.msk.bf16.gmra.mxu0 %vm1528_vm6, %v7293_v25 }
0x156b   : > { %v7286_v11 = vpop.f32.mrf.mxu1  ;;  %11291 = vmatprep.mubr.msk.bf16.mxu0 %vm12088_vm5, %v16851_v12 }
0x156d   : > { %v11184_v46 = vpop.f32.mrf.mxu1 }
0x156f   : > { %v16108_v43 = vpop.f32.mrf.mxu1 }
0x1571   : > { %v11219_v52 = vpop.f32.mrf.mxu1 }
0x1573   : > { %v16110_v21 = vpop.f32.mrf.mxu1 }
0x1575   : > { %v11220_v10 = vpop.f32.mrf.mxu1 }
0x1577   : > { %v16112_v51 = vpop.f32.mrf.mxu1 }
0x1579   : > { %v11223_v6 = vpop.f32.mrf.mxu1 }
0x157b   : > { %v16114_v2 = vpop.f32.mrf.mxu1 }
0x157d   : > { %v11224_v17 = vpop.f32.mrf.mxu1 }
0x157f   : > { %v16116_v53 = vpop.f32.mrf.mxu1 }
0x1581   : > { %v11227_v15 = vpop.f32.mrf.mxu1 }
0x1583   : > { %v16118_v63 = vpop.f32.mrf.mxu1 }
0x1585   : > { %v11228_v18 = vpop.f32.mrf.mxu1 }
0x1587   : > { %v16120_v45 = vpop.f32.mrf.mxu1 }
0x1589   : > { %v11231_v28 = vpop.f32.mrf.mxu1 }
0x158b   : > { %v16122_v57 = vpop.f32.mrf.mxu1 }
0x158d   : > { %v11232_v38 = vpop.f32.mrf.mxu1 }
0x158f   : > { %v16124_v55 = vpop.f32.mrf.mxu1 }
0x1591   : > { %v11235_v34 = vpop.f32.mrf.mxu1 }
0x1593   : > { %v7489_v26 = vpop.f32.mrf.mxu1 }
0x1595   : > { %v11236_v44 = vpop.f32.mrf.mxu1 }
0x1597   : > { %v7647_v47 = vpop.f32.mrf.mxu1 }
0x1599   : > { %v11271_v14 = vpop.f32.mrf.mxu1 }
0x159b   : > { %v7650_v61 = vpop.f32.mrf.mxu1 }
0x159c   : > { %v7685_v16 = vpack.c.bf16 %v7650_v61, %v7647_v47 }
0x159d   : > { %v11272_v41 = vpop.f32.mrf.mxu1 }
0x159e   : > { %11292 = vmatmul.mubr.msk.bf16.vlgmr.msra.gmra.mxu0 %vm1528_vm6, %v7685_v16 }
0x159f   : > { %v7655_v54 = vpop.f32.mrf.mxu1  ;;  %11295 = vmatprep.mubr.msk.bf16.mxu0 %vm12088_vm5, %v16851_v12  ;;  %11342 = vmatpush3.bf16.msra.mxu0 %v11550_v49 }
0x15a1   : > { %v11275_v30 = vpop.f32.mrf.mxu1 }
0x15a3   : > { %v7658_v48 = vpop.f32.mrf.mxu1 }
0x15a4   : > { %v7686_v13 = vpack.c.bf16 %v7658_v48, %v7655_v54  ;;  %v17014_v48 = vmov 0  }
0x15a5   : > { %v11276_v59 = vpop.f32.mrf.mxu1 }
0x15a6   : > { %11296 = vmatmul.mubr.msk.bf16.gmra.mxu0 %vm1528_vm6, %v7686_v13 }
0x15a7   : > { %v7663_v40 = vpop.f32.mrf.mxu1  ;;  %11299 = vmatprep.mubr.msk.bf16.mxu0 %vm12088_vm5, %v16851_v12 }
0x15a9   : > { %v11279_v60 = vpop.f32.mrf.mxu1 }
0x15ab   : > { %v7666_v58 = vpop.f32.mrf.mxu1 }
0x15ac   : > { %v7687_v23 = vpack.c.bf16 %v7666_v58, %v7663_v40 }
0x15ad   : > { %v11280_v56 = vpop.f32.mrf.mxu1 }
0x15ae   : > { %11300 = vmatmul.mubr.msk.bf16.gmra.mxu0 %vm1528_vm6, %v7687_v23 }
0x15af   : > { %v7671_v1 = vpop.f32.mrf.mxu1  ;;  %11303 = vmatprep.mubr.msk.bf16.mxu0 %vm12088_vm5, %v16851_v12 }
0x15b1   : > { %v11283_v29 = vpop.f32.mrf.mxu1 }
0x15b3   : > { %v7674_v5 = vpop.f32.mrf.mxu1 }
0x15b4   : > { %v7688_v3 = vpack.c.bf16 %v7674_v5, %v7671_v1 }
0x15b5   : > { %v11284_v32 = vpop.f32.mrf.mxu1 }
0x15b6   : > { %11304 = vmatmul.mubr.msk.bf16.gmra.mxu0 %vm1528_vm6, %v7688_v3  ;;  %v7551_v3 = vadd.f32 %v16051_v22, %v16110_v21  ;;  %v7564_v22 = vadd.f32 %v16057_v39, %v16116_v53  ;;  %v7575_v39 = vadd.f32 %v16068_v9, %v16122_v57 }
0x15b7   : > { %v7679_v62 = vpop.f32.mrf.mxu1  ;;  %11307 = vmatprep.mubr.msk.bf16.mxu0 %vm12088_vm5, %v16851_v12 }
0x15b8   : > { %v7689_v25 = vpack.c.bf16 %v7679_v62, %v7679_v62 }
0x15b9   : > { %v11287_v50 = vpop.f32.mrf.mxu1 }
0x15bb   : > { %v7682_v35 = vpop.f32.mrf.mxu1 }
0x15bc   : > { %v7556_v35 = vadd.f32 %v16053_v4, %v16112_v51  ;;  %v7567_v4 = vadd.f32 %v16060_v20, %v16118_v63 }
0x15bd   : > { %v11288_v33 = vpop.f32.mrf.mxu1 }
0x15be   : > { %11308 = vmatmul.mubr.msk.bf16.gmra.mxu0 %vm1528_vm6, %v7689_v25 }
0x15bf   : > { %11343 = vmatprep.mubr.msk.bf16.mxu0 %vm12088_vm5, %v16851_v12 }
0x15ce   : > { %v7098_v11 = vpop.xlane.xlu1 %7097 }
0x15cf   : > { %11947 = vrcp.f32 %v7098_v11 }
0x15d1   : > { %v7101_v46 = vpop.xlane.xlu0 %7100 }
0x15d2   : > { %11949 = vrcp.f32 %v7101_v46  ;;  %v7104_v52 = vpop.xlane.xlu1 %7103 }
0x15d5   : > { %v7107_v10 = vpop.xlane.xlu0 %7106 }
0x15d6   : > { %11951 = vrcp.f32 %v7107_v10  ;;  %v7110_v15 = vpop.xlane.xlu1 %7109 }
0x15d7   : > { %11953 = vrcp.f32 %v7104_v52 }
0x15d9   : > { %v7113_v6 = vpop.xlane.xlu0 %7112 }
0x15da   : > { %11955 = vrcp.f32 %v7113_v6  ;;  %v7116_v44 = vpop.xlane.xlu1 %7115 }
0x15db   : > { %11957 = vrcp.f32 %v7110_v15 }
0x15dc   : > { %v11948_v17 = vpop.eup %11947  ;;  %11959 = vrcp.f32 %v7116_v44 }
0x15dd   : > { %v7182_v28 = vmul.f32 %v11948_v17, %v16074_v31 }
0x15df   : > { %v11950_v18 = vpop.eup %11949 }
0x15e0   : > { %v7183_v38 = vmul.f32 %v11950_v18, %v16081_v42 }
0x15e2   : > { %v7793_v34 = vpack.c.bf16 %v7183_v38, %v7182_v28 }
0x15e3   : > { %v11952_v26 = vpop.eup %11951 }
0x15e4   : > { %11326 = vmatmul.mubr.msk.bf16.gmra.mxu1 %vm2885_vm7, %v7793_v34  ;;  %v11954_v47 = vpop.eup %11953  ;;  %v7185_v14 = vmul.f32 %v11952_v26, %v16089_v8 }
0x15e5   : > { %11329 = vmatprep.mubr.msk.bf16.mxu1 %vm12088_vm5, %v16851_v12  ;;  %v7184_v61 = vmul.f32 %v11954_v47, %v16083_v0 }
0x15e7   : > { %v7794_v49 = vpack.c.bf16 %v7185_v14, %v7184_v61  ;;  %v11956_v16 = vpop.eup %11955 }
0x15e8   : > { %v11958_v31 = vpop.eup %11957  ;;  %v7187_v42 = vmul.f32 %v11956_v16, %v16097_v7 }
0x15e9   : > { %v7186_v41 = vmul.f32 %v11958_v31, %v16091_v36  ;;  %v11960_v30 = vpop.eup %11959 }
0x15ea   : > { %v7188_v0 = vmul.f32 %v11960_v30, %v16099_v27  ;;  %v7548_v27 = vadd.f32 %v16048_v19, %v16108_v43  ;;  %v7559_v19 = vadd.f32 %v16055_v24, %v16114_v2  ;;  %v7572_v24 = vadd.f32 %v16064_v37, %v16120_v45 }
0x15eb   : > { %v7795_v54 = vpack.c.bf16 %v7187_v42, %v7186_v41 }
0x15ec   : > { %11330 = vmatmul.mubr.msk.bf16.gmra.mxu1 %vm2885_vm7, %v7794_v49  ;;  %v7796_v8 = vpack.c.bf16 %v7188_v0, %v7188_v0 }
0x15ed   : > { %11333 = vmatprep.mubr.msk.bf16.mxu1 %vm12088_vm5, %v16851_v12 }
0x15f4   : > { %11334 = vmatmul.mubr.msk.bf16.gmra.mxu1 %vm2885_vm7, %v7795_v54 }
0x15f5   : > { %11337 = vmatprep.mubr.msk.bf16.mxu1 %vm12088_vm5, %v16851_v12 }
0x15fc   : > { %11338 = vmatmul.mubr.msk.bf16.gmra.mxu1 %vm2885_vm7, %v7796_v8 }
0x15fd   : > { %8290 = vmatprep.mubr.bf16.mxu1 %v17014_v48 }
0x1603   : > { %v7854_v13 = vpop.f32.mrf.mxu1 }
0x1605   : > { %v11323_v59 = vpop.f32.mrf.mxu1 }
0x1607   : > { %v7857_v40 = vpop.f32.mrf.mxu1 }
0x1608   : > { %v7892_v7 = vpack.c.bf16 %v7857_v40, %v7854_v13 }
0x1609   : > { %v11324_v60 = vpop.f32.mrf.mxu1 }
0x160a   : > { %11344 = vmatmul.mubr.msk.bf16.vlgmr.msra.gmra.mxu0 %vm1528_vm6, %v7892_v7 }
0x160b   : > { %11347 = vmatprep.mubr.msk.bf16.mxu0 %vm12088_vm5, %v16851_v12 }
0x162a   : > { %v7579_v36 = vpop.f32.mrf.mxu0 }
0x162b   : > { %v7580_v20 = vadd.f32 %v7579_v36, %v16124_v55 }
0x162c   : > { %v11257_v58 = vpop.f32.mrf.mxu0 }
0x162e   : > { %v7582_v23 = vpop.f32.mrf.mxu0 }
0x162f   : > { %v16214_v23 = vld [vmem:[%s16667_s14 + $0x1] ss:$0 sm:$0xff] }
0x1630   : > { %v11258_v56 = vpop.f32.mrf.mxu0 }
0x165e   : > { %v7745_v1 = vpop.f32.mrf.mxu0 }
0x165f   : > { %v16167_v29 = vadd.f32 %v7745_v1, %v7548_v27  ;;  %v17015_v27 = vld [vmem:[#allocation26_spill] sm:$0xff] }
0x1660   : > { %v11293_v5 = vpop.f32.mrf.mxu0 }
0x1662   : > { %v7748_v32 = vpop.f32.mrf.mxu0 }
0x1663   : > { %v16171_v62 = vadd.f32 %v7748_v32, %v7551_v3 }
0x1664   : > { %v11294_v50 = vpop.f32.mrf.mxu0 }
0x1666   : > { %v7753_v25 = vpop.f32.mrf.mxu0 }
0x1667   : > { %v16175_v33 = vadd.f32 %v7753_v25, %v7556_v35  ;;  %v17016_v35 = vld [vmem:[#allocation25_spill] sm:$0xff] }
0x1668   : > { %v11297_v11 = vpop.f32.mrf.mxu0 }
0x166a   : > { %v7756_v43 = vpop.f32.mrf.mxu0 }
0x166b   : > { %v16179_v46 = vadd.f32 %v7756_v43, %v7559_v19  ;;  %v11551_v43 = vld [vmem:[%s16670_s17 + $0x70] ss:$8 sps:$4 sm:$0xff]  }
0x166c   : > { %v11298_v52 = vpop.f32.mrf.mxu0 }
0x166e   : > { %v7761_v21 = vpop.f32.mrf.mxu0 }
0x166f   : > { %v16183_v10 = vadd.f32 %v7761_v21, %v7564_v22 }
0x1670   : > { %v11301_v6 = vpop.f32.mrf.mxu0 }
0x1672   : > { %v7764_v51 = vpop.f32.mrf.mxu0 }
0x1673   : > { %v16187_v17 = vadd.f32 %v7764_v51, %v7567_v4 }
0x1674   : > { %v11302_v15 = vpop.f32.mrf.mxu0 }
0x1676   : > { %v7769_v2 = vpop.f32.mrf.mxu0 }
0x1677   : > { %v16191_v18 = vadd.f32 %v7769_v2, %v7572_v24 }
0x1678   : > { %v11305_v28 = vpop.f32.mrf.mxu0 }
0x167a   : > { %v7772_v53 = vpop.f32.mrf.mxu0 }
0x167b   : > { %v16195_v38 = vadd.f32 %v7772_v53, %v7575_v39 }
0x167c   : > { %v11306_v34 = vpop.f32.mrf.mxu0 }
0x167e   : > { %v7777_v63 = vpop.f32.mrf.mxu0 }
0x167f   : > { %v16198_v26 = vadd.f32 %v7777_v63, %v7580_v20  ;;  %v17017_v20 = vld [vmem:[#allocation24_spill] sm:$0xff] }
0x1680   : > { %v11309_v44 = vpop.f32.mrf.mxu0 }
0x1682   : > { %v7780_v47 = vpop.f32.mrf.mxu0 }
0x1684   : > { %v11310_v14 = vpop.f32.mrf.mxu0 }
0x16a4   : > { %v7862_v37 = vpop.f32.mrf.mxu1 }
0x16a6   : > { %v11327_v45 = vpop.f32.mrf.mxu1 }
0x16a7   : > { %v17018_v45 = vld [vmem:[#allocation23_spill] sm:$0xff] }
0x16a8   : > { %v7865_v61 = vpop.f32.mrf.mxu1 }
0x16a9   : > { %v7893_v49 = vpack.c.bf16 %v7865_v61, %v7862_v37 }
0x16aa   : > { %v11328_v16 = vpop.f32.mrf.mxu1 }
0x16ab   : > { %11348 = vmatmul.mubr.msk.bf16.gmra.mxu0 %vm1528_vm6, %v7893_v49 }
0x16ac   : > { %v7870_v9 = vpop.f32.mrf.mxu1  ;;  %11351 = vmatprep.mubr.msk.bf16.mxu0 %vm12088_vm5, %v16851_v12 }
0x16ae   : > { %v11331_v57 = vpop.f32.mrf.mxu1 }
0x16b0   : > { %v7873_v31 = vpop.f32.mrf.mxu1 }
0x16b1   : > { %v7894_v55 = vpack.c.bf16 %v7873_v31, %v7870_v9  ;;  %v17019_v31 = vld [vmem:[#allocation38_spill] sm:$0xff] }
0x16b2   : > { %v11332_v42 = vpop.f32.mrf.mxu1 }
0x16b3   : > { %11352 = vmatmul.mubr.msk.bf16.gmra.mxu0 %vm1528_vm6, %v7894_v55 }
0x16b4   : > { %v7878_v41 = vpop.f32.mrf.mxu1  ;;  %11355 = vmatprep.mubr.msk.bf16.mxu0 %vm12088_vm5, %v16851_v12 }
0x16b6   : > { %v11335_v54 = vpop.f32.mrf.mxu1 }
0x16b8   : > { %v7881_v30 = vpop.f32.mrf.mxu1 }
0x16b9   : > { %v7895_v0 = vpack.c.bf16 %v7881_v30, %v7878_v41 }
0x16ba   : > { %v11336_v8 = vpop.f32.mrf.mxu1 }
0x16bb   : > { %11356 = vmatmul.mubr.msk.bf16.gmra.mxu0 %vm1528_vm6, %v7895_v0  ;;  %v17020_v0 = vld [vmem:[#allocation37_spill] sm:$0xff] }
0x16bc   : > { %v7886_v13 = vpop.f32.mrf.mxu1  ;;  %11359 = vmatprep.mubr.msk.bf16.mxu0 %vm12088_vm5, %v16851_v12 }
0x16bd   : > { %v7896_v7 = vpack.c.bf16 %v7886_v13, %v7886_v13 }
0x16be   : > { %v11339_v59 = vpop.f32.mrf.mxu1 }
0x16c0   : > { %v7889_v40 = vpop.f32.mrf.mxu1 }
0x16c2   : > { %v11340_v60 = vpop.f32.mrf.mxu1 }
0x16c3   : > { %11360 = vmatmul.mubr.msk.bf16.gmra.mxu0 %vm1528_vm6, %v7896_v7  ;;  %v17021_v60 = vld [vmem:[#allocation22_spill] sm:$0xff] }
0x16ca   : > { %v7952_v36 = vpop.f32.mrf.mxu0 }
0x16cb   : > { %v7990_v58 = vadd.f32 %v7952_v36, %v16167_v29 }
0x16cc   : > { %v11345_v56 = vpop.f32.mrf.mxu0 }
0x16cd   : > { %v7999_v1 = vadd.f32 %v7990_v58, %v17015_v27 }
0x16ce   : > { %v7955_v5 = vpop.f32.mrf.mxu0 }
0x16cf   : > { %v16218_v3 = vadd.f32 %v16214_v23, %v7999_v1  ;;  %v7991_v32 = vadd.f32 %v7955_v5, %v16171_v62  ;;  %v11553_v62 = vld [vmem:[%s16670_s17 + $0x74] ss:$8 sps:$4 sm:$0xff]   ;;  %v17022_v5 = vld [vmem:[#allocation21_spill] sm:$0xff] }
0x16d0   : > { %v11346_v50 = vpop.f32.mrf.mxu0  ;;  %8266 = vmatprep.subr.bf16.mxu1 %v11553_v62 }
0x16d1   : > { %v8000_v25 = vadd.f32 %v7991_v32, %v17016_v35  ;;  %v8029_v29 = vsel %vm926_vm3, %v16218_v3, 0.0  ;;  %8267 = vmatpush1.bf16.msra.mxu1 %v11551_v43  ;;  %v11554_v35 = vld [vmem:[%s16670_s17 + $0x60] ss:$8 sps:$4 sm:$0xff]  }
0x16d2   : > { %8030 = vadd.xlane.f32.xlu0 %v8029_v29 }
0x16d3   : > { %v8017_v11 = vadd.f32 %v16214_v23, %v8000_v25  ;;  %v11556_v25 = vld [vmem:[%s16670_s17 + $0x64] ss:$8 sps:$4 sm:$0xff]  }
0x16d4   : > { %8268 = vmatprep.subr.bf16.mxu1 %v11556_v25 }
0x16d5   : > { %v8032_v19 = vsel %vm926_vm3, %v8017_v11, 0.0  ;;  %8269 = vmatpush1.bf16.msra.mxu1 %v11554_v35 }
0x16d6   : > { %8033 = vadd.xlane.f32.xlu1 %v8032_v19  ;;  %v17023_v19 = vld [vmem:[#allocation40_spill] sm:$0xff] }
0x175b   : > { %v8031_v52 = vpop.xlane.xlu0 %8030 }
0x175c   : > { %v8056_v22 = vmul.f32 0.015625, %v8031_v52 }
0x175e   : > { %v16233_v21 = vsub.f32 %v16218_v3, %v8056_v22 }
0x175f   : > { %v8034_v6 = vpop.xlane.xlu1 %8033 }
0x1760   : > { %v8057_v4 = vmul.f32 0.015625, %v8034_v6  ;;  %v8074_v51 = vmul.f32 %v16233_v21, %v16233_v21 }
0x1762   : > { %v16237_v15 = vsub.f32 %v8017_v11, %v8057_v4  ;;  %v8083_v24 = vsel %vm926_vm3, %v8074_v51, 0.0  ;;  %v11559_v4 = vld [vmem:[%s16670_s17 + $0x54] ss:$8 sps:$4 sm:$0xff]  }
0x1763   : > { %8084 = vadd.xlane.f32.xlu0 %v8083_v24  ;;  %v11562_v24 = vld [vmem:[%s16670_s17 + $0x44] ss:$8 sps:$4 sm:$0xff]   ;;  %8270 = vmatprep.subr.bf16.mxu1 %v11559_v4 }
0x1764   : > { %v8075_v2 = vmul.f32 %v16237_v15, %v16237_v15  ;;  %v11568_v4 = vld [vmem:[%s16672_s19 + $0xa8] sm:$0xff]  }
0x1766   : > { %v8086_v28 = vsel %vm926_vm3, %v8075_v2, 0.0 }
0x1767   : > { %8087 = vadd.xlane.f32.xlu1 %v8086_v28 }
0x176b   : > { %v7960_v39 = vpop.f32.mrf.mxu0 }
0x176c   : > { %v7992_v53 = vadd.f32 %v7960_v39, %v16175_v33 }
0x176d   : > { %v11349_v34 = vpop.f32.mrf.mxu0 }
0x176e   : > { %v8001_v63 = vadd.f32 %v7992_v53, %v17017_v20 }
0x176f   : > { %v7963_v44 = vpop.f32.mrf.mxu0 }
0x1770   : > { %v7993_v47 = vadd.f32 %v7963_v44, %v16179_v46  ;;  %v16247_v14 = vadd.f32 %v16214_v23, %v8001_v63 }
0x1771   : > { %v11350_v37 = vpop.f32.mrf.mxu0 }
0x1772   : > { %v8002_v61 = vadd.f32 %v7993_v47, %v17018_v45  ;;  %v8035_v49 = vsel %vm926_vm3, %v16247_v14, 0.0 }
0x1773   : > { %8036 = vadd.xlane.f32.xlu0 %v8035_v49  ;;  %v7968_v16 = vpop.f32.mrf.mxu0 }
0x1774   : > { %v7994_v9 = vadd.f32 %v7968_v16, %v16183_v10  ;;  %v16254_v33 = vadd.f32 %v16214_v23, %v8002_v61  ;;  %v16318_v61 = vld [vmem:[%s16668_s15 + $0x1] ss:$0 sm:$0xff] }
0x1775   : > { %v11353_v57 = vpop.f32.mrf.mxu0 }
0x1776   : > { %v8003_v55 = vadd.f32 %v7994_v9, %v17019_v31  ;;  %v8038_v46 = vsel %vm926_vm3, %v16254_v33, 0.0 }
0x1777   : > { %8039 = vadd.xlane.f32.xlu1 %v8038_v46  ;;  %v7971_v42 = vpop.f32.mrf.mxu0  ;;  %v16331_v46 = vld [vmem:[%s16669_s16 + $0x1] ss:$0 sm:$0xff] }
0x1778   : > { %v7995_v41 = vadd.f32 %v7971_v42, %v16187_v17  ;;  %v16261_v54 = vadd.f32 %v16214_v23, %v8003_v55 }
0x1779   : > { %v11354_v30 = vpop.f32.mrf.mxu0 }
0x177a   : > { %v8004_v8 = vadd.f32 %v7995_v41, %v17020_v0  ;;  %v8041_v10 = vsel %vm926_vm3, %v16261_v54, 0.0 }
0x177b   : > { %8042 = vadd.xlane.f32.xlu0 %v8041_v10  ;;  %v7976_v13 = vpop.f32.mrf.mxu0 }
0x177c   : > { %v7996_v59 = vadd.f32 %v7976_v13, %v16191_v18  ;;  %v16268_v40 = vadd.f32 %v16214_v23, %v8004_v8 }
0x177d   : > { %v11357_v7 = vpop.f32.mrf.mxu0 }
0x177e   : > { %v8005_v36 = vadd.f32 %v7996_v59, %v17021_v60  ;;  %v8044_v17 = vsel %vm926_vm3, %v16268_v40, 0.0 }
0x177f   : > { %8045 = vadd.xlane.f32.xlu1 %v8044_v17  ;;  %v7979_v58 = vpop.f32.mrf.mxu0 }
0x1780   : > { %v7997_v56 = vadd.f32 %v7979_v58, %v16195_v38  ;;  %v16275_v27 = vadd.f32 %v16214_v23, %v8005_v36 }
0x1781   : > { %v11358_v1 = vpop.f32.mrf.mxu0 }
0x1782   : > { %v8006_v32 = vadd.f32 %v7997_v56, %v17022_v5  ;;  %v8047_v18 = vsel %vm926_vm3, %v16275_v27, 0.0 }
0x1783   : > { %8048 = vadd.xlane.f32.xlu0 %v8047_v18  ;;  %v7984_v50 = vpop.f32.mrf.mxu0 }
0x1784   : > { %v7998_v38 = vadd.f32 %v7984_v50, %v16198_v26  ;;  %v16288_v29 = vadd.f32 %v16214_v23, %v8006_v32  ;;  %v11557_v26 = vld [vmem:[%s16670_s17 + $0x50] ss:$8 sps:$4 sm:$0xff]  }
0x1785   : > { %v11361_v11 = vpop.f32.mrf.mxu0  ;;  %8271 = vmatpush1.bf16.msra.mxu1 %v11557_v26  ;;  %v11567_v26 = vld [vmem:[%s16672_s19 + $0xe8] sm:$0xff]  }
0x1786   : > { %v8007_v43 = vadd.f32 %v7998_v38, %v17023_v19  ;;  %v8050_v62 = vsel %vm926_vm3, %v16288_v29, 0.0  ;;  %8272 = vmatprep.subr.bf16.mxu1 %v11562_v24  ;;  %v11570_v24 = vld [vmem:[%s16672_s19 + $0xa0] sm:$0xff]  }
0x1787   : > { %8051 = vadd.xlane.f32.xlu1 %v8050_v62  ;;  %v7987_v52 = vpop.f32.mrf.mxu0  ;;  %v11563_v62 = vld [vmem:[%s16672_s19 + $0xf8] sm:$0xff]  }
0x1788   : > { %v16294_v22 = vadd.f32 %v16214_v23, %v8007_v43  ;;  %v11560_v23 = vld [vmem:[%s16670_s17 + $0x40] ss:$8 sps:$4 sm:$0xff]   ;;  %v11564_v52 = vld [vmem:[%s16672_s19 + $0xb8] sm:$0xff]   ;;  %9974 = vmatprep.subr.bf16.mxu0 %v11563_v62 }
0x1789   : > { %v11362_v6 = vpop.f32.mrf.mxu0  ;;  %8273 = vmatpush1.bf16.msra.mxu1 %v11560_v23  ;;  %9975 = vmatpush3.bf16.msra.mxu0 %v11564_v52  ;;  %v11571_v23 = vld [vmem:[%s16672_s19 + $0xd8] sm:$0xff]  }
0x178a   : > { %v8053_v51 = vsel %vm951_vm4, %v16294_v22, 0.0  ;;  %11363 = vmatprep.subr.bf16.mxu1 %v16851_v12  ;;  %v11566_v6 = vld [vmem:[%s16672_s19 + $0xb0] sm:$0xff]  }
0x178b   : > { %8054 = vadd.xlane.f32.xlu0 %v8053_v51  ;;  %v11569_v51 = vld [vmem:[%s16672_s19 + $0xe0] sm:$0xff]  }
0x17ec   : > { %v8085_v2 = vpop.xlane.xlu0 %8084 }
0x17ed   : > { %v8110_v28 = vmul.f32 0.015625, %v8085_v2  ;;  %v11572_v2 = vld [vmem:[%s16672_s19 + $0x98] sm:$0xff]  }
0x17ef   : > { %v8119_v39 = vadd.f32 1e-05, %v8110_v28  ;;  %v11573_v28 = vld [vmem:[%s16672_s19 + $0xd0] sm:$0xff]  }
0x17f0   : > { %v8088_v53 = vpop.xlane.xlu1 %8087 }
0x17f1   : > { %11961 = vrsqrt.f32 %v8119_v39  ;;  %v8111_v34 = vmul.f32 0.015625, %v8088_v53  ;;  %v11574_v39 = vld [vmem:[%s16672_s19 + $0x90] sm:$0xff]   ;;  %v11575_v53 = vld [vmem:[%s16672_s19 + $0xc8] sm:$0xff]  }
0x17f3   : > { %v8120_v20 = vadd.f32 1e-05, %v8111_v34  ;;  %v11576_v34 = vld [vmem:[%s16672_s19 + $0x88] sm:$0xff]  }
0x17f5   : > { %11963 = vrsqrt.f32 %v8120_v20  ;;  %v11577_v20 = vld [vmem:[%s16672_s19 + $0xc0] sm:$0xff]  }
0x17fc   : > { %v8037_v63 = vpop.xlane.xlu0 %8036 }
0x17fd   : > { %v8058_v44 = vmul.f32 0.015625, %v8037_v63  ;;  %v11578_v63 = vld [vmem:[%s16672_s19 + $0x80] sm:$0xff]  }
0x17fe   : > { %v11962_v47 = vpop.eup %11961 }
0x17ff   : > { %v8137_v37 = vmul.f32 %v11962_v47, %v16233_v21  ;;  %v16313_v45 = vsub.f32 %v16247_v14, %v8058_v44 }
0x1800   : > { %v8040_v49 = vpop.xlane.xlu1 %8039 }
0x1801   : > { %v8059_v16 = vmul.f32 0.015625, %v8040_v49  ;;  %v8076_v9 = vmul.f32 %v16313_v45, %v16313_v45  ;;  %v8152_v31 = vmul.f32 %v16318_v61, %v8137_v37 }
0x1802   : > { %v11964_v57 = vpop.eup %11963 }
0x1803   : > { %v8138_v55 = vmul.f32 %v11964_v57, %v16237_v15  ;;  %v16325_v21 = vsub.f32 %v16254_v33, %v8059_v16  ;;  %v8089_v14 = vsel %vm926_vm3, %v8076_v9, 0.0  ;;  %v8167_v15 = vadd.f32 %v16331_v46, %v8152_v31 }
0x1804   : > { %v8043_v42 = vpop.xlane.xlu0 %8042  ;;  %8090 = vadd.xlane.f32.xlu1 %v8089_v14 }
0x1805   : > { %v8153_v41 = vmul.f32 %v16318_v61, %v8138_v55  ;;  %v8060_v30 = vmul.f32 0.015625, %v8043_v42  ;;  %v8077_v0 = vmul.f32 %v16325_v21, %v16325_v21 }
0x1807   : > { %v8168_v33 = vadd.f32 %v16331_v46, %v8153_v41  ;;  %v16339_v8 = vsub.f32 %v16261_v54, %v8060_v30  ;;  %v8092_v10 = vsel %vm926_vm3, %v8077_v0, 0.0 }
0x1808   : > { %v8046_v13 = vpop.xlane.xlu1 %8045  ;;  %8093 = vadd.xlane.f32.xlu0 %v8092_v10 }
0x1809   : > { %v8185_v59 = vpack.c.bf16 %v8168_v33, %v8167_v15  ;;  %v8061_v7 = vmul.f32 0.015625, %v8046_v13  ;;  %v8078_v60 = vmul.f32 %v16339_v8, %v16339_v8 }
0x180b   : > { %v16345_v36 = vsub.f32 %v16268_v40, %v8061_v7  ;;  %9435 = vmatmul.mubr.msk.bf16.vlgmr.msra.gmra.mxu1 %vm926_vm3, %v8185_v59  ;;  %v8095_v17 = vsel %vm926_vm3, %v8078_v60, 0.0 }
0x180c   : > { %v8049_v58 = vpop.xlane.xlu0 %8048  ;;  %8096 = vadd.xlane.f32.xlu1 %v8095_v17  ;;  %8300 = vmatprep.mubr.bf16.mxu1 %v17014_v48 }
0x180d   : > { %v8062_v54 = vmul.f32 0.015625, %v8049_v58  ;;  %v8079_v56 = vmul.f32 %v16345_v36, %v16345_v36 }
0x180f   : > { %v16353_v1 = vsub.f32 %v16275_v27, %v8062_v54  ;;  %v8098_v5 = vsel %vm926_vm3, %v8079_v56, 0.0 }
0x1810   : > { %v8052_v32 = vpop.xlane.xlu1 %8051  ;;  %8099 = vadd.xlane.f32.xlu0 %v8098_v5 }
0x1811   : > { %v8063_v40 = vmul.f32 0.015625, %v8052_v32  ;;  %v8080_v18 = vmul.f32 %v16353_v1, %v16353_v1 }
0x1813   : > { %v16359_v50 = vsub.f32 %v16288_v29, %v8063_v40  ;;  %v8101_v35 = vsel %vm926_vm3, %v8080_v18, 0.0 }
0x1814   : > { %8102 = vadd.xlane.f32.xlu1 %v8101_v35  ;;  %v8055_v25 = vpop.xlane.xlu0 %8054 }
0x1815   : > { %v8064_v38 = vmul.f32 0.015625, %v8055_v25  ;;  %v8081_v27 = vmul.f32 %v16359_v50, %v16359_v50 }
0x1817   : > { %v16365_v11 = vsub.f32 %v16294_v22, %v8064_v38  ;;  %v8104_v19 = vsel %vm926_vm3, %v8081_v27, 0.0  ;;  %v11565_v22 = vld [vmem:[%s16672_s19 + $0xf0] sm:$0xff]  }
0x1818   : > { %8105 = vadd.xlane.f32.xlu0 %v8104_v19  ;;  %9976 = vmatprep.subr.bf16.mxu0 %v11565_v22 }
0x1819   : > { %v8082_v43 = vmul.f32 %v16365_v11, %v16365_v11  ;;  %9977 = vmatpush3.bf16.msra.mxu0 %v11566_v6 }
0x181a   : > { %9978 = vmatprep.subr.bf16.mxu0 %v11567_v26 }
0x181b   : > { %v8107_v29 = vsel %vm951_vm4, %v8082_v43, 0.0 }
0x181c   : > { %8108 = vadd.xlane.f32.xlu1 %v8107_v29 }
0x181d   : > { %9979 = vmatpush3.bf16.msra.mxu0 %v11568_v4 }
0x181e   : > { %9980 = vmatprep.subr.bf16.mxu0 %v11569_v51 }
0x1821   : > { %9981 = vmatpush3.bf16.msra.mxu0 %v11570_v24 }
0x1822   : > { %9982 = vmatprep.subr.bf16.mxu0 %v11571_v23 }
0x1825   : > { %9983 = vmatpush3.bf16.msra.mxu0 %v11572_v2 }
0x1826   : > { %9984 = vmatprep.subr.bf16.mxu0 %v11573_v28 }
0x1829   : > { %9985 = vmatpush3.bf16.msra.mxu0 %v11574_v39  ;;  %v17024_v39 = vld [vmem:[#allocation36_spill] sm:$0xff] }
0x182a   : > { %9986 = vmatprep.subr.bf16.mxu0 %v11575_v53  ;;  %v17025_v53 = vsub.s32 0, %v17024_v39 }
0x182d   : > { %9987 = vmatpush3.bf16.msra.mxu0 %v11576_v34 }
0x182e   : > { %9988 = vmatprep.subr.bf16.mxu0 %v11577_v20 }
0x1831   : > { %9989 = vmatpush3.bf16.msra.mxu0 %v11578_v63 }
0x188d   : > { %v8091_v44 = vpop.xlane.xlu1 %8090 }
0x188e   : > { %v8112_v47 = vmul.f32 0.015625, %v8091_v44 }
0x1890   : > { %v8121_v37 = vadd.f32 1e-05, %v8112_v47 }
0x1891   : > { %v8094_v49 = vpop.xlane.xlu0 %8093 }
0x1892   : > { %11965 = vrsqrt.f32 %v8121_v37  ;;  %v8113_v16 = vmul.f32 0.015625, %v8094_v49 }
0x1894   : > { %v8122_v9 = vadd.f32 1e-05, %v8113_v16 }
0x1895   : > { %v8097_v57 = vpop.xlane.xlu1 %8096 }
0x1896   : > { %11967 = vrsqrt.f32 %v8122_v9  ;;  %v8114_v31 = vmul.f32 0.015625, %v8097_v57 }
0x1898   : > { %v8123_v55 = vadd.f32 1e-05, %v8114_v31 }
0x1899   : > { %v8100_v14 = vpop.xlane.xlu0 %8099 }
0x189a   : > { %11969 = vrsqrt.f32 %v8123_v55  ;;  %v8115_v42 = vmul.f32 0.015625, %v8100_v14 }
0x189c   : > { %v8124_v41 = vadd.f32 1e-05, %v8115_v42 }
0x189d   : > { %v8103_v30 = vpop.xlane.xlu1 %8102 }
0x189e   : > { %11971 = vrsqrt.f32 %v8124_v41  ;;  %v8116_v0 = vmul.f32 0.015625, %v8103_v30 }
0x189f   : > { %v11966_v15 = vpop.eup %11965 }
0x18a0   : > { %v8139_v33 = vmul.f32 %v11966_v15, %v16313_v45  ;;  %v8125_v10 = vadd.f32 1e-05, %v8116_v0 }
0x18a1   : > { %v8106_v13 = vpop.xlane.xlu0 %8105 }
0x18a2   : > { %11973 = vrsqrt.f32 %v8125_v10  ;;  %v8117_v59 = vmul.f32 0.015625, %v8106_v13  ;;  %v8154_v58 = vmul.f32 %v16318_v61, %v8139_v33 }
0x18a3   : > { %v11968_v7 = vpop.eup %11967 }
0x18a4   : > { %v8140_v60 = vmul.f32 %v11968_v7, %v16325_v21  ;;  %v8126_v17 = vadd.f32 1e-05, %v8117_v59  ;;  %v8169_v45 = vadd.f32 %v16331_v46, %v8154_v58 }
0x18a5   : > { %v8109_v54 = vpop.xlane.xlu1 %8108 }
0x18a6   : > { %11975 = vrsqrt.f32 %v8126_v17  ;;  %v8118_v56 = vmul.f32 0.015625, %v8109_v54  ;;  %v8155_v5 = vmul.f32 %v16318_v61, %v8140_v60 }
0x18a7   : > { %v11970_v32 = vpop.eup %11969 }
0x18a8   : > { %v8141_v40 = vmul.f32 %v11970_v32, %v16339_v8  ;;  %v8127_v18 = vadd.f32 1e-05, %v8118_v56  ;;  %v8170_v35 = vadd.f32 %v16331_v46, %v8155_v5 }
0x18aa   : > { %11977 = vrsqrt.f32 %v8127_v18  ;;  %v8186_v25 = vpack.c.bf16 %v8170_v35, %v8169_v45  ;;  %v8156_v27 = vmul.f32 %v16318_v61, %v8141_v40 }
0x18ab   : > { %v11972_v38 = vpop.eup %11971 }
0x18ac   : > { %v8142_v21 = vmul.f32 %v11972_v38, %v16345_v36  ;;  %9436 = vmatmul.mubr.msk.bf16.gmra.mxu1 %vm926_vm3, %v8186_v25  ;;  %v8171_v29 = vadd.f32 %v16331_v46, %v8156_v27 }
0x18ad   : > { %8310 = vmatprep.mubr.bf16.mxu1 %v17014_v48 }
0x18ae   : > { %v8157_v19 = vmul.f32 %v16318_v61, %v8142_v21 }
0x18af   : > { %v11974_v43 = vpop.eup %11973 }
0x18b0   : > { %v8143_v8 = vmul.f32 %v11974_v43, %v16353_v1  ;;  %v8172_v62 = vadd.f32 %v16331_v46, %v8157_v19 }
0x18b2   : > { %v8187_v52 = vpack.c.bf16 %v8172_v62, %v8171_v29  ;;  %v8158_v36 = vmul.f32 %v16318_v61, %v8143_v8 }
0x18b3   : > { %v11976_v22 = vpop.eup %11975 }
0x18b4   : > { %v8144_v6 = vmul.f32 %v11976_v22, %v16359_v50  ;;  %9437 = vmatmul.mubr.msk.bf16.gmra.mxu1 %vm926_vm3, %v8187_v52  ;;  %v8173_v1 = vadd.f32 %v16331_v46, %v8158_v36 }
0x18b5   : > { %8320 = vmatprep.mubr.bf16.mxu1 %v17014_v48 }
0x18b6   : > { %v8159_v26 = vmul.f32 %v16318_v61, %v8144_v6 }
0x18b7   : > { %v11978_v4 = vpop.eup %11977 }
0x18b8   : > { %v8145_v51 = vmul.f32 %v11978_v4, %v16365_v11  ;;  %v8174_v24 = vadd.f32 %v16331_v46, %v8159_v26  ;;  %v9426_v11 = vld [vmem:[%s16671_s18 + $0x2] sm:$0x3] }
0x18b9   : > { %v16454_v34 = vrot.slane %v9426_v11, %v17025_v53 }
0x18ba   : > { %v8188_v23 = vpack.c.bf16 %v8174_v24, %v8173_v1  ;;  %v8160_v2 = vmul.f32 %v16318_v61, %v8145_v51  ;;  %v17026_v61 = vsub.s32 1, %v17024_v39 }
0x18bc   : > { %9438 = vmatmul.mubr.msk.bf16.gmra.mxu1 %vm926_vm3, %v8188_v23  ;;  %v8175_v50 = vadd.f32 %v16331_v46, %v8160_v2  ;;  %v16458_v20 = vrot.slane %v9426_v11, %v17026_v61 }
0x18bd   : > { %8330 = vmatprep.mubr.bf16.mxu1 %v17014_v48 }
0x18be   : > { %v8189_v28 = vpack.c.bf16 %v8175_v50, %v8175_v50 }
0x18c4   : > { %9439 = vmatmul.mubr.msk.bf16.gmra.mxu1 %vm926_vm3, %v8189_v28 }
0x18c5   : > { %11371 = vmatprep.mubr.msk.bf16.mxu1 %vm12088_vm5, %v16851_v12 }
0x18cb   : > { %v8292_v48 = vpop.f32.mrf.mxu1 }
0x18cc   : > { %v8293_v46 = vadd.f32 %v8292_v48, %v16454_v34 }
0x18cd   : > { %v8294_v63 = vpop.f32.mrf.mxu1 }
0x18ce   : > { %v8357_v44 = vmul.f32 0.044715, %v8293_v46  ;;  %v8295_v47 = vadd.f32 %v8294_v63, %v16458_v20  ;;  %v8339_v43 = vmul.f32 0.5, %v8293_v46 }
0x18cf   : > { %v8296_v37 = vpop.f32.mrf.mxu1 }
0x18d0   : > { %v8375_v49 = vmul.f32 %v8357_v44, %v8293_v46  ;;  %v8358_v16 = vmul.f32 0.044715, %v8295_v47  ;;  %v8297_v9 = vadd.f32 %v8296_v37, %v16454_v34  ;;  %v8340_v21 = vmul.f32 0.5, %v8295_v47 }
0x18d1   : > { %v8298_v57 = vpop.f32.mrf.mxu1 }
0x18d2   : > { %v8393_v31 = vmul.f32 %v8375_v49, %v8293_v46  ;;  %v8376_v55 = vmul.f32 %v8358_v16, %v8295_v47  ;;  %v8359_v14 = vmul.f32 0.044715, %v8297_v9  ;;  %v8299_v42 = vadd.f32 %v8298_v57, %v16458_v20 }
0x18d3   : > { %v8341_v38 = vmul.f32 0.5, %v8297_v9 }
0x18d4   : > { %v8411_v41 = vadd.f32 %v8393_v31, %v8293_v46  ;;  %v8394_v30 = vmul.f32 %v8376_v55, %v8295_v47  ;;  %v8377_v0 = vmul.f32 %v8359_v14, %v8297_v9  ;;  %v8360_v15 = vmul.f32 0.044715, %v8299_v42 }
0x18d5   : > { %v8342_v27 = vmul.f32 0.5, %v8299_v42 }
0x18d6   : > { %v8429_v33 = vmul.f32 0.7978846, %v8411_v41  ;;  %v8395_v10 = vmul.f32 %v8377_v0, %v8297_v9  ;;  %v8412_v13 = vadd.f32 %v8394_v30, %v8295_v47  ;;  %v8378_v59 = vmul.f32 %v8360_v15, %v8299_v42 }
0x18d8   : > { %v8413_v7 = vadd.f32 %v8395_v10, %v8297_v9  ;;  %v8430_v60 = vmul.f32 0.7978846, %v8412_v13  ;;  %v8396_v17 = vmul.f32 %v8378_v59, %v8299_v42  ;;  %11979 = vtanh.f32 %v8429_v33 }
0x18da   : > { %v8431_v58 = vmul.f32 0.7978846, %v8413_v7  ;;  %v8414_v54 = vadd.f32 %v8396_v17, %v8299_v42  ;;  %11981 = vtanh.f32 %v8430_v60 }
0x18dc   : > { %11983 = vtanh.f32 %v8431_v58  ;;  %v8432_v56 = vmul.f32 0.7978846, %v8414_v54 }
0x18de   : > { %11985 = vtanh.f32 %v8432_v56 }
0x18e5   : > { %v11980_v5 = vpop.eup %11979 }
0x18e6   : > { %v8465_v25 = vadd.f32 1.0, %v11980_v5 }
0x18e7   : > { %v11982_v32 = vpop.eup %11981 }
0x18e8   : > { %v8466_v45 = vadd.f32 1.0, %v11982_v32  ;;  %v8483_v52 = vmul.f32 %v8465_v25, %v8339_v43 }
0x18e9   : > { %v11984_v40 = vpop.eup %11983 }
0x18ea   : > { %v8467_v18 = vadd.f32 1.0, %v11984_v40  ;;  %v8484_v29 = vmul.f32 %v8466_v45, %v8340_v21 }
0x18eb   : > { %v11986_v35 = vpop.eup %11985 }
0x18ec   : > { %v8468_v19 = vadd.f32 1.0, %v11986_v35  ;;  %v8485_v8 = vmul.f32 %v8467_v18, %v8341_v38 }
0x18ee   : > { %v8486_v62 = vmul.f32 %v8468_v19, %v8342_v27  ;;  %v8534_v6 = vpack.c.bf16 %v8485_v8, %v8483_v52 }
0x18f0   : > { %v8535_v22 = vpack.c.bf16 %v8486_v62, %v8484_v29 }
0x18f2   : > { %8672 = vmatprep.mubr.bf16.mxu0 %v8535_v22 }
0x18f3   : > { %8673 = vmatmul.mubr.bf16.vlgmr.msra.gmra.mxu0 %v8534_v6 }
0x196c   : > { %v8302_v36 = vpop.f32.mrf.mxu1 }
0x196d   : > { %v16465_v26 = vadd.f32 %v8302_v36, %v16454_v34 }
0x196e   : > { %v8304_v4 = vpop.f32.mrf.mxu1 }
0x196f   : > { %v8361_v51 = vmul.f32 0.044715, %v16465_v26  ;;  %v16469_v1 = vadd.f32 %v8304_v4, %v16458_v20 }
0x1970   : > { %v8306_v24 = vpop.f32.mrf.mxu1 }
0x1971   : > { %v8379_v23 = vmul.f32 %v8361_v51, %v16465_v26  ;;  %v8362_v2 = vmul.f32 0.044715, %v16469_v1  ;;  %v16474_v50 = vadd.f32 %v8306_v24, %v16454_v34 }
0x1972   : > { %v8308_v28 = vpop.f32.mrf.mxu1 }
0x1973   : > { %v8397_v11 = vmul.f32 %v8379_v23, %v16465_v26  ;;  %v8380_v39 = vmul.f32 %v8362_v2, %v16469_v1  ;;  %v8363_v53 = vmul.f32 0.044715, %v16474_v50  ;;  %v16480_v61 = vadd.f32 %v8308_v28, %v16458_v20 }
0x1974   : > { %v8312_v48 = vpop.f32.mrf.mxu1 }
0x1975   : > { %v8415_v46 = vadd.f32 %v8397_v11, %v16465_v26  ;;  %v8398_v63 = vmul.f32 %v8380_v39, %v16469_v1  ;;  %v8381_v44 = vmul.f32 %v8363_v53, %v16474_v50  ;;  %v8364_v47 = vmul.f32 0.044715, %v16480_v61 }
0x1976   : > { %v16487_v37 = vadd.f32 %v8312_v48, %v16454_v34  ;;  %v8314_v49 = vpop.f32.mrf.mxu1 }
0x1977   : > { %v8433_v16 = vmul.f32 0.7978846, %v8415_v46  ;;  %v8399_v9 = vmul.f32 %v8381_v44, %v16474_v50  ;;  %v8382_v57 = vmul.f32 %v8364_v47, %v16480_v61  ;;  %v16492_v31 = vadd.f32 %v8314_v49, %v16458_v20 }
0x1978   : > { %v8365_v55 = vmul.f32 0.044715, %v16487_v37  ;;  %v8316_v14 = vpop.f32.mrf.mxu1  ;;  %v8416_v42 = vadd.f32 %v8398_v63, %v16469_v1 }
0x1979   : > { %v8417_v41 = vadd.f32 %v8399_v9, %v16474_v50  ;;  %v8400_v30 = vmul.f32 %v8382_v57, %v16480_v61  ;;  %v8366_v0 = vmul.f32 0.044715, %v16492_v31  ;;  %11987 = vtanh.f32 %v8433_v16 }
0x197a   : > { %v8383_v15 = vmul.f32 %v8365_v55, %v16487_v37  ;;  %v16501_v33 = vadd.f32 %v8316_v14, %v16454_v34  ;;  %v8318_v10 = vpop.f32.mrf.mxu1  ;;  %v8434_v13 = vmul.f32 0.7978846, %v8416_v42 }
0x197b   : > { %v8435_v59 = vmul.f32 0.7978846, %v8417_v41  ;;  %v8384_v7 = vmul.f32 %v8366_v0, %v16492_v31  ;;  %v16505_v60 = vadd.f32 %v8318_v10, %v16458_v20  ;;  %v8418_v17 = vadd.f32 %v8400_v30, %v16480_v61 }
0x197c   : > { %v8401_v58 = vmul.f32 %v8383_v15, %v16487_v37  ;;  %v8367_v54 = vmul.f32 0.044715, %v16501_v33  ;;  %v8322_v56 = vpop.f32.mrf.mxu1  ;;  %11989 = vtanh.f32 %v8434_v13 }
0x197d   : > { %11991 = vtanh.f32 %v8435_v59  ;;  %v8402_v5 = vmul.f32 %v8384_v7, %v16492_v31  ;;  %v8368_v32 = vmul.f32 0.044715, %v16505_v60  ;;  %v16513_v40 = vadd.f32 %v8322_v56, %v16454_v34 }
0x197e   : > { %v8419_v18 = vadd.f32 %v8401_v58, %v16487_v37  ;;  %v8385_v45 = vmul.f32 %v8367_v54, %v16501_v33  ;;  %v8324_v35 = vpop.f32.mrf.mxu1  ;;  %v8436_v25 = vmul.f32 0.7978846, %v8418_v17 }
0x197f   : > { %v8386_v38 = vmul.f32 %v8368_v32, %v16505_v60  ;;  %v8369_v21 = vmul.f32 0.044715, %v16513_v40  ;;  %v16520_v27 = vadd.f32 %v8324_v35, %v16458_v20  ;;  %v8420_v19 = vadd.f32 %v8402_v5, %v16492_v31 }
0x1980   : > { %v8437_v43 = vmul.f32 0.7978846, %v8419_v18  ;;  %v8403_v8 = vmul.f32 %v8385_v45, %v16501_v33  ;;  %v8326_v29 = vpop.f32.mrf.mxu1  ;;  %11993 = vtanh.f32 %v8436_v25  ;;  %v8345_v45 = vmul.f32 0.5, %v16474_v50 }
0x1981   : > { %v8404_v62 = vmul.f32 %v8386_v38, %v16505_v60  ;;  %v8387_v52 = vmul.f32 %v8369_v21, %v16513_v40  ;;  %v8370_v22 = vmul.f32 0.044715, %v16520_v27  ;;  %v16528_v6 = vadd.f32 %v8326_v29, %v16454_v34 }
0x1982   : > { %11995 = vtanh.f32 %v8437_v43  ;;  %v8421_v36 = vadd.f32 %v8403_v8, %v16501_v33  ;;  %v8328_v4 = vpop.f32.mrf.mxu1  ;;  %v8438_v51 = vmul.f32 0.7978846, %v8420_v19  ;;  %v8344_v43 = vmul.f32 0.5, %v16469_v1 }
0x1983   : > { %v8405_v24 = vmul.f32 %v8387_v52, %v16513_v40  ;;  %v8388_v23 = vmul.f32 %v8370_v22, %v16520_v27  ;;  %v8371_v2 = vmul.f32 0.044715, %v16528_v6  ;;  %v16535_v28 = vadd.f32 %v8328_v4, %v16458_v20 }
0x1984   : > { %v8439_v11 = vmul.f32 0.7978846, %v8421_v36  ;;  %v8332_v39 = vpop.f32.mrf.mxu1  ;;  %v8422_v53 = vadd.f32 %v8404_v62, %v16505_v60  ;;  %11997 = vtanh.f32 %v8438_v51  ;;  %v8346_v8 = vmul.f32 0.5, %v16480_v61 }
0x1985   : > { %v8423_v48 = vadd.f32 %v8405_v24, %v16513_v40  ;;  %v8406_v46 = vmul.f32 %v8388_v23, %v16520_v27  ;;  %v8389_v63 = vmul.f32 %v8371_v2, %v16528_v6  ;;  %v8372_v44 = vmul.f32 0.044715, %v16535_v28 }
0x1986   : > { %11999 = vtanh.f32 %v8439_v11  ;;  %v16543_v47 = vadd.f32 %v8332_v39, %v16454_v34  ;;  %v8334_v49 = vpop.f32.mrf.mxu1  ;;  %v8440_v16 = vmul.f32 0.7978846, %v8422_v53  ;;  %v11988_v9 = vpop.eup %11987  ;;  %v8343_v52 = vmul.f32 0.5, %v16465_v26 }
0x1987   : > { %v8441_v57 = vmul.f32 0.7978846, %v8423_v48  ;;  %v8407_v55 = vmul.f32 %v8389_v63, %v16528_v6  ;;  %v8390_v14 = vmul.f32 %v8372_v44, %v16535_v28  ;;  %v16548_v42 = vadd.f32 %v8334_v49, %v16458_v20 }
0x1988   : > { %v8373_v41 = vmul.f32 0.044715, %v16543_v47  ;;  %v8336_v30 = vpop.f32.mrf.mxu1  ;;  %12001 = vtanh.f32 %v8440_v16  ;;  %v8424_v0 = vadd.f32 %v8406_v46, %v16520_v27  ;;  %v8469_v25 = vadd.f32 1.0, %v11988_v9 }
0x1989   : > { %v11990_v15 = vpop.eup %11989  ;;  %v8425_v34 = vadd.f32 %v8407_v55, %v16528_v6  ;;  %v8408_v10 = vmul.f32 %v8390_v14, %v16535_v28  ;;  %v8374_v13 = vmul.f32 0.044715, %v16548_v42  ;;  %12003 = vtanh.f32 %v8441_v57 }
0x198a   : > { %v11992_v59 = vpop.eup %11991  ;;  %v8391_v7 = vmul.f32 %v8373_v41, %v16543_v47  ;;  %v8337_v17 = vpop.f32.mrf.mxu1  ;;  %v8442_v20 = vmul.f32 0.7978846, %v8424_v0  ;;  %v8470_v18 = vadd.f32 1.0, %v11990_v15  ;;  %v8487_v23 = vmul.f32 %v8469_v25, %v8343_v52 }
0x198b   : > { %v8443_v58 = vmul.f32 0.7978846, %v8425_v34  ;;  %v8392_v54 = vmul.f32 %v8374_v13, %v16548_v42  ;;  %v8471_v56 = vadd.f32 1.0, %v11992_v59  ;;  %v8426_v5 = vadd.f32 %v8408_v10, %v16535_v28 }
0x198c   : > { %v8409_v32 = vmul.f32 %v8391_v7, %v16543_v47  ;;  %12005 = vtanh.f32 %v8442_v20  ;;  %v8488_v4 = vmul.f32 %v8470_v18, %v8344_v43  ;;  %v8349_v26 = vmul.f32 0.5, %v16501_v33 }
0x198d   : > { %v11994_v35 = vpop.eup %11993  ;;  %12007 = vtanh.f32 %v8443_v58  ;;  %v8444_v38 = vmul.f32 0.7978846, %v8426_v5  ;;  %v8410_v21 = vmul.f32 %v8392_v54, %v16548_v42  ;;  %v8489_v22 = vmul.f32 %v8471_v56, %v8345_v45 }
0x198e   : > { %v8427_v19 = vadd.f32 %v8409_v32, %v16543_v47  ;;  %v8472_v29 = vadd.f32 1.0, %v11994_v35  ;;  %v8348_v63 = vmul.f32 0.5, %v16492_v31  ;;  %v8350_v44 = vmul.f32 0.5, %v16505_v60 }
0x198f   : > { %v11996_v62 = vpop.eup %11995  ;;  %12009 = vtanh.f32 %v8444_v38  ;;  %v8428_v50 = vadd.f32 %v8410_v21, %v16548_v42  ;;  %v8536_v1 = vpack.c.bf16 %v8489_v22, %v8487_v23  ;;  %v8347_v9 = vmul.f32 0.5, %v16487_v37 }
0x1990   : > { %v8445_v36 = vmul.f32 0.7978846, %v8427_v19  ;;  %v8490_v51 = vmul.f32 %v8472_v29, %v8346_v8  ;;  %v8473_v46 = vadd.f32 1.0, %v11996_v62  ;;  %v8352_v31 = vmul.f32 0.5, %v16520_v27 }
0x1991   : > { %v11998_v24 = vpop.eup %11997  ;;  %v8446_v2 = vmul.f32 0.7978846, %v8428_v50  ;;  %v8354_v60 = vmul.f32 0.5, %v16535_v28  ;;  %v8353_v37 = vmul.f32 0.5, %v16528_v6  ;;  %v8351_v54 = vmul.f32 0.5, %v16513_v40 }
0x1992   : > { %v8537_v11 = vpack.c.bf16 %v8490_v51, %v8488_v4  ;;  %12011 = vtanh.f32 %v8445_v36  ;;  %v8474_v61 = vadd.f32 1.0, %v11998_v24  ;;  %v8491_v30 = vmul.f32 %v8473_v46, %v8347_v9  ;;  %v11580_v36 = vld [vmem:[%s16676_s23 + $0x10] sm:$0xff]  }
0x1993   : > { %v12000_v39 = vpop.eup %11999  ;;  %12013 = vtanh.f32 %v8446_v2  ;;  %v8356_v45 = vmul.f32 0.5, %v16548_v42  ;;  %v8355_v6 = vmul.f32 0.5, %v16543_v47  ;;  %v9489_v42 = vld [vmem:[%s16673_s20 + $0x1] ss:$0 sm:$0xff]  ;;  %v11579_v47 = vld [vmem:[%s16676_s23 + $0x18] sm:$0xff]  }
0x1994   : > { %8679 = vmatprep.mubr.bf16.mxu0 %v8537_v11  ;;  %v8475_v53 = vadd.f32 1.0, %v12000_v39  ;;  %v8492_v55 = vmul.f32 %v8474_v61, %v8348_v63  ;;  %11364 = vmatpush3.bf16.msra.mxu1 %v11579_v47 }
0x1995   : > { %v12002_v48 = vpop.eup %12001  ;;  %8680 = vmatmul.mubr.bf16.gmra.mxu0 %v8536_v1  ;;  %11365 = vmatprep.subr.bf16.mxu1 %v16851_v12 }
0x1996   : > { %v8476_v49 = vadd.f32 1.0, %v12002_v48  ;;  %v12004_v16 = vpop.eup %12003  ;;  %v8493_v57 = vmul.f32 %v8475_v53, %v8349_v26 }
0x1997   : > { %v8477_v7 = vadd.f32 1.0, %v12004_v16 }
0x1998   : > { %v8494_v14 = vmul.f32 %v8476_v49, %v8350_v44  ;;  %v8538_v34 = vpack.c.bf16 %v8493_v57, %v8491_v30  ;;  %11366 = vmatpush3.bf16.msra.mxu1 %v11580_v36 }
0x1999   : > { %v12006_v41 = vpop.eup %12005  ;;  %v8495_v18 = vmul.f32 %v8477_v7, %v8351_v54  ;;  %11367 = vmatprep.subr.bf16.mxu1 %v16851_v12 }
0x199a   : > { %v12008_v0 = vpop.eup %12007  ;;  %v8539_v15 = vpack.c.bf16 %v8494_v14, %v8492_v55  ;;  %v8478_v10 = vadd.f32 1.0, %v12006_v41  ;;  %v11581_v55 = vld [vmem:[%s16676_s23 + $0x8] sm:$0xff]   ;;  %v11582_v41 = vld [vmem:[%s16676_s23] sm:$0xff]  }
0x199b   : > { %v8479_v13 = vadd.f32 1.0, %v12008_v0 }
0x199c   : > { %v12010_v33 = vpop.eup %12009  ;;  %8685 = vmatprep.mubr.bf16.mxu0 %v8539_v15  ;;  %v8496_v20 = vmul.f32 %v8478_v10, %v8352_v31  ;;  %11368 = vmatpush3.bf16.msra.mxu1 %v11581_v55  ;;  %v8714_v10 = vld [vmem:[%s16674_s21] sm:$0x1] }
0x199d   : > { %8686 = vmatmul.mubr.bf16.gmra.mxu0 %v8538_v34  ;;  %v8480_v59 = vadd.f32 1.0, %v12010_v33  ;;  %v8497_v56 = vmul.f32 %v8479_v13, %v8353_v37  ;;  %11369 = vmatprep.subr.bf16.mxu1 %v16851_v12  ;;  %v8715_v33 = vld [vmem:[%s16675_s22] sm:$0x1] }
0x199e   : > { %v8740_v12 = vld [vmem:[%s17028_s0] sm:$0x1]  ;;  %s12029_s0 = sshll.u32 %s12090_s7, 4  ;;  %s12030_s0 = int_to_ptr.vmem [resolvable:$false] %s12029_s0 }
0x199f   : > { %v12012_v17 = vpop.eup %12011  ;;  %v8498_v58 = vmul.f32 %v8480_v59, %v8354_v60  ;;  %v8540_v27 = vpack.c.bf16 %v8497_v56, %v8495_v18  ;;  %s12031_s3 = scalar_lea.vmem %s12030_s0, 32  ;;  %p12032_p0 = scmp.lt.s32.totalorder %s16614_s29, %s12030_s0 }
0x19a0   : > { %v12014_v5 = vpop.eup %12013  ;;  %v8481_v28 = vadd.f32 1.0, %v12012_v17  ;;  %11370 = vmatpush3.bf16.msra.mxu1 %v11582_v41  ;;  %p12033_p1 = scmp.lt.s32.totalorder %s12031_s3, %s12025_s4 }
0x19a1   : > { %v8541_v32 = vpack.c.bf16 %v8498_v58, %v8496_v20  ;;  %v8482_v35 = vadd.f32 1.0, %v12014_v5 }
0x19a2   : > { %v8499_v21 = vmul.f32 %v8481_v28, %v8355_v6  ;;  %p12034_p2 = por %p12033_p1, %p12032_p0 }
0x19a3   : > { %8691 = vmatprep.mubr.bf16.mxu0 %v8541_v32  ;;  %v8500_v25 = vmul.f32 %v8482_v35, %v8356_v45 }
0x19a4   : > { %v8542_v19 = vpack.c.bf16 %v8499_v21, %v8499_v21  ;;  %p12035_p3 = pnand %p12034_p2, %p12028_p13 }
0x19a5   : > { %8692 = vmatmul.mubr.bf16.gmra.mxu0 %v8540_v27  ;;  %v8543_v38 = vpack.c.bf16 %v8500_v25, %v8500_v25 }
0x19a7   : > { %8697 = vmatprep.mubr.bf16.mxu0 %v8543_v38 }
0x19ad   : > { %8698 = vmatmul.mubr.bf16.gmra.mxu0 %v8542_v19 }
0x19b3   : > { %v9990_v40 = vpop.f32.mrf.mxu0 }
0x19b5   : > { %v9991_v43 = vpop.f32.mrf.mxu0 }
0x19b6   : > { %v9992_v8 = vadd.f32 %v9991_v43, %v9990_v40 }
0x19b7   : > { %v9993_v29 = vpop.f32.mrf.mxu0 }
0x19b8   : > { %v8704_v62 = vadd.f32 %v9992_v8, %v16218_v3 }
0x19b9   : > { %v9994_v52 = vpop.f32.mrf.mxu0 }
0x19ba   : > { %v8713_v22 = vadd.f32 %v9489_v42, %v8704_v62 }
0x19bc   : > { %v8716_v50 = vsel %vm951_vm4, %v8713_v22, 0.0 }
0x19bd   : > { %8717 = vadd.xlane.f32.xlu0 %v8716_v50 }
0x1a46   : > { %v8718_v3 = vpop.xlane.xlu0 %8717 }
0x1a47   : > { %v8719_v4 = vmul.f32 0.015625, %v8718_v3 }
0x1a49   : > { %v8720_v51 = vsub.f32 %v8713_v22, %v8719_v4 }
0x1a4b   : > { %v8721_v24 = vmul.f32 %v8720_v51, %v8720_v51 }
0x1a4d   : > { %v8722_v23 = vsel %vm951_vm4, %v8721_v24, 0.0 }
0x1a4e   : > { %8723 = vadd.xlane.f32.xlu1 %v8722_v23 }
0x1a55   : > { %v9996_v2 = vpop.f32.mrf.mxu0 }
0x1a57   : > { %v9997_v11 = vpop.f32.mrf.mxu0 }
0x1a59   : > { %v9999_v39 = vpop.f32.mrf.mxu0 }
0x1a5b   : > { %v10000_v1 = vpop.f32.mrf.mxu0 }
0x1a5d   : > { %v10002_v61 = vpop.f32.mrf.mxu0 }
0x1a5f   : > { %v10003_v53 = vpop.f32.mrf.mxu0 }
0x1a61   : > { %v10005_v48 = vpop.f32.mrf.mxu0 }
0x1a63   : > { %v10006_v26 = vpop.f32.mrf.mxu0 }
0x1a65   : > { %v10008_v46 = vpop.f32.mrf.mxu0 }
0x1a67   : > { %v10009_v63 = vpop.f32.mrf.mxu0 }
0x1a69   : > { %v10011_v44 = vpop.f32.mrf.mxu0 }
0x1a6b   : > { %v10012_v49 = vpop.f32.mrf.mxu0 }
0x1a6d   : > { %v10014_v16 = vpop.f32.mrf.mxu0 }
0x1a6f   : > { %v10015_v9 = vpop.f32.mrf.mxu0 }
0x1a71   : > { %v10017_v57 = vpop.f32.mrf.mxu0 }
0x1a73   : > { %v10018_v14 = vpop.f32.mrf.mxu0 }
0x1ad7   : > { %v8724_v30 = vpop.xlane.xlu1 %8723 }
0x1ad8   : > { %v8725_v0 = vmul.f32 0.015625, %v8724_v30 }
0x1ada   : > { %v8726_v15 = vadd.f32 1e-05, %v8725_v0 }
0x1adc   : > { %12015 = vrsqrt.f32 %v8726_v15 }
0x1ae9   : > { %v12016_v34 = vpop.eup %12015 }
0x1aea   : > { %v8728_v13 = vmul.f32 %v12016_v34, %v8720_v51 }
0x1aec   : > { %v8729_v31 = vmul.f32 %v8728_v13, %v8714_v10 }
0x1aee   : > { %v8730_v60 = vadd.f32 %v8729_v31, %v8715_v33 }
0x1af0   : > { %v8739_v59 = vpack.c.bf16 %v8730_v60, %v8730_v60 }
0x1af2   : > { %11372 = vmatmul.mubr.msk.bf16.vlgmr.msra.gmra.mxu1 %vm926_vm3, %v8739_v59 }
0x1bb2   : > { %v8802_v37 = vpop.f32.mrf.mxu1 }
0x1bb3   : > { %v8803_v7 = vadd.f32 %v8802_v37, %v8740_v12 }
0x1bb4   : > { %v11373_v17 = vpop.f32.mrf.mxu1 }
0x1bb5   : > { %8808 = vst [vmem:[%s756_s1] sm:$0x1] %v8803_v7 }
0x1bb6   : > { %v8805_v20 = vpop.f32.mrf.mxu1 }
0x1bb7   : > { %12038 = shalt.err (!%p12035_p3)
}
0x1bb8   : > { %s12039_s1 = scalar_lea.hbm %s16612_s30, 16  ;;  %s12043_s6 = scalar_lea.hbm %s17029_s25, 32 }
0x1bb9   : > { %p12040_p4 = scmp.ne.s32.totalorder %s16612_s30, %s12039_s1  ;;  %p12044_p9 = scmp.lt.s32.totalorder %s16612_s30, %s17029_s25 }
0x1bba   : > { %p12045_p10 = scmp.lt.s32.totalorder %s12043_s6, %s12039_s1 }
0x1bbb   : > { %p12041_p7 = pnand %p12040_p4, %p12259_p5 }
0x1bbc   : > { %p12046_p11 = por %p12045_p10, %p12044_p9 }
0x1bbd   : > { %p12042_p8 = pneg %p12041_p7 }
0x1bbf   : > { %p12047_p12 = pnand %p12046_p11, %p12042_p8 }
0x1bc1   : > { %12050 = shalt.err (!%p12047_p12)
}
0x1bc2   : > { %11376 = dma.vmem_to_hbm [thread:$0]  (%p12259_p5), %s16614_s29, 16, %s16612_s30, %s8810_s24   ;;  %v11374_v58 = vpop.f32.mrf.mxu1 }
0x1bc3 PF: > { %s17030_s4 = sld [smem:[#allocation7_spill]] }
0x1bc4   : > { %s17031_s0 = sld [smem:[#allocation5_spill]] }
0x1bc9   : > { %p11382_p13 = scmp.ge.s32.totalorder %s17030_s4, 2 }
0x1bca   : > { %s8834_s8 = sand.u32 1, %s17031_s0  }
0x1bcb   : > { %p11379_p0 = pnand %p11382_p13, %p12263_p6  ;;  %s8835_s5 = scalar_lea.sflag [#allocation3], %s8834_s8 }
0x1bcd   : > { %p11380_p1 = pneg %p11379_p0 }
0x1bcf   : > { %12068 = dma.done.wait (%p11380_p1), %s8835_s5, 16  }
0x1bd0   : > { %12070 = vsyncadd (%p11380_p1), %s8835_s5, 4294967280  ;;  %s17033_s30 = sld [smem:[#allocation8_spill]]  ;;  %s17036_s29 = smov %s12077_s2 }
0x1bd1   : > { %s17034_s1 = sld [smem:[#allocation6_spill]] }
0x1bd2   : > { %s17035_s6 = sld [smem:[#allocation9_spill]] }
0x1bd6   : > { %p35_p2 = scmp.ge.s32.totalorder %s17033_s30, 4  }
0x1bd7   : > { %s17037_s2 = smov %s17034_s1 }
0x1bd8   :  { %37 = sbr.rel (!%p35_p2) target bundleno = 16 (0x10), region = 171 }
0x1bdd   :  { %8839 = vsyncpa [#allocation3], 1 }
0x1bde   :  { %8841 = vsyncpa [#allocation3 + $0x1], 1 }

</bundles_post_ra>
